<compile_context>
chip_gen: v6e
topology: v6e:2x2x1
jax: 0.10.0
libtpu: 0.0.40
codegen_flags: <defaults>
</compile_context>

<pallas_src>
import jax
import jax.numpy as jnp
from jax.experimental import pallas as pl
from jax.experimental.pallas import tpu as pltpu


def _round_up(x, m):
    return (x + m - 1) // m * m


def _pick_row_tile(n):
    # Big tiles amortize the ~0.35us/step pipeline overhead and the per-step
    # index rebuild; always a multiple of 8 sublanes.
    for cand in (1024, 512, 256):
        if n >= cand:
            return cand
    return _round_up(max(n, 8), 8)


# -----------------------------------------------------------------------------
# Kernel 1: fused projection + neighbor aggregation.
#   grid = (P parallel super-tiles, T row tiles per super-tile)  [reduction on T]
#   per row tile (p, i) covering rows base = (p*T + i)*bm .. +bm:
#     sup       = x_tile @ W + b                (bf16 MXU, f32 acc) -> supports tile
#     A[s, r]   = sum_k where(neigh[s,k]-base == r, mask[s,k], 0)
#     Pm[s, r]  = (src_idx[s]-base == r)
#     acc_agg  += A @ sup ;  acc_src += Pm @ sup   (bf16 MXU, f32 acc)
#   last tile of each super-tile: write the partial accumulators (combined outside).
# -----------------------------------------------------------------------------
def _proj_agg_kernel(srcidx_ref, neigh_ref, mask_ref, x_ref, w_ref, b_ref,
                     supports_ref, pagg_ref, psrc_ref, acc_agg, acc_src):
    bm = x_ref.shape[0]
    s_pad, k_nb = neigh_ref.shape
    p = pl.program_id(0)
    i = pl.program_id(1)
    n_inner = pl.num_programs(1)

    @pl.when(i == 0)
    def _init():
        acc_agg[...] = jnp.zeros_like(acc_agg)
        acc_src[...] = jnp.zeros_like(acc_src)

    # Linear projection for this row tile (bf16 operands, f32 accumulation).
    sup_f32 = jnp.dot(x_ref[...], w_ref[...],
                      preferred_element_type=jnp.float32) + b_ref[...]
    supports_ref[...] = sup_f32
    sup = sup_f32.astype(jnp.bfloat16)

    # Dense weighted-adjacency / one-hot slices for this row tile.  The tile
    # base offset is folded into the tiny [s_pad, K] index arrays instead of a
    # full-width [s_pad, bm] iota add each step.
    base = (p * n_inner + i) * bm
    col_ids = jax.lax.broadcasted_iota(jnp.int32, (s_pad, bm), 1)
    neigh = neigh_ref[...] - base
    srcs = srcidx_ref[...] - base
    mask = mask_ref[...]

    a_tile = jnp.zeros((s_pad, bm), jnp.float32)
    for k in range(k_nb):  # K is small & static: unrolled compare/select/add
        a_tile = a_tile + jnp.where(col_ids == neigh[:, k:k + 1],
                                    mask[:, k:k + 1], 0.0)
    p_tile = (col_ids == srcs).astype(jnp.bfloat16)

    acc_agg[...] += jnp.dot(a_tile.astype(jnp.bfloat16), sup,
                            preferred_element_type=jnp.float32)
    acc_src[...] += jnp.dot(p_tile, sup, preferred_element_type=jnp.float32)

    @pl.when(i == n_inner - 1)
    def _finish():
        pagg_ref[...] = acc_agg[...]
        psrc_ref[...] = acc_src[...]


# -----------------------------------------------------------------------------
# Kernel 2: sparse indexed row update  supports[src_idx] = updates  (in place).
# Grid has one step per src row; the scalar-prefetched (sorted) tile id selects
# the supports tile to rewrite, so untouched tiles are never read or written.
# Duplicate/resident tiles are recomputed idempotently.
# -----------------------------------------------------------------------------
def _scatter_kernel(tile_ref, srcrow_ref, upd_ref, sup_ref, out_ref):
    bm = out_ref.shape[0]
    s_lane = srcrow_ref.shape[1]
    base = tile_ref[pl.program_id(0)] * bm
    row_ids = jax.lax.broadcasted_iota(jnp.int32, (bm, s_lane), 0)
    srcs = srcrow_ref[...] - base                          # tiny [1, s_lane] shift
    p_t = (row_ids == srcs).astype(jnp.float32)            # [bm, s_lane] one-hot
    scat = jnp.dot(p_t, upd_ref[...], preferred_element_type=jnp.float32)
    hit = jnp.sum(p_t, axis=1, keepdims=True)              # [bm, 1]
    out_ref[...] = jnp.where(hit > 0.0, scat, sup_ref[...])


# -----------------------------------------------------------------------------
# Full GraphConv forward.
# -----------------------------------------------------------------------------
def graph_conv_forward(word_vectors, src_idx, neighs_idx, src_mask, w, b):
    n, cin = word_vectors.shape
    cout = w.shape[1]
    s, k_nb = neighs_idx.shape

    bm = _pick_row_tile(n)
    tiles = -(-n // bm)
    p_par = 2 if tiles >= 2 else 1   # recovers v7x's 2nd TensorCore; ~free on v5e/v6e
    tiles = _round_up(tiles, p_par)
    t_inner = tiles // p_par
    n_pad = tiles * bm
    d_pad = _round_up(cout, 128)     # lane-dense feature dim
    s_pad = _round_up(s, 8)          # S in the sublane dim (kernel 1)
    s_lane = _round_up(s, 128)       # S in the lane dim (kernel 2)

    x_p = jnp.pad(word_vectors, ((0, n_pad - n), (0, 0))).astype(jnp.bfloat16)
    w_p = jnp.pad(w, ((0, 0), (0, d_pad - cout))).astype(jnp.bfloat16)
    b_p = jnp.pad(b.astype(jnp.float32), (0, d_pad - cout)).reshape(1, d_pad)
    src_col = jnp.pad(src_idx.astype(jnp.int32), (0, s_pad - s),
                      constant_values=-1).reshape(s_pad, 1)
    neigh_p = jnp.pad(neighs_idx.astype(jnp.int32), ((0, s_pad - s), (0, 0)))
    mask_p = jnp.pad(src_mask.astype(jnp.float32), ((0, s_pad - s), (0, 0)))

    vmem_cap = 32 * 1024 * 1024

    supports_pad, pagg, psrc = pl.pallas_call(
        _proj_agg_kernel,
        out_shape=(
            jax.ShapeDtypeStruct((n_pad, d_pad), jnp.float32),
            jax.ShapeDtypeStruct((p_par, s_pad, d_pad), jnp.float32),
            jax.ShapeDtypeStruct((p_par, s_pad, d_pad), jnp.float32),
        ),
        grid=(p_par, t_inner),
        in_specs=[
            pl.BlockSpec((s_pad, 1), lambda p, i: (0, 0)),         # src_idx column
            pl.BlockSpec((s_pad, k_nb), lambda p, i: (0, 0)),      # neighs_idx
            pl.BlockSpec((s_pad, k_nb), lambda p, i: (0, 0)),      # src_mask
            pl.BlockSpec((bm, cin), lambda p, i: (p * t_inner + i, 0)),  # x tile
            pl.BlockSpec((cin, d_pad), lambda p, i: (0, 0)),       # W (bf16)
            pl.BlockSpec((1, d_pad), lambda p, i: (0, 0)),         # b
        ],
        out_specs=(
            pl.BlockSpec((bm, d_pad), lambda p, i: (p * t_inner + i, 0)),
            pl.BlockSpec((None, s_pad, d_pad), lambda p, i: (p, 0, 0)),  # partial agg
            pl.BlockSpec((None, s_pad, d_pad), lambda p, i: (p, 0, 0)),  # partial src
        ),
        scratch_shapes=[
            pltpu.VMEM((s_pad, d_pad), jnp.float32),               # acc_agg
            pltpu.VMEM((s_pad, d_pad), jnp.float32),               # acc_src
        ],
        compiler_params=pltpu.CompilerParams(
            dimension_semantics=("parallel", "arbitrary"),
            vmem_limit_bytes=vmem_cap,
        ),
    )(src_col, neigh_p, mask_p, x_p, w_p, b_p)

    # Combine the P partial accumulators and apply LeakyReLU(0.2): tiny (P,S,d) op.
    agg = jnp.sum(pagg, axis=0)
    src_feats = jnp.sum(psrc, axis=0)
    z = agg + src_feats
    updates = src_feats + jnp.where(z > 0.0, z, 0.2 * z)

    # Lane-dense (128-multiple) S padding for the scatter kernel.
    upd_l = jnp.pad(updates, ((0, s_lane - s_pad), (0, 0)))
    src_row = jnp.pad(src_idx.astype(jnp.int32), (0, s_lane - s),
                      constant_values=-1).reshape(1, s_lane)

    # Sorted touched-tile ids (duplicates are idempotent & stay resident).
    tile_ids = jnp.sort(src_idx.astype(jnp.int32) // bm)

    new_supports = pl.pallas_call(
        _scatter_kernel,
        out_shape=jax.ShapeDtypeStruct((n_pad, d_pad), jnp.float32),
        grid_spec=pltpu.PrefetchScalarGridSpec(
            num_scalar_prefetch=1,
            grid=(s,),
            in_specs=[
                pl.BlockSpec((1, s_lane), lambda g, t: (0, 0)),       # src_idx row
                pl.BlockSpec((s_lane, d_pad), lambda g, t: (0, 0)),   # updates
                pl.BlockSpec((bm, d_pad), lambda g, t: (t[g], 0)),    # supports tile
            ],
            out_specs=pl.BlockSpec((bm, d_pad), lambda g, t: (t[g], 0)),
        ),
        # supports is operand 3 (prefetch arg counts); written in place so the
        # untouched tiles keep their kernel-1 values with zero HBM traffic.
        input_output_aliases={3: 0},
        compiler_params=pltpu.CompilerParams(
            dimension_semantics=("arbitrary",),
            vmem_limit_bytes=vmem_cap,
        ),
    )(tile_ids, src_row, upd_l, supports_pad)

    return new_supports[:n, :cout]


# -----------------------------------------------------------------------------
# Pure-JAX reference for validation (mirrors the torch module exactly).
# -----------------------------------------------------------------------------
def graph_conv_reference(word_vectors, src_idx, neighs_idx, src_mask, w, b):
    hp = jax.lax.Precision.HIGHEST
    supports = jnp.dot(word_vectors, w, precision=hp) + b
    src_feats = supports[src_idx]
    neigh_feats = supports[neighs_idx]
    agg = jnp.einsum("sk,skd->sd", src_mask.astype(jnp.float32), neigh_feats,
                     precision=hp)
    outputs = agg + src_feats
    outputs = jnp.where(outputs > 0, outputs, 0.2 * outputs)
    return supports.at[src_idx].set(src_feats + outputs)


if __name__ == "__main__":
    key = jax.random.PRNGKey(0)
    k1, k2, k3, k4, k5, k6 = jax.random.split(key, 6)

    # N=4096 exercises the (parallel=2, arbitrary=2) grid at bm=1024; C_OUT=96
    # exercises lane padding to 128; S=20 exercises sublane(8)/lane(128) padding.
    N, C_IN, C_OUT = 4096, 64, 96
    S, K = 20, 10

    word_vectors = jax.random.normal(k1, (N, C_IN), dtype=jnp.float32)

    # torch Linear init style: W stored here as [C_in, C_out] (x @ W + b).
    bound = 1.0 / (C_IN ** 0.5)
    w = jax.random.uniform(k2, (C_IN, C_OUT), minval=-bound, maxval=bound,
                           dtype=jnp.float32)
    b = jax.random.uniform(k3, (C_OUT,), minval=-bound, maxval=bound,
                           dtype=jnp.float32)

    # Unique source indices (torch's `supports[src_idx] += outputs` is
    # ill-defined for duplicates).
    src_idx = jax.random.permutation(k4, N)[:S].astype(jnp.int32)
    neighs_idx = jax.random.randint(k5, (S, K), 0, N, dtype=jnp.int32)
    src_mask = jax.random.uniform(k6, (S, K), dtype=jnp.float32)

    fwd = jax.jit(graph_conv_forward)
    out = jax.block_until_ready(fwd(word_vectors, src_idx, neighs_idx, src_mask, w, b))

    ref = graph_conv_reference(word_vectors, src_idx, neighs_idx, src_mask, w, b)
    assert out.shape == (N, C_OUT)
    # bf16 MXU operands (f32 accumulation) vs HIGHEST-precision f32 reference.
    assert jnp.allclose(out, ref, atol=5e-2, rtol=5e-2), (
        f"mismatch vs reference, max abs err = {jnp.max(jnp.abs(out - ref))}")

    print("KERNEL_OK")
</pallas_src>

<mosaic_0001>
module attributes {stable_mosaic.version = 11 : i64} {
  func.func @_proj_agg_kernel(%arg0: i32, %arg1: i32, %arg2: memref<24x1xi32, #tpu.memory_space<vmem>>, %arg3: memref<24x10xi32, #tpu.memory_space<vmem>>, %arg4: memref<24x10xf32, #tpu.memory_space<vmem>>, %arg5: memref<1024x64xbf16, #tpu.memory_space<vmem>>, %arg6: memref<64x128xbf16, #tpu.memory_space<vmem>>, %arg7: memref<1x128xf32, #tpu.memory_space<vmem>>, %arg8: memref<1024x128xf32, #tpu.memory_space<vmem>>, %arg9: memref<1x24x128xf32, #tpu.memory_space<vmem>>, %arg10: memref<1x24x128xf32, #tpu.memory_space<vmem>>, %arg11: memref<24x128xf32, #tpu.memory_space<vmem>>, %arg12: memref<24x128xf32, #tpu.memory_space<vmem>>) attributes {dimension_semantics = [#tpu.dimension_semantics<parallel>, #tpu.dimension_semantics<arbitrary>], iteration_bounds = array<i64: 2, 2>, scalar_prefetch = 0 : i64, scratch_operands = 2 : i64, tpu.core_type = #tpu.core_type<tc>, window_params = [{pipeline_mode = #tpu.pipeline_mode<synchronous>, transform_indices = @transform_0, window_bounds = array<i64: 24, 1>}, {pipeline_mode = #tpu.pipeline_mode<synchronous>, transform_indices = @transform_1, window_bounds = array<i64: 24, 10>}, {pipeline_mode = #tpu.pipeline_mode<synchronous>, transform_indices = @transform_2, window_bounds = array<i64: 24, 10>}, {transform_indices = @transform_3, window_bounds = array<i64: 1024, 64>}, {pipeline_mode = #tpu.pipeline_mode<synchronous>, transform_indices = @transform_4, window_bounds = array<i64: 64, 128>}, {pipeline_mode = #tpu.pipeline_mode<synchronous>, transform_indices = @transform_5, window_bounds = array<i64: 1, 128>}, {transform_indices = @transform_6, window_bounds = array<i64: 1024, 128>}, {transform_indices = @transform_7, window_bounds = array<i64: 1, 24, 128>}, {transform_indices = @transform_8, window_bounds = array<i64: 1, 24, 128>}]} {
    %c0_i32 = arith.constant 0 : i32
    %0 = arith.cmpi eq, %arg1, %c0_i32 : i32
    %1 = arith.extui %0 : i1 to i32
    %c0_i32_0 = arith.constant 0 : i32
    %2 = arith.cmpi ne, %1, %c0_i32_0 : i32
    scf.if %2 {
      %cst_36 = arith.constant 0.000000e+00 : f32
      %130 = vector.broadcast %cst_36 : f32 to vector<24x128xf32>
      %c0_37 = arith.constant 0 : index
      %c0_38 = arith.constant 0 : index
      %131 = vector.load %arg11[%c0_37, %c0_38] : memref<24x128xf32, #tpu.memory_space<vmem>>, vector<24x128xf32>
      tpu.vector_store %arg11[%c0_37, %c0_38], %130 {strides = array<i32>} : memref<24x128xf32, #tpu.memory_space<vmem>>, vector<24x128xf32>,
      %cst_39 = arith.constant 0.000000e+00 : f32
      %132 = vector.broadcast %cst_39 : f32 to vector<24x128xf32>
      %c0_40 = arith.constant 0 : index
      %c0_41 = arith.constant 0 : index
      %133 = vector.load %arg12[%c0_40, %c0_41] : memref<24x128xf32, #tpu.memory_space<vmem>>, vector<24x128xf32>
      tpu.vector_store %arg12[%c0_40, %c0_41], %132 {strides = array<i32>} : memref<24x128xf32, #tpu.memory_space<vmem>>, vector<24x128xf32>,
    } else {
    }
    %c0 = arith.constant 0 : index
    %c0_1 = arith.constant 0 : index
    %3 = vector.load %arg5[%c0, %c0_1] : memref<1024x64xbf16, #tpu.memory_space<vmem>>, vector<1024x64xbf16>
    %c0_2 = arith.constant 0 : index
    %c0_3 = arith.constant 0 : index
    %4 = vector.load %arg6[%c0_2, %c0_3] : memref<64x128xbf16, #tpu.memory_space<vmem>>, vector<64x128xbf16>
    %cst = arith.constant dense<0.000000e+00> : vector<1024x128xf32>
    %5 = tpu.matmul %3, %4, %cst {dimension_numbers = #tpu.dot_dimension_numbers<[1], [0], [0], [1], [0, 0, 1, 1], [], []>} : vector<1024x64xbf16>, vector<64x128xbf16>, vector<1024x128xf32> -> vector<1024x128xf32>
    %c0_4 = arith.constant 0 : index
    %c0_5 = arith.constant 0 : index
    %6 = vector.load %arg7[%c0_4, %c0_5] : memref<1x128xf32, #tpu.memory_space<vmem>>, vector<1x128xf32>
    %7 = vector.broadcast %6 : vector<1x128xf32> to vector<1024x128xf32>
    %8 = arith.addf %5, %7 : vector<1024x128xf32>
    %c0_6 = arith.constant 0 : index
    %c0_7 = arith.constant 0 : index
    %9 = vector.load %arg8[%c0_6, %c0_7] : memref<1024x128xf32, #tpu.memory_space<vmem>>, vector<1024x128xf32>
    tpu.vector_store %arg8[%c0_6, %c0_7], %8 {strides = array<i32>} : memref<1024x128xf32, #tpu.memory_space<vmem>>, vector<1024x128xf32>,
    %10 = arith.truncf %8 : vector<1024x128xf32> to vector<1024x128xbf16>
    %c2_i32 = arith.constant 2 : i32
    %11 = arith.muli %arg0, %c2_i32 : i32
    %12 = arith.addi %11, %arg1 : i32
    %c1024_i32 = arith.constant 1024 : i32
    %13 = arith.muli %12, %c1024_i32 : i32
    %14 = tpu.iota {dimensions = array<i32: 1>} : vector<24x1024xi32>
    %c0_8 = arith.constant 0 : index
    %c0_9 = arith.constant 0 : index
    %15 = vector.load %arg3[%c0_8, %c0_9] : memref<24x10xi32, #tpu.memory_space<vmem>>, vector<24x10xi32>
    %16 = vector.broadcast %13 : i32 to vector<24x10xi32>
    %17 = arith.subi %15, %16 : vector<24x10xi32>
    %c0_10 = arith.constant 0 : index
    %c0_11 = arith.constant 0 : index
    %18 = vector.load %arg2[%c0_10, %c0_11] : memref<24x1xi32, #tpu.memory_space<vmem>>, vector<24x1xi32>
    %19 = vector.broadcast %13 : i32 to vector<24x1xi32>
    %20 = arith.subi %18, %19 : vector<24x1xi32>
    %c0_12 = arith.constant 0 : index
    %c0_13 = arith.constant 0 : index
    %21 = vector.load %arg4[%c0_12, %c0_13] : memref<24x10xf32, #tpu.memory_space<vmem>>, vector<24x10xf32>
    %cst_14 = arith.constant 0.000000e+00 : f32
    %22 = vector.broadcast %cst_14 : f32 to vector<24x1024xf32>
    %23 = vector.extract_strided_slice %17 {offsets = [0, 0], sizes = [24, 1], strides = [1, 1]} : vector<24x10xi32> to vector<24x1xi32>
    %24 = vector.broadcast %23 : vector<24x1xi32> to vector<24x1024xi32>
    %25 = arith.cmpi eq, %14, %24 : vector<24x1024xi32>
    %26 = vector.extract_strided_slice %21 {offsets = [0, 0], sizes = [24, 1], strides = [1, 1]} : vector<24x10xf32> to vector<24x1xf32>
    %cst_15 = arith.constant 0.000000e+00 : f32
    %27 = vector.shape_cast %26 : vector<24x1xf32> to vector<24x1xf32>
    %28 = vector.broadcast %27 : vector<24x1xf32> to vector<24x1024xf32>
    %29 = vector.broadcast %cst_15 : f32 to vector<24x1024xf32>
    %30 = arith.select %25, %28, %29 : vector<24x1024xi1>, vector<24x1024xf32>
    %31 = arith.addf %22, %30 : vector<24x1024xf32>
    %32 = vector.extract_strided_slice %17 {offsets = [0, 1], sizes = [24, 1], strides = [1, 1]} : vector<24x10xi32> to vector<24x1xi32>
    %33 = vector.broadcast %32 : vector<24x1xi32> to vector<24x1024xi32>
    %34 = arith.cmpi eq, %14, %33 : vector<24x1024xi32>
    %35 = vector.extract_strided_slice %21 {offsets = [0, 1], sizes = [24, 1], strides = [1, 1]} : vector<24x10xf32> to vector<24x1xf32>
    %cst_16 = arith.constant 0.000000e+00 : f32
    %36 = vector.shape_cast %35 : vector<24x1xf32> to vector<24x1xf32>
    %37 = vector.broadcast %36 : vector<24x1xf32> to vector<24x1024xf32>
    %38 = vector.broadcast %cst_16 : f32 to vector<24x1024xf32>
    %39 = arith.select %34, %37, %38 : vector<24x1024xi1>, vector<24x1024xf32>
    %40 = arith.addf %31, %39 : vector<24x1024xf32>
    %41 = vector.extract_strided_slice %17 {offsets = [0, 2], sizes = [24, 1], strides = [1, 1]} : vector<24x10xi32> to vector<24x1xi32>
    %42 = vector.broadcast %41 : vector<24x1xi32> to vector<24x1024xi32>
    %43 = arith.cmpi eq, %14, %42 : vector<24x1024xi32>
    %44 = vector.extract_strided_slice %21 {offsets = [0, 2], sizes = [24, 1], strides = [1, 1]} : vector<24x10xf32> to vector<24x1xf32>
    %cst_17 = arith.constant 0.000000e+00 : f32
    %45 = vector.shape_cast %44 : vector<24x1xf32> to vector<24x1xf32>
    %46 = vector.broadcast %45 : vector<24x1xf32> to vector<24x1024xf32>
    %47 = vector.broadcast %cst_17 : f32 to vector<24x1024xf32>
    %48 = arith.select %43, %46, %47 : vector<24x1024xi1>, vector<24x1024xf32>
    %49 = arith.addf %40, %48 : vector<24x1024xf32>
    %50 = vector.extract_strided_slice %17 {offsets = [0, 3], sizes = [24, 1], strides = [1, 1]} : vector<24x10xi32> to vector<24x1xi32>
    %51 = vector.broadcast %50 : vector<24x1xi32> to vector<24x1024xi32>
    %52 = arith.cmpi eq, %14, %51 : vector<24x1024xi32>
    %53 = vector.extract_strided_slice %21 {offsets = [0, 3], sizes = [24, 1], strides = [1, 1]} : vector<24x10xf32> to vector<24x1xf32>
    %cst_18 = arith.constant 0.000000e+00 : f32
    %54 = vector.shape_cast %53 : vector<24x1xf32> to vector<24x1xf32>
    %55 = vector.broadcast %54 : vector<24x1xf32> to vector<24x1024xf32>
    %56 = vector.broadcast %cst_18 : f32 to vector<24x1024xf32>
    %57 = arith.select %52, %55, %56 : vector<24x1024xi1>, vector<24x1024xf32>
    %58 = arith.addf %49, %57 : vector<24x1024xf32>
    %59 = vector.extract_strided_slice %17 {offsets = [0, 4], sizes = [24, 1], strides = [1, 1]} : vector<24x10xi32> to vector<24x1xi32>
    %60 = vector.broadcast %59 : vector<24x1xi32> to vector<24x1024xi32>
    %61 = arith.cmpi eq, %14, %60 : vector<24x1024xi32>
    %62 = vector.extract_strided_slice %21 {offsets = [0, 4], sizes = [24, 1], strides = [1, 1]} : vector<24x10xf32> to vector<24x1xf32>
    %cst_19 = arith.constant 0.000000e+00 : f32
    %63 = vector.shape_cast %62 : vector<24x1xf32> to vector<24x1xf32>
    %64 = vector.broadcast %63 : vector<24x1xf32> to vector<24x1024xf32>
    %65 = vector.broadcast %cst_19 : f32 to vector<24x1024xf32>
    %66 = arith.select %61, %64, %65 : vector<24x1024xi1>, vector<24x1024xf32>
    %67 = arith.addf %58, %66 : vector<24x1024xf32>
    %68 = vector.extract_strided_slice %17 {offsets = [0, 5], sizes = [24, 1], strides = [1, 1]} : vector<24x10xi32> to vector<24x1xi32>
    %69 = vector.broadcast %68 : vector<24x1xi32> to vector<24x1024xi32>
    %70 = arith.cmpi eq, %14, %69 : vector<24x1024xi32>
    %71 = vector.extract_strided_slice %21 {offsets = [0, 5], sizes = [24, 1], strides = [1, 1]} : vector<24x10xf32> to vector<24x1xf32>
    %cst_20 = arith.constant 0.000000e+00 : f32
    %72 = vector.shape_cast %71 : vector<24x1xf32> to vector<24x1xf32>
    %73 = vector.broadcast %72 : vector<24x1xf32> to vector<24x1024xf32>
    %74 = vector.broadcast %cst_20 : f32 to vector<24x1024xf32>
    %75 = arith.select %70, %73, %74 : vector<24x1024xi1>, vector<24x1024xf32>
    %76 = arith.addf %67, %75 : vector<24x1024xf32>
    %77 = vector.extract_strided_slice %17 {offsets = [0, 6], sizes = [24, 1], strides = [1, 1]} : vector<24x10xi32> to vector<24x1xi32>
    %78 = vector.broadcast %77 : vector<24x1xi32> to vector<24x1024xi32>
    %79 = arith.cmpi eq, %14, %78 : vector<24x1024xi32>
    %80 = vector.extract_strided_slice %21 {offsets = [0, 6], sizes = [24, 1], strides = [1, 1]} : vector<24x10xf32> to vector<24x1xf32>
    %cst_21 = arith.constant 0.000000e+00 : f32
    %81 = vector.shape_cast %80 : vector<24x1xf32> to vector<24x1xf32>
    %82 = vector.broadcast %81 : vector<24x1xf32> to vector<24x1024xf32>
    %83 = vector.broadcast %cst_21 : f32 to vector<24x1024xf32>
    %84 = arith.select %79, %82, %83 : vector<24x1024xi1>, vector<24x1024xf32>
    %85 = arith.addf %76, %84 : vector<24x1024xf32>
    %86 = vector.extract_strided_slice %17 {offsets = [0, 7], sizes = [24, 1], strides = [1, 1]} : vector<24x10xi32> to vector<24x1xi32>
    %87 = vector.broadcast %86 : vector<24x1xi32> to vector<24x1024xi32>
    %88 = arith.cmpi eq, %14, %87 : vector<24x1024xi32>
    %89 = vector.extract_strided_slice %21 {offsets = [0, 7], sizes = [24, 1], strides = [1, 1]} : vector<24x10xf32> to vector<24x1xf32>
    %cst_22 = arith.constant 0.000000e+00 : f32
    %90 = vector.shape_cast %89 : vector<24x1xf32> to vector<24x1xf32>
    %91 = vector.broadcast %90 : vector<24x1xf32> to vector<24x1024xf32>
    %92 = vector.broadcast %cst_22 : f32 to vector<24x1024xf32>
    %93 = arith.select %88, %91, %92 : vector<24x1024xi1>, vector<24x1024xf32>
    %94 = arith.addf %85, %93 : vector<24x1024xf32>
    %95 = vector.extract_strided_slice %17 {offsets = [0, 8], sizes = [24, 1], strides = [1, 1]} : vector<24x10xi32> to vector<24x1xi32>
    %96 = vector.broadcast %95 : vector<24x1xi32> to vector<24x1024xi32>
    %97 = arith.cmpi eq, %14, %96 : vector<24x1024xi32>
    %98 = vector.extract_strided_slice %21 {offsets = [0, 8], sizes = [24, 1], strides = [1, 1]} : vector<24x10xf32> to vector<24x1xf32>
    %cst_23 = arith.constant 0.000000e+00 : f32
    %99 = vector.shape_cast %98 : vector<24x1xf32> to vector<24x1xf32>
    %100 = vector.broadcast %99 : vector<24x1xf32> to vector<24x1024xf32>
    %101 = vector.broadcast %cst_23 : f32 to vector<24x1024xf32>
    %102 = arith.select %97, %100, %101 : vector<24x1024xi1>, vector<24x1024xf32>
    %103 = arith.addf %94, %102 : vector<24x1024xf32>
    %104 = vector.extract_strided_slice %17 {offsets = [0, 9], sizes = [24, 1], strides = [1, 1]} : vector<24x10xi32> to vector<24x1xi32>
    %105 = vector.broadcast %104 : vector<24x1xi32> to vector<24x1024xi32>
    %106 = arith.cmpi eq, %14, %105 : vector<24x1024xi32>
    %107 = vector.extract_strided_slice %21 {offsets = [0, 9], sizes = [24, 1], strides = [1, 1]} : vector<24x10xf32> to vector<24x1xf32>
    %cst_24 = arith.constant 0.000000e+00 : f32
    %108 = vector.shape_cast %107 : vector<24x1xf32> to vector<24x1xf32>
    %109 = vector.broadcast %108 : vector<24x1xf32> to vector<24x1024xf32>
    %110 = vector.broadcast %cst_24 : f32 to vector<24x1024xf32>
    %111 = arith.select %106, %109, %110 : vector<24x1024xi1>, vector<24x1024xf32>
    %112 = arith.addf %103, %111 : vector<24x1024xf32>
    %113 = vector.broadcast %20 : vector<24x1xi32> to vector<24x1024xi32>
    %114 = arith.cmpi eq, %14, %113 : vector<24x1024xi32>
    %115 = arith.extui %114 : vector<24x1024xi1> to vector<24x1024xi32>
    %116 = arith.sitofp %115 : vector<24x1024xi32> to vector<24x1024xf32>
    %117 = arith.truncf %116 : vector<24x1024xf32> to vector<24x1024xbf16>
    %c0_25 = arith.constant 0 : index
    %c0_26 = arith.constant 0 : index
    %118 = vector.load %arg11[%c0_25, %c0_26] : memref<24x128xf32, #tpu.memory_space<vmem>>, vector<24x128xf32>
    %119 = arith.truncf %112 : vector<24x1024xf32> to vector<24x1024xbf16>
    %cst_27 = arith.constant dense<0.000000e+00> : vector<24x128xf32>
    %120 = tpu.matmul %119, %10, %cst_27 {dimension_numbers = #tpu.dot_dimension_numbers<[1], [0], [0], [1], [0, 0, 1, 1], [], []>} : vector<24x1024xbf16>, vector<1024x128xbf16>, vector<24x128xf32> -> vector<24x128xf32>
    %121 = arith.addf %118, %120 : vector<24x128xf32>
    %c0_28 = arith.constant 0 : index
    %c0_29 = arith.constant 0 : index
    %122 = vector.load %arg11[%c0_28, %c0_29] : memref<24x128xf32, #tpu.memory_space<vmem>>, vector<24x128xf32>
    tpu.vector_store %arg11[%c0_28, %c0_29], %121 {strides = array<i32>} : memref<24x128xf32, #tpu.memory_space<vmem>>, vector<24x128xf32>,
    %c0_30 = arith.constant 0 : index
    %c0_31 = arith.constant 0 : index
    %123 = vector.load %arg12[%c0_30, %c0_31] : memref<24x128xf32, #tpu.memory_space<vmem>>, vector<24x128xf32>
    %cst_32 = arith.constant dense<0.000000e+00> : vector<24x128xf32>
    %124 = tpu.matmul %117, %10, %cst_32 {dimension_numbers = #tpu.dot_dimension_numbers<[1], [0], [0], [1], [0, 0, 1, 1], [], []>} : vector<24x1024xbf16>, vector<1024x128xbf16>, vector<24x128xf32> -> vector<24x128xf32>
    %125 = arith.addf %123, %124 : vector<24x128xf32>
    %c0_33 = arith.constant 0 : index
    %c0_34 = arith.constant 0 : index
    %126 = vector.load %arg12[%c0_33, %c0_34] : memref<24x128xf32, #tpu.memory_space<vmem>>, vector<24x128xf32>
    tpu.vector_store %arg12[%c0_33, %c0_34], %125 {strides = array<i32>} : memref<24x128xf32, #tpu.memory_space<vmem>>, vector<24x128xf32>,
    %c1_i32 = arith.constant 1 : i32
    %127 = arith.cmpi eq, %arg1, %c1_i32 : i32
    %128 = arith.extui %127 : i1 to i32
    %c0_i32_35 = arith.constant 0 : i32
    %129 = arith.cmpi ne, %128, %c0_i32_35 : i32
    scf.if %129 {
      %c0_36 = arith.constant 0 : index
      %c0_37 = arith.constant 0 : index
      %130 = vector.load %arg11[%c0_36, %c0_37] : memref<24x128xf32, #tpu.memory_space<vmem>>, vector<24x128xf32>
      %c0_38 = arith.constant 0 : index
      %c0_39 = arith.constant 0 : index
      %c0_40 = arith.constant 0 : index
      %131 = vector.load %arg9[%c0_38, %c0_39, %c0_40] : memref<1x24x128xf32, #tpu.memory_space<vmem>>, vector<1x24x128xf32>
      %132 = vector.shape_cast %131 : vector<1x24x128xf32> to vector<24x128xf32>
      %133 = vector.shape_cast %130 : vector<24x128xf32> to vector<1x24x128xf32>
      tpu.vector_store %arg9[%c0_38, %c0_39, %c0_40], %133 {strides = array<i32>} : memref<1x24x128xf32, #tpu.memory_space<vmem>>, vector<1x24x128xf32>,
      %c0_41 = arith.constant 0 : index
      %c0_42 = arith.constant 0 : index
      %134 = vector.load %arg12[%c0_41, %c0_42] : memref<24x128xf32, #tpu.memory_space<vmem>>, vector<24x128xf32>
      %c0_43 = arith.constant 0 : index
      %c0_44 = arith.constant 0 : index
      %c0_45 = arith.constant 0 : index
      %135 = vector.load %arg10[%c0_43, %c0_44, %c0_45] : memref<1x24x128xf32, #tpu.memory_space<vmem>>, vector<1x24x128xf32>
      %136 = vector.shape_cast %135 : vector<1x24x128xf32> to vector<24x128xf32>
      %137 = vector.shape_cast %134 : vector<24x128xf32> to vector<1x24x128xf32>
      tpu.vector_store %arg10[%c0_43, %c0_44, %c0_45], %137 {strides = array<i32>} : memref<1x24x128xf32, #tpu.memory_space<vmem>>, vector<1x24x128xf32>,
    } else {
    }
    return
  }
  func.func @transform_0(%arg0: i32, %arg1: i32) -> (i32, i32) {
    %c0_i32 = arith.constant 0 : i32
    %c0_i32_0 = arith.constant 0 : i32
    %c0_i32_1 = arith.constant 0 : i32
    return %c0_i32, %c0_i32_0 : i32, i32
  }
  func.func @transform_1(%arg0: i32, %arg1: i32) -> (i32, i32) {
    %c0_i32 = arith.constant 0 : i32
    %c0_i32_0 = arith.constant 0 : i32
    %c0_i32_1 = arith.constant 0 : i32
    return %c0_i32, %c0_i32_0 : i32, i32
  }
  func.func @transform_2(%arg0: i32, %arg1: i32) -> (i32, i32) {
    %c0_i32 = arith.constant 0 : i32
    %c0_i32_0 = arith.constant 0 : i32
    %c0_i32_1 = arith.constant 0 : i32
    return %c0_i32, %c0_i32_0 : i32, i32
  }
  func.func @transform_3(%arg0: i32, %arg1: i32) -> (i32, i32) {
    %c2_i32 = arith.constant 2 : i32
    %0 = arith.muli %arg0, %c2_i32 : i32
    %1 = arith.addi %0, %arg1 : i32
    %c0_i32 = arith.constant 0 : i32
    %c0_i32_0 = arith.constant 0 : i32
    return %1, %c0_i32 : i32, i32
  }
  func.func @transform_4(%arg0: i32, %arg1: i32) -> (i32, i32) {
    %c0_i32 = arith.constant 0 : i32
    %c0_i32_0 = arith.constant 0 : i32
    %c0_i32_1 = arith.constant 0 : i32
    return %c0_i32, %c0_i32_0 : i32, i32
  }
  func.func @transform_5(%arg0: i32, %arg1: i32) -> (i32, i32) {
    %c0_i32 = arith.constant 0 : i32
    %c0_i32_0 = arith.constant 0 : i32
    %c0_i32_1 = arith.constant 0 : i32
    return %c0_i32, %c0_i32_0 : i32, i32
  }
  func.func @transform_6(%arg0: i32, %arg1: i32) -> (i32, i32) {
    %c2_i32 = arith.constant 2 : i32
    %0 = arith.muli %arg0, %c2_i32 : i32
    %1 = arith.addi %0, %arg1 : i32
    %c0_i32 = arith.constant 0 : i32
    %c0_i32_0 = arith.constant 0 : i32
    return %1, %c0_i32 : i32, i32
  }
  func.func @transform_7(%arg0: i32, %arg1: i32) -> (i32, i32, i32) {
    %c0_i32 = arith.constant 0 : i32
    %c0_i32_0 = arith.constant 0 : i32
    %c0_i32_1 = arith.constant 0 : i32
    return %arg0, %c0_i32, %c0_i32_0 : i32, i32, i32
  }
  func.func @transform_8(%arg0: i32, %arg1: i32) -> (i32, i32, i32) {
    %c0_i32 = arith.constant 0 : i32
    %c0_i32_0 = arith.constant 0 : i32
    %c0_i32_1 = arith.constant 0 : i32
    return %arg0, %c0_i32, %c0_i32_0 : i32, i32, i32
  }
}

module attributes {stable_mosaic.version = 11 : i64} {
  func.func @_scatter_kernel(%arg0: i32, %arg1: memref<20xi32, #tpu.memory_space<smem>>, %arg2: memref<1x128xi32, #tpu.memory_space<vmem>>, %arg3: memref<128x128xf32, #tpu.memory_space<vmem>>, %arg4: memref<1024x128xf32, #tpu.memory_space<vmem>>, %arg5: memref<1024x128xf32, #tpu.memory_space<vmem>>) attributes {dimension_semantics = [#tpu.dimension_semantics<arbitrary>], iteration_bounds = array<i64: 20>, scalar_prefetch = 1 : i64, scratch_operands = 0 : i64, tpu.core_type = #tpu.core_type<tc>, window_params = [{pipeline_mode = #tpu.pipeline_mode<synchronous>, transform_indices = @transform_0, window_bounds = array<i64: 1, 128>}, {pipeline_mode = #tpu.pipeline_mode<synchronous>, transform_indices = @transform_1, window_bounds = array<i64: 128, 128>}, {transform_indices = @transform_2, window_bounds = array<i64: 1024, 128>}, {transform_indices = @transform_3, window_bounds = array<i64: 1024, 128>}]} {
    %0 = arith.index_cast %arg0 : i32 to index
    %1 = memref.load %arg1[%0] : memref<20xi32, #tpu.memory_space<smem>>
    %c1024_i32 = arith.constant 1024 : i32
    %2 = arith.muli %1, %c1024_i32 : i32
    %3 = tpu.iota {dimensions = array<i32: 0>} : vector<1024x128xi32>
    %c0 = arith.constant 0 : index
    %c0_0 = arith.constant 0 : index
    %4 = vector.load %arg2[%c0, %c0_0] : memref<1x128xi32, #tpu.memory_space<vmem>>, vector<1x128xi32>
    %5 = vector.broadcast %2 : i32 to vector<1x128xi32>
    %6 = arith.subi %4, %5 : vector<1x128xi32>
    %7 = vector.broadcast %6 : vector<1x128xi32> to vector<1024x128xi32>
    %8 = arith.cmpi eq, %3, %7 : vector<1024x128xi32>
    %9 = arith.extui %8 : vector<1024x128xi1> to vector<1024x128xi32>
    %10 = arith.sitofp %9 : vector<1024x128xi32> to vector<1024x128xf32>
    %c0_1 = arith.constant 0 : index
    %c0_2 = arith.constant 0 : index
    %11 = vector.load %arg3[%c0_1, %c0_2] : memref<128x128xf32, #tpu.memory_space<vmem>>, vector<128x128xf32>
    %cst = arith.constant dense<0.000000e+00> : vector<1024x128xf32>
    %12 = tpu.matmul %10, %11, %cst {dimension_numbers = #tpu.dot_dimension_numbers<[1], [0], [0], [1], [0, 0, 1, 1], [], []>} : vector<1024x128xf32>, vector<128x128xf32>, vector<1024x128xf32> -> vector<1024x128xf32>
    %cst_3 = arith.constant dense<0.000000e+00> : vector<1024xf32>
    %13 = vector.multi_reduction <add>, %10, %cst_3 [1] : vector<1024x128xf32> to vector<1024xf32>
    %14 = vector.shape_cast %13 : vector<1024xf32> to vector<1024x1xf32>
    %cst_4 = arith.constant 0.000000e+00 : f32
    %15 = vector.broadcast %cst_4 : f32 to vector<1024x1xf32>
    %16 = arith.cmpf ogt, %14, %15 : vector<1024x1xf32>
    %c0_5 = arith.constant 0 : index
    %c0_6 = arith.constant 0 : index
    %17 = vector.load %arg4[%c0_5, %c0_6] : memref<1024x128xf32, #tpu.memory_space<vmem>>, vector<1024x128xf32>
    %18 = vector.shape_cast %16 : vector<1024x1xi1> to vector<1024x1xi1>
    %19 = vector.broadcast %18 : vector<1024x1xi1> to vector<1024x128xi1>
    %20 = arith.select %19, %12, %17 : vector<1024x128xi1>, vector<1024x128xf32>
    %c0_7 = arith.constant 0 : index
    %c0_8 = arith.constant 0 : index
    %21 = vector.load %arg5[%c0_7, %c0_8] : memref<1024x128xf32, #tpu.memory_space<vmem>>, vector<1024x128xf32>
    tpu.vector_store %arg5[%c0_7, %c0_8], %20 {strides = array<i32>} : memref<1024x128xf32, #tpu.memory_space<vmem>>, vector<1024x128xf32>,
    return
  }
  func.func @transform_0(%arg0: i32, %arg1: memref<20xi32, #tpu.memory_space<smem>>) -> (i32, i32) {
    %c0_i32 = arith.constant 0 : i32
    %c0_i32_0 = arith.constant 0 : i32
    %c0_i32_1 = arith.constant 0 : i32
    return %c0_i32, %c0_i32_0 : i32, i32
  }
  func.func @transform_1(%arg0: i32, %arg1: memref<20xi32, #tpu.memory_space<smem>>) -> (i32, i32) {
    %c0_i32 = arith.constant 0 : i32
    %c0_i32_0 = arith.constant 0 : i32
    %c0_i32_1 = arith.constant 0 : i32
    return %c0_i32, %c0_i32_0 : i32, i32
  }
  func.func @transform_2(%arg0: i32, %arg1: memref<20xi32, #tpu.memory_space<smem>>) -> (i32, i32) {
    %0 = arith.index_cast %arg0 : i32 to index
    %1 = memref.load %arg1[%0] : memref<20xi32, #tpu.memory_space<smem>>
    %c0_i32 = arith.constant 0 : i32
    %c0_i32_0 = arith.constant 0 : i32
    return %1, %c0_i32 : i32, i32
  }
  func.func @transform_3(%arg0: i32, %arg1: memref<20xi32, #tpu.memory_space<smem>>) -> (i32, i32) {
    %0 = arith.index_cast %arg0 : i32 to index
    %1 = memref.load %arg1[%0] : memref<20xi32, #tpu.memory_space<smem>>
    %c0_i32 = arith.constant 0 : i32
    %c0_i32_0 = arith.constant 0 : i32
    return %1, %c0_i32 : i32, i32
  }
}

</mosaic_0001>

<bundles_post_ra>
// kernel: graph_conv_forward.3
= control target key start
LH: loop header
LB: loop body
LE: loop exit
PB: predicated region body
PF: predicated region fallthrough
CT: control target
= control target key end

     0   :  { %s5996_s0 = inlined_call_operand.vmem [shape: s32[20], index: 0, kind: input, shape index: {}]   ;;  %s5997_s1 = inlined_call_operand.vmem [shape: s32[1,128], index: 1, kind: input, shape index: {}]   ;;  %s5998_s2 = inlined_call_operand.vmem [shape: f32[128,128], index: 2, kind: input, shape index: {}]   ;;  %s5999_s3 = inlined_call_operand.vmem [shape: f32[4096,128], index: 3, kind: input, shape index: {}, may-alias: {3,4}]   ;;  %s6000_s4 = inlined_call_operand.vmem [shape: f32[4096,128], index: 4, kind: output, shape index: {}, may-alias: {3,4}]  }
   0x1   :  { %s9_s17 = sshll.u32 %s5996_s0, 4  ;;  %s10_s17 = int_to_ptr.vmem [resolvable:$true] %s9_s17 }
   0x2   :  { %s3198_s18 = scalar_lea.vmem %s10_s17, 16  ;;  %p3203_p1 = scmp.lt.s32.totalorder %s10_s17, %s10_s17 }
   0x3   :  { %p3199_p0 = scmp.ne.s32.totalorder %s10_s17, %s3198_s18  ;;  %p3204_p2 = scmp.lt.s32.totalorder %s3198_s18, %s3198_s18 }
   0x5   :  { %p3205_p3 = por %p3204_p2, %p3203_p1 }
   0x7   :  { %p3206_p4 = pnand %p3205_p3, %p3199_p0 }
   0x9   :  { %3209 = shalt.err (!%p3206_p4)  }
   0xa   :  { %s3220_s19 = smov [#allocation3]  }
   0xb   :  { %12 = dma.vmem_to_smem %s10_s17, 16, %s3220_s19, [#allocation2] }
   0xc   :  { %3214 = dma.done.wait [#allocation2], 16 }
   0xd   :  { %3215 = vsyncadd [#allocation2], 4294967280 }
   0xe   :  { %14 = sfence }
   0xf   :  { %s3251_s20 = smov 0  }
  0x10 LB: > { %s3257_s0 = sadd.s32 4294967295, %s3218_s20   ;;  %p2523_p5 = scmp.ge.s32.totalorder %s3218_s20, 1  ;;  %s3218_s20 = sphi %s3251_s20, %s20_s20  }
  0x11   : > { %p151_p6 = scmp.lt.s32.totalorder %s3218_s20, 21 }
  0x13   : > { %p152_p7 = pnand %p2523_p5, %p151_p6 }
  0x15   : > { %155 = sbr.rel (%p152_p7) target bundleno = 448 (0x1c0), region = 32 }
  0x1a   : > { %v730_v0 = vld [vmem:[%s5998_s2 + $0x78] sm:$0xff]  ;;  %v729_v1 = vld [vmem:[%s5998_s2 + $0x70] sm:$0xff]  ;;  %v195_v2 = vlaneseq  ;;  %s193_s25 = sld [smem:[#allocation3 + %s3257_s0]]  ;;  %v728_v3 = vld [vmem:[%s5998_s2 + $0x68] sm:$0xff]  ;;  %v6046_v19 = vmov 0.0   ;;  %v3222_v23 = vmov 1.0  }
  0x1b   : > { %2931 = vmatprep.subr.mxu0 %v730_v0  ;;  %3155 = vmatprep.subr.mxu1 %v730_v0  ;;  %v727_v5 = vld [vmem:[%s5998_s2 + $0x60] sm:$0xff]  ;;  %v726_v6 = vld [vmem:[%s5998_s2 + $0x58] sm:$0xff]  ;;  %v725_v9 = vld [vmem:[%s5998_s2 + $0x50] sm:$0xff]  ;;  %s177_s6 = sld [smem:[#allocation3 + %s3257_s0]] }
  0x1c   : > { %2932 = vmatpush3.msra.mxu0 %v730_v0  ;;  %3171 = vmatpush3.msra.mxu1 %v730_v0  ;;  %v3271_v4 = vshrl.u32 %v195_v2, 7  ;;  %v324_v7 = vld [vmem:[%s5997_s1] sm:$0x1]  ;;  %v724_v14 = vld [vmem:[%s5998_s2 + $0x48] sm:$0xff]  ;;  %v722_v24 = vld [vmem:[%s5998_s2 + $0x38] sm:$0xff]  ;;  %s4911_s7 = sld [smem:[#allocation3 + %s3257_s0]] }
  0x1d   : > { %2933 = vmatprep.subr.mxu0 %v729_v1  ;;  %3156 = vmatprep.subr.mxu1 %v729_v1  ;;  %v723_v17 = vld [vmem:[%s5998_s2 + $0x40] sm:$0xff]  ;;  %v721_v27 = vld [vmem:[%s5998_s2 + $0x30] sm:$0xff]  ;;  %v720_v30 = vld [vmem:[%s5998_s2 + $0x28] sm:$0xff] }
  0x1e   : > { %2934 = vmatpush3.msra.mxu0 %v729_v1  ;;  %3172 = vmatpush3.msra.mxu1 %v729_v1  ;;  %v329_v8 = vsub.s32 0, %v3271_v4  ;;  %v3287_v11 = vadd.s32 16, %v3271_v4  ;;  %v3290_v13 = vadd.s32 24, %v3271_v4  ;;  %v3296_v15 = vadd.s32 8, %v3271_v4  ;;  %v719_v33 = vld [vmem:[%s5998_s2 + $0x20] sm:$0xff]  ;;  %v718_v36 = vld [vmem:[%s5998_s2 + $0x18] sm:$0xff] }
  0x1f   : > { %2935 = vmatprep.subr.mxu0 %v728_v3  ;;  %3157 = vmatprep.subr.mxu1 %v728_v3  ;;  %v3310_v18 = vadd.s32 40, %v3271_v4  ;;  %v3320_v22 = vadd.s32 32, %v3271_v4  ;;  %v3340_v28 = vadd.s32 56, %v3271_v4  ;;  %v3345_v29 = vadd.s32 48, %v3271_v4  ;;  %v717_v39 = vld [vmem:[%s5998_s2 + $0x10] sm:$0xff]  ;;  %v3398_v42 = vld [vmem:[%s5998_s2 + $0x8] sm:$0xff] }
  0x20   : > { %2936 = vmatpush3.msra.mxu0 %v728_v3  ;;  %3173 = vmatpush3.msra.mxu1 %v728_v3  ;;  %s2528_s8 = sshll.u32 %s193_s25, 10  ;;  %v3364_v34 = vadd.s32 72, %v3271_v4  ;;  %v3369_v35 = vadd.s32 64, %v3271_v4  ;;  %v3388_v40 = vadd.s32 88, %v3271_v4  ;;  %v3393_v41 = vadd.s32 80, %v3271_v4  ;;  %v3411_v45 = vld [vmem:[%s5998_s2] sm:$0xff] }
  0x21   : > { %2937 = vmatprep.subr.mxu0 %v727_v5  ;;  %3158 = vmatprep.subr.mxu1 %v727_v5  ;;  %v325_v10 = vstv %s2528_s8  ;;  %v3416_v46 = vadd.s32 104, %v3271_v4  ;;  %v3422_v47 = vadd.s32 96, %v3271_v4  ;;  %v3425_v48 = vadd.s32 512, %v3271_v4  ;;  %s2524_s8 = sshll.u32 %s177_s6, 7 }
  0x22   : > { %2938 = vmatpush3.msra.mxu0 %v727_v5  ;;  %3174 = vmatpush3.msra.mxu1 %v727_v5  ;;  %v326_v12 = vsub.s32 %v324_v7, %v325_v10  ;;  %v3441_v51 = vadd.s32 120, %v3271_v4  ;;  %v3450_v52 = vadd.s32 112, %v3271_v4  ;;  %v3469_v55 = vadd.s32 136, %v3271_v4  ;;  %p179_p8 = scmp.lt.s32.totalorder %s2524_s8, 511  ;;  %s2526_s0 = sshll.u32 %s4911_s7, 7 }
  0x23   : > { %2939 = vmatprep.subr.mxu0 %v726_v6  ;;  %3159 = vmatprep.subr.mxu1 %v726_v6  ;;  %v3482_v56 = vadd.s32 128, %v3271_v4  ;;  %v3499_v59 = vadd.s32 152, %v3271_v4  ;;  %v3502_v60 = vadd.s32 520, %v3271_v4  ;;  %v3511_v61 = vadd.s32 144, %v3271_v4  ;;  %p187_p9 = scmp.lt.s32.totalorder %s2526_s0, 511 }
  0x24   : > { %2940 = vmatpush3.msra.mxu0 %v726_v6  ;;  %3175 = vmatpush3.msra.mxu1 %v726_v6  ;;  %v3298_v16 = vrot.slane %v326_v12, %v329_v8  ;;  %v3515_v62 = vadd.s32 528, %v3271_v4  ;;  %v3526_v0 = vadd.s32 168, %v3271_v4  ;;  %v3539_v2 = vadd.s32 536, %v3271_v4  ;;  %s6387_s8 = smov (!%p179_p8, %s2524_s8), 511 }
  0x25   : > { %2941 = vmatprep.subr.mxu0 %v725_v9  ;;  %3160 = vmatprep.subr.mxu1 %v725_v9  ;;  %v3548_v3 = vadd.s32 160, %v3271_v4  ;;  %v3554_v5 = vadd.s32 544, %v3271_v4  ;;  %v3565_v7 = vadd.s32 184, %v3271_v4  ;;  %v3593_v10 = vadd.s32 176, %v3271_v4  ;;  %s2525_s9 = sshll.u32 %s6387_s8, 3  ;;  %s6389_s0 = smov (!%p187_p9, %s2526_s0), 511 }
  0x26   : > { %2942 = vmatpush3.msra.mxu0 %v725_v9  ;;  %3176 = vmatpush3.msra.mxu1 %v725_v9  ;;  %vm333_vm0 = vcmp.eq.s32.totalorder %v3287_v11, %v3298_v16  ;;  %vm331_vm1 = vcmp.eq.s32.totalorder %v3271_v4, %v3298_v16  ;;  %vm334_vm2 = vcmp.eq.s32.totalorder %v3290_v13, %v3298_v16  ;;  %v3584_v9 = vadd.s32 552, %v3271_v4  ;;  %s4967_s12 = scalar_lea.vmem %s5999_s3, %s2525_s9  ;;  %s2527_s13 = sshll.u32 %s6389_s0, 3 }
  0x27   : > { %2943 = vmatprep.subr.mxu0 %v724_v14  ;;  %v2531_v20 = vsel %vm333_vm0, 1.0, %v6046_v19  ;;  %v2529_v21 = vsel %vm331_vm1, 1.0, %v6046_v19  ;;  %vm332_vm3 = vcmp.eq.s32.totalorder %v3296_v15, %v3298_v16  ;;  %2963 = vmatprep.mubr.msk.f32.mxu0 %vm331_vm1, %v3222_v23  ;;  %v2532_v25 = vsel %vm334_vm2, 1.0, %v6046_v19  ;;  %s5371_s16 = scalar_lea.vmem %s6000_s4, %s2527_s13 }
  0x28   : > { %2944 = vmatpush3.msra.mxu0 %v724_v14  ;;  %1440 = vadd.xlane.f32.xlu1 %v2531_v20  ;;  %v2530_v26 = vsel %vm332_vm3, 1.0, %v6046_v19  ;;  %vm336_vm4 = vcmp.eq.s32.totalorder %v3310_v18, %v3298_v16  ;;  %vm335_vm5 = vcmp.eq.s32.totalorder %v3320_v22, %v3298_v16  ;;  %vm338_vm6 = vcmp.eq.s32.totalorder %v3340_v28, %v3298_v16 }
  0x29   : > { %1436 = vadd.xlane.f32.xlu0 %v2529_v21  ;;  %2945 = vmatprep.subr.mxu0 %v723_v17  ;;  %v2534_v31 = vsel %vm336_vm4, 1.0, %v6046_v19  ;;  %v2533_v32 = vsel %vm335_vm5, 1.0, %v6046_v19  ;;  %vm337_vm7 = vcmp.eq.s32.totalorder %v3345_v29, %v3298_v16  ;;  %v2536_v37 = vsel %vm338_vm6, 1.0, %v6046_v19 }
  0x2a   : > { %3161 = vmatprep.subr.mxu1 %v724_v14  ;;  %2946 = vmatpush3.msra.mxu0 %v723_v17  ;;  %v2535_v38 = vsel %vm337_vm7, 1.0, %v6046_v19  ;;  %vm340_vm8 = vcmp.eq.s32.totalorder %v3364_v34, %v3298_v16  ;;  %vm339_vm9 = vcmp.eq.s32.totalorder %v3369_v35, %v3298_v16  ;;  %vm342_vm10 = vcmp.eq.s32.totalorder %v3388_v40, %v3298_v16 }
  0x2b   : > { %3177 = vmatpush3.msra.mxu1 %v724_v14  ;;  %2947 = vmatprep.subr.mxu0 %v722_v24  ;;  %v2538_v43 = vsel %vm340_vm8, 1.0, %v6046_v19  ;;  %v2537_v44 = vsel %vm339_vm9, 1.0, %v6046_v19  ;;  %vm341_vm11 = vcmp.eq.s32.totalorder %v3393_v41, %v3298_v16  ;;  %v2540_v49 = vsel %vm342_vm10, 1.0, %v6046_v19 }
  0x2c   : > { %3162 = vmatprep.subr.mxu1 %v723_v17  ;;  %2948 = vmatpush3.msra.mxu0 %v722_v24  ;;  %v2539_v50 = vsel %vm341_vm11, 1.0, %v6046_v19  ;;  %vm344_vm12 = vcmp.eq.s32.totalorder %v3416_v46, %v3298_v16  ;;  %vm343_vm13 = vcmp.eq.s32.totalorder %v3422_v47, %v3298_v16  ;;  %vm6001_vm14 = vcmp.eq.s32.totalorder %v3425_v48, %v3298_v16 }
  0x2d   : > { %1442 = vadd.xlane.f32.xlu1 %v2532_v25  ;;  %1438 = vadd.xlane.f32.xlu0 %v2530_v26  ;;  %v2542_v53 = vsel %vm344_vm12, 1.0, %v6046_v19  ;;  %v2541_v54 = vsel %vm343_vm13, 1.0, %v6046_v19  ;;  %vm346_vm15 = vcmp.eq.s32.totalorder %v3441_v51, %v3298_v16  ;;  %vm348_vm1 = vcmp.eq.s32.totalorder %v3469_v55, %v3298_v16 }
  0x2e   : > { %2949 = vmatprep.subr.mxu0 %v721_v27  ;;  %3178 = vmatpush3.msra.mxu1 %v723_v17  ;;  %v2544_v57 = vsel %vm346_vm15, 1.0, %v6046_v19  ;;  %v2546_v63 = vsel %vm348_vm1, 1.0, %v6046_v19  ;;  %v3598_v11 = vadd.s32 560, %v3271_v4  ;;  %v3609_v13 = vadd.s32 200, %v3271_v4 }
  0x2f   : > { %2950 = vmatpush3.msra.mxu0 %v721_v27  ;;  %3163 = vmatprep.subr.mxu1 %v722_v24  ;;  %v3628_v15 = vadd.s32 568, %v3271_v4  ;;  %v3637_v17 = vadd.s32 192, %v3271_v4  ;;  %v3642_v18 = vadd.s32 576, %v3271_v4  ;;  %v3653_v21 = vadd.s32 216, %v3271_v4 }
  0x30   : > { %2951 = vmatprep.subr.mxu0 %v720_v30  ;;  %3179 = vmatpush3.msra.mxu1 %v722_v24  ;;  %v3672_v24 = vadd.s32 584, %v3271_v4  ;;  %v3681_v25 = vadd.s32 208, %v3271_v4  ;;  %v3686_v26 = vadd.s32 592, %v3271_v4  ;;  %v3697_v28 = vadd.s32 232, %v3271_v4 }
  0x31   : > { %2952 = vmatpush3.msra.mxu0 %v720_v30  ;;  %1446 = vadd.xlane.f32.xlu1 %v2534_v31  ;;  %v3725_v31 = vadd.s32 224, %v3271_v4  ;;  %v3741_v34 = vadd.s32 248, %v3271_v4  ;;  %v3744_v35 = vadd.s32 240, %v3271_v4  ;;  %v3787_v40 = vadd.s32 264, %v3271_v4 }
  0x32   : > { %1444 = vadd.xlane.f32.xlu0 %v2533_v32  ;;  %2953 = vmatprep.subr.mxu0 %v719_v33  ;;  %v3730_v32 = vadd.s32 608, %v3271_v4  ;;  %v3790_v41 = vadd.s32 256, %v3271_v4  ;;  %v3841_v47 = vadd.s32 280, %v3271_v4  ;;  %v3862_v51 = vadd.s32 656, %v3271_v4 }
  0x33   : > { %2954 = vmatpush3.msra.mxu0 %v719_v33  ;;  %3164 = vmatprep.subr.mxu1 %v721_v27  ;;  %v3880_v55 = vadd.s32 288, %v3271_v4 }
  0x34   : > { %2955 = vmatprep.subr.mxu0 %v718_v36  ;;  %3180 = vmatpush3.msra.mxu1 %v721_v27 }
  0x35   : > { %2956 = vmatpush3.msra.mxu0 %v718_v36  ;;  %1450 = vadd.xlane.f32.xlu1 %v2536_v37  ;;  %v3763_v37 = vadd.s32 616, %v3271_v4 }
  0x36   : > { %1448 = vadd.xlane.f32.xlu0 %v2535_v38  ;;  %2957 = vmatprep.subr.mxu0 %v717_v39  ;;  %v3774_v38 = vadd.s32 624, %v3271_v4 }
  0x37   : > { %2958 = vmatpush3.msra.mxu0 %v717_v39  ;;  %3165 = vmatprep.subr.mxu1 %v720_v30 }
  0x38   : > { %2959 = vmatprep.subr.mxu0 %v3398_v42  ;;  %3181 = vmatpush3.msra.mxu1 %v720_v30  ;;  %v3716_v30 = vadd.s32 600, %v3271_v4 }
  0x39   : > { %2960 = vmatpush3.msra.mxu0 %v3398_v42  ;;  %1454 = vadd.xlane.f32.xlu1 %v2538_v43  ;;  %v3809_v43 = vadd.s32 632, %v3271_v4 }
  0x3a   : > { %1452 = vadd.xlane.f32.xlu0 %v2537_v44  ;;  %2961 = vmatprep.subr.mxu0 %v3411_v45  ;;  %v3818_v44 = vadd.s32 640, %v3271_v4 }
  0x3b   : > { %2962 = vmatpush3.msra.mxu0 %v3411_v45  ;;  %3166 = vmatprep.subr.mxu1 %v719_v33 }
  0x3c   : > { %2964 = vmatmul.mubr.msk.f32.vlgmr.msra.gmra.mxu0 %vm332_vm3, %v3222_v23  ;;  %3182 = vmatpush3.msra.mxu1 %v719_v33  ;;  %vm350_vm3 = vcmp.eq.s32.totalorder %v3499_v59, %v3298_v16 }
  0x3d   : > { %1458 = vadd.xlane.f32.xlu1 %v2540_v49  ;;  %2966 = vmatprep.mubr.msk.f32.mxu0 %vm333_vm0, %v3222_v23  ;;  %vm345_vm0 = vcmp.eq.s32.totalorder %v3450_v52, %v3298_v16  ;;  %v2548_v6 = vsel %vm350_vm3, 1.0, %v6046_v19  ;;  %v3844_v49 = vadd.s32 272, %v3271_v4 }
  0x3e   : > { %1456 = vadd.xlane.f32.xlu0 %v2539_v50  ;;  %3167 = vmatprep.subr.mxu1 %v718_v36  ;;  %v2543_v58 = vsel %vm345_vm0, 1.0, %v6046_v19  ;;  %v3853_v50 = vadd.s32 648, %v3271_v4 }
  0x3f   : > { %3059 = vmatprep.mubr.msk.f32.mxu1 %vm6001_vm14, %v3222_v23  ;;  %3183 = vmatpush3.msra.mxu1 %v718_v36  ;;  %vm351_vm14 = vcmp.eq.s32.totalorder %v3548_v3, %v3298_v16 }
  0x40   : > { %2967 = vmatmul.mubr.msk.f32.gmra.mxu0 %vm334_vm2, %v3222_v23  ;;  %3168 = vmatprep.subr.mxu1 %v717_v39  ;;  %vm347_vm2 = vcmp.eq.s32.totalorder %v3482_v56, %v3298_v16  ;;  %v2549_v14 = vsel %vm351_vm14, 1.0, %v6046_v19  ;;  %v3897_v56 = vadd.s32 664, %v3271_v4 }
  0x41   : > { %1462 = vadd.xlane.f32.xlu1 %v2542_v53  ;;  %2969 = vmatprep.mubr.msk.f32.mxu0 %vm335_vm5, %v3222_v23  ;;  %v2545_v1 = vsel %vm347_vm2, 1.0, %v6046_v19  ;;  %vm349_vm5 = vcmp.eq.s32.totalorder %v3511_v61, %v3298_v16  ;;  %v3929_v61 = vadd.s32 312, %v3271_v4 }
  0x42   : > { %1460 = vadd.xlane.f32.xlu0 %v2541_v54  ;;  %3184 = vmatpush3.msra.mxu1 %v717_v39  ;;  %v2547_v8 = vsel %vm349_vm5, 1.0, %v6046_v19  ;;  %v3877_v54 = vadd.s32 296, %v3271_v4 }
  0x43   : > { %3169 = vmatprep.subr.mxu1 %v3398_v42 }
  0x44   : > { %2970 = vmatmul.mubr.msk.f32.gmra.mxu0 %vm336_vm4, %v3222_v23  ;;  %3185 = vmatpush3.msra.mxu1 %v3398_v42  ;;  %vm6010_vm4 = vcmp.eq.s32.totalorder %v3502_v60, %v3298_v16 }
  0x45   : > { %1466 = vadd.xlane.f32.xlu1 %v2544_v57  ;;  %2972 = vmatprep.mubr.msk.f32.mxu0 %vm337_vm7, %v3222_v23  ;;  %vm6002_vm7 = vcmp.eq.s32.totalorder %v3515_v62, %v3298_v16  ;;  %v3906_v57 = vadd.s32 672, %v3271_v4 }
  0x46   : > { %1464 = vadd.xlane.f32.xlu0 %v2543_v58  ;;  %3170 = vmatprep.subr.mxu1 %v3411_v45 }
  0x47   : > { %3186 = vmatpush3.msra.mxu1 %v3411_v45 }
  0x48   : > { %2973 = vmatmul.mubr.msk.f32.gmra.mxu0 %vm338_vm6, %v3222_v23  ;;  %3060 = vmatmul.mubr.msk.f32.vlgmr.msra.gmra.mxu1 %vm6010_vm4, %v3222_v23  ;;  %vm352_vm6 = vcmp.eq.s32.totalorder %v3526_v0, %v3298_v16  ;;  %vm6013_vm4 = vcmp.eq.s32.totalorder %v3730_v32, %v3298_v16  ;;  %v3941_v0 = vadd.s32 680, %v3271_v4 }
  0x49   : > { %1470 = vadd.xlane.f32.xlu1 %v2546_v63  ;;  %2975 = vmatprep.mubr.msk.f32.mxu0 %vm339_vm9, %v3222_v23  ;;  %vm6003_vm9 = vcmp.eq.s32.totalorder %v3539_v2, %v3298_v16  ;;  %v2550_v12 = vsel %vm352_vm6, 1.0, %v6046_v19  ;;  %v3932_v63 = vadd.s32 304, %v3271_v4 }
  0x4a   : > { %1468 = vadd.xlane.f32.xlu0 %v2545_v1  ;;  %3062 = vmatprep.mubr.msk.f32.mxu1 %vm6002_vm7, %v3222_v23  ;;  %vm6004_vm7 = vcmp.eq.s32.totalorder %v3554_v5, %v3298_v16  ;;  %v3950_v1 = vadd.s32 688, %v3271_v4 }
  0x4c   : > { %2976 = vmatmul.mubr.msk.f32.gmra.mxu0 %vm340_vm8, %v3222_v23  ;;  %3063 = vmatmul.mubr.msk.f32.gmra.mxu1 %vm6003_vm9, %v3222_v23  ;;  %vm354_vm8 = vcmp.eq.s32.totalorder %v3565_v7, %v3298_v16  ;;  %vm353_vm9 = vcmp.eq.s32.totalorder %v3593_v10, %v3298_v16  ;;  %v3965_v7 = vadd.s32 328, %v3271_v4  ;;  %v3985_v10 = vadd.s32 696, %v3271_v4 }
  0x4d   : > { %1474 = vadd.xlane.f32.xlu1 %v2548_v6  ;;  %2978 = vmatprep.mubr.msk.f32.mxu0 %vm341_vm11, %v3222_v23  ;;  %vm6005_vm11 = vcmp.eq.s32.totalorder %v3584_v9, %v3298_v16  ;;  %v2552_v20 = vsel %vm354_vm8, 1.0, %v6046_v19  ;;  %v2551_v22 = vsel %vm353_vm9, 1.0, %v6046_v19 }
  0x4e   : > { %1472 = vadd.xlane.f32.xlu0 %v2547_v8  ;;  %3065 = vmatprep.mubr.msk.f32.mxu1 %vm6004_vm7, %v3222_v23  ;;  %vm6006_vm7 = vcmp.eq.s32.totalorder %v3598_v11, %v3298_v16  ;;  %v3968_v8 = vadd.s32 320, %v3271_v4 }
  0x50   : > { %2979 = vmatmul.mubr.msk.f32.gmra.mxu0 %vm342_vm10, %v3222_v23  ;;  %3066 = vmatmul.mubr.msk.f32.gmra.mxu1 %vm6005_vm11, %v3222_v23  ;;  %vm356_vm10 = vcmp.eq.s32.totalorder %v3609_v13, %v3298_v16  ;;  %vm355_vm11 = vcmp.eq.s32.totalorder %v3637_v17, %v3298_v16  ;;  %v4017_v17 = vadd.s32 344, %v3271_v4 }
  0x51   : > { %1478 = vadd.xlane.f32.xlu1 %v2550_v12  ;;  %2981 = vmatprep.mubr.msk.f32.mxu0 %vm343_vm13, %v3222_v23  ;;  %vm6007_vm13 = vcmp.eq.s32.totalorder %v3628_v15, %v3298_v16  ;;  %v2554_v27 = vsel %vm356_vm10, 1.0, %v6046_v19  ;;  %v2553_v29 = vsel %vm355_vm11, 1.0, %v6046_v19  ;;  %v3994_v12 = vadd.s32 704, %v3271_v4 }
  0x52   : > { %1476 = vadd.xlane.f32.xlu0 %v2549_v14  ;;  %3068 = vmatprep.mubr.msk.f32.mxu1 %vm6006_vm7, %v3222_v23  ;;  %vm6008_vm7 = vcmp.eq.s32.totalorder %v3642_v18, %v3298_v16 }
  0x54   : > { %2982 = vmatmul.mubr.msk.f32.gmra.mxu0 %vm344_vm12, %v3222_v23  ;;  %3069 = vmatmul.mubr.msk.f32.gmra.mxu1 %vm6007_vm13, %v3222_v23  ;;  %vm358_vm12 = vcmp.eq.s32.totalorder %v3653_v21, %v3298_v16  ;;  %vm357_vm13 = vcmp.eq.s32.totalorder %v3681_v25, %v3298_v16  ;;  %v4029_v21 = vadd.s32 712, %v3271_v4 }
  0x55   : > { %1482 = vadd.xlane.f32.xlu1 %v2552_v20  ;;  %2984 = vmatprep.mubr.msk.f32.mxu0 %vm345_vm0, %v3222_v23  ;;  %vm6009_vm0 = vcmp.eq.s32.totalorder %v3672_v24, %v3298_v16  ;;  %v2556_v33 = vsel %vm358_vm12, 1.0, %v6046_v19  ;;  %v2555_v36 = vsel %vm357_vm13, 1.0, %v6046_v19  ;;  %v4020_v20 = vadd.s32 336, %v3271_v4 }
  0x56   : > { %1480 = vadd.xlane.f32.xlu0 %v2551_v22  ;;  %3071 = vmatprep.mubr.msk.f32.mxu1 %vm6008_vm7, %v3222_v23  ;;  %vm6011_vm7 = vcmp.eq.s32.totalorder %v3686_v26, %v3298_v16  ;;  %v4038_v22 = vadd.s32 720, %v3271_v4 }
  0x58   : > { %2985 = vmatmul.mubr.msk.f32.gmra.mxu0 %vm346_vm15, %v3222_v23  ;;  %3072 = vmatmul.mubr.msk.f32.gmra.mxu1 %vm6009_vm0, %v3222_v23  ;;  %vm360_vm15 = vcmp.eq.s32.totalorder %v3697_v28, %v3298_v16  ;;  %vm359_vm0 = vcmp.eq.s32.totalorder %v3725_v31, %v3298_v16  ;;  %v4053_v28 = vadd.s32 360, %v3271_v4  ;;  %v4073_v31 = vadd.s32 728, %v3271_v4 }
  0x59   : > { %1486 = vadd.xlane.f32.xlu1 %v2554_v27  ;;  %2987 = vmatprep.mubr.msk.f32.mxu0 %vm347_vm2, %v3222_v23  ;;  %vm6012_vm2 = vcmp.eq.s32.totalorder %v3716_v30, %v3298_v16  ;;  %v2558_v39 = vsel %vm360_vm15, 1.0, %v6046_v19  ;;  %v2557_v42 = vsel %vm359_vm0, 1.0, %v6046_v19 }
  0x5a   : > { %1484 = vadd.xlane.f32.xlu0 %v2553_v29  ;;  %3074 = vmatprep.mubr.msk.f32.mxu1 %vm6011_vm7, %v3222_v23  ;;  %vm6014_vm7 = vcmp.eq.s32.totalorder %v3763_v37, %v3298_v16  ;;  %v4056_v29 = vadd.s32 352, %v3271_v4 }
  0x5c   : > { %2988 = vmatmul.mubr.msk.f32.gmra.mxu0 %vm348_vm1, %v3222_v23  ;;  %vm362_vm1 = vcmp.eq.s32.totalorder %v3741_v34, %v3298_v16  ;;  %3075 = vmatmul.mubr.msk.f32.gmra.mxu1 %vm6012_vm2, %v3222_v23  ;;  %vm6015_vm2 = vcmp.eq.s32.totalorder %v3774_v38, %v3298_v16 }
  0x5d   : > { %1490 = vadd.xlane.f32.xlu1 %v2556_v33  ;;  %2990 = vmatprep.mubr.msk.f32.mxu0 %vm349_vm5, %v3222_v23  ;;  %vm361_vm5 = vcmp.eq.s32.totalorder %v3744_v35, %v3298_v16  ;;  %v2560_v45 = vsel %vm362_vm1, 1.0, %v6046_v19  ;;  %v4082_v33 = vadd.s32 736, %v3271_v4 }
  0x5e   : > { %1488 = vadd.xlane.f32.xlu0 %v2555_v36  ;;  %3077 = vmatprep.mubr.msk.f32.mxu1 %vm6013_vm4, %v3222_v23  ;;  %v2559_v46 = vsel %vm361_vm5, 1.0, %v6046_v19  ;;  %vm363_vm4 = vcmp.eq.s32.totalorder %v3790_v41, %v3298_v16  ;;  %v4105_v36 = vadd.s32 376, %v3271_v4  ;;  %v4117_v41 = vadd.s32 744, %v3271_v4 }
  0x5f   : > { %v2561_v53 = vsel %vm363_vm4, 1.0, %v6046_v19 }
  0x60   : > { %2991 = vmatmul.mubr.msk.f32.gmra.mxu0 %vm350_vm3, %v3222_v23  ;;  %vm364_vm3 = vcmp.eq.s32.totalorder %v3787_v40, %v3298_v16  ;;  %3078 = vmatmul.mubr.msk.f32.gmra.mxu1 %vm6014_vm7, %v3222_v23  ;;  %vm6017_vm7 = vcmp.eq.s32.totalorder %v3818_v44, %v3298_v16 }
  0x61   : > { %1494 = vadd.xlane.f32.xlu1 %v2558_v39  ;;  %2993 = vmatprep.mubr.msk.f32.mxu0 %vm351_vm14, %v3222_v23  ;;  %vm6016_vm14 = vcmp.eq.s32.totalorder %v3809_v43, %v3298_v16  ;;  %v2562_v52 = vsel %vm364_vm3, 1.0, %v6046_v19  ;;  %v4108_v39 = vadd.s32 368, %v3271_v4 }
  0x62   : > { %1492 = vadd.xlane.f32.xlu0 %v2557_v42  ;;  %3080 = vmatprep.mubr.msk.f32.mxu1 %vm6015_vm2, %v3222_v23  ;;  %vm6018_vm2 = vcmp.eq.s32.totalorder %v3853_v50, %v3298_v16  ;;  %v4126_v42 = vadd.s32 752, %v3271_v4 }
  0x64   : > { %2994 = vmatmul.mubr.msk.f32.gmra.mxu0 %vm352_vm6, %v3222_v23  ;;  %3081 = vmatmul.mubr.msk.f32.gmra.mxu1 %vm6016_vm14, %v3222_v23  ;;  %vm366_vm6 = vcmp.eq.s32.totalorder %v3841_v47, %v3298_v16  ;;  %vm6019_vm14 = vcmp.eq.s32.totalorder %v3862_v51, %v3298_v16 }
  0x65   : > { %1498 = vadd.xlane.f32.xlu1 %v2560_v45  ;;  %2996 = vmatprep.mubr.msk.f32.mxu0 %vm353_vm9, %v3222_v23  ;;  %vm365_vm9 = vcmp.eq.s32.totalorder %v3844_v49, %v3298_v16  ;;  %v2564_v58 = vsel %vm366_vm6, 1.0, %v6046_v19  ;;  %v4161_v49 = vadd.s32 760, %v3271_v4 }
  0x66   : > { %1496 = vadd.xlane.f32.xlu0 %v2559_v46  ;;  %3083 = vmatprep.mubr.msk.f32.mxu1 %vm6017_vm7, %v3222_v23  ;;  %v2563_v59 = vsel %vm365_vm9, 1.0, %v6046_v19  ;;  %vm367_vm7 = vcmp.eq.s32.totalorder %v3880_v55, %v3298_v16  ;;  %v4141_v46 = vadd.s32 392, %v3271_v4  ;;  %v4193_v55 = vadd.s32 408, %v3271_v4 }
  0x67   : > { %v2565_v6 = vsel %vm367_vm7, 1.0, %v6046_v19 }
  0x68   : > { %2997 = vmatmul.mubr.msk.f32.gmra.mxu0 %vm354_vm8, %v3222_v23  ;;  %vm368_vm8 = vcmp.eq.s32.totalorder %v3877_v54, %v3298_v16  ;;  %3084 = vmatmul.mubr.msk.f32.gmra.mxu1 %vm6018_vm2, %v3222_v23  ;;  %vm6021_vm2 = vcmp.eq.s32.totalorder %v3906_v57, %v3298_v16 }
  0x69   : > { %1502 = vadd.xlane.f32.xlu1 %v2562_v52  ;;  %2999 = vmatprep.mubr.msk.f32.mxu0 %vm355_vm11, %v3222_v23  ;;  %vm6020_vm11 = vcmp.eq.s32.totalorder %v3897_v56, %v3298_v16  ;;  %v2566_v3 = vsel %vm368_vm8, 1.0, %v6046_v19  ;;  %v4144_v52 = vadd.s32 384, %v3271_v4 }
  0x6a   : > { %1500 = vadd.xlane.f32.xlu0 %v2561_v53  ;;  %3086 = vmatprep.mubr.msk.f32.mxu1 %vm6019_vm14, %v3222_v23  ;;  %vm6022_vm14 = vcmp.eq.s32.totalorder %v3941_v0, %v3298_v16  ;;  %v4170_v53 = vadd.s32 768, %v3271_v4 }
  0x6c   : > { %3000 = vmatmul.mubr.msk.f32.gmra.mxu0 %vm356_vm10, %v3222_v23  ;;  %3087 = vmatmul.mubr.msk.f32.gmra.mxu1 %vm6020_vm11, %v3222_v23  ;;  %vm370_vm10 = vcmp.eq.s32.totalorder %v3929_v61, %v3298_v16  ;;  %vm6023_vm11 = vcmp.eq.s32.totalorder %v3950_v1, %v3298_v16 }
  0x6d   : > { %1506 = vadd.xlane.f32.xlu1 %v2564_v58  ;;  %3002 = vmatprep.mubr.msk.f32.mxu0 %vm357_vm13, %v3222_v23  ;;  %vm369_vm13 = vcmp.eq.s32.totalorder %v3932_v63, %v3298_v16  ;;  %v2568_v13 = vsel %vm370_vm10, 1.0, %v6046_v19  ;;  %v4249_v63 = vadd.s32 792, %v3271_v4 }
  0x6e   : > { %1504 = vadd.xlane.f32.xlu0 %v2563_v59  ;;  %3089 = vmatprep.mubr.msk.f32.mxu1 %vm6021_vm2, %v3222_v23  ;;  %v2567_v14 = vsel %vm369_vm13, 1.0, %v6046_v19  ;;  %vm371_vm2 = vcmp.eq.s32.totalorder %v3968_v8, %v3298_v16  ;;  %v4196_v59 = vadd.s32 400, %v3271_v4  ;;  %v4281_v8 = vadd.s32 440, %v3271_v4 }
  0x6f   : > { %v2569_v27 = vsel %vm371_vm2, 1.0, %v6046_v19 }
  0x70   : > { %3003 = vmatmul.mubr.msk.f32.gmra.mxu0 %vm358_vm12, %v3222_v23  ;;  %vm372_vm12 = vcmp.eq.s32.totalorder %v3965_v7, %v3298_v16  ;;  %3090 = vmatmul.mubr.msk.f32.gmra.mxu1 %vm6022_vm14, %v3222_v23  ;;  %vm6025_vm14 = vcmp.eq.s32.totalorder %v3994_v12, %v3298_v16 }
  0x71   : > { %1510 = vadd.xlane.f32.xlu1 %v2566_v3  ;;  %3005 = vmatprep.mubr.msk.f32.mxu0 %vm359_vm0, %v3222_v23  ;;  %vm6024_vm0 = vcmp.eq.s32.totalorder %v3985_v10, %v3298_v16  ;;  %v2570_v25 = vsel %vm372_vm12, 1.0, %v6046_v19  ;;  %v4205_v3 = vadd.s32 776, %v3271_v4 }
  0x72   : > { %1508 = vadd.xlane.f32.xlu0 %v2565_v6  ;;  %3092 = vmatprep.mubr.msk.f32.mxu1 %vm6023_vm11, %v3222_v23  ;;  %vm6026_vm11 = vcmp.eq.s32.totalorder %v4029_v21, %v3298_v16  ;;  %v4214_v6 = vadd.s32 784, %v3271_v4 }
  0x74   : > { %3006 = vmatmul.mubr.msk.f32.gmra.mxu0 %vm360_vm15, %v3222_v23  ;;  %3093 = vmatmul.mubr.msk.f32.gmra.mxu1 %vm6024_vm0, %v3222_v23  ;;  %vm374_vm15 = vcmp.eq.s32.totalorder %v4017_v17, %v3298_v16  ;;  %vm6027_vm0 = vcmp.eq.s32.totalorder %v4038_v22, %v3298_v16 }
  0x75   : > { %1514 = vadd.xlane.f32.xlu1 %v2568_v13  ;;  %3008 = vmatprep.mubr.msk.f32.mxu0 %vm361_vm5, %v3222_v23  ;;  %vm373_vm5 = vcmp.eq.s32.totalorder %v4020_v20, %v3298_v16  ;;  %v2572_v35 = vsel %vm374_vm15, 1.0, %v6046_v19  ;;  %v4337_v20 = vadd.s32 824, %v3271_v4 }
  0x76   : > { %1512 = vadd.xlane.f32.xlu0 %v2567_v14  ;;  %3095 = vmatprep.mubr.msk.f32.mxu1 %vm6025_vm14, %v3222_v23  ;;  %v2571_v34 = vsel %vm373_vm5, 1.0, %v6046_v19  ;;  %vm375_vm14 = vcmp.eq.s32.totalorder %v4056_v29, %v3298_v16  ;;  %v4229_v14 = vadd.s32 424, %v3271_v4  ;;  %v4369_v29 = vadd.s32 472, %v3271_v4 }
  0x77   : > { %v2573_v40 = vsel %vm375_vm14, 1.0, %v6046_v19 }
  0x78   : > { %3009 = vmatmul.mubr.msk.f32.gmra.mxu0 %vm362_vm1, %v3222_v23  ;;  %vm376_vm1 = vcmp.eq.s32.totalorder %v4053_v28, %v3298_v16  ;;  %3096 = vmatmul.mubr.msk.f32.gmra.mxu1 %vm6026_vm11, %v3222_v23  ;;  %vm6029_vm11 = vcmp.eq.s32.totalorder %v4082_v33, %v3298_v16 }
  0x79   : > { %1518 = vadd.xlane.f32.xlu1 %v2570_v25  ;;  %3011 = vmatprep.mubr.msk.f32.mxu0 %vm363_vm4, %v3222_v23  ;;  %vm6028_vm4 = vcmp.eq.s32.totalorder %v4073_v31, %v3298_v16  ;;  %v2574_v45 = vsel %vm376_vm1, 1.0, %v6046_v19  ;;  %v4232_v25 = vadd.s32 416, %v3271_v4 }
  0x7a   : > { %1516 = vadd.xlane.f32.xlu0 %v2569_v27  ;;  %3098 = vmatprep.mubr.msk.f32.mxu1 %vm6027_vm0, %v3222_v23  ;;  %vm6030_vm0 = vcmp.eq.s32.totalorder %v4117_v41, %v3298_v16  ;;  %v4258_v27 = vadd.s32 800, %v3271_v4 }
  0x7c   : > { %3012 = vmatmul.mubr.msk.f32.gmra.mxu0 %vm364_vm3, %v3222_v23  ;;  %3099 = vmatmul.mubr.msk.f32.gmra.mxu1 %vm6028_vm4, %v3222_v23  ;;  %vm378_vm3 = vcmp.eq.s32.totalorder %v4105_v36, %v3298_v16  ;;  %vm6031_vm4 = vcmp.eq.s32.totalorder %v4126_v42, %v3298_v16  ;;  %6062 = vst [vmem:[#allocation5_spill] sm:$0xff] %v4258_v27 }
  0x7d   : > { %1522 = vadd.xlane.f32.xlu1 %v2572_v35  ;;  %3014 = vmatprep.mubr.msk.f32.mxu0 %vm365_vm9, %v3222_v23  ;;  %vm377_vm9 = vcmp.eq.s32.totalorder %v4108_v39, %v3298_v16  ;;  %v2576_v58 = vsel %vm378_vm3, 1.0, %v6046_v19  ;;  %v4422_v39 = vadd.s32 856, %v3271_v4 }
  0x7e   : > { %1520 = vadd.xlane.f32.xlu0 %v2571_v34  ;;  %3101 = vmatprep.mubr.msk.f32.mxu1 %vm6029_vm11, %v3222_v23  ;;  %v2575_v47 = vsel %vm377_vm9, 1.0, %v6046_v19  ;;  %vm379_vm11 = vcmp.eq.s32.totalorder %v4144_v52, %v3298_v16  ;;  %v4284_v34 = vadd.s32 432, %v3271_v4  ;;  %v4455_v52 = vadd.s32 504, %v3271_v4 }
  0x7f   : > { %v2577_v54 = vsel %vm379_vm11, 1.0, %v6046_v19 }
  0x80   : > { %3015 = vmatmul.mubr.msk.f32.gmra.mxu0 %vm366_vm6, %v3222_v23  ;;  %vm380_vm6 = vcmp.eq.s32.totalorder %v4141_v46, %v3298_v16  ;;  %3102 = vmatmul.mubr.msk.f32.gmra.mxu1 %vm6030_vm0, %v3222_v23  ;;  %vm6033_vm0 = vcmp.eq.s32.totalorder %v4170_v53, %v3298_v16  ;;  %v6067_v46 = vmov 0.0  }
  0x81   : > { %1526 = vadd.xlane.f32.xlu1 %v2574_v45  ;;  %3017 = vmatprep.mubr.msk.f32.mxu0 %vm367_vm7, %v3222_v23  ;;  %vm6032_vm7 = vcmp.eq.s32.totalorder %v4161_v49, %v3298_v16  ;;  %v2578_v13 = vsel %vm380_vm6, 1.0, %v6046_v19  ;;  %v4293_v45 = vadd.s32 808, %v3271_v4 }
  0x82   : > { %1524 = vadd.xlane.f32.xlu0 %v2573_v40  ;;  %3104 = vmatprep.mubr.msk.f32.mxu1 %vm6031_vm4, %v3222_v23  ;;  %vm6034_vm4 = vcmp.eq.s32.totalorder %v4205_v3, %v3298_v16  ;;  %v4302_v40 = vadd.s32 816, %v3271_v4 }
  0x84   : > { %3018 = vmatmul.mubr.msk.f32.gmra.mxu0 %vm368_vm8, %v3222_v23  ;;  %3105 = vmatmul.mubr.msk.f32.gmra.mxu1 %vm6032_vm7, %v3222_v23  ;;  %vm382_vm8 = vcmp.eq.s32.totalorder %v4193_v55, %v3298_v16  ;;  %vm6035_vm7 = vcmp.eq.s32.totalorder %v4214_v6, %v3298_v16  ;;  %6063 = vst [vmem:[#allocation6_spill] sm:$0xff] %v4302_v40 }
  0x85   : > { %1530 = vadd.xlane.f32.xlu1 %v2576_v58  ;;  %3020 = vmatprep.mubr.msk.f32.mxu0 %vm369_vm13, %v3222_v23  ;;  %vm381_vm13 = vcmp.eq.s32.totalorder %v4196_v59, %v3298_v16  ;;  %v2580_v35 = vsel %vm382_vm8, 1.0, %v6046_v19  ;;  %v4505_v59 = vadd.s32 888, %v3271_v4 }
  0x86   : > { %1528 = vadd.xlane.f32.xlu0 %v2575_v47  ;;  %3107 = vmatprep.mubr.msk.f32.mxu1 %vm6033_vm0, %v3222_v23  ;;  %v2579_v61 = vsel %vm381_vm13, 1.0, %v6046_v19  ;;  %vm383_vm0 = vcmp.eq.s32.totalorder %v4232_v25, %v3298_v16  ;;  %v4317_v47 = vadd.s32 456, %v3271_v4  ;;  %v4541_v25 = vadd.s32 904, %v3271_v4 }
  0x87   : > { %v2581_v7 = vsel %vm383_vm0, 1.0, %v6046_v19 }
  0x88   : > { %3021 = vmatmul.mubr.msk.f32.gmra.mxu0 %vm370_vm10, %v3222_v23  ;;  %vm384_vm10 = vcmp.eq.s32.totalorder %v4229_v14, %v3298_v16  ;;  %3108 = vmatmul.mubr.msk.f32.gmra.mxu1 %vm6034_vm4, %v3222_v23  ;;  %vm6037_vm4 = vcmp.eq.s32.totalorder %v4258_v27, %v3298_v16  ;;  %v4405_v27 = vadd.s32 488, %v3271_v4 }
  0x89   : > { %1534 = vadd.xlane.f32.xlu1 %v2578_v13  ;;  %3023 = vmatprep.mubr.msk.f32.mxu0 %vm371_vm2, %v3222_v23  ;;  %vm6036_vm2 = vcmp.eq.s32.totalorder %v4249_v63, %v3298_v16  ;;  %v2582_v58 = vsel %vm384_vm10, 1.0, %v6046_v19  ;;  %v4320_v13 = vadd.s32 448, %v3271_v4 }
  0x8a   : > { %1532 = vadd.xlane.f32.xlu0 %v2577_v54  ;;  %3110 = vmatprep.mubr.msk.f32.mxu1 %vm6035_vm7, %v3222_v23  ;;  %vm6038_vm7 = vcmp.eq.s32.totalorder %v4293_v45, %v3298_v16  ;;  %v4346_v54 = vadd.s32 832, %v3271_v4 }
  0x8c   : > { %3024 = vmatmul.mubr.msk.f32.gmra.mxu0 %vm372_vm12, %v3222_v23  ;;  %3111 = vmatmul.mubr.msk.f32.gmra.mxu1 %vm6036_vm2, %v3222_v23  ;;  %vm386_vm12 = vcmp.eq.s32.totalorder %v4281_v8, %v3298_v16  ;;  %vm6041_vm2 = vcmp.eq.s32.totalorder %v4302_v40, %v3298_v16  ;;  %6064 = vst [vmem:[#allocation7_spill] sm:$0xff] %v4346_v54 }
  0x8d   : > { %1538 = vadd.xlane.f32.xlu1 %v2580_v35  ;;  %3026 = vmatprep.mubr.msk.f32.mxu0 %vm373_vm5, %v3222_v23  ;;  %vm385_vm5 = vcmp.eq.s32.totalorder %v4284_v34, %v3298_v16  ;;  %v2584_v35 = vsel %vm386_vm12, 1.0, %v6046_v19 }
  0x8e   : > { %1536 = vadd.xlane.f32.xlu0 %v2579_v61  ;;  %3113 = vmatprep.mubr.msk.f32.mxu1 %vm6037_vm4, %v3222_v23  ;;  %v2583_v17 = vsel %vm385_vm5, 1.0, %v6046_v19  ;;  %vm387_vm4 = vcmp.eq.s32.totalorder %v4320_v13, %v3298_v16  ;;  %v4372_v61 = vadd.s32 464, %v3271_v4 }
  0x8f   : > { %v2585_v28 = vsel %vm387_vm4, 1.0, %v6046_v19 }
  0x90   : > { %3027 = vmatmul.mubr.msk.f32.gmra.mxu0 %vm374_vm15, %v3222_v23  ;;  %vm388_vm15 = vcmp.eq.s32.totalorder %v4317_v47, %v3298_v16  ;;  %3114 = vmatmul.mubr.msk.f32.gmra.mxu1 %vm6038_vm7, %v3222_v23  ;;  %vm6044_vm7 = vcmp.eq.s32.totalorder %v4346_v54, %v3298_v16 }
  0x91   : > { %1542 = vadd.xlane.f32.xlu1 %v2582_v58  ;;  %3029 = vmatprep.mubr.msk.f32.mxu0 %vm375_vm14, %v3222_v23  ;;  %vm6042_vm14 = vcmp.eq.s32.totalorder %v4337_v20, %v3298_v16  ;;  %v4381_v58 = vadd.s32 840, %v3271_v4  ;;  %v2586_v40 = vsel %vm388_vm15, 1.0, %v6046_v19 }
  0x92   : > { %1540 = vadd.xlane.f32.xlu0 %v2581_v7  ;;  %3116 = vmatprep.mubr.msk.f32.mxu1 %vm6041_vm2, %v3222_v23  ;;  %v4390_v7 = vadd.s32 848, %v3271_v4 }
  0x93   : > { %vm6050_vm2 = vcmp.eq.s32.totalorder %v4381_v58, %v3298_v16 }
  0x94   : > { %3030 = vmatmul.mubr.msk.f32.gmra.mxu0 %vm376_vm1, %v3222_v23  ;;  %6065 = vst [vmem:[#allocation8_spill] sm:$0xff] %v4390_v7  ;;  %3117 = vmatmul.mubr.msk.f32.gmra.mxu1 %vm6042_vm14, %v3222_v23  ;;  %vm390_vm1 = vcmp.eq.s32.totalorder %v4369_v29, %v3298_v16  ;;  %vm6045_vm14 = vcmp.eq.s32.totalorder %v4390_v7, %v3298_v16 }
  0x95   : > { %1546 = vadd.xlane.f32.xlu1 %v2584_v35  ;;  %3032 = vmatprep.mubr.msk.f32.mxu0 %vm377_vm9, %v3222_v23  ;;  %vm389_vm9 = vcmp.eq.s32.totalorder %v4372_v61, %v3298_v16  ;;  %v4429_v35 = vadd.s32 480, %v3271_v4  ;;  %v2588_v36 = vsel %vm390_vm1, 1.0, %v6046_v19 }
  0x96   : > { %1544 = vadd.xlane.f32.xlu0 %v2583_v17  ;;  %3119 = vmatprep.mubr.msk.f32.mxu1 %vm6044_vm7, %v3222_v23  ;;  %v4434_v17 = vadd.s32 864, %v3271_v4  ;;  %v2587_v54 = vsel %vm389_vm9, 1.0, %v6046_v19  ;;  %v4478_v19 = vadd.s32 880, %v3271_v4 }
  0x97   : > { %vm391_vm7 = vcmp.eq.s32.totalorder %v4429_v35, %v3298_v16 }
  0x98   : > { %3033 = vmatmul.mubr.msk.f32.gmra.mxu0 %vm378_vm3, %v3222_v23  ;;  %3120 = vmatmul.mubr.msk.f32.gmra.mxu1 %vm6050_vm2, %v3222_v23  ;;  %vm392_vm3 = vcmp.eq.s32.totalorder %v4405_v27, %v3298_v16  ;;  %6066 = vst [vmem:[#allocation9_spill] sm:$0xff] %v4478_v19  ;;  %vm6051_vm2 = vcmp.eq.s32.totalorder %v4478_v19, %v3298_v16 }
  0x99   : > { %1550 = vadd.xlane.f32.xlu1 %v2586_v40  ;;  %3035 = vmatprep.mubr.msk.f32.mxu0 %vm379_vm11, %v3222_v23  ;;  %vm6049_vm11 = vcmp.eq.s32.totalorder %v4422_v39, %v3298_v16  ;;  %v4464_v40 = vadd.s32 872, %v3271_v4  ;;  %v2590_v7 = vsel %vm392_vm3, 1.0, %v6067_v46 }
  0x9a   : > { %1548 = vadd.xlane.f32.xlu0 %v2585_v28  ;;  %3122 = vmatprep.mubr.msk.f32.mxu1 %vm6045_vm14, %v3222_v23  ;;  %v4473_v28 = vadd.s32 496, %v3271_v4  ;;  %vm439_vm14 = vcmp.eq.s32.totalorder %v4434_v17, %v3298_v16 }
  0x9c   : > { %3036 = vmatmul.mubr.msk.f32.gmra.mxu0 %vm380_vm6, %v3222_v23  ;;  %3123 = vmatmul.mubr.msk.f32.gmra.mxu1 %vm6049_vm11, %v3222_v23  ;;  %vm394_vm6 = vcmp.eq.s32.totalorder %v4455_v52, %v3298_v16  ;;  %vm393_vm11 = vcmp.eq.s32.totalorder %v4473_v28, %v3298_v16 }
  0x9d   : > { %1554 = vadd.xlane.f32.xlu1 %v2588_v36  ;;  %3038 = vmatprep.mubr.msk.f32.mxu0 %vm381_vm13, %v3222_v23  ;;  %v2589_v36 = vsel %vm391_vm7, 1.0, %v6067_v46  ;;  %vm440_vm13 = vcmp.eq.s32.totalorder %v4464_v40, %v3298_v16  ;;  %v2592_v55 = vsel %vm394_vm6, 1.0, %v6067_v46 }
  0x9e   : > { %1552 = vadd.xlane.f32.xlu0 %v2587_v54  ;;  %3125 = vmatprep.mubr.msk.f32.mxu1 %vm439_vm14, %v3222_v23  ;;  %v4516_v54 = vadd.s32 896, %v3271_v4 }
  0xa0   : > { %3039 = vmatmul.mubr.msk.f32.gmra.mxu0 %vm382_vm8, %v3222_v23  ;;  %3126 = vmatmul.mubr.msk.f32.gmra.mxu1 %vm440_vm13, %v3222_v23  ;;  %vm443_vm8 = vcmp.eq.s32.totalorder %v4516_v54, %v3298_v16 }
  0xa1   : > { %1558 = vadd.xlane.f32.xlu1 %v2590_v7  ;;  %3041 = vmatprep.mubr.msk.f32.mxu0 %vm383_vm0, %v3222_v23  ;;  %v2591_v7 = vsel %vm393_vm11, 1.0, %v6067_v46  ;;  %vm442_vm0 = vcmp.eq.s32.totalorder %v4505_v59, %v3298_v16 }
  0xa2   : > { %1556 = vadd.xlane.f32.xlu0 %v2589_v36  ;;  %3128 = vmatprep.mubr.msk.f32.mxu1 %vm6051_vm2, %v3222_v23  ;;  %v4550_v36 = vadd.s32 912, %v3271_v4  ;;  %vm6068_vm2 = vcmp.eq.s32.totalorder %v3502_v60, %v3298_v16  ;;  %v4575_v60 = vadd.s32 920, %v3271_v4  ;;  %v2640_v17 = vsel %vm442_vm0, 1.0, %v6067_v46 }
  0xa3   : > { %v2594_v19 = vsel %vm6068_vm2, 1.0, %v6067_v46 }
  0xa4   : > { %3042 = vmatmul.mubr.msk.f32.gmra.mxu0 %vm384_vm10, %v3222_v23  ;;  %3129 = vmatmul.mubr.msk.f32.gmra.mxu1 %vm442_vm0, %v3222_v23  ;;  %vm6069_vm10 = vcmp.eq.s32.totalorder %v3425_v48, %v3298_v16  ;;  %vm445_vm2 = vcmp.eq.s32.totalorder %v4550_v36, %v3298_v16  ;;  %v4584_v48 = vadd.s32 928, %v3271_v4 }
  0xa5   : > { %1562 = vadd.xlane.f32.xlu1 %v2592_v55  ;;  %3044 = vmatprep.mubr.msk.f32.mxu0 %vm385_vm5, %v3222_v23  ;;  %v2593_v14 = vsel %vm6069_vm10, 1.0, %v6067_v46  ;;  %vm444_vm5 = vcmp.eq.s32.totalorder %v4541_v25, %v3298_v16  ;;  %vm6070_vm10 = vcmp.eq.s32.totalorder %v3539_v2, %v3298_v16  ;;  %v4609_v2 = vadd.s32 936, %v3271_v4 }
  0xa6   : > { %1560 = vadd.xlane.f32.xlu0 %v2591_v7  ;;  %3131 = vmatprep.mubr.msk.f32.mxu1 %vm443_vm8, %v3222_v23  ;;  %v2596_v34 = vsel %vm6070_vm10, 1.0, %v6067_v46  ;;  %vm447_vm10 = vcmp.eq.s32.totalorder %v4584_v48, %v3298_v16 }
  0xa8   : > { %3045 = vmatmul.mubr.msk.f32.gmra.mxu0 %vm386_vm12, %v3222_v23  ;;  %3132 = vmatmul.mubr.msk.f32.gmra.mxu1 %vm444_vm5, %v3222_v23  ;;  %vm6071_vm12 = vcmp.eq.s32.totalorder %v3515_v62, %v3298_v16  ;;  %v4618_v62 = vadd.s32 944, %v3271_v4 }
  0xa9   : > { %1566 = vadd.xlane.f32.xlu1 %v2594_v19  ;;  %3047 = vmatprep.mubr.msk.f32.mxu0 %vm387_vm4, %v3222_v23  ;;  %v2595_v19 = vsel %vm6071_vm12, 1.0, %v6067_v46  ;;  %vm446_vm4 = vcmp.eq.s32.totalorder %v4575_v60, %v3298_v16  ;;  %vm6072_vm12 = vcmp.eq.s32.totalorder %v3584_v9, %v3298_v16  ;;  %v4643_v9 = vadd.s32 952, %v3271_v4 }
  0xaa   : > { %1564 = vadd.xlane.f32.xlu0 %v2593_v14  ;;  %3134 = vmatprep.mubr.msk.f32.mxu1 %vm445_vm2, %v3222_v23  ;;  %v2598_v8 = vsel %vm6072_vm12, 1.0, %v6067_v46  ;;  %vm449_vm12 = vcmp.eq.s32.totalorder %v4618_v62, %v3298_v16  ;;  %v2644_v54 = vsel %vm446_vm4, 1.0, %v6067_v46 }
  0xac   : > { %3048 = vmatmul.mubr.msk.f32.gmra.mxu0 %vm388_vm15, %v3222_v23  ;;  %3135 = vmatmul.mubr.msk.f32.gmra.mxu1 %vm446_vm4, %v3222_v23  ;;  %vm6073_vm15 = vcmp.eq.s32.totalorder %v3554_v5, %v3298_v16  ;;  %v4652_v5 = vadd.s32 960, %v3271_v4 }
  0xad   : > { %1570 = vadd.xlane.f32.xlu1 %v2596_v34  ;;  %3050 = vmatprep.mubr.msk.f32.mxu0 %vm389_vm9, %v3222_v23  ;;  %v2597_v47 = vsel %vm6073_vm15, 1.0, %v6067_v46  ;;  %vm448_vm9 = vcmp.eq.s32.totalorder %v4609_v2, %v3298_v16  ;;  %vm6075_vm15 = vcmp.eq.s32.totalorder %v3598_v11, %v3298_v16  ;;  %v4690_v11 = vadd.s32 976, %v3271_v4 }
  0xae   : > { %1568 = vadd.xlane.f32.xlu0 %v2595_v19  ;;  %3137 = vmatprep.mubr.msk.f32.mxu1 %vm447_vm10, %v3222_v23  ;;  %v2599_v35 = vsel %vm6075_vm15, 1.0, %v6067_v46  ;;  %vm6076_vm15 = vcmp.eq.s32.totalorder %v3672_v24, %v3298_v16  ;;  %v4719_v24 = vadd.s32 984, %v3271_v4  ;;  %v2646_v36 = vsel %vm448_vm9, 1.0, %v6067_v46 }
  0xaf   : > { %v2602_v27 = vsel %vm6076_vm15, 1.0, %v6067_v46  ;;  %vm6054_vm15 = vcmp.eq.s32.totalorder %v4690_v11, %v3298_v16 }
  0xb0   : > { %3051 = vmatmul.mubr.msk.f32.gmra.mxu0 %vm390_vm1, %v3222_v23  ;;  %vm6074_vm1 = vcmp.eq.s32.totalorder %v3628_v15, %v3298_v16  ;;  %3138 = vmatmul.mubr.msk.f32.gmra.mxu1 %vm448_vm9, %v3222_v23  ;;  %v4681_v15 = vadd.s32 968, %v3271_v4 }
  0xb1   : > { %1574 = vadd.xlane.f32.xlu1 %v2598_v8  ;;  %3053 = vmatprep.mubr.msk.f32.mxu0 %vm391_vm7, %v3222_v23  ;;  %v4658_v13 = vpop.xlane.xlu1 %1440  ;;  %v2600_v29 = vsel %vm6074_vm1, 1.0, %v6067_v46  ;;  %vm450_vm7 = vcmp.eq.s32.totalorder %v4643_v9, %v3298_v16  ;;  %vm6053_vm1 = vcmp.eq.s32.totalorder %v4652_v5, %v3298_v16  ;;  %v4758_v8 = vadd.s32 1008, %v3271_v4 }
  0xb2   : > { %1572 = vadd.xlane.f32.xlu0 %v2597_v47  ;;  %v4660_v61 = vpop.xlane.xlu0 %1436  ;;  %3140 = vmatprep.mubr.msk.f32.mxu1 %vm449_vm12, %v3222_v23  ;;  %v2648_v48 = vsel %vm450_vm7, 1.0, %v6067_v46 }
  0xb3   : > { %6081 = vst [vmem:[#allocation11_spill] sm:$0xff] %v4758_v8 }
  0xb4   : > { %3054 = vmatmul.mubr.msk.f32.gmra.mxu0 %vm392_vm3, %v3222_v23  ;;  %3141 = vmatmul.mubr.msk.f32.gmra.mxu1 %vm450_vm7, %v3222_v23  ;;  %vm6077_vm3 = vcmp.eq.s32.totalorder %v3642_v18, %v3298_v16  ;;  %v4728_v18 = vadd.s32 992, %v3271_v4 }
  0xb5   : > { %1578 = vadd.xlane.f32.xlu1 %v2600_v29  ;;  %3056 = vmatprep.mubr.msk.f32.mxu0 %vm393_vm11, %v3222_v23  ;;  %v2601_v28 = vsel %vm6077_vm3, 1.0, %v6067_v46  ;;  %vm452_vm11 = vcmp.eq.s32.totalorder %v4681_v15, %v3298_v16  ;;  %vm6079_vm3 = vcmp.eq.s32.totalorder %v3716_v30, %v3298_v16  ;;  %v4753_v30 = vadd.s32 1000, %v3271_v4 }
  0xb6   : > { %1576 = vadd.xlane.f32.xlu0 %v2599_v35  ;;  %v4696_v55 = vpop.xlane.xlu1 %1442  ;;  %v4706_v7 = vpop.xlane.xlu0 %1438  ;;  %3143 = vmatprep.mubr.msk.f32.mxu1 %vm6053_vm1, %v3222_v23  ;;  %6078 = vst [vmem:[#allocation10_spill] sm:$0xff] %v4728_v18  ;;  %v2604_v34 = vsel %vm6079_vm3, 1.0, %v6067_v46  ;;  %vm6055_vm3 = vcmp.eq.s32.totalorder %v4719_v24, %v3298_v16  ;;  %vm6056_vm1 = vcmp.eq.s32.totalorder %v4728_v18, %v3298_v16  ;;  %v5306_v18 = vld [vmem:[%s4967_s12 + $0x350] sm:$0xff]  ;;  %v2650_v62 = vsel %vm452_vm11, 1.0, %v6067_v46 }
  0xb7   : > { %6224 = vst [vmem:[#allocation118_spill] sm:$0xff] %v5306_v18  ;;  %v5345_v18 = vld [vmem:[%s4967_s12 + $0x3c8] sm:$0xff] }
  0xb8   : > { %3057 = vmatmul.mubr.msk.f32.gmra.mxu0 %vm394_vm6, %v3222_v23  ;;  %3144 = vmatmul.mubr.msk.f32.gmra.mxu1 %vm452_vm11, %v3222_v23  ;;  %vm6080_vm6 = vcmp.eq.s32.totalorder %v3686_v26, %v3298_v16  ;;  %6237 = vst [vmem:[#allocation131_spill] sm:$0xff] %v5345_v18  ;;  %v5380_v18 = vld [vmem:[%s4967_s12 + $0x3e0] sm:$0xff] }
  0xb9   : > { %1582 = vadd.xlane.f32.xlu1 %v2602_v27  ;;  %v2603_v19 = vsel %vm6080_vm6, 1.0, %v6067_v46  ;;  %3146 = vmatprep.mubr.msk.f32.mxu1 %vm6054_vm15, %v3222_v23  ;;  %vm6082_vm6 = vcmp.eq.s32.totalorder %v3763_v37, %v3298_v16  ;;  %vm6083_vm15 = vcmp.eq.s32.totalorder %v3730_v32, %v3298_v16  ;;  %v4783_v37 = vadd.s32 1016, %v3271_v4 }
  0xba   : > { %1580 = vadd.xlane.f32.xlu0 %v2601_v28  ;;  %v4730_v14 = vpop.xlane.xlu1 %1446  ;;  %v2606_v47 = vsel %vm6082_vm6, 1.0, %v6067_v46  ;;  %v2605_v35 = vsel %vm6083_vm15, 1.0, %v6067_v46  ;;  %vm6057_vm6 = vcmp.eq.s32.totalorder %v4753_v30, %v3298_v16  ;;  %vm6085_vm15 = vcmp.eq.s32.totalorder %v3809_v43, %v3298_v16 }
  0xbb   : > { %v4740_v52 = vpop.xlane.xlu0 %1444  ;;  %6084 = vst [vmem:[#allocation12_spill] sm:$0xff] %v4783_v37  ;;  %v2608_v32 = vsel %vm6085_vm15, 1.0, %v6067_v46  ;;  %vm458_vm15 = vcmp.eq.s32.totalorder %v4783_v37, %v3298_v16  ;;  %v5051_v37 = vld [vmem:[%s4967_s12 + $0xb8] sm:$0xff] }
  0xbc   : > { %3147 = vmatmul.mubr.msk.f32.gmra.mxu1 %vm6055_vm3, %v3222_v23  ;;  %vm6058_vm3 = vcmp.eq.s32.totalorder %v4758_v8, %v3298_v16  ;;  %v5048_v8 = vld [vmem:[%s4967_s12 + $0xa0] sm:$0xff]  ;;  %6139 = vst [vmem:[#allocation33_spill] sm:$0xff] %v5051_v37  ;;  %vm1696_vm0 = vcmp.gt.f32.partialorder %v4740_v52, 0.0  ;;  %v2641_v52 = vsel %vm443_vm8, 1.0, %v6067_v46 }
  0xbd   : > { %1586 = vadd.xlane.f32.xlu1 %v2604_v34  ;;  %3149 = vmatprep.mubr.msk.f32.mxu1 %vm6056_vm1, %v3222_v23  ;;  %vm6086_vm1 = vcmp.eq.s32.totalorder %v3774_v38, %v3298_v16  ;;  %6138 = vst [vmem:[#allocation32_spill] sm:$0xff] %v5048_v8  ;;  %v5069_v8 = vld [vmem:[%s4967_s12 + $0xd0] sm:$0xff]  ;;  %v5072_v37 = vld [vmem:[%s4967_s12 + $0x200] sm:$0xff] }
  0xbe   : > { %1584 = vadd.xlane.f32.xlu0 %v2603_v19  ;;  %v4760_v26 = vpop.xlane.xlu1 %1450  ;;  %v2607_v4 = vsel %vm6086_vm1, 1.0, %v6067_v46  ;;  %vm6088_vm1 = vcmp.eq.s32.totalorder %v3818_v44, %v3298_v16  ;;  %6145 = vst [vmem:[#allocation39_spill] sm:$0xff] %v5069_v8  ;;  %6146 = vst [vmem:[#allocation40_spill] sm:$0xff] %v5072_v37  ;;  %v5090_v8 = vld [vmem:[%s4967_s12 + $0x228] sm:$0xff]  ;;  %v5093_v37 = vld [vmem:[%s4967_s12 + $0xf0] sm:$0xff] }
  0xbf   : > { %v4770_v29 = vpop.xlane.xlu0 %1448  ;;  %v2609_v19 = vsel %vm6088_vm1, 1.0, %v6067_v46  ;;  %vm6091_vm1 = vcmp.eq.s32.totalorder %v3941_v0, %v3298_v16  ;;  %6152 = vst [vmem:[#allocation46_spill] sm:$0xff] %v5090_v8  ;;  %6153 = vst [vmem:[#allocation47_spill] sm:$0xff] %v5093_v37  ;;  %v5111_v8 = vld [vmem:[%s4967_s12 + $0x118] sm:$0xff]  ;;  %v5114_v37 = vld [vmem:[%s4967_s12 + $0x248] sm:$0xff] }
  0xc0   : > { %3150 = vmatmul.mubr.msk.f32.gmra.mxu1 %vm6057_vm6, %v3222_v23  ;;  %vm6087_vm6 = vcmp.eq.s32.totalorder %v3853_v50, %v3298_v16  ;;  %6159 = vst [vmem:[#allocation53_spill] sm:$0xff] %v5111_v8  ;;  %6160 = vst [vmem:[#allocation54_spill] sm:$0xff] %v5114_v37  ;;  %v5132_v8 = vld [vmem:[%s4967_s12 + $0x250] sm:$0xff]  ;;  %v5135_v37 = vld [vmem:[%s4967_s12 + $0x138] sm:$0xff] }
  0xc1   : > { %1590 = vadd.xlane.f32.xlu1 %v2606_v47  ;;  %3152 = vmatprep.mubr.msk.f32.mxu1 %vm6058_vm3, %v3222_v23  ;;  %v2610_v34 = vsel %vm6087_vm6, 1.0, %v6067_v46  ;;  %vm6089_vm6 = vcmp.eq.s32.totalorder %v3897_v56, %v3298_v16  ;;  %vm6090_vm3 = vcmp.eq.s32.totalorder %v3862_v51, %v3298_v16  ;;  %6166 = vst [vmem:[#allocation60_spill] sm:$0xff] %v5132_v8  ;;  %6167 = vst [vmem:[#allocation61_spill] sm:$0xff] %v5135_v37  ;;  %v5153_v8 = vld [vmem:[%s4967_s12 + $0x140] sm:$0xff]  ;;  %v5156_v37 = vld [vmem:[%s4967_s12 + $0x270] sm:$0xff] }
  0xc2   : > { %1588 = vadd.xlane.f32.xlu0 %v2605_v35  ;;  %v4787_v27 = vpop.xlane.xlu1 %1454  ;;  %v2612_v50 = vsel %vm6089_vm6, 1.0, %v6067_v46  ;;  %vm6092_vm6 = vcmp.eq.s32.totalorder %v3906_v57, %v3298_v16  ;;  %6173 = vst [vmem:[#allocation67_spill] sm:$0xff] %v5153_v8  ;;  %6174 = vst [vmem:[#allocation68_spill] sm:$0xff] %v5156_v37  ;;  %v5174_v8 = vld [vmem:[%s4967_s12 + $0x298] sm:$0xff]  ;;  %v5177_v37 = vld [vmem:[%s4967_s12 + $0x160] sm:$0xff] }
  0xc3   : > { %v4797_v28 = vpop.xlane.xlu0 %1452  ;;  %v2613_v56 = vsel %vm6092_vm6, 1.0, %v6067_v46  ;;  %vm6096_vm6 = vcmp.eq.s32.totalorder %v4029_v21, %v3298_v16  ;;  %6180 = vst [vmem:[#allocation74_spill] sm:$0xff] %v5174_v8  ;;  %6181 = vst [vmem:[#allocation75_spill] sm:$0xff] %v5177_v37  ;;  %v5195_v8 = vld [vmem:[%s4967_s12 + $0x188] sm:$0xff]  ;;  %v5198_v37 = vld [vmem:[%s4967_s12 + $0x2b8] sm:$0xff]  ;;  %vm1701_vm8 = vcmp.gt.f32.partialorder %v4787_v27, 0.0 }
  0xc4   : > { %3153 = vmatmul.mubr.msk.f32.gmra.mxu1 %vm458_vm15, %v3222_v23  ;;  %v2611_v23 = vsel %vm6090_vm3, 1.0, %v6067_v46  ;;  %vm6093_vm3 = vcmp.eq.s32.totalorder %v3985_v10, %v3298_v16  ;;  %6187 = vst [vmem:[#allocation81_spill] sm:$0xff] %v5195_v8  ;;  %6188 = vst [vmem:[#allocation82_spill] sm:$0xff] %v5198_v37  ;;  %v5216_v8 = vld [vmem:[%s4967_s12 + $0x2c0] sm:$0xff]  ;;  %v5219_v37 = vld [vmem:[%s4967_s12 + $0x1a8] sm:$0xff]  ;;  %vm1700_vm4 = vcmp.gt.f32.partialorder %v4797_v28, 0.0 }
  0xc5   : > { %1594 = vadd.xlane.f32.xlu1 %v2608_v32  ;;  %v2614_v32 = vsel %vm6091_vm1, 1.0, %v6067_v46  ;;  %vm6094_vm1 = vcmp.eq.s32.totalorder %v3950_v1, %v3298_v16  ;;  %6194 = vst [vmem:[#allocation88_spill] sm:$0xff] %v5216_v8  ;;  %6195 = vst [vmem:[#allocation89_spill] sm:$0xff] %v5219_v37  ;;  %v5237_v8 = vld [vmem:[%s4967_s12 + $0x1b0] sm:$0xff]  ;;  %v5240_v37 = vld [vmem:[%s4967_s12 + $0x2e0] sm:$0xff]  ;;  %v2645_v28 = vsel %vm447_vm10, 1.0, %v6067_v46 }
  0xc6   : > { %1592 = vadd.xlane.f32.xlu0 %v2607_v4  ;;  %v4809_v43 = vpop.xlane.xlu1 %1458  ;;  %v2615_v0 = vsel %vm6094_vm1, 1.0, %v6067_v46  ;;  %vm6100_vm1 = vcmp.eq.s32.totalorder %v4073_v31, %v3298_v16  ;;  %6201 = vst [vmem:[#allocation95_spill] sm:$0xff] %v5237_v8  ;;  %6202 = vst [vmem:[#allocation96_spill] sm:$0xff] %v5240_v37  ;;  %v5258_v8 = vld [vmem:[%s4967_s12 + $0x308] sm:$0xff]  ;;  %v5261_v37 = vld [vmem:[%s4967_s12 + $0x1d0] sm:$0xff] }
  0xc7   : > { %v4819_v38 = vpop.xlane.xlu0 %1456  ;;  %6208 = vst [vmem:[#allocation102_spill] sm:$0xff] %v5258_v8  ;;  %6209 = vst [vmem:[#allocation103_spill] sm:$0xff] %v5261_v37  ;;  %v5279_v8 = vld [vmem:[%s4967_s12 + $0x1f8] sm:$0xff]  ;;  %v5282_v37 = vld [vmem:[%s4967_s12 + $0x328] sm:$0xff] }
  0xc8   : > { %6215 = vst [vmem:[#allocation109_spill] sm:$0xff] %v5279_v8  ;;  %6216 = vst [vmem:[#allocation110_spill] sm:$0xff] %v5282_v37  ;;  %v5300_v8 = vld [vmem:[%s4967_s12 + $0x340] sm:$0xff]  ;;  %v5303_v37 = vld [vmem:[%s4967_s12 + $0x358] sm:$0xff]  ;;  %vm1702_vm9 = vcmp.gt.f32.partialorder %v4819_v38, 0.0  ;;  %v2647_v38 = vsel %vm449_vm12, 1.0, %v6067_v46  ;;  %vm6249_vm12 = vcmp.eq.s32.totalorder %v4652_v5, %v3298_v16 }
  0xc9   : > { %1598 = vadd.xlane.f32.xlu1 %v2610_v34  ;;  %v2616_v34 = vsel %vm6093_vm3, 1.0, %v6067_v46  ;;  %vm6098_vm3 = vcmp.eq.s32.totalorder %v3994_v12, %v3298_v16  ;;  %6222 = vst [vmem:[#allocation116_spill] sm:$0xff] %v5300_v8  ;;  %6223 = vst [vmem:[#allocation117_spill] sm:$0xff] %v5303_v37  ;;  %v5324_v8 = vld [vmem:[%s4967_s12 + $0x380] sm:$0xff]  ;;  %v5330_v37 = vld [vmem:[%s4967_s12 + $0x390] sm:$0xff] }
  0xca   : > { %1596 = vadd.xlane.f32.xlu0 %v2609_v19  ;;  %v4825_v47 = vpop.xlane.xlu1 %1462  ;;  %v2617_v10 = vsel %vm6098_vm3, 1.0, %v6067_v46  ;;  %vm6104_vm3 = vcmp.eq.s32.totalorder %v4117_v41, %v3298_v16  ;;  %6230 = vst [vmem:[#allocation124_spill] sm:$0xff] %v5324_v8  ;;  %6232 = vst [vmem:[#allocation126_spill] sm:$0xff] %v5330_v37  ;;  %v5358_v37 = vld [vmem:[%s4967_s12 + $0x3d8] sm:$0xff] }
  0xcb   : > { %v4831_v35 = vpop.xlane.xlu0 %1460  ;;  %6240 = vst [vmem:[#allocation133_spill] sm:$0xff] %v5358_v37  ;;  %v5383_v37 = vld [vmem:[%s4967_s12 + $0x3f8] sm:$0xff]  ;;  %vm1705_vm10 = vcmp.gt.f32.partialorder %v4825_v47, 0.0 }
  0xcc   : > { %vm1704_vm7 = vcmp.gt.f32.partialorder %v4831_v35, 0.0  ;;  %v2649_v35 = vsel %vm6249_vm12, 1.0, %v6067_v46 }
  0xcd   : > { %1602 = vadd.xlane.f32.xlu1 %v2612_v50  ;;  %v2618_v50 = vsel %vm6096_vm6, 1.0, %v6067_v46  ;;  %vm6102_vm6 = vcmp.eq.s32.totalorder %v4038_v22, %v3298_v16 }
  0xce   : > { %1600 = vadd.xlane.f32.xlu0 %v2611_v23  ;;  %v4837_v44 = vpop.xlane.xlu1 %1466 }
  0xcf   : > { %v4843_v4 = vpop.xlane.xlu0 %1464 }
  0xd0   : > { %vm1706_vm11 = vcmp.gt.f32.partialorder %v4843_v4, 0.0 }
  0xd1   : > { %1606 = vadd.xlane.f32.xlu1 %v2614_v32  ;;  %v2620_v32 = vsel %vm6100_vm1, 1.0, %v6067_v46  ;;  %vm6106_vm1 = vcmp.eq.s32.totalorder %v4082_v33, %v3298_v16 }
  0xd2   : > { %1604 = vadd.xlane.f32.xlu0 %v2613_v56  ;;  %v4849_v51 = vpop.xlane.xlu1 %1470  ;;  %v2619_v56 = vsel %vm6102_vm6, 1.0, %v6067_v46  ;;  %v2621_v31 = vsel %vm6106_vm1, 1.0, %v6067_v46  ;;  %vm6108_vm6 = vcmp.eq.s32.totalorder %v4161_v49, %v3298_v16  ;;  %vm6112_vm1 = vcmp.eq.s32.totalorder %v4205_v3, %v3298_v16 }
  0xd3   : > { %v4855_v19 = vpop.xlane.xlu0 %1468  ;;  %v2626_v49 = vsel %vm6112_vm1, 1.0, %v6067_v46  ;;  %vm6118_vm1 = vcmp.eq.s32.totalorder %v4214_v6, %v3298_v16 }
  0xd5   : > { %1610 = vadd.xlane.f32.xlu1 %v2616_v34  ;;  %v2622_v34 = vsel %vm6104_vm3, 1.0, %v6067_v46  ;;  %vm6110_vm3 = vcmp.eq.s32.totalorder %v4126_v42, %v3298_v16 }
  0xd6   : > { %1608 = vadd.xlane.f32.xlu0 %v2615_v0  ;;  %v4861_v57 = vpop.xlane.xlu1 %1474  ;;  %v2623_v41 = vsel %vm6110_vm3, 1.0, %v6067_v46  ;;  %vm6116_vm3 = vcmp.eq.s32.totalorder %v4249_v63, %v3298_v16 }
  0xd7   : > { %6095 = vst [vmem:[#allocation13_spill] sm:$0xff] %v4861_v57  ;;  %v4867_v23 = vpop.xlane.xlu0 %1472  ;;  %v5057_v57 = vld [vmem:[%s4967_s12 + $0xc8] sm:$0xff] }
  0xd8   : > { %6097 = vst [vmem:[#allocation14_spill] sm:$0xff] %v4867_v23  ;;  %v5054_v23 = vld [vmem:[%s4967_s12 + $0xb0] sm:$0xff]  ;;  %6141 = vst [vmem:[#allocation35_spill] sm:$0xff] %v5057_v57  ;;  %v5078_v57 = vld [vmem:[%s4967_s12 + $0x218] sm:$0xff] }
  0xd9   : > { %1614 = vadd.xlane.f32.xlu1 %v2618_v50  ;;  %v2624_v50 = vsel %vm6108_vm6, 1.0, %v6067_v46  ;;  %vm6114_vm6 = vcmp.eq.s32.totalorder %v4170_v53, %v3298_v16  ;;  %6140 = vst [vmem:[#allocation34_spill] sm:$0xff] %v5054_v23  ;;  %v5075_v23 = vld [vmem:[%s4967_s12 + $0xe8] sm:$0xff]  ;;  %6148 = vst [vmem:[#allocation42_spill] sm:$0xff] %v5078_v57 }
  0xda   : > { %1612 = vadd.xlane.f32.xlu0 %v2617_v10  ;;  %v4873_v1 = vpop.xlane.xlu1 %1478  ;;  %v2625_v42 = vsel %vm6114_vm6, 1.0, %v6067_v46  ;;  %vm6120_vm6 = vcmp.eq.s32.totalorder %v4293_v45, %v3298_v16  ;;  %6147 = vst [vmem:[#allocation41_spill] sm:$0xff] %v5075_v23  ;;  %v5096_v23 = vld [vmem:[%s4967_s12 + $0x220] sm:$0xff]  ;;  %v5099_v57 = vld [vmem:[%s4967_s12 + $0x108] sm:$0xff] }
  0xdb   : > { %6099 = vst [vmem:[#allocation15_spill] sm:$0xff] %v4873_v1  ;;  %v4879_v21 = vpop.xlane.xlu0 %1476  ;;  %v5045_v1 = vld [vmem:[%s4967_s12 + $0xa8] sm:$0xff]  ;;  %6154 = vst [vmem:[#allocation48_spill] sm:$0xff] %v5096_v23  ;;  %v5117_v23 = vld [vmem:[%s4967_s12 + $0x110] sm:$0xff] }
  0xdc   : > { %6101 = vst [vmem:[#allocation16_spill] sm:$0xff] %v4879_v21  ;;  %v5042_v21 = vld [vmem:[%s4967_s12 + $0x90] sm:$0xff]  ;;  %6137 = vst [vmem:[#allocation31_spill] sm:$0xff] %v5045_v1  ;;  %v5066_v1 = vld [vmem:[%s4967_s12 + $0x208] sm:$0xff] }
  0xdd   : > { %1618 = vadd.xlane.f32.xlu1 %v2620_v32  ;;  %6136 = vst [vmem:[#allocation30_spill] sm:$0xff] %v5042_v21  ;;  %v5063_v21 = vld [vmem:[%s4967_s12 + $0xd8] sm:$0xff]  ;;  %6144 = vst [vmem:[#allocation38_spill] sm:$0xff] %v5066_v1 }
  0xde   : > { %1616 = vadd.xlane.f32.xlu0 %v2619_v56  ;;  %v4885_v12 = vpop.xlane.xlu1 %1482  ;;  %6143 = vst [vmem:[#allocation37_spill] sm:$0xff] %v5063_v21  ;;  %v5084_v21 = vld [vmem:[%s4967_s12 + $0x210] sm:$0xff]  ;;  %v5087_v1 = vld [vmem:[%s4967_s12 + $0xf8] sm:$0xff]  ;;  %6155 = vst [vmem:[#allocation49_spill] sm:$0xff] %v5099_v57 }
  0xdf   : > { %6103 = vst [vmem:[#allocation17_spill] sm:$0xff] %v4885_v12  ;;  %v4891_v0 = vpop.xlane.xlu0 %1480  ;;  %v5039_v12 = vld [vmem:[%s4967_s12 + $0x98] sm:$0xff]  ;;  %6150 = vst [vmem:[#allocation44_spill] sm:$0xff] %v5084_v21  ;;  %v5105_v21 = vld [vmem:[%s4967_s12 + $0x100] sm:$0xff] }
  0xe0   : > { %6105 = vst [vmem:[#allocation18_spill] sm:$0xff] %v4891_v0  ;;  %v5036_v0 = vld [vmem:[%s4967_s12 + $0x80] sm:$0xff]  ;;  %6135 = vst [vmem:[#allocation29_spill] sm:$0xff] %v5039_v12 }
  0xe1   : > { %1622 = vadd.xlane.f32.xlu1 %v2622_v34  ;;  %v2628_v34 = vsel %vm6116_vm3, 1.0, %v6067_v46  ;;  %v5060_v12 = vld [vmem:[%s4967_s12 + $0xc0] sm:$0xff]  ;;  %6151 = vst [vmem:[#allocation45_spill] sm:$0xff] %v5087_v1  ;;  %6157 = vst [vmem:[#allocation51_spill] sm:$0xff] %v5105_v21  ;;  %v5108_v1 = vld [vmem:[%s4967_s12 + $0x230] sm:$0xff] }
  0xe2   : > { %1620 = vadd.xlane.f32.xlu0 %v2621_v31  ;;  %v4898_v22 = vpop.xlane.xlu1 %1486  ;;  %v2627_v31 = vsel %vm6118_vm1, 1.0, %v6067_v46  ;;  %vm6125_vm1 = vcmp.eq.s32.totalorder %v4337_v20, %v3298_v16  ;;  %6142 = vst [vmem:[#allocation36_spill] sm:$0xff] %v5060_v12  ;;  %v5081_v12 = vld [vmem:[%s4967_s12 + $0xe0] sm:$0xff]  ;;  %6158 = vst [vmem:[#allocation52_spill] sm:$0xff] %v5108_v1  ;;  %v5126_v21 = vld [vmem:[%s4967_s12 + $0x258] sm:$0xff] }
  0xe3   : > { %6107 = vst [vmem:[#allocation19_spill] sm:$0xff] %v4898_v22  ;;  %v4904_v10 = vpop.xlane.xlu0 %1484  ;;  %v5033_v22 = vld [vmem:[%s4967_s12 + $0x88] sm:$0xff]  ;;  %6149 = vst [vmem:[#allocation43_spill] sm:$0xff] %v5081_v12  ;;  %v5102_v12 = vld [vmem:[%s4967_s12 + $0x238] sm:$0xff] }
  0xe4   : > { %6109 = vst [vmem:[#allocation20_spill] sm:$0xff] %v4904_v10  ;;  %v5030_v10 = vld [vmem:[%s4967_s12 + $0x70] sm:$0xff]  ;;  %6156 = vst [vmem:[#allocation50_spill] sm:$0xff] %v5102_v12  ;;  %v5120_v57 = vld [vmem:[%s4967_s12 + $0x240] sm:$0xff] }
  0xe5   : > { %1626 = vadd.xlane.f32.xlu1 %v2624_v50  ;;  %v2630_v50 = vsel %vm6120_vm6, 1.0, %v6067_v46  ;;  %6161 = vst [vmem:[#allocation55_spill] sm:$0xff] %v5117_v23  ;;  %6162 = vst [vmem:[#allocation56_spill] sm:$0xff] %v5120_v57  ;;  %v5123_v12 = vld [vmem:[%s4967_s12 + $0x128] sm:$0xff]  ;;  %v5129_v1 = vld [vmem:[%s4967_s12 + $0x120] sm:$0xff] }
  0xe6   : > { %1624 = vadd.xlane.f32.xlu0 %v2623_v41  ;;  %v4913_v33 = vpop.xlane.xlu1 %1490  ;;  %v6122_v41 = vld [vmem:[#allocation5_spill] sm:$0xff]  ;;  %6163 = vst [vmem:[#allocation57_spill] sm:$0xff] %v5123_v12  ;;  %6164 = vst [vmem:[#allocation58_spill] sm:$0xff] %v5126_v21  ;;  %v5138_v23 = vld [vmem:[%s4967_s12 + $0x268] sm:$0xff] }
  0xe7   : > { %6111 = vst [vmem:[#allocation21_spill] sm:$0xff] %v4913_v33  ;;  %v4919_v32 = vpop.xlane.xlu0 %1488  ;;  %vm6123_vm3 = vcmp.eq.s32.totalorder %v6122_v41, %v3298_v16  ;;  %v5027_v33 = vld [vmem:[%s4967_s12 + $0x78] sm:$0xff]  ;;  %6165 = vst [vmem:[#allocation59_spill] sm:$0xff] %v5129_v1  ;;  %v5141_v57 = vld [vmem:[%s4967_s12 + $0x130] sm:$0xff] }
  0xe8   : > { %6113 = vst [vmem:[#allocation22_spill] sm:$0xff] %v4919_v32  ;;  %v5024_v32 = vld [vmem:[%s4967_s12 + $0x60] sm:$0xff]  ;;  %6168 = vst [vmem:[#allocation62_spill] sm:$0xff] %v5138_v23  ;;  %v5147_v21 = vld [vmem:[%s4967_s12 + $0x148] sm:$0xff] }
  0xe9   : > { %1630 = vadd.xlane.f32.xlu1 %v2626_v49  ;;  %v2629_v49 = vsel %vm6123_vm3, 1.0, %v6067_v46  ;;  %vm6130_vm3 = vcmp.eq.s32.totalorder %v4381_v58, %v3298_v16  ;;  %v4988_v58 = vld [vmem:[%s4967_s12] sm:$0xff]  ;;  %6169 = vst [vmem:[#allocation63_spill] sm:$0xff] %v5141_v57  ;;  %6171 = vst [vmem:[#allocation65_spill] sm:$0xff] %v5147_v21  ;;  %v5150_v1 = vld [vmem:[%s4967_s12 + $0x278] sm:$0xff] }
  0xea   : > { %1628 = vadd.xlane.f32.xlu0 %v2625_v42  ;;  %v4925_v56 = vpop.xlane.xlu1 %1494  ;;  %v2632_v42 = vsel %vm6125_vm1, 1.0, %v6067_v46  ;;  %v5144_v12 = vld [vmem:[%s4967_s12 + $0x260] sm:$0xff]  ;;  %6172 = vst [vmem:[#allocation66_spill] sm:$0xff] %v5150_v1  ;;  %v5159_v23 = vld [vmem:[%s4967_s12 + $0x158] sm:$0xff]  ;;  %v5162_v57 = vld [vmem:[%s4967_s12 + $0x288] sm:$0xff] }
  0xeb   : > { %6115 = vst [vmem:[#allocation23_spill] sm:$0xff] %v4925_v56  ;;  %v4931_v3 = vpop.xlane.xlu0 %1492  ;;  %v5021_v56 = vld [vmem:[%s4967_s12 + $0x68] sm:$0xff]  ;;  %6170 = vst [vmem:[#allocation64_spill] sm:$0xff] %v5144_v12  ;;  %v5165_v12 = vld [vmem:[%s4967_s12 + $0x150] sm:$0xff] }
  0xec   : > { %6117 = vst [vmem:[#allocation24_spill] sm:$0xff] %v4931_v3  ;;  %v5018_v3 = vld [vmem:[%s4967_s12 + $0x50] sm:$0xff]  ;;  %6175 = vst [vmem:[#allocation69_spill] sm:$0xff] %v5159_v23  ;;  %v5168_v21 = vld [vmem:[%s4967_s12 + $0x280] sm:$0xff] }
  0xed   : > { %1634 = vadd.xlane.f32.xlu1 %v2628_v34  ;;  %v6127_v34 = vld [vmem:[#allocation6_spill] sm:$0xff]  ;;  %6176 = vst [vmem:[#allocation70_spill] sm:$0xff] %v5162_v57  ;;  %6177 = vst [vmem:[#allocation71_spill] sm:$0xff] %v5165_v12  ;;  %v5180_v23 = vld [vmem:[%s4967_s12 + $0x290] sm:$0xff] }
  0xee   : > { %1632 = vadd.xlane.f32.xlu0 %v2627_v31  ;;  %v4938_v53 = vpop.xlane.xlu1 %1498  ;;  %vm6128_vm6 = vcmp.eq.s32.totalorder %v6127_v34, %v3298_v16  ;;  %v4985_v34 = vld [vmem:[%s4967_s12 + $0x8] sm:$0xff]  ;;  %6178 = vst [vmem:[#allocation72_spill] sm:$0xff] %v5168_v21  ;;  %6182 = vst [vmem:[#allocation76_spill] sm:$0xff] %v5180_v23  ;;  %v5183_v57 = vld [vmem:[%s4967_s12 + $0x178] sm:$0xff] }
  0xef   : > { %6119 = vst [vmem:[#allocation25_spill] sm:$0xff] %v4938_v53  ;;  %v4944_v63 = vpop.xlane.xlu0 %1496  ;;  %v2631_v31 = vsel %vm6128_vm6, 1.0, %v6067_v46  ;;  %v5015_v53 = vld [vmem:[%s4967_s12 + $0x58] sm:$0xff]  ;;  %v5171_v1 = vld [vmem:[%s4967_s12 + $0x168] sm:$0xff]  ;;  %6183 = vst [vmem:[#allocation77_spill] sm:$0xff] %v5183_v57  ;;  %vm6239_vm6 = vcmp.eq.s32.totalorder %v4422_v39, %v3298_v16 }
  0xf0   : > { %6121 = vst [vmem:[#allocation26_spill] sm:$0xff] %v4944_v63  ;;  %v5012_v63 = vld [vmem:[%s4967_s12 + $0x40] sm:$0xff]  ;;  %6179 = vst [vmem:[#allocation73_spill] sm:$0xff] %v5171_v1  ;;  %v5186_v12 = vld [vmem:[%s4967_s12 + $0x2a8] sm:$0xff] }
  0xf1   : > { %1638 = vadd.xlane.f32.xlu1 %v2630_v50  ;;  %v2634_v50 = vsel %vm6130_vm3, 1.0, %v6067_v46  ;;  %6184 = vst [vmem:[#allocation78_spill] sm:$0xff] %v5186_v12  ;;  %v5189_v21 = vld [vmem:[%s4967_s12 + $0x170] sm:$0xff]  ;;  %v5192_v1 = vld [vmem:[%s4967_s12 + $0x2a0] sm:$0xff]  ;;  %v5207_v12 = vld [vmem:[%s4967_s12 + $0x198] sm:$0xff] }
  0xf2   : > { %1636 = vadd.xlane.f32.xlu0 %v2629_v49  ;;  %v4950_v6 = vpop.xlane.xlu1 %1502  ;;  %v6132_v49 = vld [vmem:[#allocation7_spill] sm:$0xff]  ;;  %6185 = vst [vmem:[#allocation79_spill] sm:$0xff] %v5189_v21  ;;  %6186 = vst [vmem:[#allocation80_spill] sm:$0xff] %v5192_v1  ;;  %v5201_v23 = vld [vmem:[%s4967_s12 + $0x180] sm:$0xff] }
  0xf3   : > { %6124 = vst [vmem:[#allocation5_spill] sm:$0xff] %v4950_v6  ;;  %v4956_v45 = vpop.xlane.xlu0 %1500  ;;  %vm6133_vm1 = vcmp.eq.s32.totalorder %v6132_v49, %v3298_v16  ;;  %v4997_v49 = vld [vmem:[%s4967_s12 + $0x28] sm:$0xff]  ;;  %6134 = vst [vmem:[#allocation7_spill] sm:$0xff] %v5036_v0  ;;  %v5204_v57 = vld [vmem:[%s4967_s12 + $0x2b0] sm:$0xff] }
  0xf4   : > { %6126 = vst [vmem:[#allocation27_spill] sm:$0xff] %v4956_v45  ;;  %v5003_v45 = vld [vmem:[%s4967_s12 + $0x38] sm:$0xff]  ;;  %v5009_v6 = vld [vmem:[%s4967_s12 + $0x48] sm:$0xff]  ;;  %6189 = vst [vmem:[#allocation83_spill] sm:$0xff] %v5201_v23 }
  0xf5   : > { %1642 = vadd.xlane.f32.xlu1 %v2632_v42  ;;  %v4981_v42 = vsel %vm6133_vm1, 1.0, %v6067_v46  ;;  %6190 = vst [vmem:[#allocation84_spill] sm:$0xff] %v5204_v57  ;;  %6191 = vst [vmem:[#allocation85_spill] sm:$0xff] %v5207_v12  ;;  %v5210_v21 = vld [vmem:[%s4967_s12 + $0x2c8] sm:$0xff]  ;;  %v5213_v1 = vld [vmem:[%s4967_s12 + $0x190] sm:$0xff]  ;;  %vm1693_vm1 = vcmp.gt.f32.partialorder %v4706_v7, 0.0 }
  0xf6   : > { %1640 = vadd.xlane.f32.xlu0 %v2631_v31  ;;  %v4969_v20 = vpop.xlane.xlu1 %1506  ;;  %v4991_v31 = vld [vmem:[%s4967_s12 + $0x18] sm:$0xff]  ;;  %6192 = vst [vmem:[#allocation86_spill] sm:$0xff] %v5210_v21  ;;  %6193 = vst [vmem:[#allocation87_spill] sm:$0xff] %v5213_v1  ;;  %v5225_v57 = vld [vmem:[%s4967_s12 + $0x1a0] sm:$0xff] }
  0xf7   : > { %6129 = vst [vmem:[#allocation6_spill] sm:$0xff] %v4969_v20  ;;  %v4975_v41 = vpop.xlane.xlu0 %1504  ;;  %v5000_v20 = vld [vmem:[%s4967_s12 + $0x20] sm:$0xff]  ;;  %v5222_v23 = vld [vmem:[%s4967_s12 + $0x2d8] sm:$0xff]  ;;  %6197 = vst [vmem:[#allocation91_spill] sm:$0xff] %v5225_v57 }
  0xf8   : > { %6131 = vst [vmem:[#allocation28_spill] sm:$0xff] %v4975_v41  ;;  %v4994_v41 = vld [vmem:[%s4967_s12 + $0x10] sm:$0xff]  ;;  %6196 = vst [vmem:[#allocation90_spill] sm:$0xff] %v5222_v23  ;;  %v5231_v21 = vld [vmem:[%s4967_s12 + $0x1b8] sm:$0xff] }
  0xf9   : > { %1646 = vadd.xlane.f32.xlu1 %v2634_v50  ;;  %v5006_v50 = vld [vmem:[%s4967_s12 + $0x30] sm:$0xff]  ;;  %6199 = vst [vmem:[#allocation93_spill] sm:$0xff] %v5231_v21  ;;  %v5234_v1 = vld [vmem:[%s4967_s12 + $0x2e8] sm:$0xff]  ;;  %v5246_v57 = vld [vmem:[%s4967_s12 + $0x2f8] sm:$0xff] }
  0xfa   : > { %v5228_v12 = vld [vmem:[%s4967_s12 + $0x2d0] sm:$0xff]  ;;  %6200 = vst [vmem:[#allocation94_spill] sm:$0xff] %v5234_v1  ;;  %v5243_v23 = vld [vmem:[%s4967_s12 + $0x1c8] sm:$0xff]  ;;  %6204 = vst [vmem:[#allocation98_spill] sm:$0xff] %v5246_v57  ;;  %1644 = vadd.xlane.f32.xlu0 %v4981_v42 }
  0xfb   : > { %6198 = vst [vmem:[#allocation92_spill] sm:$0xff] %v5228_v12  ;;  %6203 = vst [vmem:[#allocation97_spill] sm:$0xff] %v5243_v23  ;;  %v5249_v12 = vld [vmem:[%s4967_s12 + $0x1c0] sm:$0xff]  ;;  %v5252_v21 = vld [vmem:[%s4967_s12 + $0x2f0] sm:$0xff]  ;;  %v5373_v42 = vpop.xlane.xlu0 %1508 }
  0xfc   : > { %6205 = vst [vmem:[#allocation99_spill] sm:$0xff] %v5249_v12  ;;  %6206 = vst [vmem:[#allocation100_spill] sm:$0xff] %v5252_v21  ;;  %v5255_v1 = vld [vmem:[%s4967_s12 + $0x1d8] sm:$0xff]  ;;  %v5264_v23 = vld [vmem:[%s4967_s12 + $0x300] sm:$0xff] }
  0xfd   : > { %6207 = vst [vmem:[#allocation101_spill] sm:$0xff] %v5255_v1  ;;  %6210 = vst [vmem:[#allocation104_spill] sm:$0xff] %v5264_v23  ;;  %v5267_v57 = vld [vmem:[%s4967_s12 + $0x1e8] sm:$0xff]  ;;  %v5270_v12 = vld [vmem:[%s4967_s12 + $0x318] sm:$0xff] }
  0xfe   : > { %6211 = vst [vmem:[#allocation105_spill] sm:$0xff] %v5267_v57  ;;  %6212 = vst [vmem:[#allocation106_spill] sm:$0xff] %v5270_v12  ;;  %v5273_v21 = vld [vmem:[%s4967_s12 + $0x1e0] sm:$0xff]  ;;  %v5276_v1 = vld [vmem:[%s4967_s12 + $0x310] sm:$0xff] }
  0xff   : > { %6213 = vst [vmem:[#allocation107_spill] sm:$0xff] %v5273_v21  ;;  %6214 = vst [vmem:[#allocation108_spill] sm:$0xff] %v5276_v1  ;;  %v5285_v23 = vld [vmem:[%s4967_s12 + $0x1f0] sm:$0xff]  ;;  %v5288_v57 = vld [vmem:[%s4967_s12 + $0x320] sm:$0xff]  ;;  %v5399_v7 = vpop.xlane.xlu0 %1512 }
 0x100   : > { %6217 = vst [vmem:[#allocation111_spill] sm:$0xff] %v5285_v23  ;;  %6218 = vst [vmem:[#allocation112_spill] sm:$0xff] %v5288_v57  ;;  %v5291_v12 = vld [vmem:[%s4967_s12 + $0x338] sm:$0xff]  ;;  %v5294_v21 = vld [vmem:[%s4967_s12 + $0x330] sm:$0xff] }
 0x101   : > { %6219 = vst [vmem:[#allocation113_spill] sm:$0xff] %v5291_v12  ;;  %6220 = vst [vmem:[#allocation114_spill] sm:$0xff] %v5294_v21  ;;  %v5297_v1 = vld [vmem:[%s4967_s12 + $0x348] sm:$0xff]  ;;  %v5312_v57 = vld [vmem:[%s4967_s12 + $0x360] sm:$0xff] }
 0x102   : > { %6221 = vst [vmem:[#allocation115_spill] sm:$0xff] %v5297_v1  ;;  %v5309_v23 = vld [vmem:[%s4967_s12 + $0x368] sm:$0xff]  ;;  %6226 = vst [vmem:[#allocation120_spill] sm:$0xff] %v5312_v57  ;;  %v5315_v12 = vld [vmem:[%s4967_s12 + $0x378] sm:$0xff] }
 0x103   : > { %6225 = vst [vmem:[#allocation119_spill] sm:$0xff] %v5309_v23  ;;  %6227 = vst [vmem:[#allocation121_spill] sm:$0xff] %v5315_v12  ;;  %v5318_v21 = vld [vmem:[%s4967_s12 + $0x370] sm:$0xff]  ;;  %v5321_v1 = vld [vmem:[%s4967_s12 + $0x388] sm:$0xff] }
 0x104   : > { %6228 = vst [vmem:[#allocation122_spill] sm:$0xff] %v5318_v21  ;;  %6229 = vst [vmem:[#allocation123_spill] sm:$0xff] %v5321_v1  ;;  %v5327_v0 = vld [vmem:[%s4967_s12 + $0x398] sm:$0xff]  ;;  %v5333_v23 = vld [vmem:[%s4967_s12 + $0x3a8] sm:$0xff] }
 0x105   : > { %6231 = vst [vmem:[#allocation125_spill] sm:$0xff] %v5327_v0  ;;  %6233 = vst [vmem:[#allocation127_spill] sm:$0xff] %v5333_v23  ;;  %v5336_v57 = vld [vmem:[%s4967_s12 + $0x3a0] sm:$0xff]  ;;  %v5339_v12 = vld [vmem:[%s4967_s12 + $0x3b8] sm:$0xff]  ;;  %v5351_v0 = vpop.xlane.xlu1 %1510  ;;  %v2636_v23 = vsel %vm6239_vm6, 1.0, %v6067_v46  ;;  %vm1692_vm6 = vcmp.gt.f32.partialorder %v4660_v61, 0.0 }
 0x106   : > { %6234 = vst [vmem:[#allocation128_spill] sm:$0xff] %v5336_v57  ;;  %6235 = vst [vmem:[#allocation129_spill] sm:$0xff] %v5339_v12  ;;  %v5342_v21 = vld [vmem:[%s4967_s12 + $0x3b0] sm:$0xff]  ;;  %v5348_v1 = vld [vmem:[%s4967_s12 + $0x3c0] sm:$0xff]  ;;  %1650 = vadd.xlane.f32.xlu1 %v2636_v23  ;;  %v2637_v61 = vsel %vm439_vm14, 1.0, %v6067_v46 }
 0x107   : > { %6236 = vst [vmem:[#allocation130_spill] sm:$0xff] %v5342_v21  ;;  %6238 = vst [vmem:[#allocation132_spill] sm:$0xff] %v5348_v1  ;;  %v5361_v57 = vld [vmem:[%s4967_s12 + $0x3d0] sm:$0xff]  ;;  %v5364_v12 = vld [vmem:[%s4967_s12 + $0x3e8] sm:$0xff] }
 0x108   : > { %6241 = vst [vmem:[#allocation134_spill] sm:$0xff] %v5361_v57  ;;  %6242 = vst [vmem:[#allocation135_spill] sm:$0xff] %v5364_v12  ;;  %v6243_v1 = vld [vmem:[#allocation8_spill] sm:$0xff]  ;;  %v5386_v57 = vld [vmem:[%s4967_s12 + $0x3f0] sm:$0xff]  ;;  %v2965_v12 = vpop.f32.mrf.mxu0 }
 0x109   : > { %vm6244_vm3 = vcmp.eq.s32.totalorder %v6243_v1, %v3298_v16  ;;  %6245 = vst [vmem:[#allocation8_spill] sm:$0xff] %v5383_v37  ;;  %6246 = vst [vmem:[#allocation136_spill] sm:$0xff] %v5386_v57  ;;  %v2205_v21 = vsel %vm1693_vm1, %v2965_v12, %v4985_v34  ;;  %v5391_v8 = vpop.xlane.xlu1 %1514  ;;  %v2638_v37 = vsel %vm440_vm13, 1.0, %v6067_v46  ;;  %vm1694_vm13 = vcmp.gt.f32.partialorder %v4658_v13, 0.0  ;;  %v5417_v34 = vpop.xlane.xlu0 %1516 }
 0x10a   : > { %v2635_v39 = vsel %vm6244_vm3, 1.0, %v6067_v46  ;;  %v797_v1 = vpop.f32.mrf.mxu0  ;;  %2333 = vst [vmem:[%s5371_s16 + $0x8] sm:$0xff] %v2205_v21  ;;  %vm1695_vm3 = vcmp.gt.f32.partialorder %v4696_v55, 0.0  ;;  %1654 = vadd.xlane.f32.xlu1 %v2638_v37  ;;  %vm1697_vm1 = vcmp.gt.f32.partialorder %v4730_v14, 0.0 }
 0x10b   : > { %1648 = vadd.xlane.f32.xlu0 %v2635_v39  ;;  %v2204_v57 = vsel %vm1692_vm6, %v797_v1, %v4988_v58  ;;  %vm1699_vm6 = vcmp.gt.f32.partialorder %v4760_v26, 0.0 }
 0x10c   : > { %v2968_v23 = vpop.f32.mrf.mxu0  ;;  %2332 = vst [vmem:[%s5371_s16] sm:$0xff] %v2204_v57  ;;  %v6247_v57 = vld [vmem:[#allocation9_spill] sm:$0xff] }
 0x10d   : > { %v2207_v12 = vsel %vm1695_vm3, %v2968_v23, %v4991_v31  ;;  %v5409_v40 = vpop.xlane.xlu1 %1518  ;;  %vm6248_vm14 = vcmp.eq.s32.totalorder %v6247_v57, %v3298_v16  ;;  %v2642_v31 = vsel %vm444_vm5, 1.0, %v6067_v46  ;;  %v5435_v39 = vpop.xlane.xlu0 %1520  ;;  %vm1698_vm5 = vcmp.gt.f32.partialorder %v4770_v29, 0.0 }
 0x10e   : > { %v807_v21 = vpop.f32.mrf.mxu0  ;;  %2335 = vst [vmem:[%s5371_s16 + $0x18] sm:$0xff] %v2207_v12  ;;  %v2639_v13 = vsel %vm6248_vm14, 1.0, %v6067_v46  ;;  %1658 = vadd.xlane.f32.xlu1 %v2640_v17  ;;  %v2643_v29 = vsel %vm445_vm2, 1.0, %v6067_v46  ;;  %vm1703_vm2 = vcmp.gt.f32.partialorder %v4809_v43, 0.0  ;;  %vm1707_vm3 = vcmp.gt.f32.partialorder %v4837_v44, 0.0 }
 0x10f   : > { %1652 = vadd.xlane.f32.xlu0 %v2637_v61  ;;  %v2206_v55 = vsel %vm1694_vm13, %v807_v21, %v4994_v41  ;;  %vm6250_vm13 = vcmp.eq.s32.totalorder %v4719_v24, %v3298_v16  ;;  %vm6251_vm14 = vcmp.eq.s32.totalorder %v4690_v11, %v3298_v16 }
 0x110   : > { %v2971_v37 = vpop.f32.mrf.mxu0  ;;  %2334 = vst [vmem:[%s5371_s16 + $0x10] sm:$0xff] %v2206_v55  ;;  %v2652_v5 = vsel %vm6250_vm13, 1.0, %v6067_v46  ;;  %v2651_v4 = vsel %vm6251_vm14, 1.0, %v6067_v46 }
 0x111   : > { %v2209_v58 = vsel %vm1697_vm1, %v2971_v37, %v4997_v49  ;;  %v5427_v59 = vpop.xlane.xlu1 %1522  ;;  %v5453_v61 = vpop.xlane.xlu0 %1524  ;;  %vm1709_vm1 = vcmp.gt.f32.partialorder %v4849_v51, 0.0  ;;  %v6253_v51 = vld [vmem:[#allocation7_spill] sm:$0xff] }
 0x112   : > { %v817_v41 = vpop.f32.mrf.mxu0  ;;  %2337 = vst [vmem:[%s5371_s16 + $0x28] sm:$0xff] %v2209_v58  ;;  %1662 = vadd.xlane.f32.xlu1 %v2642_v31 }
 0x113   : > { %1656 = vadd.xlane.f32.xlu0 %v2639_v13  ;;  %v2208_v14 = vsel %vm1696_vm0, %v817_v41, %v5000_v20  ;;  %vm1708_vm0 = vcmp.gt.f32.partialorder %v4855_v19, 0.0 }
 0x114   : > { %v2974_v49 = vpop.f32.mrf.mxu0  ;;  %2336 = vst [vmem:[%s5371_s16 + $0x20] sm:$0xff] %v2208_v14 }
 0x115   : > { %v2211_v1 = vsel %vm1699_vm6, %v2974_v49, %v5003_v45  ;;  %v5445_v25 = vpop.xlane.xlu1 %1526  ;;  %v5459_v45 = vpop.f32.mrf.mxu1  ;;  %vm6252_vm6 = vcmp.eq.s32.totalorder %v4753_v30, %v3298_v16 }
 0x116   : > { %v827_v20 = vpop.f32.mrf.mxu0  ;;  %2339 = vst [vmem:[%s5371_s16 + $0x38] sm:$0xff] %v2211_v1  ;;  %1666 = vadd.xlane.f32.xlu1 %v2644_v54  ;;  %v5475_v17 = vpop.xlane.xlu0 %1528  ;;  %v2654_v11 = vsel %vm6252_vm6, 1.0, %v6067_v46 }
 0x117   : > { %1660 = vadd.xlane.f32.xlu0 %v2641_v52  ;;  %v2210_v26 = vsel %vm1698_vm5, %v827_v20, %v5006_v50  ;;  %v5464_v12 = vpop.f32.mrf.mxu1 }
 0x118   : > { %v2977_v23 = vpop.f32.mrf.mxu0  ;;  %2338 = vst [vmem:[%s5371_s16 + $0x30] sm:$0xff] %v2210_v26 }
 0x119   : > { %v2213_v60 = vsel %vm1701_vm8, %v2977_v23, %v5009_v6  ;;  %v5467_v50 = vpop.xlane.xlu1 %1530  ;;  %v5481_v6 = vpop.f32.mrf.mxu1 }
 0x11a   : > { %v837_v21 = vpop.f32.mrf.mxu0  ;;  %2341 = vst [vmem:[%s5371_s16 + $0x48] sm:$0xff] %v2213_v60  ;;  %1670 = vadd.xlane.f32.xlu1 %v2646_v36  ;;  %v5497_v37 = vpop.xlane.xlu0 %1532  ;;  %v6256_v36 = vld [vmem:[#allocation13_spill] sm:$0xff] }
 0x11b   : > { %1664 = vadd.xlane.f32.xlu0 %v2643_v29  ;;  %v2212_v27 = vsel %vm1700_vm4, %v837_v21, %v5012_v63  ;;  %v5486_v57 = vpop.f32.mrf.mxu1  ;;  %vm1711_vm8 = vcmp.gt.f32.partialorder %v6256_v36, 0.0 }
 0x11c   : > { %v2980_v55 = vpop.f32.mrf.mxu0  ;;  %2340 = vst [vmem:[%s5371_s16 + $0x40] sm:$0xff] %v2212_v27 }
 0x11d   : > { %v2215_v2 = vsel %vm1703_vm2, %v2980_v55, %v5015_v53  ;;  %v5489_v63 = vpop.xlane.xlu1 %1534  ;;  %v5503_v53 = vpop.f32.mrf.mxu1 }
 0x11e   : > { %v847_v13 = vpop.f32.mrf.mxu0  ;;  %2343 = vst [vmem:[%s5371_s16 + $0x58] sm:$0xff] %v2215_v2  ;;  %1674 = vadd.xlane.f32.xlu1 %v2648_v48  ;;  %v5519_v14 = vpop.xlane.xlu0 %1536  ;;  %v6258_v2 = vld [vmem:[#allocation14_spill] sm:$0xff] }
 0x11f   : > { %1668 = vadd.xlane.f32.xlu0 %v2645_v28  ;;  %v2214_v43 = vsel %vm1702_vm9, %v847_v13, %v5018_v3  ;;  %v5508_v41 = vpop.f32.mrf.mxu1  ;;  %v6257_v28 = vld [vmem:[#allocation29_spill] sm:$0xff]  ;;  %vm1710_vm4 = vcmp.gt.f32.partialorder %v6258_v2, 0.0  ;;  %v6270_v2 = vld [vmem:[#allocation34_spill] sm:$0xff] }
 0x120   : > { %v2983_v58 = vpop.f32.mrf.mxu0  ;;  %2342 = vst [vmem:[%s5371_s16 + $0x50] sm:$0xff] %v2214_v43 }
 0x121   : > { %v2217_v9 = vsel %vm1705_vm10, %v2983_v58, %v5021_v56  ;;  %v5511_v3 = vpop.xlane.xlu1 %1538  ;;  %v5525_v56 = vpop.f32.mrf.mxu1  ;;  %v6260_v58 = vld [vmem:[#allocation30_spill] sm:$0xff] }
 0x122   : > { %v857_v31 = vpop.f32.mrf.mxu0  ;;  %2345 = vst [vmem:[%s5371_s16 + $0x68] sm:$0xff] %v2217_v9  ;;  %1678 = vadd.xlane.f32.xlu1 %v2650_v62  ;;  %v5541_v20 = vpop.xlane.xlu0 %1540  ;;  %v6261_v62 = vld [vmem:[#allocation11_spill] sm:$0xff] }
 0x123   : > { %1672 = vadd.xlane.f32.xlu0 %v2647_v38  ;;  %v2216_v47 = vsel %vm1704_vm7, %v857_v31, %v5024_v32  ;;  %v5530_v49 = vpop.f32.mrf.mxu1  ;;  %v2656_v38 = vsel %vm458_vm15, 1.0, %v6067_v46  ;;  %vm6262_vm2 = vcmp.eq.s32.totalorder %v6261_v62, %v3298_v16  ;;  %v6272_v62 = vld [vmem:[#allocation35_spill] sm:$0xff] }
 0x124   : > { %v2986_v52 = vpop.f32.mrf.mxu0  ;;  %2344 = vst [vmem:[%s5371_s16 + $0x60] sm:$0xff] %v2216_v47  ;;  %v2655_v47 = vsel %vm6262_vm2, 1.0, %v6067_v46 }
 0x125   : > { %v2219_v15 = vsel %vm1707_vm3, %v2986_v52, %v5027_v33  ;;  %v5533_v32 = vpop.xlane.xlu1 %1542  ;;  %v5547_v33 = vpop.f32.mrf.mxu1  ;;  %v6263_v52 = vld [vmem:[#allocation15_spill] sm:$0xff] }
 0x126   : > { %v867_v1 = vpop.f32.mrf.mxu0  ;;  %2347 = vst [vmem:[%s5371_s16 + $0x78] sm:$0xff] %v2219_v15  ;;  %1682 = vadd.xlane.f32.xlu1 %v2652_v5  ;;  %v5563_v60 = vpop.xlane.xlu0 %1544  ;;  %vm1713_vm9 = vcmp.gt.f32.partialorder %v6263_v52, 0.0 }
 0x127   : > { %1676 = vadd.xlane.f32.xlu0 %v2649_v35  ;;  %v2218_v44 = vsel %vm1706_vm11, %v867_v1, %v5030_v10  ;;  %v5552_v26 = vpop.f32.mrf.mxu1  ;;  %v6264_v1 = vld [vmem:[#allocation31_spill] sm:$0xff] }
 0x128   : > { %v2989_v54 = vpop.f32.mrf.mxu0  ;;  %2346 = vst [vmem:[%s5371_s16 + $0x70] sm:$0xff] %v2218_v44 }
 0x129   : > { %v2221_v24 = vsel %vm1709_vm1, %v2989_v54, %v5033_v22  ;;  %v5555_v10 = vpop.xlane.xlu1 %1546  ;;  %v6254_v22 = vld [vmem:[#allocation10_spill] sm:$0xff]  ;;  %v5569_v21 = vpop.f32.mrf.mxu1 }
 0x12a   : > { %v877_v29 = vpop.f32.mrf.mxu0  ;;  %2349 = vst [vmem:[%s5371_s16 + $0x88] sm:$0xff] %v2221_v24  ;;  %vm6255_vm5 = vcmp.eq.s32.totalorder %v6254_v22, %v3298_v16  ;;  %1686 = vadd.xlane.f32.xlu1 %v2654_v11  ;;  %v5585_v31 = vpop.xlane.xlu0 %1548  ;;  %v6268_v22 = vld [vmem:[#allocation33_spill] sm:$0xff] }
 0x12b   : > { %1680 = vadd.xlane.f32.xlu0 %v2651_v4  ;;  %v2220_v23 = vsel %vm1708_vm0, %v877_v29, %v6253_v51  ;;  %v2653_v19 = vsel %vm6255_vm5, 1.0, %v6067_v46  ;;  %v5574_v55 = vpop.f32.mrf.mxu1  ;;  %v6265_v4 = vld [vmem:[#allocation16_spill] sm:$0xff]  ;;  %v6267_v51 = vld [vmem:[#allocation17_spill] sm:$0xff] }
 0x12c   : > { %v2992_v27 = vpop.f32.mrf.mxu0  ;;  %2348 = vst [vmem:[%s5371_s16 + $0x80] sm:$0xff] %v2220_v23  ;;  %vm1712_vm15 = vcmp.gt.f32.partialorder %v6265_v4, 0.0  ;;  %v6266_v46 = vld [vmem:[#allocation32_spill] sm:$0xff]  ;;  %vm1715_vm10 = vcmp.gt.f32.partialorder %v6267_v51, 0.0  ;;  %v6275_v51 = vld [vmem:[#allocation21_spill] sm:$0xff] }
 0x12d   : > { %v2223_v30 = vsel %vm1711_vm8, %v2992_v27, %v6257_v28  ;;  %v5577_v13 = vpop.xlane.xlu1 %1550  ;;  %v5591_v35 = vpop.f32.mrf.mxu1  ;;  %v6269_v27 = vld [vmem:[#allocation18_spill] sm:$0xff]  ;;  %v6274_v4 = vld [vmem:[#allocation36_spill] sm:$0xff]  ;;  %vm1719_vm11 = vcmp.gt.f32.partialorder %v6275_v51, 0.0 }
 0x12e   : > { %v887_v48 = vpop.f32.mrf.mxu0  ;;  %2351 = vst [vmem:[%s5371_s16 + $0x98] sm:$0xff] %v2223_v30  ;;  %1690 = vadd.xlane.f32.xlu1 %v2656_v38  ;;  %v5603_v29 = vpop.xlane.xlu0 %1552  ;;  %vm1714_vm7 = vcmp.gt.f32.partialorder %v6269_v27, 0.0  ;;  %v6281_v51 = vld [vmem:[#allocation40_spill] sm:$0xff] }
 0x12f   : > { %1684 = vadd.xlane.f32.xlu0 %v2653_v19  ;;  %v2222_v9 = vsel %vm1710_vm4, %v887_v48, %v6260_v58  ;;  %v5596_v44 = vpop.f32.mrf.mxu1  ;;  %v6271_v58 = vld [vmem:[#allocation19_spill] sm:$0xff] }
 0x130   : > { %v2995_v15 = vpop.f32.mrf.mxu0  ;;  %2350 = vst [vmem:[%s5371_s16 + $0x90] sm:$0xff] %v2222_v9  ;;  %vm1717_vm12 = vcmp.gt.f32.partialorder %v6271_v58, 0.0  ;;  %v6278_v58 = vld [vmem:[#allocation39_spill] sm:$0xff] }
 0x131   : > { %v2225_v5 = vsel %vm1713_vm9, %v2995_v15, %v6264_v1  ;;  %v5599_v54 = vpop.xlane.xlu1 %1554  ;;  %v5605_v11 = vpop.f32.mrf.mxu1  ;;  %v6273_v15 = vld [vmem:[#allocation20_spill] sm:$0xff] }
 0x132   : > { %v897_v16 = vpop.f32.mrf.mxu0  ;;  %2353 = vst [vmem:[%s5371_s16 + $0xa8] sm:$0xff] %v2225_v5  ;;  %v5617_v43 = vpop.xlane.xlu0 %1556  ;;  %vm1716_vm3 = vcmp.gt.f32.partialorder %v6273_v15, 0.0  ;;  %v6279_v15 = vld [vmem:[#allocation23_spill] sm:$0xff] }
 0x133   : > { %1688 = vadd.xlane.f32.xlu0 %v2655_v47  ;;  %v2224_v24 = vsel %vm1712_vm15, %v897_v16, %v6266_v46  ;;  %v5610_v36 = vpop.f32.mrf.mxu1  ;;  %vm1721_vm1 = vcmp.gt.f32.partialorder %v6279_v15, 0.0  ;;  %v6285_v15 = vld [vmem:[#allocation25_spill] sm:$0xff] }
 0x134   : > { %v2998_v23 = vpop.f32.mrf.mxu0  ;;  %2352 = vst [vmem:[%s5371_s16 + $0xa0] sm:$0xff] %v2224_v24  ;;  %vm1723_vm8 = vcmp.gt.f32.partialorder %v6285_v15, 0.0  ;;  %v6291_v15 = vld [vmem:[#allocation5_spill] sm:$0xff] }
 0x135   : > { %v2227_v19 = vsel %vm1715_vm10, %v2998_v23, %v6268_v22  ;;  %v5613_v28 = vpop.xlane.xlu1 %1558  ;;  %v5619_v38 = vpop.f32.mrf.mxu1  ;;  %v6276_v22 = vld [vmem:[#allocation37_spill] sm:$0xff]  ;;  %vm1725_vm15 = vcmp.gt.f32.partialorder %v6291_v15, 0.0  ;;  %v6297_v15 = vld [vmem:[#allocation6_spill] sm:$0xff] }
 0x136   : > { %v907_v30 = vpop.f32.mrf.mxu0  ;;  %2355 = vst [vmem:[%s5371_s16 + $0xb8] sm:$0xff] %v2227_v19  ;;  %v5631_v46 = vpop.xlane.xlu0 %1560 }
 0x137   : > { %v2226_v48 = vsel %vm1714_vm7, %v907_v30, %v6270_v2  ;;  %v5624_v52 = vpop.f32.mrf.mxu1  ;;  %v6277_v30 = vld [vmem:[#allocation22_spill] sm:$0xff] }
 0x138   : > { %v3001_v9 = vpop.f32.mrf.mxu0  ;;  %2354 = vst [vmem:[%s5371_s16 + $0xb0] sm:$0xff] %v2226_v48  ;;  %vm1718_vm13 = vcmp.gt.f32.partialorder %v6277_v30, 0.0 }
 0x139   : > { %v2229_v47 = vsel %vm1717_vm12, %v3001_v9, %v6272_v62  ;;  %v5627_v1 = vpop.xlane.xlu1 %1562  ;;  %v5633_v24 = vpop.f32.mrf.mxu1 }
 0x13a   : > { %v917_v5 = vpop.f32.mrf.mxu0  ;;  %2357 = vst [vmem:[%s5371_s16 + $0xc8] sm:$0xff] %v2229_v47  ;;  %v1565_v62 = vpop.xlane.xlu0 %1564 }
 0x13b   : > { %v2228_v16 = vsel %vm1716_vm3, %v917_v5, %v6274_v4  ;;  %v5638_v27 = vpop.f32.mrf.mxu1  ;;  %v6280_v5 = vld [vmem:[#allocation38_spill] sm:$0xff]  ;;  %vm1756_vm0 = vcmp.gt.f32.partialorder %v1565_v62, 0.0  ;;  %vm1727_vm3 = vcmp.gt.f32.partialorder %v6297_v15, 0.0 }
 0x13c   : > { %v3004_v23 = vpop.f32.mrf.mxu0  ;;  %2356 = vst [vmem:[%s5371_s16 + $0xc0] sm:$0xff] %v2228_v16  ;;  %v6303_v15 = vld [vmem:[#allocation54_spill] sm:$0xff] }
 0x13d   : > { %v2231_v19 = vsel %vm1719_vm11, %v3004_v23, %v6276_v22  ;;  %v1567_v2 = vpop.xlane.xlu1 %1566  ;;  %v5643_v47 = vpop.f32.mrf.mxu1  ;;  %v2268_v23 = vsel %vm1756_vm0, %v5464_v12, %v6281_v51  ;;  %v6282_v22 = vld [vmem:[#allocation41_spill] sm:$0xff]  ;;  %v6287_v51 = vld [vmem:[#allocation44_spill] sm:$0xff] }
 0x13e   : > { %v927_v48 = vpop.f32.mrf.mxu0  ;;  %2359 = vst [vmem:[%s5371_s16 + $0xd8] sm:$0xff] %v2231_v19  ;;  %vm1757_vm14 = vcmp.gt.f32.partialorder %v1567_v2, 0.0  ;;  %v6283_v2 = vld [vmem:[#allocation24_spill] sm:$0xff]  ;;  %2396 = vst [vmem:[%s5371_s16 + $0x200] sm:$0xff] %v2268_v23  ;;  %v1569_v62 = vpop.xlane.xlu0 %1568  ;;  %v6288_v23 = vld [vmem:[#allocation45_spill] sm:$0xff] }
 0x13f   : > { %v2230_v9 = vsel %vm1718_vm13, %v927_v48, %v6278_v58  ;;  %v2269_v4 = vsel %vm1757_vm14, %v5459_v45, %v6280_v5  ;;  %v5652_v30 = vpop.f32.mrf.mxu1  ;;  %vm1720_vm6 = vcmp.gt.f32.partialorder %v6283_v2, 0.0  ;;  %v6284_v45 = vld [vmem:[#allocation43_spill] sm:$0xff]  ;;  %v6286_v5 = vld [vmem:[#allocation42_spill] sm:$0xff]  ;;  %vm1758_vm4 = vcmp.gt.f32.partialorder %v1569_v62, 0.0 }
 0x140   : > { %v3007_v16 = vpop.f32.mrf.mxu0  ;;  %2358 = vst [vmem:[%s5371_s16 + $0xd0] sm:$0xff] %v2230_v9  ;;  %2397 = vst [vmem:[%s5371_s16 + $0x208] sm:$0xff] %v2269_v4 }
 0x141   : > { %v2233_v19 = vsel %vm1721_vm1, %v3007_v16, %v6282_v22  ;;  %v1571_v48 = vpop.xlane.xlu1 %1570  ;;  %v5659_v12 = vpop.f32.mrf.mxu1  ;;  %v2270_v22 = vsel %vm1758_vm4, %v5486_v57, %v6287_v51  ;;  %v6293_v51 = vld [vmem:[#allocation48_spill] sm:$0xff]  ;;  %vm1729_vm1 = vcmp.gt.f32.partialorder %v5351_v0, 0.0 }
 0x142   : > { %v937_v58 = vpop.f32.mrf.mxu0  ;;  %2361 = vst [vmem:[%s5371_s16 + $0xe8] sm:$0xff] %v2233_v19  ;;  %vm1759_vm5 = vcmp.gt.f32.partialorder %v1571_v48, 0.0  ;;  %v6289_v48 = vld [vmem:[#allocation26_spill] sm:$0xff]  ;;  %2398 = vst [vmem:[%s5371_s16 + $0x210] sm:$0xff] %v2270_v22  ;;  %v1573_v62 = vpop.xlane.xlu0 %1572  ;;  %v6294_v22 = vld [vmem:[#allocation49_spill] sm:$0xff] }
 0x143   : > { %v2232_v9 = vsel %vm1720_vm6, %v937_v58, %v6284_v45  ;;  %v2271_v4 = vsel %vm1759_vm5, %v5481_v6, %v6286_v5  ;;  %v5668_v2 = vpop.f32.mrf.mxu1  ;;  %vm1722_vm2 = vcmp.gt.f32.partialorder %v6289_v48, 0.0  ;;  %v6290_v6 = vld [vmem:[#allocation47_spill] sm:$0xff]  ;;  %v6292_v5 = vld [vmem:[#allocation46_spill] sm:$0xff]  ;;  %vm1760_vm10 = vcmp.gt.f32.partialorder %v1573_v62, 0.0 }
 0x144   : > { %v3010_v16 = vpop.f32.mrf.mxu0  ;;  %2360 = vst [vmem:[%s5371_s16 + $0xe0] sm:$0xff] %v2232_v9  ;;  %2399 = vst [vmem:[%s5371_s16 + $0x218] sm:$0xff] %v2271_v4  ;;  %vm1728_vm6 = vcmp.gt.f32.partialorder %v5373_v42, 0.0 }
 0x145   : > { %v2235_v19 = vsel %vm1723_vm8, %v3010_v16, %v6288_v23  ;;  %v1575_v58 = vpop.xlane.xlu1 %1574  ;;  %v5675_v57 = vpop.f32.mrf.mxu1  ;;  %v2272_v23 = vsel %vm1760_vm10, %v5508_v41, %v6293_v51  ;;  %v6299_v51 = vld [vmem:[#allocation52_spill] sm:$0xff]  ;;  %vm1731_vm8 = vcmp.gt.f32.partialorder %v5391_v8, 0.0 }
 0x146   : > { %v947_v45 = vpop.f32.mrf.mxu0  ;;  %2363 = vst [vmem:[%s5371_s16 + $0xf8] sm:$0xff] %v2235_v19  ;;  %vm1761_vm9 = vcmp.gt.f32.partialorder %v1575_v58, 0.0  ;;  %v6295_v58 = vld [vmem:[#allocation27_spill] sm:$0xff]  ;;  %2400 = vst [vmem:[%s5371_s16 + $0x220] sm:$0xff] %v2272_v23  ;;  %v1577_v62 = vpop.xlane.xlu0 %1576  ;;  %v6300_v23 = vld [vmem:[#allocation53_spill] sm:$0xff] }
 0x147   : > { %v2234_v9 = vsel %vm1722_vm2, %v947_v45, %v6290_v6  ;;  %v2273_v4 = vsel %vm1761_vm9, %v5503_v53, %v6292_v5  ;;  %v5684_v48 = vpop.f32.mrf.mxu1  ;;  %vm1724_vm7 = vcmp.gt.f32.partialorder %v6295_v58, 0.0  ;;  %v6296_v53 = vld [vmem:[#allocation51_spill] sm:$0xff]  ;;  %v6298_v5 = vld [vmem:[#allocation50_spill] sm:$0xff]  ;;  %vm1762_vm11 = vcmp.gt.f32.partialorder %v1577_v62, 0.0 }
 0x148   : > { %v3013_v16 = vpop.f32.mrf.mxu0  ;;  %2362 = vst [vmem:[%s5371_s16 + $0xf0] sm:$0xff] %v2234_v9  ;;  %2401 = vst [vmem:[%s5371_s16 + $0x228] sm:$0xff] %v2273_v4  ;;  %vm1730_vm2 = vcmp.gt.f32.partialorder %v5399_v7, 0.0 }
 0x149   : > { %v2237_v19 = vsel %vm1725_vm15, %v3013_v16, %v6294_v22  ;;  %v1579_v45 = vpop.xlane.xlu1 %1578  ;;  %v5691_v41 = vpop.f32.mrf.mxu1  ;;  %v2274_v22 = vsel %vm1762_vm11, %v5530_v49, %v6299_v51  ;;  %vm1733_vm15 = vcmp.gt.f32.partialorder %v5409_v40, 0.0 }
 0x14a   : > { %v957_v6 = vpop.f32.mrf.mxu0  ;;  %2365 = vst [vmem:[%s5371_s16 + $0x108] sm:$0xff] %v2237_v19  ;;  %vm1763_vm12 = vcmp.gt.f32.partialorder %v1579_v45, 0.0  ;;  %v6301_v45 = vld [vmem:[#allocation28_spill] sm:$0xff]  ;;  %2402 = vst [vmem:[%s5371_s16 + $0x230] sm:$0xff] %v2274_v22  ;;  %v1581_v62 = vpop.xlane.xlu0 %1580  ;;  %v6305_v22 = vld [vmem:[#allocation57_spill] sm:$0xff] }
 0x14b   : > { %v2236_v9 = vsel %vm1724_vm7, %v957_v6, %v6296_v53  ;;  %v2275_v4 = vsel %vm1763_vm12, %v5525_v56, %v6298_v5  ;;  %v5700_v58 = vpop.f32.mrf.mxu1  ;;  %vm1726_vm13 = vcmp.gt.f32.partialorder %v6301_v45, 0.0  ;;  %v6302_v56 = vld [vmem:[#allocation55_spill] sm:$0xff]  ;;  %vm1764_vm0 = vcmp.gt.f32.partialorder %v1581_v62, 0.0  ;;  %v6308_v62 = vld [vmem:[#allocation60_spill] sm:$0xff] }
 0x14c   : > { %v3016_v16 = vpop.f32.mrf.mxu0  ;;  %2364 = vst [vmem:[%s5371_s16 + $0x100] sm:$0xff] %v2236_v9  ;;  %2403 = vst [vmem:[%s5371_s16 + $0x238] sm:$0xff] %v2275_v4  ;;  %vm1732_vm7 = vcmp.gt.f32.partialorder %v5417_v34, 0.0 }
 0x14d   : > { %v2239_v19 = vsel %vm1727_vm3, %v3016_v16, %v6300_v23  ;;  %v1583_v6 = vpop.xlane.xlu1 %1582  ;;  %v5707_v49 = vpop.f32.mrf.mxu1  ;;  %v6304_v16 = vld [vmem:[#allocation56_spill] sm:$0xff]  ;;  %vm1735_vm3 = vcmp.gt.f32.partialorder %v5427_v59, 0.0 }
 0x14e   : > { %v967_v53 = vpop.f32.mrf.mxu0  ;;  %2367 = vst [vmem:[%s5371_s16 + $0x118] sm:$0xff] %v2239_v19  ;;  %vm1765_vm14 = vcmp.gt.f32.partialorder %v1583_v6, 0.0  ;;  %v2276_v51 = vsel %vm1764_vm0, %v5552_v26, %v6304_v16 }
 0x14f   : > { %v2238_v9 = vsel %vm1726_vm13, %v967_v53, %v6302_v56  ;;  %v2277_v5 = vsel %vm1765_vm14, %v5547_v33, %v6303_v15  ;;  %v5716_v19 = vpop.f32.mrf.mxu1  ;;  %2404 = vst [vmem:[%s5371_s16 + $0x240] sm:$0xff] %v2276_v51  ;;  %v6306_v33 = vld [vmem:[#allocation59_spill] sm:$0xff]  ;;  %v1585_v53 = vpop.xlane.xlu0 %1584  ;;  %v6307_v56 = vld [vmem:[#allocation58_spill] sm:$0xff]  ;;  %vm1734_vm13 = vcmp.gt.f32.partialorder %v5435_v39, 0.0 }
 0x150   : > { %v3019_v4 = vpop.f32.mrf.mxu0  ;;  %2366 = vst [vmem:[%s5371_s16 + $0x110] sm:$0xff] %v2238_v9  ;;  %2405 = vst [vmem:[%s5371_s16 + $0x248] sm:$0xff] %v2277_v5  ;;  %vm1766_vm4 = vcmp.gt.f32.partialorder %v1585_v53, 0.0  ;;  %v6309_v5 = vld [vmem:[#allocation61_spill] sm:$0xff] }
 0x151   : > { %v2241_v23 = vsel %vm1729_vm1, %v3019_v4, %v6305_v22  ;;  %v1587_v45 = vpop.xlane.xlu1 %1586  ;;  %v5723_v26 = vpop.f32.mrf.mxu1  ;;  %v2278_v15 = vsel %vm1766_vm4, %v5574_v55, %v6308_v62  ;;  %v6313_v53 = vld [vmem:[#allocation65_spill] sm:$0xff]  ;;  %vm1737_vm1 = vcmp.gt.f32.partialorder %v5445_v25, 0.0 }
 0x152   : > { %v977_v0 = vpop.f32.mrf.mxu0  ;;  %2369 = vst [vmem:[%s5371_s16 + $0x128] sm:$0xff] %v2241_v23  ;;  %vm1767_vm5 = vcmp.gt.f32.partialorder %v1587_v45, 0.0  ;;  %2406 = vst [vmem:[%s5371_s16 + $0x250] sm:$0xff] %v2278_v15  ;;  %v6311_v45 = vld [vmem:[#allocation62_spill] sm:$0xff] }
 0x153   : > { %v2240_v6 = vsel %vm1728_vm6, %v977_v0, %v6306_v33  ;;  %v2279_v9 = vsel %vm1767_vm5, %v5569_v21, %v6307_v56  ;;  %v5732_v16 = vpop.f32.mrf.mxu1  ;;  %v6310_v21 = vld [vmem:[#allocation63_spill] sm:$0xff]  ;;  %v1589_v23 = vpop.xlane.xlu0 %1588  ;;  %v6312_v33 = vld [vmem:[#allocation64_spill] sm:$0xff]  ;;  %vm1736_vm6 = vcmp.gt.f32.partialorder %v5453_v61, 0.0 }
 0x154   : > { %v3022_v42 = vpop.f32.mrf.mxu0  ;;  %2368 = vst [vmem:[%s5371_s16 + $0x120] sm:$0xff] %v2240_v6  ;;  %2407 = vst [vmem:[%s5371_s16 + $0x258] sm:$0xff] %v2279_v9  ;;  %vm1768_vm10 = vcmp.gt.f32.partialorder %v1589_v23, 0.0 }
 0x155   : > { %v2243_v4 = vsel %vm1731_vm8, %v3022_v42, %v6309_v5  ;;  %v1591_v51 = vpop.xlane.xlu1 %1590  ;;  %v5739_v55 = vpop.f32.mrf.mxu1  ;;  %v2280_v6 = vsel %vm1768_vm10, %v5596_v44, %v6312_v33  ;;  %v6315_v5 = vld [vmem:[#allocation66_spill] sm:$0xff]  ;;  %vm1739_vm8 = vcmp.gt.f32.partialorder %v5467_v50, 0.0 }
 0x156   : > { %v987_v8 = vpop.f32.mrf.mxu0  ;;  %2371 = vst [vmem:[%s5371_s16 + $0x138] sm:$0xff] %v2243_v4  ;;  %vm1769_vm9 = vcmp.gt.f32.partialorder %v1591_v51, 0.0  ;;  %2408 = vst [vmem:[%s5371_s16 + $0x260] sm:$0xff] %v2280_v6  ;;  %v6316_v51 = vld [vmem:[#allocation68_spill] sm:$0xff]  ;;  %v6319_v33 = vld [vmem:[#allocation70_spill] sm:$0xff] }
 0x157   : > { %v2242_v22 = vsel %vm1730_vm2, %v987_v8, %v6310_v21  ;;  %v2281_v0 = vsel %vm1769_vm9, %v5591_v35, %v6311_v45  ;;  %v5748_v9 = vpop.f32.mrf.mxu1  ;;  %v6314_v35 = vld [vmem:[#allocation67_spill] sm:$0xff]  ;;  %v1593_v15 = vpop.xlane.xlu0 %1592  ;;  %v6317_v21 = vld [vmem:[#allocation69_spill] sm:$0xff]  ;;  %vm1738_vm2 = vcmp.gt.f32.partialorder %v5475_v17, 0.0 }
 0x158   : > { %v3025_v7 = vpop.f32.mrf.mxu0  ;;  %2370 = vst [vmem:[%s5371_s16 + $0x130] sm:$0xff] %v2242_v22  ;;  %2409 = vst [vmem:[%s5371_s16 + $0x268] sm:$0xff] %v2281_v0  ;;  %vm1770_vm11 = vcmp.gt.f32.partialorder %v1593_v15, 0.0 }
 0x159   : > { %v2245_v56 = vsel %vm1733_vm15, %v3025_v7, %v6313_v53  ;;  %v1595_v42 = vpop.xlane.xlu1 %1594  ;;  %v5755_v44 = vpop.f32.mrf.mxu1  ;;  %v2282_v8 = vsel %vm1770_vm11, %v5610_v36, %v6316_v51  ;;  %v6320_v53 = vld [vmem:[#allocation72_spill] sm:$0xff]  ;;  %vm1741_vm15 = vcmp.gt.f32.partialorder %v5489_v63, 0.0 }
 0x15a   : > { %v997_v40 = vpop.f32.mrf.mxu0  ;;  %2373 = vst [vmem:[%s5371_s16 + $0x148] sm:$0xff] %v2245_v56  ;;  %vm1771_vm12 = vcmp.gt.f32.partialorder %v1595_v42, 0.0  ;;  %2410 = vst [vmem:[%s5371_s16 + $0x270] sm:$0xff] %v2282_v8  ;;  %v6321_v42 = vld [vmem:[#allocation73_spill] sm:$0xff]  ;;  %v6324_v51 = vld [vmem:[#allocation76_spill] sm:$0xff] }
 0x15b   : > { %v2244_v62 = vsel %vm1732_vm7, %v997_v40, %v6314_v35  ;;  %v2283_v4 = vsel %vm1771_vm12, %v5605_v11, %v6315_v5  ;;  %v5764_v23 = vpop.f32.mrf.mxu1  ;;  %v6318_v11 = vld [vmem:[#allocation71_spill] sm:$0xff]  ;;  %v1597_v7 = vpop.xlane.xlu0 %1596  ;;  %vm1740_vm7 = vcmp.gt.f32.partialorder %v5497_v37, 0.0 }
 0x15c   : > { %v3028_v34 = vpop.f32.mrf.mxu0  ;;  %2372 = vst [vmem:[%s5371_s16 + $0x140] sm:$0xff] %v2244_v62  ;;  %2411 = vst [vmem:[%s5371_s16 + $0x278] sm:$0xff] %v2283_v4  ;;  %vm1772_vm0 = vcmp.gt.f32.partialorder %v1597_v7, 0.0  ;;  %v6323_v4 = vld [vmem:[#allocation74_spill] sm:$0xff] }
 0x15d   : > { %v2247_v22 = vsel %vm1735_vm3, %v3028_v34, %v6317_v21  ;;  %v1599_v45 = vpop.xlane.xlu1 %1598  ;;  %v5771_v36 = vpop.f32.mrf.mxu1  ;;  %v2284_v56 = vsel %vm1772_vm0, %v5624_v52, %v6320_v53  ;;  %v6325_v21 = vld [vmem:[#allocation77_spill] sm:$0xff]  ;;  %v6327_v7 = vld [vmem:[#allocation78_spill] sm:$0xff]  ;;  %vm1743_vm3 = vcmp.gt.f32.partialorder %v5511_v3, 0.0 }
 0x15e   : > { %v1007_v59 = vpop.f32.mrf.mxu0  ;;  %2375 = vst [vmem:[%s5371_s16 + $0x158] sm:$0xff] %v2247_v22  ;;  %vm1773_vm14 = vcmp.gt.f32.partialorder %v1599_v45, 0.0  ;;  %2412 = vst [vmem:[%s5371_s16 + $0x280] sm:$0xff] %v2284_v56  ;;  %v6329_v53 = vld [vmem:[#allocation81_spill] sm:$0xff] }
 0x15f   : > { %v2246_v0 = vsel %vm1734_vm13, %v1007_v59, %v6318_v11  ;;  %v2285_v6 = vsel %vm1773_vm14, %v5619_v38, %v6319_v33  ;;  %v5780_v35 = vpop.f32.mrf.mxu1  ;;  %v6322_v38 = vld [vmem:[#allocation75_spill] sm:$0xff]  ;;  %v1601_v5 = vpop.xlane.xlu0 %1600  ;;  %vm1742_vm13 = vcmp.gt.f32.partialorder %v5519_v14, 0.0  ;;  %v6336_v14 = vld [vmem:[#allocation88_spill] sm:$0xff] }
 0x160   : > { %v3031_v39 = vpop.f32.mrf.mxu0  ;;  %2374 = vst [vmem:[%s5371_s16 + $0x150] sm:$0xff] %v2246_v0  ;;  %2413 = vst [vmem:[%s5371_s16 + $0x288] sm:$0xff] %v2285_v6  ;;  %vm1774_vm4 = vcmp.gt.f32.partialorder %v1601_v5, 0.0  ;;  %v6328_v6 = vld [vmem:[#allocation80_spill] sm:$0xff] }
 0x161   : > { %v2249_v40 = vsel %vm1737_vm1, %v3031_v39, %v6321_v42  ;;  %v1603_v62 = vpop.xlane.xlu1 %1602  ;;  %v5787_v52 = vpop.f32.mrf.mxu1  ;;  %v2286_v8 = vsel %vm1774_vm4, %v5638_v27, %v6324_v51  ;;  %v6332_v5 = vld [vmem:[#allocation84_spill] sm:$0xff]  ;;  %vm1745_vm1 = vcmp.gt.f32.partialorder %v5533_v32, 0.0 }
 0x162   : > { %v1017_v25 = vpop.f32.mrf.mxu0  ;;  %2377 = vst [vmem:[%s5371_s16 + $0x168] sm:$0xff] %v2249_v40  ;;  %vm1775_vm5 = vcmp.gt.f32.partialorder %v1603_v62, 0.0  ;;  %2414 = vst [vmem:[%s5371_s16 + $0x290] sm:$0xff] %v2286_v8 }
 0x163   : > { %v2248_v15 = vsel %vm1736_vm6, %v1017_v25, %v6322_v38  ;;  %v2287_v34 = vsel %vm1775_vm5, %v5633_v24, %v6323_v4  ;;  %v5796_v45 = vpop.f32.mrf.mxu1  ;;  %v6326_v24 = vld [vmem:[#allocation79_spill] sm:$0xff]  ;;  %v1605_v0 = vpop.xlane.xlu0 %1604  ;;  %v6331_v38 = vld [vmem:[#allocation82_spill] sm:$0xff]  ;;  %vm1744_vm6 = vcmp.gt.f32.partialorder %v5541_v20, 0.0  ;;  %v6340_v20 = vld [vmem:[#allocation92_spill] sm:$0xff] }
 0x164   : > { %v3034_v61 = vpop.f32.mrf.mxu0  ;;  %2376 = vst [vmem:[%s5371_s16 + $0x160] sm:$0xff] %v2248_v15  ;;  %2415 = vst [vmem:[%s5371_s16 + $0x298] sm:$0xff] %v2287_v34  ;;  %vm1776_vm10 = vcmp.gt.f32.partialorder %v1605_v0, 0.0  ;;  %v6333_v34 = vld [vmem:[#allocation85_spill] sm:$0xff] }
 0x165   : > { %v2251_v22 = vsel %vm1739_vm8, %v3034_v61, %v6325_v21  ;;  %v1607_v59 = vpop.xlane.xlu1 %1606  ;;  %v5803_v27 = vpop.f32.mrf.mxu1  ;;  %v2288_v39 = vsel %vm1776_vm10, %v5652_v30, %v6328_v6  ;;  %v6337_v0 = vld [vmem:[#allocation89_spill] sm:$0xff]  ;;  %vm1747_vm8 = vcmp.gt.f32.partialorder %v5555_v10, 0.0 }
 0x166   : > { %v1027_v50 = vpop.f32.mrf.mxu0  ;;  %2379 = vst [vmem:[%s5371_s16 + $0x178] sm:$0xff] %v2251_v22  ;;  %vm1777_vm9 = vcmp.gt.f32.partialorder %v1607_v59, 0.0  ;;  %2416 = vst [vmem:[%s5371_s16 + $0x2a0] sm:$0xff] %v2288_v39 }
 0x167   : > { %v2250_v11 = vsel %vm1738_vm2, %v1027_v50, %v6326_v24  ;;  %v2289_v33 = vsel %vm1777_vm9, %v5643_v47, %v6327_v7  ;;  %v5812_v42 = vpop.f32.mrf.mxu1  ;;  %v6330_v47 = vld [vmem:[#allocation83_spill] sm:$0xff]  ;;  %v1609_v25 = vpop.xlane.xlu0 %1608  ;;  %vm1746_vm2 = vcmp.gt.f32.partialorder %v5563_v60, 0.0  ;;  %v6344_v60 = vld [vmem:[#allocation96_spill] sm:$0xff] }
 0x168   : > { %v3037_v17 = vpop.f32.mrf.mxu0  ;;  %2378 = vst [vmem:[%s5371_s16 + $0x170] sm:$0xff] %v2250_v11  ;;  %2417 = vst [vmem:[%s5371_s16 + $0x2a8] sm:$0xff] %v2289_v33  ;;  %vm1778_vm11 = vcmp.gt.f32.partialorder %v1609_v25, 0.0 }
 0x169   : > { %v2253_v56 = vsel %vm1741_vm15, %v3037_v17, %v6329_v53  ;;  %v1611_v40 = vpop.xlane.xlu1 %1610  ;;  %v5819_v30 = vpop.f32.mrf.mxu1  ;;  %v2290_v4 = vsel %vm1778_vm11, %v5668_v2, %v6332_v5  ;;  %v6335_v2 = vld [vmem:[#allocation86_spill] sm:$0xff]  ;;  %vm1749_vm15 = vcmp.gt.f32.partialorder %v5577_v13, 0.0 }
 0x16a   : > { %v1037_v63 = vpop.f32.mrf.mxu0  ;;  %2381 = vst [vmem:[%s5371_s16 + $0x188] sm:$0xff] %v2253_v56  ;;  %vm1779_vm12 = vcmp.gt.f32.partialorder %v1611_v40, 0.0  ;;  %2418 = vst [vmem:[%s5371_s16 + $0x2b0] sm:$0xff] %v2290_v4 }
 0x16b   : > { %v2252_v62 = vsel %vm1740_vm7, %v1037_v63, %v6330_v47  ;;  %v2291_v15 = vsel %vm1779_vm12, %v5659_v12, %v6331_v38  ;;  %v5828_v51 = vpop.f32.mrf.mxu1  ;;  %v6334_v12 = vld [vmem:[#allocation87_spill] sm:$0xff]  ;;  %v1613_v22 = vpop.xlane.xlu0 %1612  ;;  %v6341_v63 = vld [vmem:[#allocation93_spill] sm:$0xff]  ;;  %vm1748_vm7 = vcmp.gt.f32.partialorder %v5585_v31, 0.0  ;;  %v6348_v31 = vld [vmem:[#allocation100_spill] sm:$0xff] }
 0x16c   : > { %v3040_v37 = vpop.f32.mrf.mxu0  ;;  %2380 = vst [vmem:[%s5371_s16 + $0x180] sm:$0xff] %v2252_v62  ;;  %2419 = vst [vmem:[%s5371_s16 + $0x2b8] sm:$0xff] %v2291_v15  ;;  %vm1780_vm0 = vcmp.gt.f32.partialorder %v1613_v22, 0.0 }
 0x16d   : > { %v2255_v61 = vsel %vm1743_vm3, %v3040_v37, %v6333_v34  ;;  %v1615_v8 = vpop.xlane.xlu1 %1614  ;;  %v5838_v24 = vpop.f32.mrf.mxu1  ;;  %v2292_v11 = vsel %vm1780_vm0, %v5684_v48, %v6336_v14  ;;  %v6339_v48 = vld [vmem:[#allocation90_spill] sm:$0xff]  ;;  %v6345_v34 = vld [vmem:[#allocation97_spill] sm:$0xff]  ;;  %vm1751_vm3 = vcmp.gt.f32.partialorder %v5599_v54, 0.0 }
 0x16e   : > { %v1047_v3 = vpop.f32.mrf.mxu0  ;;  %2383 = vst [vmem:[%s5371_s16 + $0x198] sm:$0xff] %v2255_v61  ;;  %vm1781_vm14 = vcmp.gt.f32.partialorder %v1615_v8, 0.0  ;;  %2420 = vst [vmem:[%s5371_s16 + $0x2c0] sm:$0xff] %v2292_v11 }
 0x16f   : > { %v2254_v21 = vsel %vm1742_vm13, %v1047_v3, %v6334_v12  ;;  %v2293_v59 = vsel %vm1781_vm14, %v5675_v57, %v6335_v2  ;;  %v6338_v57 = vld [vmem:[#allocation91_spill] sm:$0xff]  ;;  %v1617_v6 = vpop.xlane.xlu0 %1616  ;;  %v5852_v56 = vpop.f32.mrf.mxu1  ;;  %vm1750_vm13 = vcmp.gt.f32.partialorder %v5603_v29, 0.0  ;;  %v6352_v29 = vld [vmem:[#allocation104_spill] sm:$0xff] }
 0x170   : > { %v3043_v50 = vpop.f32.mrf.mxu0  ;;  %2382 = vst [vmem:[%s5371_s16 + $0x190] sm:$0xff] %v2254_v21  ;;  %2421 = vst [vmem:[%s5371_s16 + $0x2c8] sm:$0xff] %v2293_v59  ;;  %vm1782_vm4 = vcmp.gt.f32.partialorder %v1617_v6, 0.0  ;;  %v6353_v6 = vld [vmem:[#allocation105_spill] sm:$0xff] }
 0x171   : > { %v2257_v7 = vsel %vm1745_vm1, %v3043_v50, %v6337_v0  ;;  %v1619_v33 = vpop.xlane.xlu1 %1618  ;;  %v2294_v40 = vsel %vm1782_vm4, %v5700_v58, %v6340_v20  ;;  %v6343_v58 = vld [vmem:[#allocation94_spill] sm:$0xff]  ;;  %v5866_v5 = vpop.f32.mrf.mxu1  ;;  %v6349_v50 = vld [vmem:[#allocation101_spill] sm:$0xff]  ;;  %vm1753_vm1 = vcmp.gt.f32.partialorder %v5613_v28, 0.0 }
 0x172   : > { %v1057_v32 = vpop.f32.mrf.mxu0  ;;  %2385 = vst [vmem:[%s5371_s16 + $0x1a8] sm:$0xff] %v2257_v7  ;;  %vm1783_vm5 = vcmp.gt.f32.partialorder %v1619_v33, 0.0  ;;  %2422 = vst [vmem:[%s5371_s16 + $0x2d0] sm:$0xff] %v2294_v40 }
 0x173   : > { %v2256_v17 = vsel %vm1744_vm6, %v1057_v32, %v6338_v57  ;;  %v2295_v39 = vsel %vm1783_vm5, %v5691_v41, %v6339_v48  ;;  %v6342_v41 = vld [vmem:[#allocation95_spill] sm:$0xff]  ;;  %v1621_v38 = vpop.xlane.xlu0 %1620  ;;  %v5880_v2 = vpop.f32.mrf.mxu1  ;;  %vm1752_vm6 = vcmp.gt.f32.partialorder %v5617_v43, 0.0  ;;  %v6356_v43 = vld [vmem:[#allocation108_spill] sm:$0xff] }
 0x174   : > { %v3046_v53 = vpop.f32.mrf.mxu0  ;;  %2384 = vst [vmem:[%s5371_s16 + $0x1a0] sm:$0xff] %v2256_v17  ;;  %2423 = vst [vmem:[%s5371_s16 + $0x2d8] sm:$0xff] %v2295_v39  ;;  %vm1784_vm10 = vcmp.gt.f32.partialorder %v1621_v38, 0.0 }
 0x175   : > { %v2259_v47 = vsel %vm1747_vm8, %v3046_v53, %v6341_v63  ;;  %v1623_v62 = vpop.xlane.xlu1 %1622  ;;  %v2296_v4 = vsel %vm1784_vm10, %v5716_v19, %v6344_v60  ;;  %v6347_v19 = vld [vmem:[#allocation98_spill] sm:$0xff]  ;;  %v5894_v57 = vpop.f32.mrf.mxu1  ;;  %vm1755_vm8 = vcmp.gt.f32.partialorder %v5627_v1, 0.0  ;;  %v6360_v60 = vld [vmem:[#allocation112_spill] sm:$0xff] }
 0x176   : > { %v1067_v10 = vpop.f32.mrf.mxu0  ;;  %2387 = vst [vmem:[%s5371_s16 + $0x1b8] sm:$0xff] %v2259_v47  ;;  %vm1785_vm9 = vcmp.gt.f32.partialorder %v1623_v62, 0.0  ;;  %2424 = vst [vmem:[%s5371_s16 + $0x2e0] sm:$0xff] %v2296_v4 }
 0x177   : > { %v2258_v25 = vsel %vm1746_vm2, %v1067_v10, %v6342_v41  ;;  %v2297_v15 = vsel %vm1785_vm9, %v5707_v49, %v6343_v58  ;;  %v6346_v49 = vld [vmem:[#allocation99_spill] sm:$0xff]  ;;  %v1625_v12 = vpop.xlane.xlu0 %1624  ;;  %v5908_v47 = vpop.f32.mrf.mxu1  ;;  %v6357_v10 = vld [vmem:[#allocation109_spill] sm:$0xff]  ;;  %vm1754_vm2 = vcmp.gt.f32.partialorder %v5631_v46, 0.0 }
 0x178   : > { %v3049_v37 = vpop.f32.mrf.mxu0  ;;  %2386 = vst [vmem:[%s5371_s16 + $0x1b0] sm:$0xff] %v2258_v25  ;;  %2425 = vst [vmem:[%s5371_s16 + $0x2e8] sm:$0xff] %v2297_v15  ;;  %vm1786_vm11 = vcmp.gt.f32.partialorder %v1625_v12, 0.0  ;;  %v6359_v15 = vld [vmem:[#allocation110_spill] sm:$0xff]  ;;  %v6363_v12 = vld [vmem:[#allocation115_spill] sm:$0xff] }
 0x179   : > { %v2261_v61 = vsel %vm1749_vm15, %v3049_v37, %v6345_v34  ;;  %v1627_v8 = vpop.xlane.xlu1 %1626  ;;  %v2298_v59 = vsel %vm1786_vm11, %v5732_v16, %v6348_v31  ;;  %v6351_v16 = vld [vmem:[#allocation102_spill] sm:$0xff] }
 0x17a   : > { %v1077_v13 = vpop.f32.mrf.mxu0  ;;  %2389 = vst [vmem:[%s5371_s16 + $0x1c8] sm:$0xff] %v2261_v61  ;;  %vm1787_vm12 = vcmp.gt.f32.partialorder %v1627_v8, 0.0  ;;  %2426 = vst [vmem:[%s5371_s16 + $0x2f0] sm:$0xff] %v2298_v59  ;;  %v6361_v61 = vld [vmem:[#allocation113_spill] sm:$0xff] }
 0x17b   : > { %v2260_v3 = vsel %vm1748_vm7, %v1077_v13, %v6346_v49  ;;  %v2299_v21 = vsel %vm1787_vm12, %v5723_v26, %v6347_v19  ;;  %v6350_v26 = vld [vmem:[#allocation103_spill] sm:$0xff]  ;;  %v1629_v7 = vpop.xlane.xlu0 %1628  ;;  %v6362_v13 = vld [vmem:[#allocation114_spill] sm:$0xff]  ;;  %v6365_v59 = vld [vmem:[#allocation117_spill] sm:$0xff] }
 0x17c   : > { %v3052_v22 = vpop.f32.mrf.mxu0  ;;  %2388 = vst [vmem:[%s5371_s16 + $0x1c0] sm:$0xff] %v2260_v3  ;;  %2427 = vst [vmem:[%s5371_s16 + $0x2f8] sm:$0xff] %v2299_v21  ;;  %vm1788_vm0 = vcmp.gt.f32.partialorder %v1629_v7, 0.0 }
 0x17d   : > { %v2263_v14 = vsel %vm1751_vm3, %v3052_v22, %v6349_v50  ;;  %v1631_v11 = vpop.xlane.xlu1 %1630  ;;  %v2300_v17 = vsel %vm1788_vm0, %v5748_v9, %v6352_v29  ;;  %v6355_v9 = vld [vmem:[#allocation106_spill] sm:$0xff]  ;;  %v6364_v22 = vld [vmem:[#allocation116_spill] sm:$0xff] }
 0x17e   : > { %v1087_v54 = vpop.f32.mrf.mxu0  ;;  %2391 = vst [vmem:[%s5371_s16 + $0x1d8] sm:$0xff] %v2263_v14  ;;  %vm1789_vm14 = vcmp.gt.f32.partialorder %v1631_v11, 0.0  ;;  %2428 = vst [vmem:[%s5371_s16 + $0x300] sm:$0xff] %v2300_v17  ;;  %v6366_v11 = vld [vmem:[#allocation118_spill] sm:$0xff] }
 0x17f   : > { %v2262_v0 = vsel %vm1750_vm13, %v1087_v54, %v6350_v26  ;;  %v2301_v33 = vsel %vm1789_vm14, %v5739_v55, %v6351_v16  ;;  %v6354_v55 = vld [vmem:[#allocation107_spill] sm:$0xff]  ;;  %v1633_v20 = vpop.xlane.xlu0 %1632  ;;  %v6368_v16 = vld [vmem:[#allocation120_spill] sm:$0xff] }
 0x180   : > { %v3055_v32 = vpop.f32.mrf.mxu0  ;;  %2390 = vst [vmem:[%s5371_s16 + $0x1d0] sm:$0xff] %v2262_v0  ;;  %2429 = vst [vmem:[%s5371_s16 + $0x308] sm:$0xff] %v2301_v33  ;;  %vm1790_vm4 = vcmp.gt.f32.partialorder %v1633_v20, 0.0  ;;  %v6367_v26 = vld [vmem:[#allocation119_spill] sm:$0xff] }
 0x181   : > { %v2265_v48 = vsel %vm1753_vm1, %v3055_v32, %v6353_v6  ;;  %v1635_v39 = vpop.xlane.xlu1 %1634  ;;  %v2302_v62 = vsel %vm1790_vm4, %v5764_v23, %v6356_v43  ;;  %v5921_v23 = vpop.f32.mrf.mxu1  ;;  %v6369_v32 = vld [vmem:[#allocation121_spill] sm:$0xff]  ;;  %v6370_v6 = vld [vmem:[#allocation122_spill] sm:$0xff] }
 0x182   : > { %v1097_v28 = vpop.f32.mrf.mxu0  ;;  %2393 = vst [vmem:[%s5371_s16 + $0x1e8] sm:$0xff] %v2265_v48  ;;  %vm1791_vm5 = vcmp.gt.f32.partialorder %v1635_v39, 0.0  ;;  %2430 = vst [vmem:[%s5371_s16 + $0x310] sm:$0xff] %v2302_v62  ;;  %v6371_v39 = vld [vmem:[#allocation123_spill] sm:$0xff]  ;;  %v6374_v43 = vld [vmem:[#allocation126_spill] sm:$0xff] }
 0x183   : > { %v2264_v53 = vsel %vm1752_vm6, %v1097_v28, %v6354_v55  ;;  %v2303_v40 = vsel %vm1791_vm5, %v5755_v44, %v6355_v9  ;;  %v6358_v44 = vld [vmem:[#allocation111_spill] sm:$0xff]  ;;  %v1637_v58 = vpop.xlane.xlu0 %1636  ;;  %v6373_v9 = vld [vmem:[#allocation125_spill] sm:$0xff] }
 0x184   : > { %v3058_v63 = vpop.f32.mrf.mxu0  ;;  %2392 = vst [vmem:[%s5371_s16 + $0x1e0] sm:$0xff] %v2264_v53  ;;  %2431 = vst [vmem:[%s5371_s16 + $0x318] sm:$0xff] %v2303_v40  ;;  %vm1792_vm15 = vcmp.gt.f32.partialorder %v1637_v58, 0.0  ;;  %v6372_v53 = vld [vmem:[#allocation124_spill] sm:$0xff] }
 0x185   : > { %v2267_v41 = vsel %vm1755_vm8, %v3058_v63, %v6357_v10  ;;  %v1639_v1 = vpop.xlane.xlu1 %1638  ;;  %v2304_v46 = vsel %vm1792_vm15, %v5780_v35, %v6360_v60  ;;  %v6375_v10 = vld [vmem:[#allocation127_spill] sm:$0xff]  ;;  %v6378_v60 = vld [vmem:[#allocation130_spill] sm:$0xff] }
 0x186   : > { %v1107_v25 = vpop.f32.mrf.mxu0  ;;  %2395 = vst [vmem:[%s5371_s16 + $0x1f8] sm:$0xff] %v2267_v41  ;;  %vm1793_vm9 = vcmp.gt.f32.partialorder %v1639_v1, 0.0  ;;  %2432 = vst [vmem:[%s5371_s16 + $0x320] sm:$0xff] %v2304_v46 }
 0x187   : > { %v2266_v38 = vsel %vm1754_vm2, %v1107_v25, %v6358_v44  ;;  %v2305_v37 = vsel %vm1793_vm9, %v5771_v36, %v6359_v15  ;;  %v1641_v34 = vpop.xlane.xlu0 %1640  ;;  %v1367_v36 = vpop.f32.mrf.mxu1  ;;  %v6376_v25 = vld [vmem:[#allocation128_spill] sm:$0xff]  ;;  %v6377_v15 = vld [vmem:[#allocation129_spill] sm:$0xff] }
 0x188   : > { %2394 = vst [vmem:[%s5371_s16 + $0x1f0] sm:$0xff] %v2266_v38  ;;  %2433 = vst [vmem:[%s5371_s16 + $0x328] sm:$0xff] %v2305_v37  ;;  %vm1794_vm7 = vcmp.gt.f32.partialorder %v1641_v34, 0.0 }
 0x189   : > { %v1643_v4 = vpop.xlane.xlu1 %1642  ;;  %v2306_v49 = vsel %vm1794_vm7, %v5796_v45, %v6362_v13  ;;  %v3139_v21 = vpop.f32.mrf.mxu1  ;;  %v6380_v13 = vld [vmem:[#allocation132_spill] sm:$0xff] }
 0x18a   : > { %vm1795_vm10 = vcmp.gt.f32.partialorder %v1643_v4, 0.0  ;;  %2434 = vst [vmem:[%s5371_s16 + $0x330] sm:$0xff] %v2306_v49 }
 0x18b   : > { %v2307_v8 = vsel %vm1795_vm10, %v5787_v52, %v6361_v61  ;;  %v1645_v35 = vpop.xlane.xlu0 %1644  ;;  %v1377_v14 = vpop.f32.mrf.mxu1  ;;  %v6379_v61 = vld [vmem:[#allocation131_spill] sm:$0xff] }
 0x18c   : > { %2435 = vst [vmem:[%s5371_s16 + $0x338] sm:$0xff] %v2307_v8  ;;  %vm1796_vm3 = vcmp.gt.f32.partialorder %v1645_v35, 0.0 }
 0x18d   : > { %v1647_v3 = vpop.xlane.xlu1 %1646  ;;  %v2308_v52 = vsel %vm1796_vm3, %v5812_v42, %v6364_v22  ;;  %v3142_v7 = vpop.f32.mrf.mxu1  ;;  %v6382_v22 = vld [vmem:[#allocation134_spill] sm:$0xff] }
 0x18e   : > { %vm1797_vm12 = vcmp.gt.f32.partialorder %v1647_v3, 0.0  ;;  %2436 = vst [vmem:[%s5371_s16 + $0x340] sm:$0xff] %v2308_v52 }
 0x18f   : > { %v2309_v19 = vsel %vm1797_vm12, %v5803_v27, %v6363_v12  ;;  %v1387_v17 = vpop.f32.mrf.mxu1  ;;  %v6381_v12 = vld [vmem:[#allocation133_spill] sm:$0xff] }
 0x190   : > { %2437 = vst [vmem:[%s5371_s16 + $0x348] sm:$0xff] %v2309_v19 }
 0x191   : > { %v1651_v31 = vpop.xlane.xlu1 %1650  ;;  %v3145_v55 = vpop.f32.mrf.mxu1 }
 0x192   : > { %vm1799_vm11 = vcmp.gt.f32.partialorder %v1651_v31, 0.0 }
 0x193   : > { %v2311_v50 = vsel %vm1799_vm11, %v5819_v30, %v6365_v59  ;;  %v1397_v63 = vpop.f32.mrf.mxu1  ;;  %v6383_v59 = vld [vmem:[#allocation135_spill] sm:$0xff] }
 0x194   : > { %v1649_v45 = vpop.xlane.xlu0 %1648  ;;  %2439 = vst [vmem:[%s5371_s16 + $0x358] sm:$0xff] %v2311_v50 }
 0x195   : > { %vm1798_vm13 = vcmp.gt.f32.partialorder %v1649_v45, 0.0  ;;  %v1655_v54 = vpop.xlane.xlu1 %1654  ;;  %v3148_v1 = vpop.f32.mrf.mxu1 }
 0x196   : > { %v2310_v27 = vsel %vm1798_vm13, %v5828_v51, %v6366_v11  ;;  %vm1801_vm14 = vcmp.gt.f32.partialorder %v1655_v54, 0.0 }
 0x197   : > { %2438 = vst [vmem:[%s5371_s16 + $0x350] sm:$0xff] %v2310_v27  ;;  %v2313_v0 = vsel %vm1801_vm14, %v5838_v24, %v6367_v26  ;;  %v6384_v26 = vld [vmem:[#allocation8_spill] sm:$0xff] }
 0x198   : > { %v1653_v42 = vpop.xlane.xlu0 %1652  ;;  %2441 = vst [vmem:[%s5371_s16 + $0x368] sm:$0xff] %v2313_v0 }
 0x199   : > { %vm1800_vm1 = vcmp.gt.f32.partialorder %v1653_v42, 0.0  ;;  %v1659_v33 = vpop.xlane.xlu1 %1658 }
 0x19a   : > { %v2312_v30 = vsel %vm1800_vm1, %v5852_v56, %v6368_v16  ;;  %vm1803_vm0 = vcmp.gt.f32.partialorder %v1659_v33, 0.0 }
 0x19b   : > { %2440 = vst [vmem:[%s5371_s16 + $0x360] sm:$0xff] %v2312_v30  ;;  %v2315_v29 = vsel %vm1803_vm0, %v5866_v5, %v6369_v32 }
 0x19c   : > { %v1657_v51 = vpop.xlane.xlu0 %1656  ;;  %2443 = vst [vmem:[%s5371_s16 + $0x378] sm:$0xff] %v2315_v29 }
 0x19d   : > { %vm1802_vm6 = vcmp.gt.f32.partialorder %v1657_v51, 0.0  ;;  %v1663_v48 = vpop.xlane.xlu1 %1662 }
 0x19e   : > { %v2314_v24 = vsel %vm1802_vm6, %v5880_v2, %v6370_v6  ;;  %vm1805_vm5 = vcmp.gt.f32.partialorder %v1663_v48, 0.0 }
 0x19f   : > { %2442 = vst [vmem:[%s5371_s16 + $0x370] sm:$0xff] %v2314_v24  ;;  %v2317_v28 = vsel %vm1805_vm5, %v5894_v57, %v6371_v39 }
 0x1a0   : > { %v1661_v56 = vpop.xlane.xlu0 %1660  ;;  %2445 = vst [vmem:[%s5371_s16 + $0x388] sm:$0xff] %v2317_v28 }
 0x1a1   : > { %vm1804_vm8 = vcmp.gt.f32.partialorder %v1661_v56, 0.0  ;;  %v1667_v20 = vpop.xlane.xlu1 %1666 }
 0x1a2   : > { %v2316_v5 = vsel %vm1804_vm8, %v5908_v47, %v6372_v53  ;;  %vm1807_vm4 = vcmp.gt.f32.partialorder %v1667_v20, 0.0 }
 0x1a3   : > { %2444 = vst [vmem:[%s5371_s16 + $0x380] sm:$0xff] %v2316_v5  ;;  %v2319_v40 = vsel %vm1807_vm4, %v5921_v23, %v6373_v9  ;;  %v1407_v23 = vpop.f32.mrf.mxu1 }
 0x1a4   : > { %v1665_v2 = vpop.xlane.xlu0 %1664  ;;  %2447 = vst [vmem:[%s5371_s16 + $0x398] sm:$0xff] %v2319_v40 }
 0x1a5   : > { %vm1806_vm2 = vcmp.gt.f32.partialorder %v1665_v2, 0.0  ;;  %v1671_v57 = vpop.xlane.xlu1 %1670 }
 0x1a6   : > { %v2318_v62 = vsel %vm1806_vm2, %v1367_v36, %v6374_v43  ;;  %vm1809_vm9 = vcmp.gt.f32.partialorder %v1671_v57, 0.0  ;;  %v3151_v36 = vpop.f32.mrf.mxu1 }
 0x1a7   : > { %2446 = vst [vmem:[%s5371_s16 + $0x390] sm:$0xff] %v2318_v62  ;;  %v2321_v41 = vsel %vm1809_vm9, %v3139_v21, %v6375_v10 }
 0x1a8   : > { %v1669_v47 = vpop.xlane.xlu0 %1668  ;;  %2449 = vst [vmem:[%s5371_s16 + $0x3a8] sm:$0xff] %v2321_v41  ;;  %v1417_v21 = vpop.f32.mrf.mxu1 }
 0x1a9   : > { %vm1808_vm15 = vcmp.gt.f32.partialorder %v1669_v47, 0.0  ;;  %v1675_v38 = vpop.xlane.xlu1 %1674 }
 0x1aa   : > { %v2320_v44 = vsel %vm1808_vm15, %v1377_v14, %v6376_v25  ;;  %vm1811_vm10 = vcmp.gt.f32.partialorder %v1675_v38, 0.0  ;;  %v3154_v14 = vpop.f32.mrf.mxu1 }
 0x1ab   : > { %2448 = vst [vmem:[%s5371_s16 + $0x3a0] sm:$0xff] %v2320_v44  ;;  %v2323_v37 = vsel %vm1811_vm10, %v3142_v7, %v6377_v15  ;;  %v6385_v7 = vld [vmem:[#allocation136_spill] sm:$0xff] }
 0x1ac   : > { %v1673_v58 = vpop.xlane.xlu0 %1672  ;;  %2451 = vst [vmem:[%s5371_s16 + $0x3b8] sm:$0xff] %v2323_v37  ;;  %v1427_v42 = vpop.f32.mrf.mxu1 }
 0x1ad   : > { %vm1810_vm7 = vcmp.gt.f32.partialorder %v1673_v58, 0.0  ;;  %v1679_v4 = vpop.xlane.xlu1 %1678 }
 0x1ae   : > { %v2322_v46 = vsel %vm1810_vm7, %v1387_v17, %v6378_v60  ;;  %vm1813_vm12 = vcmp.gt.f32.partialorder %v1679_v4, 0.0 }
 0x1af   : > { %2450 = vst [vmem:[%s5371_s16 + $0x3b0] sm:$0xff] %v2322_v46  ;;  %v2325_v8 = vsel %vm1813_vm12, %v3145_v55, %v6379_v61 }
 0x1b0   : > { %v1677_v34 = vpop.xlane.xlu0 %1676  ;;  %2453 = vst [vmem:[%s5371_s16 + $0x3c8] sm:$0xff] %v2325_v8 }
 0x1b1   : > { %vm1812_vm3 = vcmp.gt.f32.partialorder %v1677_v34, 0.0  ;;  %v1683_v3 = vpop.xlane.xlu1 %1682 }
 0x1b2   : > { %v2324_v49 = vsel %vm1812_vm3, %v1397_v63, %v6380_v13  ;;  %vm1815_vm11 = vcmp.gt.f32.partialorder %v1683_v3, 0.0 }
 0x1b3   : > { %2452 = vst [vmem:[%s5371_s16 + $0x3c0] sm:$0xff] %v2324_v49  ;;  %v2327_v19 = vsel %vm1815_vm11, %v3148_v1, %v6381_v12 }
 0x1b4   : > { %v1681_v35 = vpop.xlane.xlu0 %1680  ;;  %2455 = vst [vmem:[%s5371_s16 + $0x3d8] sm:$0xff] %v2327_v19 }
 0x1b5   : > { %vm1814_vm13 = vcmp.gt.f32.partialorder %v1681_v35, 0.0  ;;  %v1687_v31 = vpop.xlane.xlu1 %1686 }
 0x1b6   : > { %v2326_v52 = vsel %vm1814_vm13, %v1407_v23, %v6382_v22  ;;  %vm1817_vm14 = vcmp.gt.f32.partialorder %v1687_v31, 0.0 }
 0x1b7   : > { %2454 = vst [vmem:[%s5371_s16 + $0x3d0] sm:$0xff] %v2326_v52  ;;  %v2329_v50 = vsel %vm1817_vm14, %v3151_v36, %v6383_v59 }
 0x1b8   : > { %v1685_v45 = vpop.xlane.xlu0 %1684  ;;  %2457 = vst [vmem:[%s5371_s16 + $0x3e8] sm:$0xff] %v2329_v50 }
 0x1b9   : > { %vm1816_vm1 = vcmp.gt.f32.partialorder %v1685_v45, 0.0  ;;  %v1691_v27 = vpop.xlane.xlu1 %1690 }
 0x1ba   : > { %v2328_v11 = vsel %vm1816_vm1, %v1417_v21, %v5380_v18  ;;  %vm1819_vm0 = vcmp.gt.f32.partialorder %v1691_v27, 0.0 }
 0x1bb   : > { %2456 = vst [vmem:[%s5371_s16 + $0x3e0] sm:$0xff] %v2328_v11  ;;  %v2331_v0 = vsel %vm1819_vm0, %v3154_v14, %v6384_v26 }
 0x1bc   : > { %v1689_v54 = vpop.xlane.xlu0 %1688  ;;  %2459 = vst [vmem:[%s5371_s16 + $0x3f8] sm:$0xff] %v2331_v0 }
 0x1bd   : > { %vm1818_vm6 = vcmp.gt.f32.partialorder %v1689_v54, 0.0 }
 0x1be   : > { %v2330_v16 = vsel %vm1818_vm6, %v1427_v42, %v6385_v7 }
 0x1bf   : > { %2458 = vst [vmem:[%s5371_s16 + $0x3f0] sm:$0xff] %v2330_v16 }
 0x1c0 PF: > { %s20_s20 = sadd.s32 1, %s3218_s20  }
 0x1c1   : > { %p17_p10 = scmp.ge.s32.totalorder %s20_s20, 22  }
 0x1c3   :  { %19 = sbr.rel (!%p17_p10) target bundleno = 16 (0x10), region = 62 }

// kernel: graph_conv_forward.2
= control target key start
LH: loop header
LB: loop body
LE: loop exit
PB: predicated region body
PF: predicated region fallthrough
CT: control target
= control target key end

     0   :  { %s4327_s27 = smov 0   ;;  %s4329_s28 = smov 0   ;;  %s7143_s0 = inlined_call_operand.vmem [shape: s32[24,1], index: 0, kind: input, shape index: {}]   ;;  %s7144_s1 = inlined_call_operand.vmem [shape: s32[24,10], index: 1, kind: input, shape index: {}]   ;;  %s7145_s2 = inlined_call_operand.vmem [shape: f32[24,10], index: 2, kind: input, shape index: {}]   ;;  %s7146_s3 = inlined_call_operand.vmem [shape: bf16[4096,64], index: 3, kind: input, shape index: {}]   ;;  %s7147_s4 = inlined_call_operand.vmem [shape: bf16[64,128], index: 4, kind: input, shape index: {}]   ;;  %s7148_s5 = inlined_call_operand.vmem [shape: f32[1,128], index: 5, kind: input, shape index: {}]   ;;  %s7149_s6 = inlined_call_operand.vmem [shape: f32[4096,128], index: 6, kind: output, shape index: {0}]   ;;  %s7150_s7 = inlined_call_operand.vmem [shape: f32[2,24,128], index: 7, kind: output, shape index: {1}]   ;;  %s7151_s8 = inlined_call_operand.vmem [shape: f32[2,24,128], index: 8, kind: output, shape index: {2}]  }
   0x1   :  { %s4331_s29 = smov 0   ;;  %s4333_s30 = smov 0  }
   0x2   :  { %s4335_s9 = smov 0  }
   0x3 LB: > { %s28_s10 = sadd.s32 1, %s4260_s29  ;;  %s31_s11 = sadd.s32 1, %s4264_s30  ;;  %s4268_s9 = sphi %s4335_s9, %s19_s9   ;;  %s4264_s30 = sphi %s4333_s30, %s7586_s30   ;;  %s4260_s29 = sphi %s4331_s29, %s7585_s29   ;;  %s4256_s28 = sphi %s4329_s28, %s7584_s28   ;;  %s4252_s27 = sphi %s4327_s27, %s7583_s27  }
   0x4   : > { %p29_p0 = scmp.ge.s32.totalorder %s28_s10, 2  ;;  %p3438_p1 = scmp.ge.s32.totalorder %s4268_s9, 1 }
   0x5   : > { %p292_p2 = scmp.lt.s32.totalorder %s4268_s9, 5 }
   0x6   : > { %s7588_s10 = smov (%p29_p0, %s28_s10), 0  ;;  %s7590_s11 = smov (!%p29_p0, %s31_s11), %s4264_s30 }
   0x7   : > { %p293_p3 = pnand %p3438_p1, %p292_p2  ;;  %p33_p4 = scmp.ge.s32.totalorder %s7590_s11, 2 }
   0x9   : > { %s7592_s11 = smov (%p33_p4, %s7590_s11), 0  ;;  %296 = sbr.rel (%p293_p3) target bundleno = 881 (0x371), region = 44 }
   0xa   : > { %7281 = sst [smem:[#allocation4_spill]] %s7592_s11 }
   0xe   : > { %s3439_s12 = sshll.u32 %s4256_s28, 1  ;;  %p360_p5 = scmp.lt.s32.totalorder %s4256_s28, 1 }
   0xf   : > { %s4360_s13 = sadd.s32 %s4252_s27, %s3439_s12  ;;  %p3447_p7 = scmp.ne.s32.totalorder %s4252_s27, 0 }
  0x10   : > { %s3440_s14 = sshll.u32 %s4360_s13, 7  ;;  %s7594_s28 = smov (!%p360_p5, %s4256_s28), 1 }
  0x11   : > { %p343_p6 = scmp.lt.s32.totalorder %s3440_s14, 511  ;;  %s4070_s15 = smul.u32 24, %s7594_s28 }
  0x12   : > { %374 = sbr.rel (%p3447_p7) target bundleno = 27 (0x1b), region = 48 }
  0x13   : > { %s7596_s14 = smov (!%p343_p6, %s3440_s14), 511  ;;  %s4376_s26 = scalar_lea.vmem %s7150_s7, %s4070_s15 }
  0x14   : > { %s3441_s16 = sshll.u32 %s7596_s14, 2  ;;  %s3444_s17 = sshll.u32 %s7596_s14, 3 }
  0x15   : > { %s4366_s20 = scalar_lea.vmem %s7146_s3, %s3441_s16  ;;  %s4371_s23 = scalar_lea.vmem %s7149_s6, %s3444_s17 }
  0x16   : > { %s4381_s28 = scalar_lea.vmem %s7151_s8, %s4070_s15 }
  0x17   : > { %v4270_v0 = vmov 0.0  }
  0x18   : > { %375 = vst [vmem:[#allocation2 + $0x10] sm:$0xff] %v4270_v0  ;;  %376 = vst [vmem:[#allocation2] sm:$0xff] %v4270_v0 }
  0x19   : > { %377 = vst [vmem:[#allocation2 + $0x8] sm:$0xff] %v4270_v0  ;;  %378 = vst [vmem:[#allocation3 + $0x8] sm:$0xff] %v4270_v0 }
  0x1a   : > { %379 = vst [vmem:[#allocation3] sm:$0xff] %v4270_v0  ;;  %380 = vst [vmem:[#allocation3 + $0x10] sm:$0xff] %v4270_v0 }
  0x1b PF: > { %v4160_v1 = vld [vmem:[%s7147_s4 + $0x18] sm:$0xff]   ;;  %v4161_v2 = vld [vmem:[%s7147_s4 + $0x10] sm:$0xff]   ;;  %vm868_vm0 = vcmask 523264   ;;  %v4271_v3 = vmov 1   ;;  %s3582_s17 = sshll.u32 %s4360_s13, 10  ;;  %v4162_v4 = vld [vmem:[%s7147_s4 + $0x8] sm:$0xff]   ;;  %v1801_v54 = vlaneseq }
  0x1c   : > { %3934 = vmatprep.subr.bf16.mxu0 %v4160_v1  ;;  %4124 = vset.pattern.permute.xlu1 %v4271_v3  ;;  %v4164_v5 = vld [vmem:[%s4366_s20] sm:$0xff]   ;;  %v4396_v6 = vstv %s3582_s17  ;;  %v4272_v7 = vmov 0   ;;  %v1811_v9 = vld [vmem:[%s7144_s1 + $0x8] sm:$0xff]  ;;  %v4166_v14 = vld [vmem:[%s4366_s20 + $0x10] sm:$0xff]   ;;  %v4273_v17 = vmov 4   ;;  %v4274_v20 = vmov 5  }
  0x1d   : > { %3935 = vmatpush3.bf16.msra.mxu0 %v4160_v1  ;;  %7282 = vst [vmem:[#allocation5_spill] sm:$0xff] %v4396_v6  ;;  %4123 = vset.pattern.permute.xlu0 %v4272_v7  ;;  %v1810_v8 = vld [vmem:[%s7144_s1] sm:$0xff]  ;;  %v4414_v12 = vsub.s32 %v1811_v9, %v4396_v6  ;;  %v4165_v13 = vld [vmem:[%s4366_s20 + $0x8] sm:$0xff]   ;;  %v4167_v18 = vld [vmem:[%s4366_s20 + $0x18] sm:$0xff]   ;;  %v4275_v21 = vmov 2   ;;  %v4276_v24 = vmov 6  }
  0x1e   : > { %3936 = vmatprep.subr.bf16.mxu0 %v4161_v2  ;;  %3942 = vmatprep.mubr.msk.bf16.mxu0 %vm868_vm0, %v4164_v5  ;;  %v4407_v10 = vsub.s32 %v1810_v8, %v4396_v6  ;;  %v4163_v11 = vld [vmem:[%s7147_s4] sm:$0xff]   ;;  %v4424_v15 = vld [vmem:[%s7145_s2 + $0x8] sm:$0xff]  ;;  %v4170_v23 = vld [vmem:[%s4366_s20 + $0x30] sm:$0xff]   ;;  %v4277_v27 = vmov 3   ;;  %v4278_v28 = vmov 7   ;;  %v4279_v31 = vmov 8  }
  0x1f   : > { %v4429_v16 = vld [vmem:[%s7145_s2] sm:$0xff]  ;;  %v4169_v22 = vld [vmem:[%s4366_s20 + $0x28] sm:$0xff]   ;;  %v4171_v25 = vld [vmem:[%s4366_s20 + $0x38] sm:$0xff]   ;;  %v4280_v34 = vmov 9   ;;  %v4570_v57 = vand.u32 127, %v1801_v54  ;;  %p3639_p8 = scmp.ne.s32.totalorder %s4252_s27, 1 }
  0x20   : > { %1923 = vperm.xlu1 %4124, %v4407_v10   ;;  %1827 = vperm.xlu0 %4123, %v4407_v10   ;;  %v4168_v19 = vld [vmem:[%s4366_s20 + $0x20] sm:$0xff]   ;;  %v4173_v29 = vld [vmem:[%s4366_s20 + $0x48] sm:$0xff]   ;;  %v4174_v30 = vld [vmem:[%s4366_s20 + $0x50] sm:$0xff]  }
  0x21   : > { %3937 = vmatpush3.bf16.msra.mxu0 %v4161_v2  ;;  %v4172_v26 = vld [vmem:[%s4366_s20 + $0x40] sm:$0xff]   ;;  %v4175_v32 = vld [vmem:[%s4366_s20 + $0x58] sm:$0xff]   ;;  %v4177_v35 = vld [vmem:[%s4366_s20 + $0x68] sm:$0xff]   ;;  %7283 = vst [vmem:[#allocation6_spill] sm:$0xff] %v4570_v57  ;;  %v4577_v58 = vadd.s32 256, %v4570_v57  ;;  %v4584_v61 = vadd.s32 384, %v4570_v57 }
  0x22   : > { %3938 = vmatprep.subr.bf16.mxu0 %v4162_v4  ;;  %v4176_v33 = vld [vmem:[%s4366_s20 + $0x60] sm:$0xff]   ;;  %v4178_v36 = vld [vmem:[%s4366_s20 + $0x70] sm:$0xff]   ;;  %v4179_v39 = vld [vmem:[%s4366_s20 + $0x78] sm:$0xff]   ;;  %v4587_v62 = vadd.s32 512, %v4570_v57  ;;  %v4590_v63 = vadd.s32 640, %v4570_v57  ;;  %v4593_v0 = vadd.s32 768, %v4570_v57 }
  0x23   : > { %v1812_v37 = vld [vmem:[%s7144_s1 + $0x10] sm:$0xff]  ;;  %v4180_v40 = vld [vmem:[%s4366_s20 + $0x80] sm:$0xff]   ;;  %v4181_v41 = vld [vmem:[%s4366_s20 + $0x88] sm:$0xff]   ;;  %7284 = vst [vmem:[#allocation7_spill] sm:$0xff] %v4577_v58  ;;  %v4598_v2 = vadd.s32 896, %v4570_v57 }
  0x24   : > { %1926 = vperm.xlu1 %4124, %v4414_v12   ;;  %1830 = vperm.xlu0 %4123, %v4414_v12   ;;  %v4495_v38 = vsub.s32 %v1812_v37, %v4396_v6  ;;  %v4182_v42 = vld [vmem:[%s4366_s20 + $0x90] sm:$0xff]   ;;  %v4183_v43 = vld [vmem:[%s4366_s20 + $0x98] sm:$0xff]   ;;  %v4184_v44 = vld [vmem:[%s4366_s20 + $0xa0] sm:$0xff]   ;;  %7285 = vst [vmem:[#allocation8_spill] sm:$0xff] %v4584_v61 }
  0x25   : > { %3939 = vmatpush3.bf16.msra.mxu0 %v4162_v4  ;;  %v4528_v45 = vld [vmem:[%s7145_s2 + $0x10] sm:$0xff]  ;;  %v4185_v46 = vld [vmem:[%s4366_s20 + $0xa8] sm:$0xff]   ;;  %v4187_v48 = vld [vmem:[%s4366_s20 + $0xb8] sm:$0xff]   ;;  %7286 = vst [vmem:[#allocation9_spill] sm:$0xff] %v4587_v62  ;;  %v4603_v4 = vadd.s32 128, %v4570_v57 }
  0x26   : > { %3940 = vmatprep.subr.bf16.mxu0 %v4163_v11  ;;  %v4186_v47 = vld [vmem:[%s4366_s20 + $0xb0] sm:$0xff]   ;;  %v4188_v49 = vld [vmem:[%s4366_s20 + $0xc0] sm:$0xff]   ;;  %v4189_v50 = vld [vmem:[%s4366_s20 + $0xc8] sm:$0xff]   ;;  %7287 = vst [vmem:[#allocation10_spill] sm:$0xff] %v4590_v63 }
  0x27   : > { %v4190_v51 = vld [vmem:[%s4366_s20 + $0xd0] sm:$0xff]   ;;  %v4191_v52 = vld [vmem:[%s4366_s20 + $0xd8] sm:$0xff]   ;;  %v4192_v53 = vld [vmem:[%s4366_s20 + $0xe0] sm:$0xff]   ;;  %7288 = vst [vmem:[#allocation11_spill] sm:$0xff] %v4593_v0 }
  0x28   : > { %4125 = vset.pattern.permute.xlu1 %v4272_v7  ;;  %1861 = vperm.xlu0 %4123, %v4429_v16   ;;  %v4193_v55 = vld [vmem:[%s4366_s20 + $0xe8] sm:$0xff]   ;;  %v4194_v56 = vld [vmem:[%s4366_s20 + $0xf0] sm:$0xff]   ;;  %v4195_v1 = vld [vmem:[%s4366_s20 + $0xf8] sm:$0xff]   ;;  %7289 = vst [vmem:[#allocation12_spill] sm:$0xff] %v4598_v2 }
  0x29   : > { %3941 = vmatpush3.bf16.msra.mxu0 %v4163_v11  ;;  %1866 = vperm.xlu1 %4125, %v4424_v15   ;;  %7290 = vst [vmem:[#allocation13_spill] sm:$0xff] %v4603_v4 }
  0x2c   : > { %3943 = vmatmul.mubr.msk.bf16.vlgmr.msra.gmra.mxu0 %vm868_vm0, %v4165_v13  ;;  %4130 = vset.pattern.permute.xlu0 %v4273_v17 }
  0x2d   : > { %3946 = vmatprep.mubr.msk.bf16.mxu0 %vm868_vm0, %v4166_v14  ;;  %4126 = vset.pattern.permute.xlu1 %v4271_v3  ;;  %v4197_v14 = vld [vmem:[%s4366_s20 + $0x108] sm:$0xff]  }
  0x2e   : > { %2205 = vperm.xlu0 %4130, %v4414_v12   ;;  %1960 = vperm.xlu1 %4126, %v4424_v15  }
  0x32   : > { %4131 = vset.pattern.permute.xlu0 %v4274_v20  ;;  %4127 = vset.pattern.permute.xlu1 %v4275_v21 }
  0x33   : > { %2016 = vperm.xlu1 %4127, %v4407_v10   ;;  %2295 = vperm.xlu0 %4131, %v4407_v10  }
  0x34   : > { %3947 = vmatmul.mubr.msk.bf16.gmra.mxu0 %vm868_vm0, %v4167_v18 }
  0x35   : > { %3950 = vmatprep.mubr.msk.bf16.mxu0 %vm868_vm0, %v4168_v19  ;;  %v4198_v19 = vld [vmem:[%s4366_s20 + $0x110] sm:$0xff]  }
  0x37   : > { %2049 = vperm.xlu1 %4127, %v4429_v16   ;;  %2332 = vperm.xlu0 %4131, %v4424_v15  }
  0x3b   : > { %2053 = vperm.xlu1 %4127, %v4424_v15   ;;  %4134 = vset.pattern.permute.xlu0 %v4276_v24 }
  0x3c   : > { %3951 = vmatmul.mubr.msk.bf16.gmra.mxu0 %vm868_vm0, %v4169_v22  ;;  %2391 = vperm.xlu0 %4134, %v4414_v12  }
  0x3d   : > { %3954 = vmatprep.mubr.msk.bf16.mxu0 %vm868_vm0, %v4170_v23 }
  0x3f   : > { %4128 = vset.pattern.permute.xlu1 %v4277_v27 }
  0x40   : > { %2112 = vperm.xlu1 %4128, %v4414_v12   ;;  %4135 = vset.pattern.permute.xlu0 %v4278_v28 }
  0x41   : > { %2481 = vperm.xlu0 %4135, %v4407_v10  }
  0x44   : > { %3955 = vmatmul.mubr.msk.bf16.gmra.mxu0 %vm868_vm0, %v4171_v25  ;;  %2142 = vperm.xlu1 %4128, %v4429_v16  }
  0x45   : > { %3958 = vmatprep.mubr.msk.bf16.mxu0 %vm868_vm0, %v4172_v26  ;;  %2518 = vperm.xlu0 %4135, %v4424_v15  }
  0x48   : > { %4129 = vset.pattern.permute.xlu1 %v4273_v17 }
  0x49   : > { %2202 = vperm.xlu1 %4129, %v4407_v10   ;;  %4138 = vset.pattern.permute.xlu0 %v4279_v31 }
  0x4a   : > { %2577 = vperm.xlu0 %4138, %v4414_v12  }
  0x4c   : > { %3959 = vmatmul.mubr.msk.bf16.gmra.mxu0 %vm868_vm0, %v4173_v29 }
  0x4d   : > { %3962 = vmatprep.mubr.msk.bf16.mxu0 %vm868_vm0, %v4174_v30  ;;  %2235 = vperm.xlu1 %4129, %v4429_v16  }
  0x4e   : > { %4139 = vset.pattern.permute.xlu0 %v4280_v34 }
  0x4f   : > { %2667 = vperm.xlu0 %4139, %v4407_v10  }
  0x51   : > { %2239 = vperm.xlu1 %4129, %v4424_v15  }
  0x53   : > { %2704 = vperm.xlu0 %4139, %v4424_v15  }
  0x54   : > { %3963 = vmatmul.mubr.msk.bf16.gmra.mxu0 %vm868_vm0, %v4175_v32 }
  0x55   : > { %3966 = vmatprep.mubr.msk.bf16.mxu0 %vm868_vm0, %v4176_v33  ;;  %4132 = vset.pattern.permute.xlu1 %v4274_v20 }
  0x56   : > { %2298 = vperm.xlu1 %4132, %v4414_v12  }
  0x57   : > { %4141 = vset.pattern.permute.xlu0 %v4271_v3 }
  0x58   : > { %1956 = vperm.xlu0 %4141, %v4429_v16  }
  0x5a   : > { %2328 = vperm.xlu1 %4132, %v4429_v16  }
  0x5c   : > { %3967 = vmatmul.mubr.msk.bf16.gmra.mxu0 %vm868_vm0, %v4177_v35  ;;  %1929 = vperm.xlu0 %4141, %v4495_v38  }
  0x5d   : > { %3970 = vmatprep.mubr.msk.bf16.mxu0 %vm868_vm0, %v4178_v36 }
  0x5e   : > { %4133 = vset.pattern.permute.xlu1 %v4276_v24 }
  0x5f   : > { %2388 = vperm.xlu1 %4133, %v4407_v10  }
  0x60   : > { %4143 = vset.pattern.permute.xlu0 %v4275_v21 }
  0x61   : > { %2019 = vperm.xlu0 %4143, %v4414_v12  }
  0x63   : > { %2421 = vperm.xlu1 %4133, %v4429_v16  }
  0x64   : > { %3971 = vmatmul.mubr.msk.bf16.gmra.mxu0 %vm868_vm0, %v4179_v39 }
  0x65   : > { %3974 = vmatprep.mubr.msk.bf16.mxu0 %vm868_vm0, %v4180_v40  ;;  %2022 = vperm.xlu0 %4143, %v4495_v38  }
  0x67   : > { %2425 = vperm.xlu1 %4133, %v4424_v15  }
  0x69   : > { %4145 = vset.pattern.permute.xlu0 %v4277_v27 }
  0x6a   : > { %2109 = vperm.xlu0 %4145, %v4407_v10  }
  0x6b   : > { %4136 = vset.pattern.permute.xlu1 %v4278_v28 }
  0x6c   : > { %3975 = vmatmul.mubr.msk.bf16.gmra.mxu0 %vm868_vm0, %v4181_v41  ;;  %2484 = vperm.xlu1 %4136, %v4414_v12  }
  0x6d   : > { %3978 = vmatprep.mubr.msk.bf16.mxu0 %vm868_vm0, %v4182_v42 }
  0x6e   : > { %2146 = vperm.xlu0 %4145, %v4424_v15  }
  0x70   : > { %2514 = vperm.xlu1 %4136, %v4429_v16  }
  0x72   : > { %2150 = vperm.xlu0 %4145, %v4528_v45  }
  0x74   : > { %3979 = vmatmul.mubr.msk.bf16.gmra.mxu0 %vm868_vm0, %v4183_v43  ;;  %4137 = vset.pattern.permute.xlu1 %v4279_v31 }
  0x75   : > { %3982 = vmatprep.mubr.msk.bf16.mxu0 %vm868_vm0, %v4184_v44  ;;  %2574 = vperm.xlu1 %4137, %v4407_v10  }
  0x76   : > { %4149 = vset.pattern.permute.xlu0 %v4274_v20 }
  0x77   : > { %2301 = vperm.xlu0 %4149, %v4495_v38  }
  0x79   : > { %2607 = vperm.xlu1 %4137, %v4429_v16  }
  0x7b   : > { %4152 = vset.pattern.permute.xlu0 %v4276_v24 }
  0x7c   : > { %3983 = vmatmul.mubr.msk.bf16.gmra.mxu0 %vm868_vm0, %v4185_v46  ;;  %2429 = vperm.xlu0 %4152, %v4528_v45  }
  0x7d   : > { %3986 = vmatprep.mubr.msk.bf16.mxu0 %vm868_vm0, %v4186_v47  ;;  %2611 = vperm.xlu1 %4137, %v4424_v15  }
  0x80   : > { %4154 = vset.pattern.permute.xlu0 %v4279_v31 }
  0x81   : > { %4140 = vset.pattern.permute.xlu1 %v4280_v34  ;;  %2580 = vperm.xlu0 %4154, %v4495_v38  }
  0x82   : > { %2670 = vperm.xlu1 %4140, %v4414_v12  }
  0x84   : > { %3987 = vmatmul.mubr.msk.bf16.gmra.mxu0 %vm868_vm0, %v4187_v48 }
  0x85   : > { %3990 = vmatprep.mubr.msk.bf16.mxu0 %vm868_vm0, %v4188_v49  ;;  %4157 = vset.pattern.permute.xlu0 %v4280_v34  ;;  %v4199_v49 = vld [vmem:[%s4366_s20 + $0x118] sm:$0xff]  }
  0x86   : > { %2700 = vperm.xlu1 %4140, %v4429_v16   ;;  %2708 = vperm.xlu0 %4157, %v4528_v45  }
  0x8a   : > { %4142 = vset.pattern.permute.xlu1 %v4272_v7  ;;  %4159 = vset.pattern.permute.xlu0 %v4272_v7 }
  0x8b   : > { %1833 = vperm.xlu1 %4142, %v4495_v38  }
  0x8c   : > { %3991 = vmatmul.mubr.msk.bf16.gmra.mxu0 %vm868_vm0, %v4189_v50 }
  0x8d   : > { %3994 = vmatprep.mubr.msk.bf16.mxu0 %vm868_vm0, %v4190_v51 }
  0x8f   : > { %1871 = vperm.xlu1 %4142, %v4528_v45  }
  0x93   : > { %4144 = vset.pattern.permute.xlu1 %v4271_v3  ;;  %v4196_v3 = vld [vmem:[%s4366_s20 + $0x100] sm:$0xff]  }
  0x94   : > { %3995 = vmatmul.mubr.msk.bf16.gmra.mxu0 %vm868_vm0, %v4191_v52  ;;  %1964 = vperm.xlu1 %4144, %v4528_v45   ;;  %v4200_v52 = vld [vmem:[%s4366_s20 + $0x120] sm:$0xff]  }
  0x95   : > { %3998 = vmatprep.mubr.msk.bf16.mxu0 %vm868_vm0, %v4192_v53 }
  0x98   : > { %4146 = vset.pattern.permute.xlu1 %v4275_v21 }
  0x99   : > { %2057 = vperm.xlu1 %4146, %v4528_v45  }
  0x9b   : > { %v4579_v59 = vpop.permute.xlu1 %1923  ;;  %v4581_v60 = vpop.permute.xlu0 %1827 }
  0x9c   : > { %3999 = vmatmul.mubr.msk.bf16.gmra.mxu0 %vm868_vm0, %v4193_v55  ;;  %vm1835_vm1 = vcmp.eq.s32.totalorder %v4570_v57, %v4581_v60  ;;  %vm1837_vm2 = vcmp.eq.s32.totalorder %v4577_v58, %v4581_v60  ;;  %vm1838_vm3 = vcmp.eq.s32.totalorder %v4584_v61, %v4581_v60  ;;  %vm1839_vm4 = vcmp.eq.s32.totalorder %v4587_v62, %v4581_v60 }
  0x9d   : > { %4002 = vmatprep.mubr.msk.bf16.mxu0 %vm868_vm0, %v4194_v56  ;;  %4147 = vset.pattern.permute.xlu1 %v4277_v27  ;;  %vm1840_vm5 = vcmp.eq.s32.totalorder %v4590_v63, %v4581_v60  ;;  %vm1841_vm6 = vcmp.eq.s32.totalorder %v4593_v0, %v4581_v60  ;;  %vm1842_vm10 = vcmp.eq.s32.totalorder %v4598_v2, %v4581_v60 }
  0x9e   : > { %2115 = vperm.xlu1 %4147, %v4495_v38  }
  0x9f   : > { %v4605_v5 = vpop.permute.xlu1 %1926  ;;  %v1831_v8 = vpop.permute.xlu0 %1830 }
  0xa0   : > { %vm1843_vm11 = vcmp.eq.s32.totalorder %v4570_v57, %v1831_v8  ;;  %vm1844_vm12 = vcmp.eq.s32.totalorder %v4603_v4, %v1831_v8  ;;  %vm1845_vm13 = vcmp.eq.s32.totalorder %v4577_v58, %v1831_v8  ;;  %vm1846_vm14 = vcmp.eq.s32.totalorder %v4584_v61, %v1831_v8 }
  0xa1   : > { %vm1847_vm15 = vcmp.eq.s32.totalorder %v4587_v62, %v1831_v8  ;;  %vm1848_vm9 = vcmp.eq.s32.totalorder %v4590_v63, %v1831_v8  ;;  %vm1849_vm8 = vcmp.eq.s32.totalorder %v4593_v0, %v1831_v8  ;;  %vm1850_vm7 = vcmp.eq.s32.totalorder %v4598_v2, %v1831_v8 }
  0xa2   : > { %4148 = vset.pattern.permute.xlu1 %v4273_v17 }
  0xa3   : > { %2208 = vperm.xlu1 %4148, %v4495_v38   ;;  %v4638_v9 = vpop.permute.xlu0 %1861 }
  0xa4   : > { %4003 = vmatmul.mubr.msk.bf16.gmra.mxu0 %vm868_vm0, %v4195_v1  ;;  %v1867_v10 = vpop.permute.xlu1 %1866  ;;  %v4645_v11 = vsel %vm1835_vm1, %v4638_v9, 0.0  ;;  %v4651_v12 = vsel %vm1837_vm2, %v4638_v9, 0.0  ;;  %v4657_v13 = vsel %vm1838_vm3, %v4638_v9, 0.0  ;;  %v4665_v25 = vsel %vm1839_vm4, %v4638_v9, 0.0 }
  0xa5   : > { %4006 = vmatprep.mubr.msk.bf16.mxu0 %vm868_vm0, %v4196_v3  ;;  %v1882_v15 = vsel %vm1843_vm11, %v1867_v10, 0.0  ;;  %v1884_v16 = vsel %vm1845_vm13, %v1867_v10, 0.0  ;;  %v1885_v17 = vsel %vm1846_vm14, %v1867_v10, 0.0  ;;  %v1886_v18 = vsel %vm1847_vm15, %v1867_v10, 0.0 }
  0xa6   : > { %v1887_v21 = vsel %vm1848_vm9, %v1867_v10, 0.0  ;;  %v1888_v22 = vsel %vm1849_vm8, %v1867_v10, 0.0  ;;  %v1889_v23 = vsel %vm1850_vm7, %v1867_v10, 0.0  ;;  %vm1943_vm1 = vcmp.eq.s32.totalorder %v4587_v62, %v4605_v5 }
  0xa7   : > { %2243 = vperm.xlu1 %4148, %v4528_v45   ;;  %v4674_v26 = vsel %vm1840_vm5, %v4638_v9, 0.0  ;;  %v4680_v27 = vsel %vm1841_vm6, %v4638_v9, 0.0  ;;  %v4686_v29 = vsel %vm1842_vm10, %v4638_v9, 0.0  ;;  %vm1944_vm2 = vcmp.eq.s32.totalorder %v4590_v63, %v4605_v5 }
  0xa8   : > { %vm1945_vm3 = vcmp.eq.s32.totalorder %v4593_v0, %v4605_v5  ;;  %vm1946_vm4 = vcmp.eq.s32.totalorder %v4598_v2, %v4605_v5  ;;  %vm1940_vm5 = vcmp.eq.s32.totalorder %v4603_v4, %v4605_v5  ;;  %v1883_v33 = vsel %vm1844_vm12, %v1867_v10, 0.0 }
  0xa9   : > { %v4694_v30 = vpop.permute.xlu0 %2205  ;;  %v1961_v32 = vpop.permute.xlu1 %1960  ;;  %vm7292_vm6 = vcmp.eq.s32.totalorder %v4570_v57, %v4605_v5  ;;  %vm7293_vm7 = vcmp.eq.s32.totalorder %v4577_v58, %v4605_v5  ;;  %vm7294_vm8 = vcmp.eq.s32.totalorder %v4584_v61, %v4605_v5 }
  0xaa   : > { %7291 = vst [vmem:[#allocation14_spill] sm:$0xff] %v4694_v30  ;;  %v1975_v35 = vsel %vm7292_vm6, %v1961_v32, 0.0  ;;  %v1977_v36 = vsel %vm7293_vm7, %v1961_v32, 0.0  ;;  %v1978_v37 = vsel %vm7294_vm8, %v1961_v32, 0.0  ;;  %v1979_v39 = vsel %vm1943_vm1, %v1961_v32, 0.0 }
  0xab   : > { %4150 = vset.pattern.permute.xlu1 %v4274_v20  ;;  %v1980_v40 = vsel %vm1944_vm2, %v1961_v32, 0.0  ;;  %v1981_v41 = vsel %vm1945_vm3, %v1961_v32, 0.0  ;;  %v1982_v42 = vsel %vm1946_vm4, %v1961_v32, 0.0  ;;  %v4715_v43 = vadd.f32 %v1975_v35, %v1882_v15 }
  0xac   : > { %4007 = vmatmul.mubr.msk.bf16.gmra.mxu0 %vm868_vm0, %v4197_v14  ;;  %2336 = vperm.xlu1 %4150, %v4528_v45   ;;  %v4718_v44 = vadd.f32 %v1977_v36, %v1884_v16  ;;  %v4720_v46 = vadd.f32 %v1978_v37, %v1885_v17  ;;  %v4722_v47 = vadd.f32 %v1979_v39, %v1886_v18  ;;  %v1976_v20 = vsel %vm1940_vm5, %v1961_v32, 0.0  ;;  %v4201_v16 = vld [vmem:[%s4366_s20 + $0x128] sm:$0xff]   ;;  %v4202_v17 = vld [vmem:[%s4366_s20 + $0x130] sm:$0xff]  }
  0xad   : > { %4010 = vmatprep.mubr.msk.bf16.mxu0 %vm868_vm0, %v4198_v19  ;;  %v4724_v48 = vadd.f32 %v1980_v40, %v1887_v21  ;;  %v4727_v50 = vadd.f32 %v1981_v41, %v1888_v22  ;;  %v4729_v51 = vadd.f32 %v1982_v42, %v1889_v23  ;;  %v4739_v55 = vadd.f32 %v1976_v20, %v1883_v33  ;;  %v4204_v23 = vld [vmem:[%s4366_s20 + $0x140] sm:$0xff]   ;;  %v4205_v36 = vld [vmem:[%s4366_s20 + $0x148] sm:$0xff]  }
  0xae   : > { %7295 = vst [vmem:[#allocation15_spill] sm:$0xff] %v4720_v46  ;;  %v4735_v53 = vpop.permute.xlu1 %2016  ;;  %v4737_v54 = vpop.permute.xlu0 %2295  ;;  %v4208_v40 = vld [vmem:[%s4366_s20 + $0x160] sm:$0xff]   ;;  %vm1931_vm1 = vcmp.eq.s32.totalorder %v4570_v57, %v4579_v59  ;;  %vm1933_vm2 = vcmp.eq.s32.totalorder %v4577_v58, %v4579_v59  ;;  %vm1934_vm3 = vcmp.eq.s32.totalorder %v4584_v61, %v4579_v59  ;;  %vm1935_vm4 = vcmp.eq.s32.totalorder %v4587_v62, %v4579_v59 }
  0xaf   : > { %7296 = vst [vmem:[#allocation16_spill] sm:$0xff] %v4724_v48  ;;  %7297 = vst [vmem:[#allocation17_spill] sm:$0xff] %v4729_v51  ;;  %vm2024_vm9 = vcmp.eq.s32.totalorder %v4570_v57, %v4735_v53  ;;  %vm2026_vm10 = vcmp.eq.s32.totalorder %v4577_v58, %v4735_v53  ;;  %vm2027_vm11 = vcmp.eq.s32.totalorder %v4584_v61, %v4735_v53 }
  0xb0   : > { %4151 = vset.pattern.permute.xlu1 %v4276_v24  ;;  %vm2028_vm12 = vcmp.eq.s32.totalorder %v4587_v62, %v4735_v53  ;;  %vm2029_vm13 = vcmp.eq.s32.totalorder %v4590_v63, %v4735_v53  ;;  %vm2030_vm14 = vcmp.eq.s32.totalorder %v4593_v0, %v4735_v53  ;;  %vm2031_vm15 = vcmp.eq.s32.totalorder %v4598_v2, %v4735_v53 }
  0xb1   : > { %2394 = vperm.xlu1 %4151, %v4495_v38   ;;  %vm1936_vm5 = vcmp.eq.s32.totalorder %v4590_v63, %v4579_v59  ;;  %vm1937_vm6 = vcmp.eq.s32.totalorder %v4593_v0, %v4579_v59  ;;  %vm1938_vm7 = vcmp.eq.s32.totalorder %v4598_v2, %v4579_v59  ;;  %vm1836_vm8 = vcmp.eq.s32.totalorder %v4603_v4, %v4581_v60  ;;  %v4211_v60 = vld [vmem:[%s4366_s20 + $0x178] sm:$0xff]  }
  0xb2   : > { %v4759_v24 = vpop.permute.xlu1 %2049  ;;  %v4761_v56 = vpop.permute.xlu0 %2332 }
  0xb3   : > { %7298 = vst [vmem:[#allocation18_spill] sm:$0xff] %v4761_v56  ;;  %v4764_v1 = vsel %vm2024_vm9, %v4759_v24, 0.0  ;;  %v4767_v3 = vsel %vm2026_vm10, %v4759_v24, 0.0  ;;  %v4770_v5 = vsel %vm2027_vm11, %v4759_v24, 0.0  ;;  %v4773_v8 = vsel %vm2028_vm12, %v4759_v24, 0.0 }
  0xb4   : > { %4011 = vmatmul.mubr.msk.bf16.gmra.mxu0 %vm868_vm0, %v4199_v49  ;;  %v4776_v10 = vsel %vm2029_vm13, %v4759_v24, 0.0  ;;  %v4779_v14 = vsel %vm2030_vm14, %v4759_v24, 0.0  ;;  %v4782_v15 = vsel %vm2031_vm15, %v4759_v24, 0.0  ;;  %v4209_v49 = vld [vmem:[%s4366_s20 + $0x168] sm:$0xff]   ;;  %vm2025_vm9 = vcmp.eq.s32.totalorder %v4603_v4, %v4735_v53 }
  0xb5   : > { %4014 = vmatprep.mubr.msk.bf16.mxu0 %vm868_vm0, %v4200_v52  ;;  %7299 = vst [vmem:[#allocation19_spill] sm:$0xff] %v4776_v10  ;;  %7300 = vst [vmem:[#allocation20_spill] sm:$0xff] %v4782_v15  ;;  %4153 = vset.pattern.permute.xlu1 %v4278_v28  ;;  %v4203_v28 = vld [vmem:[%s4366_s20 + $0x138] sm:$0xff]  }
  0xb6   : > { %2487 = vperm.xlu1 %4153, %v4495_v38   ;;  %v4788_v18 = vpop.permute.xlu1 %2053 }
  0xb7   : > { %v4790_v19 = vpop.permute.xlu0 %2391 }
  0xb8   : > { %7301 = vst [vmem:[#allocation21_spill] sm:$0xff] %v4790_v19 }
  0xba   : > { %2522 = vperm.xlu1 %4153, %v4528_v45  }
  0xbb   : > { %v4795_v21 = vpop.permute.xlu1 %2112 }
  0xbc   : > { %4015 = vmatmul.mubr.msk.bf16.gmra.mxu0 %vm868_vm0, %v4201_v16  ;;  %v4797_v22 = vpop.permute.xlu0 %2481  ;;  %vm2127_vm13 = vcmp.eq.s32.totalorder %v4577_v58, %v4795_v21  ;;  %vm2129_vm10 = vcmp.eq.s32.totalorder %v4587_v62, %v4795_v21  ;;  %vm2131_vm12 = vcmp.eq.s32.totalorder %v4593_v0, %v4795_v21 }
  0xbd   : > { %4018 = vmatprep.mubr.msk.bf16.mxu0 %vm868_vm0, %v4202_v17 }
  0xbe   : > { %4155 = vset.pattern.permute.xlu1 %v4279_v31  ;;  %v4206_v31 = vld [vmem:[%s4366_s20 + $0x150] sm:$0xff]  }
  0xbf   : > { %2615 = vperm.xlu1 %4155, %v4528_v45   ;;  %v4803_v32 = vpop.permute.xlu1 %2142 }
  0xc0   : > { %7302 = vst [vmem:[#allocation22_spill] sm:$0xff] %v4803_v32  ;;  %v4805_v33 = vpop.permute.xlu0 %2518 }
  0xc1   : > { %7303 = vst [vmem:[#allocation23_spill] sm:$0xff] %v4805_v33 }
  0xc3   : > { %4156 = vset.pattern.permute.xlu1 %v4280_v34 }
  0xc4   : > { %4019 = vmatmul.mubr.msk.bf16.gmra.mxu0 %vm868_vm0, %v4203_v28  ;;  %2673 = vperm.xlu1 %4156, %v4495_v38   ;;  %v4811_v35 = vpop.permute.xlu1 %2202  ;;  %v4207_v38 = vld [vmem:[%s4366_s20 + $0x158] sm:$0xff]  }
  0xc5   : > { %4022 = vmatprep.mubr.msk.bf16.mxu0 %vm868_vm0, %v4204_v23  ;;  %7304 = vst [vmem:[#allocation24_spill] sm:$0xff] %v4811_v35  ;;  %v4815_v37 = vpop.permute.xlu0 %2577  ;;  %v4210_v23 = vld [vmem:[%s4366_s20 + $0x170] sm:$0xff]   ;;  %vm2213_vm15 = vcmp.eq.s32.totalorder %v4584_v61, %v4811_v35  ;;  %vm2215_vm14 = vcmp.eq.s32.totalorder %v4590_v63, %v4811_v35 }
  0xc8   : > { %v4817_v45 = vpop.permute.xlu1 %2235  ;;  %4158 = vset.pattern.permute.xlu1 %v4272_v7 }
  0xc9   : > { %7305 = vst [vmem:[#allocation25_spill] sm:$0xff] %v4817_v45 }
  0xca   : > { %v4822_v39 = vpop.permute.xlu0 %2667 }
  0xcc   : > { %4023 = vmatmul.mubr.msk.bf16.gmra.mxu0 %vm868_vm0, %v4205_v36  ;;  %v4824_v34 = vpop.permute.xlu1 %2239 }
  0xcd   : > { %4026 = vmatprep.mubr.msk.bf16.mxu0 %vm868_vm0, %v4206_v31  ;;  %7306 = vst [vmem:[#allocation26_spill] sm:$0xff] %v4824_v34 }
  0xce   : > { %v4828_v41 = vpop.permute.xlu0 %2704 }
  0xcf   : > { %7307 = vst [vmem:[#allocation27_spill] sm:$0xff] %v4828_v41 }
  0xd1   : > { %v4831_v42 = vpop.permute.xlu1 %2298 }
  0xd2   : > { %7308 = vst [vmem:[#allocation28_spill] sm:$0xff] %v4831_v42 }
  0xd3   : > { %v4848_v7 = vpop.permute.xlu0 %1956 }
  0xd4   : > { %4027 = vmatmul.mubr.msk.bf16.gmra.mxu0 %vm868_vm0, %v4207_v38  ;;  %v1967_v52 = vsel %vm1931_vm1, %v4848_v7, 0.0  ;;  %v1969_v16 = vsel %vm1933_vm2, %v4848_v7, 0.0  ;;  %v1970_v17 = vsel %vm1934_vm3, %v4848_v7, 0.0  ;;  %v1971_v28 = vsel %vm1935_vm4, %v4848_v7, 0.0 }
  0xd5   : > { %4030 = vmatprep.mubr.msk.bf16.mxu0 %vm868_vm0, %v4208_v40  ;;  %v4851_v20 = vpop.permute.xlu1 %2328  ;;  %v1972_v36 = vsel %vm1936_vm5, %v4848_v7, 0.0  ;;  %v1973_v31 = vsel %vm1937_vm6, %v4848_v7, 0.0  ;;  %v1974_v38 = vsel %vm1938_vm7, %v4848_v7, 0.0  ;;  %v1991_v40 = vadd.f32 %v1967_v52, %v4645_v11 }
  0xd6   : > { %7309 = vst [vmem:[#allocation29_spill] sm:$0xff] %v4851_v20  ;;  %v1993_v51 = vadd.f32 %v1969_v16, %v4651_v12  ;;  %v4866_v15 = vadd.f32 %v1970_v17, %v4657_v13  ;;  %v1995_v6 = vadd.f32 %v1971_v28, %v4665_v25  ;;  %v4870_v48 = vadd.f32 %v1972_v36, %v4674_v26 }
  0xd7   : > { %v1997_v10 = vadd.f32 %v1973_v31, %v4680_v27  ;;  %v4873_v41 = vpop.permute.xlu0 %1929  ;;  %v4877_v46 = vadd.f32 %v1974_v38, %v4686_v29  ;;  %v4903_v26 = vsel %vm1836_vm8, %v4638_v9, 0.0  ;;  %vm2212_vm2 = vcmp.eq.s32.totalorder %v4577_v58, %v4811_v35  ;;  %v4212_v29 = vld [vmem:[%s4366_s20 + $0x180] sm:$0xff]  }
  0xd8   : > { %7310 = vst [vmem:[#allocation30_spill] sm:$0xff] %v4870_v48  ;;  %v4880_v11 = vadd.f32 %v4767_v3, %v1993_v51  ;;  %v4890_v13 = vadd.f32 %v4773_v8, %v1995_v6  ;;  %v4908_v6 = vsel %vm2025_vm9, %v4759_v24, 0.0  ;;  %vm2214_vm3 = vcmp.eq.s32.totalorder %v4587_v62, %v4811_v35 }
  0xd9   : > { %7311 = vst [vmem:[#allocation31_spill] sm:$0xff] %v4877_v46  ;;  %v4893_v25 = vadd.f32 %v4779_v14, %v1997_v10  ;;  %vm2211_vm4 = vcmp.eq.s32.totalorder %v4603_v4, %v4811_v35  ;;  %v4926_v27 = vadd.f32 %v4764_v1, %v1991_v40  ;;  %v5027_v31 = vsel %vm2213_vm15, %v4817_v45, 0.0 }
  0xda   : > { %v4887_v12 = vpop.permute.xlu1 %2388  ;;  %v5033_v38 = vsel %vm2215_vm14, %v4817_v45, 0.0  ;;  %vm7324_vm15 = vcmp.eq.s32.totalorder %v4603_v4, %v4579_v59 }
  0xdb   : > { %7312 = vst [vmem:[#allocation32_spill] sm:$0xff] %v4887_v12  ;;  %7321 = vst [vmem:[#allocation39_spill] sm:$0xff] %v5033_v38 }
  0xdc   : > { %4031 = vmatmul.mubr.msk.bf16.gmra.mxu0 %vm868_vm0, %v4209_v49  ;;  %v4921_v9 = vpop.permute.xlu0 %2019 }
  0xdd   : > { %4034 = vmatprep.mubr.msk.bf16.mxu0 %vm868_vm0, %v4210_v23  ;;  %vm2032_vm5 = vcmp.eq.s32.totalorder %v4570_v57, %v4921_v9  ;;  %vm2034_vm6 = vcmp.eq.s32.totalorder %v4577_v58, %v4921_v9  ;;  %vm2035_vm7 = vcmp.eq.s32.totalorder %v4584_v61, %v4921_v9  ;;  %vm2036_vm8 = vcmp.eq.s32.totalorder %v4587_v62, %v4921_v9 }
  0xde   : > { %v4929_v51 = vpop.permute.xlu1 %2421  ;;  %vm2037_vm9 = vcmp.eq.s32.totalorder %v4590_v63, %v4921_v9  ;;  %vm2038_vm11 = vcmp.eq.s32.totalorder %v4593_v0, %v4921_v9  ;;  %vm2039_vm1 = vcmp.eq.s32.totalorder %v4598_v2, %v4921_v9  ;;  %v4958_v53 = vsel %vm2032_vm5, %v4788_v18, 0.0 }
  0xdf   : > { %7313 = vst [vmem:[#allocation33_spill] sm:$0xff] %v4929_v51  ;;  %v2070_v24 = vsel %vm2034_vm6, %v4788_v18, 0.0  ;;  %v4963_v1 = vsel %vm2035_vm7, %v4788_v18, 0.0  ;;  %v2072_v3 = vsel %vm2036_vm8, %v4788_v18, 0.0  ;;  %v4967_v8 = vsel %vm2037_vm9, %v4788_v18, 0.0 }
  0xe0   : > { %7314 = vst [vmem:[#allocation34_spill] sm:$0xff] %v4967_v8  ;;  %v2074_v10 = vsel %vm2038_vm11, %v4788_v18, 0.0  ;;  %v4970_v14 = vpop.permute.xlu0 %2022  ;;  %v4976_v52 = vsel %vm2039_vm1, %v4788_v18, 0.0  ;;  %v2094_v16 = vadd.f32 %v2070_v24, %v4718_v44  ;;  %v4980_v17 = vadd.f32 %v2072_v3, %v4722_v47  ;;  %v4214_v24 = vld [vmem:[%s4366_s20 + $0x190] sm:$0xff]  }
  0xe1   : > { %7315 = vst [vmem:[#allocation35_spill] sm:$0xff] %v4970_v14  ;;  %7317 = vst [vmem:[#allocation37_spill] sm:$0xff] %v4976_v52  ;;  %v4983_v28 = vadd.f32 %v2074_v10, %v4727_v50  ;;  %vm2304_vm11 = vcmp.eq.s32.totalorder %v4603_v4, %v4737_v54  ;;  %v4991_v23 = vsel %vm2212_vm2, %v4817_v45, 0.0  ;;  %v4997_v44 = vsel %vm2214_vm3, %v4817_v45, 0.0  ;;  %v5078_v52 = vld [vmem:[%s7148_s5] ss:$0 sm:$0xff] }
  0xe2   : > { %v4973_v49 = vpop.permute.xlu1 %2425  ;;  %7318 = vst [vmem:[#allocation38_spill] sm:$0xff] %v4997_v44  ;;  %vm2126_vm1 = vcmp.eq.s32.totalorder %v4603_v4, %v4795_v21  ;;  %v5005_v47 = vsel %vm2211_vm4, %v4817_v45, 0.0  ;;  %vm7319_vm2 = vcmp.eq.s32.totalorder %v4570_v57, %v4811_v35  ;;  %vm7320_vm3 = vcmp.eq.s32.totalorder %v4577_v58, %v4694_v30 }
  0xe3   : > { %7316 = vst [vmem:[#allocation36_spill] sm:$0xff] %v4973_v49  ;;  %v5011_v50 = vsel %vm7319_vm2, %v4817_v45, 0.0  ;;  %v5017_v36 = vsel %vm7320_vm3, %v4824_v34, 0.0  ;;  %vm2313_vm5 = vcmp.eq.s32.totalorder %v4577_v58, %v4831_v42  ;;  %vm2405_vm6 = vcmp.eq.s32.totalorder %v4603_v4, %v4790_v19 }
  0xe4   : > { %4035 = vmatmul.mubr.msk.bf16.gmra.mxu0 %vm868_vm0, %v4211_v60  ;;  %vm7322_vm4 = vcmp.eq.s32.totalorder %v4587_v62, %v4694_v30  ;;  %v4213_v60 = vld [vmem:[%s4366_s20 + $0x188] sm:$0xff]   ;;  %vm2315_vm7 = vcmp.eq.s32.totalorder %v4587_v62, %v4831_v42  ;;  %vm2312_vm8 = vcmp.eq.s32.totalorder %v4603_v4, %v4831_v42  ;;  %vm2033_vm14 = vcmp.eq.s32.totalorder %v4603_v4, %v4921_v9 }
  0xe5   : > { %4038 = vmatprep.mubr.msk.bf16.mxu0 %vm868_vm0, %v4212_v29  ;;  %v5039_v40 = vsel %vm7322_vm4, %v4824_v34, 0.0  ;;  %v1968_v29 = vsel %vm7324_vm15, %v4848_v7, 0.0  ;;  %v5051_v3 = vpop.permute.xlu0 %2109  ;;  %vm7326_vm9 = vcmp.eq.s32.totalorder %v4603_v4, %v4694_v30  ;;  %vm2490_vm2 = vcmp.eq.s32.totalorder %v4603_v4, %v4797_v22 }
  0xe6   : > { %7323 = vst [vmem:[#allocation40_spill] sm:$0xff] %v5039_v40  ;;  %7325 = vst [vmem:[#allocation41_spill] sm:$0xff] %v5051_v3  ;;  %v5059_v10 = vsel %vm7326_vm9, %v4824_v34, 0.0  ;;  %vm7327_vm3 = vcmp.eq.s32.totalorder %v4570_v57, %v4694_v30  ;;  %vm7328_vm4 = vcmp.eq.s32.totalorder %v4584_v61, %v4694_v30  ;;  %v5084_v46 = vsel %vm2313_vm5, %v4761_v56, 0.0 }
  0xe7   : > { %v5067_v59 = vsel %vm7327_vm3, %v4824_v34, 0.0  ;;  %v5073_v7 = vsel %vm7328_vm4, %v4824_v34, 0.0  ;;  %7329 = vst [vmem:[#allocation42_spill] sm:$0xff] %v5084_v46  ;;  %v5086_v45 = vpop.permute.xlu1 %2484  ;;  %vm2119_vm15 = vcmp.eq.s32.totalorder %v4577_v58, %v5051_v3  ;;  %vm2121_vm9 = vcmp.eq.s32.totalorder %v4587_v62, %v5051_v3 }
  0xe8   : > { %7330 = vst [vmem:[#allocation43_spill] sm:$0xff] %v5086_v45  ;;  %vm7331_vm3 = vcmp.eq.s32.totalorder %v4590_v63, %v4694_v30  ;;  %vm2125_vm4 = vcmp.eq.s32.totalorder %v4570_v57, %v4795_v21  ;;  %v5104_v38 = vsel %vm2315_vm7, %v4761_v56, 0.0  ;;  %v1992_v8 = vadd.f32 %v1968_v29, %v4903_v26 }
  0xe9   : > { %v5096_v35 = vsel %vm7331_vm3, %v4824_v34, 0.0  ;;  %7333 = vst [vmem:[#allocation45_spill] sm:$0xff] %v5104_v38  ;;  %v5111_v48 = vsel %vm2312_vm8, %v4761_v56, 0.0  ;;  %vm2397_vm5 = vcmp.eq.s32.totalorder %v4603_v4, %v4887_v12  ;;  %vm2303_vm3 = vcmp.eq.s32.totalorder %v4570_v57, %v4737_v54  ;;  %v5135_v44 = vpop.permute.xlu0 %2146 }
  0xea   : > { %7332 = vst [vmem:[#allocation44_spill] sm:$0xff] %v5096_v35  ;;  %vm2123_vm7 = vcmp.eq.s32.totalorder %v4593_v0, %v5051_v3  ;;  %v2155_v26 = vsel %vm2119_vm15, %v4803_v32, 0.0  ;;  %v2157_v29 = vsel %vm2121_vm9, %v4803_v32, 0.0  ;;  %v2069_v30 = vsel %vm2033_vm14, %v4788_v18, 0.0  ;;  %7335 = vst [vmem:[#allocation47_spill] sm:$0xff] %v5135_v44 }
  0xeb   : > { %v2159_v35 = vsel %vm2123_vm7, %v4803_v32, 0.0  ;;  %v5133_v40 = vadd.f32 %v2157_v29, %v4890_v13  ;;  %v5137_v14 = vpop.permute.xlu1 %2514  ;;  %v2167_v13 = vsel %vm2131_vm12, %v5135_v44, 0.0  ;;  %v2085_v9 = vadd.f32 %v4908_v6, %v1992_v8 }
  0xec   : > { %v3944_v34 = vpop.f32.mrf.mxu0  ;;  %4039 = vmatmul.mubr.msk.bf16.gmra.mxu0 %vm868_vm0, %v4213_v60  ;;  %v5130_v60 = vadd.f32 %v2155_v26, %v4880_v11  ;;  %7336 = vst [vmem:[#allocation48_spill] sm:$0xff] %v5137_v14  ;;  %v5140_v18 = vadd.f32 %v2159_v35, %v4893_v25  ;;  %v2165_v11 = vsel %vm2129_vm10, %v5135_v44, 0.0  ;;  %vm2404_vm8 = vcmp.eq.s32.totalorder %v4570_v57, %v4790_v19  ;;  %v4215_v26 = vld [vmem:[%s4366_s20 + $0x198] sm:$0xff]  }
  0xed   : > { %v1104_v38 = vadd.f32 %v3944_v34, %v5078_v52  ;;  %4042 = vmatprep.mubr.msk.bf16.mxu0 %vm868_vm0, %v4214_v24  ;;  %7334 = vst [vmem:[#allocation46_spill] sm:$0xff] %v5133_v40  ;;  %v2163_v34 = vsel %vm2127_vm13, %v5135_v44, 0.0  ;;  %vm2311_vm13 = vcmp.eq.s32.totalorder %v4570_v57, %v4831_v42  ;;  %v5165_v29 = vadd.f32 %v2165_v11, %v4980_v17 }
  0xee   : > { %v1095_v46 = vpop.f32.mrf.mxu0  ;;  %7337 = vst [vmem:[#allocation49_spill] sm:$0xff] %v5140_v18  ;;  %v5156_v25 = vadd.f32 %v2163_v34, %v2094_v16  ;;  %v5168_v18 = vadd.f32 %v2167_v13, %v4983_v28  ;;  %v2340_v6 = vsel %vm2304_vm11, %v4851_v20, 0.0  ;;  %v4216_v16 = vld [vmem:[%s4366_s20 + $0x1a0] sm:$0xff]   ;;  %vm2118_vm10 = vcmp.eq.s32.totalorder %v4603_v4, %v5051_v3 }
  0xef   : > { %1608 = vst [vmem:[%s4371_s23 + $0x10] sm:$0xff] %v1104_v38  ;;  %v1096_v35 = vadd.f32 %v5078_v52, %v1095_v46  ;;  %7338 = vst [vmem:[#allocation50_spill] sm:$0xff] %v5165_v29  ;;  %v2093_v46 = vadd.f32 %v2069_v30, %v4739_v55  ;;  %v2162_v17 = vsel %vm2126_vm1, %v5135_v44, 0.0  ;;  %v2433_v30 = vsel %vm2397_vm5, %v4929_v51, 0.0 }
  0xf0   : > { %v3945_v24 = vpop.f32.mrf.mxu0  ;;  %7339 = vst [vmem:[#allocation51_spill] sm:$0xff] %v5168_v18  ;;  %vm2591_vm12 = vcmp.eq.s32.totalorder %v4603_v4, %v4815_v37  ;;  %vm2117_vm11 = vcmp.eq.s32.totalorder %v4570_v57, %v5051_v3  ;;  %v2154_v28 = vsel %vm2118_vm10, %v4803_v32, 0.0  ;;  %v2441_v11 = vsel %vm2405_vm6, %v4973_v49, 0.0  ;;  %v5203_v18 = vpop.permute.xlu1 %2574 }
  0xf1   : > { %1606 = vst [vmem:[%s4371_s23] sm:$0xff] %v1096_v35  ;;  %v1107_v8 = vadd.f32 %v3945_v24, %v5078_v52  ;;  %v2186_v34 = vadd.f32 %v2162_v17, %v2093_v46  ;;  %vm2489_vm1 = vcmp.eq.s32.totalorder %v4570_v57, %v4797_v22  ;;  %v2178_v29 = vadd.f32 %v2154_v28, %v2085_v9 }
  0xf2   : > { %v1098_v55 = vpop.f32.mrf.mxu0  ;;  %vm2498_vm14 = vcmp.eq.s32.totalorder %v4603_v4, %v5086_v45  ;;  %vm2583_vm6 = vcmp.eq.s32.totalorder %v4603_v4, %v5203_v18  ;;  %vm2590_vm15 = vcmp.eq.s32.totalorder %v4570_v57, %v4815_v37  ;;  %vm2307_vm9 = vcmp.eq.s32.totalorder %v4587_v62, %v4737_v54 }
  0xf3   : > { %1609 = vst [vmem:[%s4371_s23 + $0x18] sm:$0xff] %v1107_v8  ;;  %v5200_v13 = vpack.c.bf16 %v1107_v8, %v1104_v38  ;;  %v1099_v24 = vadd.f32 %v5078_v52, %v1098_v55  ;;  %v2279_v17 = vadd.f32 %v5059_v10, %v2186_v34  ;;  %v2526_v38 = vsel %vm2490_vm2, %v5137_v14, 0.0 }
  0xf4   : > { %v3948_v46 = vpop.f32.mrf.mxu0  ;;  %4043 = vmatmul.mubr.msk.bf16.gmra.mxu0 %vm868_vm0, %v4215_v26  ;;  %v2534_v8 = vsel %vm2498_vm14, %v4805_v33, 0.0  ;;  %v2271_v10 = vadd.f32 %v5005_v47, %v2178_v29  ;;  %v2092_v55 = vadd.f32 %v4958_v53, %v4715_v43  ;;  %v2339_v47 = vsel %vm2303_vm3, %v4851_v20, 0.0 }
  0xf5   : > { %7340 = vst [vmem:[#allocation52_spill] sm:$0xff] %v5200_v13  ;;  %1607 = vst [vmem:[%s4371_s23 + $0x8] sm:$0xff] %v1099_v24  ;;  %v5219_v9 = vpack.c.bf16 %v1099_v24, %v1096_v35  ;;  %v1120_v26 = vadd.f32 %v3948_v46, %v5078_v52  ;;  %4046 = vmatprep.mubr.msk.bf16.mxu0 %vm868_vm0, %v4216_v16  ;;  %v2372_v34 = vadd.f32 %v5111_v48, %v2279_v17  ;;  %v5241_v48 = vpop.permute.xlu1 %2607  ;;  %v4217_v46 = vld [vmem:[%s4366_s20 + $0x1a8] sm:$0xff]  }
  0xf6   : > { %v1111_v28 = vpop.f32.mrf.mxu0  ;;  %v2153_v13 = vsel %vm2117_vm11, %v4803_v32, 0.0  ;;  %v2161_v35 = vsel %vm2125_vm4, %v5135_v44, 0.0  ;;  %v2364_v53 = vadd.f32 %v2340_v6, %v2271_v10  ;;  %vm2305_vm2 = vcmp.eq.s32.totalorder %v4577_v58, %v4737_v54 }
  0xf7   : > { %7341 = vst [vmem:[#allocation53_spill] sm:$0xff] %v5219_v9  ;;  %1612 = vst [vmem:[%s4371_s23 + $0x30] sm:$0xff] %v1120_v26  ;;  %v1112_v43 = vadd.f32 %v5078_v52, %v1111_v28  ;;  %v2177_v29 = vadd.f32 %v2153_v13, %v4926_v27  ;;  %v2185_v16 = vadd.f32 %v2161_v35, %v2092_v55  ;;  %v2619_v6 = vsel %vm2583_vm6, %v5241_v48, 0.0  ;;  %v4218_v13 = vld [vmem:[%s4366_s20 + $0x1b0] sm:$0xff]  }
  0xf8   : > { %vm2398_vm4 = vcmp.eq.s32.totalorder %v4577_v58, %v4887_v12  ;;  %v3949_v24 = vpop.f32.mrf.mxu0  ;;  %v2465_v17 = vadd.f32 %v2441_v11, %v2372_v34  ;;  %v2347_v27 = vsel %vm2311_vm13, %v4761_v56, 0.0  ;;  %vm2396_vm5 = vcmp.eq.s32.totalorder %v4570_v57, %v4887_v12 }
  0xf9   : > { %vm2128_vm3 = vcmp.eq.s32.totalorder %v4584_v61, %v4795_v21  ;;  %1610 = vst [vmem:[%s4371_s23 + $0x20] sm:$0xff] %v1112_v43  ;;  %v1123_v11 = vadd.f32 %v3949_v24, %v5078_v52  ;;  %v2457_v10 = vadd.f32 %v2433_v30, %v2364_v53  ;;  %v2270_v55 = vadd.f32 %v5011_v50, %v2177_v29  ;;  %v5283_v30 = vpop.permute.xlu1 %2611 }
  0xfa   : > { %v2278_v28 = vadd.f32 %v5067_v59, %v2185_v16  ;;  %v1114_v34 = vpop.f32.mrf.mxu0  ;;  %v2558_v35 = vadd.f32 %v2534_v8, %v2465_v17  ;;  %vm2676_vm7 = vcmp.eq.s32.totalorder %v4603_v4, %v4822_v39  ;;  %v2432_v9 = vsel %vm2396_vm5, %v4929_v51, 0.0 }
  0xfb   : > { %v2440_v40 = vsel %vm2404_vm8, %v4973_v49, 0.0  ;;  %vm2497_vm13 = vcmp.eq.s32.totalorder %v4570_v57, %v5086_v45  ;;  %vm2675_vm10 = vcmp.eq.s32.totalorder %v4570_v57, %v4822_v39  ;;  %1613 = vst [vmem:[%s4371_s23 + $0x38] sm:$0xff] %v1123_v11  ;;  %v5280_v50 = vpack.c.bf16 %v1123_v11, %v1120_v26 }
  0xfc   : > { %v1115_v59 = vadd.f32 %v5078_v52, %v1114_v34  ;;  %v2550_v8 = vadd.f32 %v2526_v38, %v2457_v10  ;;  %v2363_v53 = vadd.f32 %v2339_v47, %v2270_v55  ;;  %vm2406_vm11 = vcmp.eq.s32.totalorder %v4577_v58, %v4790_v19  ;;  %v3952_v29 = vpop.f32.mrf.mxu0  ;;  %4047 = vmatmul.mubr.msk.bf16.gmra.mxu0 %vm868_vm0, %v4217_v46 }
  0xfd   : > { %7342 = vst [vmem:[#allocation54_spill] sm:$0xff] %v5280_v50  ;;  %vm2400_vm8 = vcmp.eq.s32.totalorder %v4587_v62, %v4887_v12  ;;  %vm2120_vm14 = vcmp.eq.s32.totalorder %v4584_v61, %v5051_v3  ;;  %v2627_v26 = vsel %vm2591_vm12, %v5283_v30, 0.0  ;;  %v2371_v38 = vadd.f32 %v2347_v27, %v2278_v28  ;;  %4050 = vmatprep.mubr.msk.bf16.mxu0 %vm868_vm0, %v4218_v13  ;;  %v5332_v28 = vpop.permute.xlu1 %2670 }
  0xfe   : > { %vm2306_vm6 = vcmp.eq.s32.totalorder %v4584_v61, %v4737_v54  ;;  %1611 = vst [vmem:[%s4371_s23 + $0x28] sm:$0xff] %v1115_v59  ;;  %v5299_v47 = vpack.c.bf16 %v1115_v59, %v1112_v43  ;;  %v5302_v16 = vadd.f32 %v3952_v29, %v5078_v52  ;;  %v2525_v24 = vsel %vm2489_vm1, %v5137_v14, 0.0  ;;  %v1127_v43 = vpop.f32.mrf.mxu0 }
  0xff   : > { %v2533_v46 = vsel %vm2497_vm13, %v4805_v33, 0.0  ;;  %vm2408_vm12 = vcmp.eq.s32.totalorder %v4587_v62, %v4790_v19  ;;  %v2643_v17 = vadd.f32 %v2619_v6, %v2550_v8  ;;  %v2456_v27 = vadd.f32 %v2432_v9, %v2363_v53  ;;  %v4219_v6 = vld [vmem:[%s4366_s20 + $0x1b8] sm:$0xff]  }
 0x100   : > { %7343 = vst [vmem:[#allocation55_spill] sm:$0xff] %v5299_v47  ;;  %v2464_v11 = vadd.f32 %v2440_v40, %v2371_v38  ;;  %vm2582_vm5 = vcmp.eq.s32.totalorder %v4570_v57, %v5203_v18  ;;  %vm2314_vm1 = vcmp.eq.s32.totalorder %v4584_v61, %v4831_v42  ;;  %1616 = vst [vmem:[%s4371_s23 + $0x50] sm:$0xff] %v5302_v16  ;;  %v2626_v40 = vsel %vm2590_vm15, %v5283_v30, 0.0  ;;  %v3953_v9 = vpop.f32.mrf.mxu0 }
 0x101   : > { %v5322_v13 = vadd.f32 %v5078_v52, %v1127_v43  ;;  %v2651_v10 = vadd.f32 %v2627_v26, %v2558_v35  ;;  %v2618_v55 = vsel %vm2582_vm5, %v5241_v48, 0.0  ;;  %v2549_v34 = vadd.f32 %v2525_v24, %v2456_v27  ;;  %v7344_v35 = vld [vmem:[#allocation15_spill] sm:$0xff] }
 0x102   : > { %v2557_v59 = vadd.f32 %v2533_v46, %v2464_v11  ;;  %v2087_v8 = vadd.f32 %v4770_v5, %v4866_v15  ;;  %v2095_v53 = vadd.f32 %v4963_v1, %v7344_v35  ;;  %v5341_v29 = vadd.f32 %v3953_v9, %v5078_v52  ;;  %v4220_v26 = vld [vmem:[%s4366_s20 + $0x1c0] sm:$0xff]   ;;  %v1130_v15 = vpop.f32.mrf.mxu0 }
 0x103   : > { %1614 = vst [vmem:[%s4371_s23 + $0x40] sm:$0xff] %v5322_v13  ;;  %vm2684_vm15 = vcmp.eq.s32.totalorder %v4603_v4, %v5332_v28  ;;  %vm2683_vm5 = vcmp.eq.s32.totalorder %v4570_v57, %v5332_v28  ;;  %v2156_v5 = vsel %vm2120_vm14, %v4803_v32, 0.0  ;;  %v7345_v1 = vld [vmem:[#allocation27_spill] sm:$0xff]  ;;  %v2642_v24 = vadd.f32 %v2618_v55, %v2549_v34  ;;  %v5380_v34 = vpop.permute.xlu1 %2700 }
 0x104   : > { %v2720_v38 = vsel %vm2684_vm15, %v7345_v1, 0.0  ;;  %v2650_v46 = vadd.f32 %v2626_v40, %v2557_v59  ;;  %v2719_v43 = vsel %vm2683_vm5, %v7345_v1, 0.0  ;;  %vm2492_vm13 = vcmp.eq.s32.totalorder %v4584_v61, %v4797_v22  ;;  %1617 = vst [vmem:[%s4371_s23 + $0x58] sm:$0xff] %v5341_v29  ;;  %v3956_v9 = vpop.f32.mrf.mxu0  ;;  %4051 = vmatmul.mubr.msk.bf16.gmra.mxu0 %vm868_vm0, %v4219_v6 }
 0x105   : > { %v5360_v27 = vsel %vm2305_vm2, %v4851_v20, 0.0  ;;  %v5366_v11 = vsel %vm2307_vm9, %v4851_v20, 0.0  ;;  %v5372_v55 = vsel %vm2398_vm4, %v4929_v51, 0.0  ;;  %v5377_v40 = vadd.f32 %v5078_v52, %v1130_v15  ;;  %4054 = vmatprep.mubr.msk.bf16.mxu0 %vm868_vm0, %v4220_v26 }
 0x106   : > { %7346 = vst [vmem:[#allocation15_spill] sm:$0xff] %v5366_v11  ;;  %v2744_v59 = vadd.f32 %v2720_v38, %v2651_v10  ;;  %v5382_v35 = vadd.f32 %v2719_v43, %v2650_v46  ;;  %v2164_v47 = vsel %vm2128_vm3, %v5135_v44, 0.0  ;;  %v2180_v50 = vadd.f32 %v2156_v5, %v2087_v8  ;;  %v1143_v5 = vpop.f32.mrf.mxu0 }
 0x107   : > { %v5392_v15 = vsel %vm2400_vm8, %v4929_v51, 0.0  ;;  %1615 = vst [vmem:[%s4371_s23 + $0x48] sm:$0xff] %v5377_v40  ;;  %v5397_v6 = vadd.f32 %v3956_v9, %v5078_v52  ;;  %v2712_v10 = vsel %vm2676_vm7, %v5380_v34, 0.0  ;;  %v2711_v8 = vsel %vm2675_vm10, %v5380_v34, 0.0 }
 0x108   : > { %7347 = vst [vmem:[#allocation27_spill] sm:$0xff] %v5382_v35  ;;  %7348 = vst [vmem:[#allocation56_spill] sm:$0xff] %v5392_v15  ;;  %v2736_v38 = vadd.f32 %v2712_v10, %v2643_v17  ;;  %v5408_v46 = vadd.f32 %v2711_v8, %v2642_v24  ;;  %v2188_v43 = vadd.f32 %v2164_v47, %v2095_v53  ;;  %v5415_v26 = vsel %vm2406_vm11, %v4973_v49, 0.0 }
 0x109   : > { %v2273_v9 = vadd.f32 %v5027_v31, %v2180_v50  ;;  %1620 = vst [vmem:[%s4371_s23 + $0x70] sm:$0xff] %v5397_v6  ;;  %v5420_v15 = vadd.f32 %v5078_v52, %v1143_v5  ;;  %v2342_v17 = vsel %vm2306_vm6, %v4851_v20, 0.0  ;;  %vm2399_vm2 = vcmp.eq.s32.totalorder %v4584_v61, %v4887_v12  ;;  %v3957_v31 = vpop.f32.mrf.mxu0  ;;  %v4221_v50 = vld [vmem:[%s4366_s20 + $0x1c8] sm:$0xff]  }
 0x10a   : > { %7349 = vst [vmem:[#allocation57_spill] sm:$0xff] %v5408_v46  ;;  %vm2593_vm9 = vcmp.eq.s32.totalorder %v4584_v61, %v4815_v37  ;;  %vm1947_vm4 = vcmp.eq.s32.totalorder %v4570_v57, %v4873_v41  ;;  %vm1948_vm3 = vcmp.eq.s32.totalorder %v4603_v4, %v4873_v41  ;;  %v2860_v47 = vpack.c.bf16 %v2744_v59, %v2736_v38  ;;  %v1834_v59 = vpop.permute.xlu1 %1833 }
 0x10b   : > { %v2281_v24 = vadd.f32 %v5073_v7, %v2188_v43  ;;  %v2366_v10 = vadd.f32 %v2342_v17, %v2273_v9  ;;  %v5444_v8 = vsel %vm2408_vm12, %v4973_v49, 0.0  ;;  %1618 = vst [vmem:[%s4371_s23 + $0x60] sm:$0xff] %v5420_v15  ;;  %v5449_v5 = vadd.f32 %v3957_v31, %v5078_v52  ;;  %v4222_v7 = vld [vmem:[%s4366_s20 + $0x1d0] sm:$0xff]   ;;  %v1146_v9 = vpop.f32.mrf.mxu0 }
 0x10c   : > { %7350 = vst [vmem:[#allocation58_spill] sm:$0xff] %v5444_v8  ;;  %v2350_v38 = vsel %vm2314_vm1, %v4761_v56, 0.0  ;;  %v2435_v43 = vsel %vm2399_vm2, %v4929_v51, 0.0  ;;  %v5474_v17 = vadd.f32 %v4991_v23, %v5130_v60  ;;  %v5478_v31 = vadd.f32 %v5017_v36, %v5156_v25  ;;  %2907 = vmatprep.mubr.bf16.mxu1 %v2860_v47  ;;  %4055 = vmatmul.mubr.msk.bf16.gmra.mxu0 %vm868_vm0, %v4221_v50  ;;  %v7353_v47 = vld [vmem:[#allocation35_spill] sm:$0xff] }
 0x10d   : > { %vm7351_vm1 = vcmp.eq.s32.totalorder %v4584_v61, %v4790_v19  ;;  %vm2500_vm15 = vcmp.eq.s32.totalorder %v4584_v61, %v5086_v45  ;;  %1621 = vst [vmem:[%s4371_s23 + $0x78] sm:$0xff] %v5449_v5  ;;  %v5489_v46 = vadd.f32 %v5078_v52, %v1146_v9  ;;  %vm1853_vm5 = vcmp.eq.s32.totalorder %v4577_v58, %v1834_v59  ;;  %v3960_v23 = vpop.f32.mrf.mxu0 }
 0x10e   : > { %v2443_v53 = vsel %vm7351_vm1, %v4973_v49, 0.0  ;;  %vm1854_vm2 = vcmp.eq.s32.totalorder %v4584_v61, %v1834_v59  ;;  %vm1855_vm12 = vcmp.eq.s32.totalorder %v4587_v62, %v1834_v59  ;;  %vm1856_vm1 = vcmp.eq.s32.totalorder %v4590_v63, %v1834_v59  ;;  %4058 = vmatprep.mubr.msk.bf16.mxu0 %vm868_vm0, %v4222_v7  ;;  %v1872_v50 = vpop.permute.xlu1 %1871  ;;  %v4223_v49 = vld [vmem:[%s4366_s20 + $0x1d8] sm:$0xff]  }
 0x10f   : > { %vm1857_vm14 = vcmp.eq.s32.totalorder %v4593_v0, %v1834_v59  ;;  %v2374_v36 = vadd.f32 %v2350_v38, %v2281_v24  ;;  %v2459_v60 = vadd.f32 %v2435_v43, %v2366_v10  ;;  %1619 = vst [vmem:[%s4371_s23 + $0x68] sm:$0xff] %v5489_v46  ;;  %v5504_v25 = vadd.f32 %v3960_v23, %v5078_v52  ;;  %v1159_v10 = vpop.f32.mrf.mxu0 }
 0x110   : > { %vm2040_vm6 = vcmp.eq.s32.totalorder %v4570_v57, %v7353_v47  ;;  %vm2041_vm11 = vcmp.eq.s32.totalorder %v4603_v4, %v7353_v47  ;;  %vm1851_vm10 = vcmp.eq.s32.totalorder %v4570_v57, %v1834_v59  ;;  %vm1858_vm7 = vcmp.eq.s32.totalorder %v4598_v2, %v1834_v59 }
 0x111   : > { %7352 = vst [vmem:[#allocation59_spill] sm:$0xff] %v5504_v25  ;;  %v2528_v24 = vsel %vm2492_vm13, %v5137_v14, 0.0  ;;  %vm1852_vm8 = vcmp.eq.s32.totalorder %v4603_v4, %v1834_v59  ;;  %v5520_v7 = vsel %vm1853_vm5, %v1872_v50, 0.0  ;;  %v5524_v38 = vsel %vm1854_vm2, %v1872_v50, 0.0  ;;  %1624 = vst [vmem:[%s4371_s23 + $0x90] sm:$0xff] %v5504_v25  ;;  %v3961_v11 = vpop.f32.mrf.mxu0 }
 0x112   : > { %v2536_v43 = vsel %vm2500_vm15, %v4805_v33, 0.0  ;;  %v5533_v9 = vadd.f32 %v5078_v52, %v1159_v10  ;;  %v5537_v23 = vsel %vm1855_vm12, %v1872_v50, 0.0  ;;  %v5541_v35 = vsel %vm1856_vm1, %v1872_v50, 0.0 }
 0x113   : > { %7355 = vst [vmem:[#allocation60_spill] sm:$0xff] %v5537_v23  ;;  %7356 = vst [vmem:[#allocation61_spill] sm:$0xff] %v5541_v35  ;;  %v5545_v8 = vsel %vm1857_vm14, %v1872_v50, 0.0  ;;  %v5548_v51 = vsel %vm1858_vm7, %v1872_v50, 0.0  ;;  %v2467_v25 = vadd.f32 %v2443_v53, %v2374_v36  ;;  %v2552_v12 = vadd.f32 %v2528_v24, %v2459_v60  ;;  %v4224_v23 = vld [vmem:[%s4366_s20 + $0x1e0] sm:$0xff]   ;;  %v1162_v60 = vpop.f32.mrf.mxu0  ;;  %v1965_v24 = vpop.permute.xlu1 %1964 }
 0x114   : > { %7354 = vst [vmem:[#allocation35_spill] sm:$0xff] %v5533_v9  ;;  %7357 = vst [vmem:[#allocation62_spill] sm:$0xff] %v5545_v8  ;;  %vm2585_vm13 = vcmp.eq.s32.totalorder %v4584_v61, %v5203_v18  ;;  %vm2592_vm12 = vcmp.eq.s32.totalorder %v4577_v58, %v4815_v37  ;;  %v5557_v10 = vadd.f32 %v3961_v11, %v5078_v52  ;;  %v1890_v8 = vsel %vm1851_vm10, %v1872_v50, 0.0 }
 0x115   : > { %7358 = vst [vmem:[#allocation63_spill] sm:$0xff] %v5548_v51  ;;  %1622 = vst [vmem:[%s4371_s23 + $0x80] sm:$0xff] %v5533_v9  ;;  %v1891_v53 = vsel %vm1852_vm8, %v1872_v50, 0.0  ;;  %v2621_v36 = vsel %vm2585_vm13, %v5241_v48, 0.0  ;;  %v2560_v51 = vadd.f32 %v2536_v43, %v2467_v25  ;;  %v2629_v35 = vsel %vm2593_vm9, %v5283_v30, 0.0  ;;  %v3964_v43 = vpop.f32.mrf.mxu0  ;;  %4059 = vmatmul.mubr.msk.bf16.gmra.mxu0 %vm868_vm0, %v4223_v49 }
 0x116   : > { %7359 = vst [vmem:[#allocation64_spill] sm:$0xff] %v5557_v10  ;;  %v2645_v11 = vadd.f32 %v2621_v36, %v2552_v12  ;;  %vm2686_vm7 = vcmp.eq.s32.totalorder %v4584_v61, %v5332_v28  ;;  %vm2677_vm10 = vcmp.eq.s32.totalorder %v4577_v58, %v4822_v39  ;;  %1625 = vst [vmem:[%s4371_s23 + $0x98] sm:$0xff] %v5557_v10  ;;  %v1983_v25 = vsel %vm1947_vm4, %v1965_v24, 0.0 }
 0x117   : > { %v5576_v59 = vadd.f32 %v5078_v52, %v1162_v60  ;;  %v1984_v50 = vsel %vm1948_vm3, %v1965_v24, 0.0  ;;  %vm7361_vm9 = vcmp.eq.s32.totalorder %v4584_v61, %v4822_v39  ;;  %vm7362_vm8 = vcmp.eq.s32.totalorder %v4577_v58, %v4873_v41  ;;  %4062 = vmatprep.mubr.msk.bf16.mxu0 %vm868_vm0, %v4224_v23 }
 0x118   : > { %v2714_v12 = vsel %vm7361_vm9, %v5380_v34, 0.0  ;;  %v5592_v36 = vsel %vm7362_vm8, %v1965_v24, 0.0  ;;  %vm7363_vm4 = vcmp.eq.s32.totalorder %v4584_v61, %v4873_v41  ;;  %vm7364_vm3 = vcmp.eq.s32.totalorder %v4587_v62, %v4873_v41 }
 0x119   : > { %7360 = vst [vmem:[#allocation65_spill] sm:$0xff] %v5576_v59  ;;  %v1986_v60 = vsel %vm7363_vm4, %v1965_v24, 0.0  ;;  %v5600_v9 = vsel %vm7364_vm3, %v1965_v24, 0.0  ;;  %vm7366_vm14 = vcmp.eq.s32.totalorder %v4590_v63, %v4873_v41  ;;  %1623 = vst [vmem:[%s4371_s23 + $0x88] sm:$0xff] %v5576_v59  ;;  %v5610_v49 = vadd.f32 %v3964_v43, %v5078_v52  ;;  %v1175_v59 = vpop.f32.mrf.mxu0 }
 0x11a   : > { %7365 = vst [vmem:[#allocation66_spill] sm:$0xff] %v5600_v9  ;;  %v5605_v10 = vsel %vm7366_vm14, %v1965_v24, 0.0  ;;  %vm2043_vm15 = vcmp.eq.s32.totalorder %v4584_v61, %v7353_v47  ;;  %vm7368_vm5 = vcmp.eq.s32.totalorder %v4593_v0, %v4873_v41  ;;  %vm7370_vm2 = vcmp.eq.s32.totalorder %v4598_v2, %v4873_v41  ;;  %v5636_v41 = vpop.permute.xlu1 %2057  ;;  %v7378_v0 = vld [vmem:[#allocation38_spill] sm:$0xff] }
 0x11b   : > { %7367 = vst [vmem:[#allocation67_spill] sm:$0xff] %v5605_v10  ;;  %v5618_v9 = vsel %vm7368_vm5, %v1965_v24, 0.0  ;;  %v5623_v10 = vsel %vm7370_vm2, %v1965_v24, 0.0  ;;  %v2722_v43 = vsel %vm2686_vm7, %v7345_v1, 0.0  ;;  %v2008_v62 = vadd.f32 %v1984_v50, %v1891_v53  ;;  %1628 = vst [vmem:[%s4371_s23 + $0xb0] sm:$0xff] %v5610_v49 }
 0x11c   : > { %7369 = vst [vmem:[#allocation68_spill] sm:$0xff] %v5618_v9  ;;  %7371 = vst [vmem:[#allocation69_spill] sm:$0xff] %v5623_v10  ;;  %v2007_v23 = vadd.f32 %v1983_v25, %v1890_v8  ;;  %v2653_v56 = vadd.f32 %v2629_v35, %v2560_v51  ;;  %v5629_v20 = vadd.f32 %v2714_v12, %v2645_v11  ;;  %v7373_v10 = vld [vmem:[#allocation42_spill] sm:$0xff]  ;;  %v3965_v35 = vpop.f32.mrf.mxu0  ;;  %v4225_v8 = vld [vmem:[%s4366_s20 + $0x1e8] sm:$0xff]   ;;  %v2077_v53 = vsel %vm2041_vm11, %v5636_v41, 0.0 }
 0x11d   : > { %v5634_v9 = vadd.f32 %v5078_v52, %v1175_v59  ;;  %v2365_v24 = vadd.f32 %v5360_v27, %v5474_v17  ;;  %v2373_v2 = vadd.f32 %v7373_v10, %v5478_v31  ;;  %vm7374_vm1 = vcmp.eq.s32.totalorder %v4577_v58, %v4797_v22  ;;  %v4226_v11 = vld [vmem:[%s4366_s20 + $0x1f0] sm:$0xff]   ;;  %v5667_v59 = vpop.permute.xlu0 %2150  ;;  %4063 = vmatmul.mubr.msk.bf16.gmra.mxu0 %vm868_vm0, %v4225_v8 }
 0x11e   : > { %7372 = vst [vmem:[#allocation70_spill] sm:$0xff] %v5629_v20  ;;  %v2527_v51 = vsel %vm7374_vm1, %v5137_v14, 0.0  ;;  %v2076_v27 = vsel %vm2040_vm6, %v5636_v41, 0.0  ;;  %v5655_v17 = vadd.f32 %v2722_v43, %v2653_v56  ;;  %vm7376_vm13 = vcmp.eq.s32.totalorder %v4577_v58, %v5086_v45  ;;  %v1178_v12 = vpop.f32.mrf.mxu0  ;;  %v7377_v43 = vld [vmem:[#allocation46_spill] sm:$0xff]  ;;  %4066 = vmatprep.mubr.msk.bf16.mxu0 %vm868_vm0, %v4226_v11 }
 0x11f   : > { %v2535_v31 = vsel %vm7376_vm13, %v4805_v33, 0.0  ;;  %1626 = vst [vmem:[%s4371_s23 + $0xa0] sm:$0xff] %v5634_v9  ;;  %vm2042_vm7 = vcmp.eq.s32.totalorder %v4577_v58, %v7353_v47  ;;  %v1187_v10 = vadd.f32 %v3965_v35, %v5078_v52  ;;  %v2101_v25 = vadd.f32 %v2077_v53, %v2008_v62  ;;  %v7379_v35 = vld [vmem:[#allocation50_spill] sm:$0xff]  ;;  %v7380_v53 = vld [vmem:[#allocation40_spill] sm:$0xff] }
 0x120   : > { %7375 = vst [vmem:[#allocation42_spill] sm:$0xff] %v5655_v17  ;;  %v5669_v50 = vadd.f32 %v2076_v27, %v2007_v23  ;;  %v2458_v56 = vadd.f32 %v5372_v55, %v2365_v24  ;;  %v5674_v14 = vadd.f32 %v7378_v0, %v7377_v43  ;;  %v2466_v45 = vadd.f32 %v5415_v26, %v2373_v2  ;;  %v3968_v24 = vpop.f32.mrf.mxu0  ;;  %v5693_v26 = vpop.permute.xlu1 %2115  ;;  %v7404_v17 = vld [vmem:[#allocation39_spill] sm:$0xff] }
 0x121   : > { %vm2584_vm11 = vcmp.eq.s32.totalorder %v4577_v58, %v5203_v18  ;;  %1629 = vst [vmem:[%s4371_s23 + $0xb8] sm:$0xff] %v1187_v10  ;;  %v1179_v62 = vadd.f32 %v5078_v52, %v1178_v12  ;;  %v2628_v0 = vsel %vm2592_vm12, %v5283_v30, 0.0  ;;  %v5691_v2 = vadd.f32 %v7380_v53, %v7379_v35  ;;  %v4227_v12 = vld [vmem:[%s4366_s20 + $0x1f8] sm:$0xff]  }
 0x122   : > { %v2551_v23 = vadd.f32 %v2527_v51, %v2458_v56  ;;  %v2620_v55 = vsel %vm2584_vm11, %v5241_v48, 0.0  ;;  %v2559_v27 = vadd.f32 %v2535_v31, %v2466_v45  ;;  %vm2685_vm6 = vcmp.eq.s32.totalorder %v4577_v58, %v5332_v28 }
 0x123   : > { %v2010_v51 = vadd.f32 %v1986_v60, %v5524_v38  ;;  %v5700_v56 = vpack.c.bf16 %v5341_v29, %v5302_v16  ;;  %1627 = vst [vmem:[%s4371_s23 + $0xa8] sm:$0xff] %v1179_v62  ;;  %v5704_v8 = vadd.f32 %v3968_v24, %v5078_v52  ;;  %vm2134_vm12 = vcmp.eq.s32.totalorder %v4603_v4, %v5693_v26  ;;  %v1191_v16 = vpop.f32.mrf.mxu0 }
 0x124   : > { %v2713_v45 = vsel %vm2677_vm10, %v5380_v34, 0.0  ;;  %v5715_v38 = vpack.c.bf16 %v5377_v40, %v5322_v13  ;;  %vm2122_vm9 = vcmp.eq.s32.totalorder %v4590_v63, %v5051_v3  ;;  %v5721_v29 = vpack.c.bf16 %v5449_v5, %v5397_v6  ;;  %v5730_v13 = vpop.permute.xlu0 %2301  ;;  %v5764_v53 = vpop.permute.xlu1 %2208 }
 0x125   : > { %7381 = vst [vmem:[#allocation46_spill] sm:$0xff] %v5700_v56  ;;  %v2644_v60 = vadd.f32 %v2620_v55, %v2551_v23  ;;  %v2652_v31 = vadd.f32 %v2628_v0, %v2559_v27  ;;  %vm2130_vm8 = vcmp.eq.s32.totalorder %v4590_v63, %v4795_v21  ;;  %1632 = vst [vmem:[%s4371_s23 + $0xd0] sm:$0xff] %v5704_v8  ;;  %v2170_v40 = vsel %vm2134_vm12, %v5667_v59, 0.0  ;;  %v3969_v5 = vpop.f32.mrf.mxu0 }
 0x126   : > { %7382 = vst [vmem:[#allocation38_spill] sm:$0xff] %v5715_v38  ;;  %7383 = vst [vmem:[#allocation50_spill] sm:$0xff] %v5721_v29  ;;  %v5728_v11 = vadd.f32 %v5078_v52, %v1191_v16  ;;  %vm2133_vm10 = vcmp.eq.s32.totalorder %v4570_v57, %v5693_v26  ;;  %v2721_v6 = vsel %vm2685_vm6, %v7345_v1, 0.0  ;;  %vm2320_vm4 = vcmp.eq.s32.totalorder %v4603_v4, %v5730_v13 }
 0x127   : > { %7384 = vst [vmem:[#allocation40_spill] sm:$0xff] %v5730_v13  ;;  %vm2319_vm3 = vcmp.eq.s32.totalorder %v4570_v57, %v5730_v13  ;;  %v5744_v43 = vadd.f32 %v2713_v45, %v2644_v60  ;;  %v5746_v23 = vadd.f32 %v2721_v6, %v2652_v31  ;;  %v2079_v55 = vsel %vm2043_vm15, %v5636_v41, 0.0  ;;  %v1194_v16 = vpop.f32.mrf.mxu0  ;;  %4067 = vmatmul.mubr.msk.bf16.gmra.mxu0 %vm868_vm0, %v4227_v12 }
 0x128   : > { %vm2136_vm14 = vcmp.eq.s32.totalorder %v4584_v61, %v5693_v26  ;;  %v5756_v0 = vpack.c.bf16 %v5489_v46, %v5420_v15  ;;  %v5759_v24 = vpack.c.bf16 %v1187_v10, %v5610_v49  ;;  %1630 = vst [vmem:[%s4371_s23 + $0xc0] sm:$0xff] %v5728_v11  ;;  %v1203_v35 = vadd.f32 %v3969_v5, %v5078_v52  ;;  %v5802_v31 = vpop.permute.xlu1 %2243 }
 0x129   : > { %7385 = vst [vmem:[#allocation71_spill] sm:$0xff] %v5744_v43  ;;  %7386 = vst [vmem:[#allocation72_spill] sm:$0xff] %v5746_v23  ;;  %v2103_v27 = vadd.f32 %v2079_v55, %v2010_v51  ;;  %v5767_v45 = vpack.c.bf16 %v1179_v62, %v5634_v9  ;;  %v2194_v60 = vadd.f32 %v2170_v40, %v2101_v25  ;;  %v2169_v15 = vsel %vm2133_vm10, %v5667_v59, 0.0  ;;  %v3972_v10 = vpop.f32.mrf.mxu0  ;;  %v7393_v43 = vld [vmem:[#allocation16_spill] sm:$0xff]  ;;  %v7394_v23 = vld [vmem:[#allocation34_spill] sm:$0xff] }
 0x12a   : > { %7387 = vst [vmem:[#allocation73_spill] sm:$0xff] %v5756_v0  ;;  %7388 = vst [vmem:[#allocation74_spill] sm:$0xff] %v5759_v24  ;;  %vm2308_vm15 = vcmp.eq.s32.totalorder %v4590_v63, %v4737_v54  ;;  %vm2316_vm5 = vcmp.eq.s32.totalorder %v4590_v63, %v4831_v42  ;;  %v1195_v9 = vadd.f32 %v5078_v52, %v1194_v16  ;;  %v2172_v49 = vsel %vm2136_vm14, %v5667_v59, 0.0 }
 0x12b   : > { %7389 = vst [vmem:[#allocation75_spill] sm:$0xff] %v5767_v45  ;;  %1633 = vst [vmem:[%s4371_s23 + $0xd8] sm:$0xff] %v1203_v35  ;;  %vm2227_vm2 = vcmp.eq.s32.totalorder %v4603_v4, %v5764_v53  ;;  %vm2226_vm1 = vcmp.eq.s32.totalorder %v4570_v57, %v5764_v53  ;;  %vm2229_vm13 = vcmp.eq.s32.totalorder %v4584_v61, %v5764_v53  ;;  %v2078_v62 = vsel %vm2042_vm7, %v5636_v41, 0.0 }
 0x12c   : > { %v2009_v25 = vadd.f32 %v5592_v36, %v5520_v7  ;;  %vm2135_vm11 = vcmp.eq.s32.totalorder %v4577_v58, %v5693_v26  ;;  %1631 = vst [vmem:[%s4371_s23 + $0xc8] sm:$0xff] %v1195_v9  ;;  %v1216_v51 = vadd.f32 %v3972_v10, %v5078_v52  ;;  %7390 = vst [vmem:[#allocation76_spill] sm:$0xff] %v5802_v31  ;;  %v1207_v7 = vpop.f32.mrf.mxu0  ;;  %v2263_v36 = vsel %vm2227_vm2, %v5802_v31, 0.0 }
 0x12d   : > { %v2193_v40 = vadd.f32 %v2169_v15, %v5669_v50  ;;  %v2171_v6 = vsel %vm2135_vm11, %v5667_v59, 0.0  ;;  %vm2228_vm0 = vcmp.eq.s32.totalorder %v4577_v58, %v5764_v53  ;;  %v2262_v5 = vsel %vm2226_vm1, %v5802_v31, 0.0 }
 0x12e   : > { %v2196_v12 = vadd.f32 %v2172_v49, %v2103_v27  ;;  %v2102_v55 = vadd.f32 %v2078_v62, %v2009_v25  ;;  %1636 = vst [vmem:[%s4371_s23 + $0xf0] sm:$0xff] %v1216_v51  ;;  %v1208_v50 = vadd.f32 %v5078_v52, %v1207_v7  ;;  %v2265_v16 = vsel %vm2229_vm13, %v5802_v31, 0.0  ;;  %v3973_v15 = vpop.f32.mrf.mxu0  ;;  %v7391_v25 = vld [vmem:[#allocation30_spill] sm:$0xff]  ;;  %v7392_v62 = vld [vmem:[#allocation19_spill] sm:$0xff] }
 0x12f   : > { %vm2322_vm7 = vcmp.eq.s32.totalorder %v4584_v61, %v5730_v13  ;;  %vm2321_vm6 = vcmp.eq.s32.totalorder %v4577_v58, %v5730_v13  ;;  %vm2409_vm12 = vcmp.eq.s32.totalorder %v4590_v63, %v4790_v19  ;;  %v2287_v27 = vadd.f32 %v2263_v36, %v2194_v60  ;;  %v5841_v36 = vpop.permute.xlu1 %2336  ;;  %v7414_v19 = vld [vmem:[#allocation23_spill] sm:$0xff] }
 0x130   : > { %v2195_v49 = vadd.f32 %v2171_v6, %v2102_v55  ;;  %v2264_v10 = vsel %vm2228_vm0, %v5802_v31, 0.0  ;;  %v2089_v7 = vadd.f32 %v7392_v62, %v7391_v25  ;;  %vm2494_vm10 = vcmp.eq.s32.totalorder %v4590_v63, %v4797_v22  ;;  %1634 = vst [vmem:[%s4371_s23 + $0xe0] sm:$0xff] %v1208_v50  ;;  %v1210_v6 = vpop.f32.mrf.mxu0  ;;  %7395 = vst [vmem:[#allocation30_spill] sm:$0xff] %v5841_v36 }
 0x131   : > { %v1219_v46 = vadd.f32 %v3973_v15, %v5078_v52  ;;  %v2286_v33 = vadd.f32 %v2262_v5, %v2193_v40  ;;  %v2097_v20 = vadd.f32 %v7394_v23, %v7393_v43  ;;  %v2158_v60 = vsel %vm2122_vm9, %v4803_v32, 0.0  ;;  %v5851_v5 = vpop.permute.xlu0 %2429 }
 0x132   : > { %v2289_v55 = vadd.f32 %v2265_v16, %v2196_v12  ;;  %v2288_v25 = vadd.f32 %v2264_v10, %v2195_v49  ;;  %v2166_v15 = vsel %vm2130_vm8, %v5135_v44, 0.0  ;;  %v2182_v40 = vadd.f32 %v2158_v60, %v2089_v7  ;;  %7397 = vst [vmem:[#allocation16_spill] sm:$0xff] %v5851_v5  ;;  %v7402_v7 = vld [vmem:[#allocation18_spill] sm:$0xff] }
 0x133   : > { %1637 = vst [vmem:[%s4371_s23 + $0xf8] sm:$0xff] %v1219_v46  ;;  %v1211_v43 = vadd.f32 %v5078_v52, %v1210_v6  ;;  %v5849_v23 = vpack.c.bf16 %v1219_v46, %v1216_v51  ;;  %v2356_v12 = vsel %vm2320_vm4, %v5841_v36, 0.0  ;;  %v2355_v16 = vsel %vm2319_vm3, %v5841_v36, 0.0  ;;  %v3976_v46 = vpop.f32.mrf.mxu0  ;;  %v5894_v32 = vpop.permute.xlu1 %2394 }
 0x134   : > { %v5862_v49 = vpack.c.bf16 %v1203_v35, %v5704_v8  ;;  %v5865_v10 = vpack.c.bf16 %v1195_v9, %v5728_v11  ;;  %v2358_v51 = vsel %vm2322_vm7, %v5841_v36, 0.0  ;;  %v2357_v62 = vsel %vm2321_vm6, %v5841_v36, 0.0  ;;  %v7401_v35 = vld [vmem:[#allocation29_spill] sm:$0xff]  ;;  %7403 = vst [vmem:[#allocation79_spill] sm:$0xff] %v5894_v32  ;;  %v7405_v36 = vld [vmem:[#allocation32_spill] sm:$0xff] }
 0x135   : > { %7396 = vst [vmem:[#allocation19_spill] sm:$0xff] %v5849_v23  ;;  %vm2595_vm9 = vcmp.eq.s32.totalorder %v4590_v63, %v4815_v37  ;;  %1635 = vst [vmem:[%s4371_s23 + $0xe8] sm:$0xff] %v1211_v43  ;;  %v5878_v8 = vpack.c.bf16 %v1211_v43, %v1208_v50  ;;  %v1232_v11 = vadd.f32 %v3976_v46, %v5078_v52  ;;  %3710 = vmatprep.subr.bf16.mxu1 %v5849_v23  ;;  %v1223_v6 = vpop.f32.mrf.mxu0 }
 0x136   : > { %7398 = vst [vmem:[#allocation34_spill] sm:$0xff] %v5862_v49  ;;  %7399 = vst [vmem:[#allocation77_spill] sm:$0xff] %v5865_v10  ;;  %v2344_v9 = vsel %vm2308_vm15, %v7401_v35, 0.0  ;;  %v2352_v60 = vsel %vm2316_vm5, %v7402_v7, 0.0  ;;  %3711 = vmatpush3.bf16.msra.mxu1 %v5721_v29  ;;  %v2380_v44 = vadd.f32 %v2356_v12, %v2287_v27  ;;  %v2379_v50 = vadd.f32 %v2355_v16, %v2286_v33  ;;  %v7406_v12 = vld [vmem:[#allocation33_spill] sm:$0xff] }
 0x137   : > { %7400 = vst [vmem:[#allocation78_spill] sm:$0xff] %v5878_v8  ;;  %v2382_v43 = vadd.f32 %v2358_v51, %v2289_v55  ;;  %v2190_v46 = vadd.f32 %v2166_v15, %v2097_v20  ;;  %1640 = vst [vmem:[%s4371_s23 + $0x110] sm:$0xff] %v1232_v11  ;;  %v1224_v23 = vadd.f32 %v5078_v52, %v1223_v6  ;;  %3712 = vmatprep.subr.bf16.mxu1 %v5878_v8  ;;  %v3977_v33 = vpop.f32.mrf.mxu0  ;;  %v7407_v51 = vld [vmem:[#allocation36_spill] sm:$0xff]  ;;  %v7408_v6 = vld [vmem:[#allocation43_spill] sm:$0xff] }
 0x138   : > { %v2381_v35 = vadd.f32 %v2357_v62, %v2288_v25  ;;  %v2275_v3 = vadd.f32 %v7404_v17, %v2182_v40  ;;  %vm2401_vm8 = vcmp.eq.s32.totalorder %v4590_v63, %v7405_v36  ;;  %vm2680_vm4 = vcmp.eq.s32.totalorder %v4590_v63, %v4822_v39  ;;  %v5911_v17 = vpop.permute.xlu0 %2580  ;;  %v7410_v8 = vld [vmem:[#allocation44_spill] sm:$0xff] }
 0x139   : > { %vm2413_vm3 = vcmp.eq.s32.totalorder %v4603_v4, %v5894_v32  ;;  %vm2412_vm14 = vcmp.eq.s32.totalorder %v4570_v57, %v5894_v32  ;;  %vm2415_vm15 = vcmp.eq.s32.totalorder %v4584_v61, %v5894_v32  ;;  %vm2414_vm5 = vcmp.eq.s32.totalorder %v4577_v58, %v5894_v32  ;;  %1638 = vst [vmem:[%s4371_s23 + $0x100] sm:$0xff] %v1224_v23  ;;  %v1226_v15 = vpop.f32.mrf.mxu0 }
 0x13a   : > { %v1235_v20 = vadd.f32 %v3977_v33, %v5078_v52  ;;  %v2449_v27 = vsel %vm2413_vm3, %v5851_v5, 0.0  ;;  %v2448_v55 = vsel %vm2412_vm14, %v5851_v5, 0.0  ;;  %v2451_v25 = vsel %vm2415_vm15, %v5851_v5, 0.0  ;;  %3713 = vmatpush3.bf16.msra.mxu1 %v5756_v0 }
 0x13b   : > { %v2450_v40 = vsel %vm2414_vm5, %v5851_v5, 0.0  ;;  %v2437_v16 = vsel %vm2401_vm8, %v7406_v12, 0.0  ;;  %v2445_v62 = vsel %vm2409_vm12, %v7407_v51, 0.0  ;;  %vm2502_vm2 = vcmp.eq.s32.totalorder %v4590_v63, %v7408_v6  ;;  %3714 = vmatprep.subr.bf16.mxu1 %v5862_v49  ;;  %v7411_v51 = vld [vmem:[#allocation48_spill] sm:$0xff]  ;;  %v3980_v36 = vpop.f32.mrf.mxu0 }
 0x13c   : > { %1641 = vst [vmem:[%s4371_s23 + $0x118] sm:$0xff] %v1235_v20  ;;  %v5929_v33 = vpack.c.bf16 %v1235_v20, %v1232_v11  ;;  %v1227_v0 = vadd.f32 %v5078_v52, %v1226_v15  ;;  %vm2601_vm1 = vcmp.eq.s32.totalorder %v4584_v61, %v5911_v17  ;;  %vm2600_vm13 = vcmp.eq.s32.totalorder %v4577_v58, %v5911_v17  ;;  %v5942_v11 = vpop.permute.xlu1 %2487 }
 0x13d   : > { %v2283_v29 = vadd.f32 %v7410_v8, %v2190_v46  ;;  %v2530_v12 = vsel %vm2494_vm10, %v7411_v51, 0.0  ;;  %7412 = vst [vmem:[#allocation43_spill] sm:$0xff] %v5942_v11  ;;  %v5944_v20 = vadd.f32 %v2449_v27, %v2380_v44  ;;  %vm2599_vm11 = vcmp.eq.s32.totalorder %v4603_v4, %v5911_v17  ;;  %v1817_v27 = vld [vmem:[%s7143_s0] sm:$0xff] }
 0x13e   : > { %7409 = vst [vmem:[#allocation39_spill] sm:$0xff] %v5929_v33  ;;  %v5948_v15 = vadd.f32 %v2448_v55, %v2379_v50  ;;  %v2475_v49 = vadd.f32 %v2451_v25, %v2382_v43  ;;  %v2368_v33 = vadd.f32 %v2344_v9, %v2275_v3  ;;  %1639 = vst [vmem:[%s4371_s23 + $0x108] sm:$0xff] %v1227_v0  ;;  %v2538_v44 = vsel %vm2502_vm2, %v7414_v19, 0.0  ;;  %v7415_v50 = vld [vmem:[#allocation9_spill] sm:$0xff]  ;;  %v1239_v43 = vpop.f32.mrf.mxu0 }
 0x13f   : > { %v5951_v8 = vpack.c.bf16 %v1227_v0, %v1224_v23  ;;  %v1248_v46 = vadd.f32 %v3980_v36, %v5078_v52  ;;  %v2474_v7 = vadd.f32 %v2450_v40, %v2381_v35  ;;  %vm2493_vm0 = vcmp.eq.s32.totalorder %v7415_v50, %v4797_v22  ;;  %3715 = vmatpush3.bf16.msra.mxu1 %v5700_v56  ;;  %v7416_v55 = vld [vmem:[#allocation5_spill] sm:$0xff] }
 0x140   : > { %vm2508_vm7 = vcmp.eq.s32.totalorder %v4584_v61, %v5942_v11  ;;  %v2376_v3 = vadd.f32 %v2352_v60, %v2283_v29  ;;  %v2461_v0 = vadd.f32 %v2437_v16, %v2368_v33  ;;  %vm2587_vm6 = vcmp.eq.s32.totalorder %v4590_v63, %v5203_v18  ;;  %3716 = vmatprep.subr.bf16.mxu1 %v5865_v10  ;;  %v3981_v23 = vpop.f32.mrf.mxu0  ;;  %v5981_v35 = vpop.permute.xlu1 %2522 }
 0x141   : > { %7413 = vst [vmem:[#allocation44_spill] sm:$0xff] %v5951_v8  ;;  %1644 = vst [vmem:[%s4371_s23 + $0x130] sm:$0xff] %v1248_v46  ;;  %v1240_v36 = vadd.f32 %v5078_v52, %v1239_v43  ;;  %vm2506_vm12 = vcmp.eq.s32.totalorder %v4603_v4, %v5942_v11  ;;  %vm2507_vm10 = vcmp.eq.s32.totalorder %v4577_v58, %v5942_v11  ;;  %v2631_v29 = vsel %vm2595_vm9, %v5283_v30, 0.0 }
 0x142   : > { %vm2501_vm8 = vcmp.eq.s32.totalorder %v7415_v50, %v7408_v6  ;;  %vm2505_vm3 = vcmp.eq.s32.totalorder %v4570_v57, %v5942_v11  ;;  %v2469_v9 = vadd.f32 %v2445_v62, %v2376_v3  ;;  %v2554_v60 = vadd.f32 %v2530_v12, %v2461_v0  ;;  %v1818_v12 = vld [vmem:[%s7143_s0 + $0x8] sm:$0xff]  ;;  %v1242_v62 = vpop.f32.mrf.mxu0 }
 0x143   : > { %v1820_v25 = vsub.s32 %v1817_v27, %v7416_v55  ;;  %1642 = vst [vmem:[%s4371_s23 + $0x120] sm:$0xff] %v1240_v36  ;;  %v1251_v40 = vadd.f32 %v3981_v23, %v5078_v52  ;;  %v2544_v16 = vsel %vm2508_vm7, %v5981_v35, 0.0  ;;  %v2623_v33 = vsel %vm2587_vm6, %v5241_v48, 0.0  ;;  %v1819_v52 = vld [vmem:[%s7143_s0 + $0x10] sm:$0xff]  ;;  %3717 = vmatpush3.bf16.msra.mxu1 %v5715_v38 }
 0x144   : > { %vm2688_vm9 = vcmp.eq.s32.totalorder %v4590_v63, %v5332_v28  ;;  %v2542_v27 = vsel %vm2506_vm12, %v5981_v35, 0.0  ;;  %v2568_v43 = vadd.f32 %v2544_v16, %v2475_v49  ;;  %v2543_v3 = vsel %vm2507_vm10, %v5981_v35, 0.0  ;;  %v6025_v49 = vld [vmem:[%s7148_s5] ss:$0 sm:$0xff]  ;;  %3718 = vmatprep.subr.bf16.mxu1 %v5759_v24  ;;  %v3984_v56 = vpop.f32.mrf.mxu0 }
 0x145   : > { %v2716_v0 = vsel %vm2680_vm4, %v5380_v34, 0.0  ;;  %2760 = vperm.xlu1 %4158, %v1820_v25   ;;  %vm2594_vm14 = vcmp.eq.s32.totalorder %v7415_v50, %v4815_v37  ;;  %1645 = vst [vmem:[%s4371_s23 + $0x138] sm:$0xff] %v1251_v40  ;;  %v6020_v23 = vpack.c.bf16 %v1251_v40, %v1248_v46  ;;  %v1243_v16 = vadd.f32 %v6025_v49, %v1242_v62  ;;  %v7418_v46 = vld [vmem:[#allocation15_spill] sm:$0xff]  ;;  %v6039_v62 = vpop.permute.xlu1 %2615 }
 0x146   : > { %v2567_v38 = vadd.f32 %v2543_v3, %v2474_v7  ;;  %v2562_v10 = vadd.f32 %v2538_v44, %v2469_v9  ;;  %v2647_v8 = vadd.f32 %v2623_v33, %v2554_v60  ;;  %v1821_v25 = vsub.s32 %v1818_v12, %v7416_v55  ;;  %v1255_v9 = vpop.f32.mrf.mxu0  ;;  %v7421_v60 = vld [vmem:[#allocation54_spill] sm:$0xff]  ;;  %v7449_v24 = vld [vmem:[#allocation67_spill] sm:$0xff] }
 0x147   : > { %7417 = vst [vmem:[#allocation48_spill] sm:$0xff] %v6020_v23  ;;  %v1822_v5 = vsub.s32 %v1819_v52, %v7416_v55  ;;  %v2367_v40 = vadd.f32 %v7418_v46, %v5674_v14  ;;  %1643 = vst [vmem:[%s4371_s23 + $0x128] sm:$0xff] %v1243_v16  ;;  %v6034_v23 = vpack.c.bf16 %v1243_v16, %v1240_v36  ;;  %v2724_v44 = vsel %vm2688_vm9, %v7345_v1, 0.0  ;;  %v7428_v16 = vld [vmem:[#allocation56_spill] sm:$0xff]  ;;  %v7429_v46 = vld [vmem:[#allocation59_spill] sm:$0xff] }
 0x148   : > { %v6037_v42 = vadd.f32 %v6025_v49, %v3984_v56  ;;  %v2655_v7 = vadd.f32 %v2631_v29, %v2562_v10  ;;  %3719 = vmatpush3.bf16.msra.mxu1 %v7421_v60  ;;  %v2566_v55 = vadd.f32 %v2542_v27, %v5944_v20  ;;  %v2637_v14 = vsel %vm2601_vm1, %v6039_v62, 0.0  ;;  %v7422_v10 = vld [vmem:[#allocation45_spill] sm:$0xff] }
 0x149   : > { %7419 = vst [vmem:[#allocation23_spill] sm:$0xff] %v6034_v23  ;;  %v2636_v56 = vsel %vm2600_vm13, %v6039_v62, 0.0  ;;  %2763 = vperm.xlu1 %4158, %v1821_v25   ;;  %v2375_v36 = vadd.f32 %v7422_v10, %v5691_v2  ;;  %v6060_v29 = vadd.f32 %v6025_v49, %v1255_v9  ;;  %3720 = vmatprep.subr.bf16.mxu1 %v5767_v45  ;;  %v2635_v20 = vsel %vm2599_vm11, %v6039_v62, 0.0  ;;  %v3985_v2 = vpop.f32.mrf.mxu0  ;;  %v7430_v9 = vld [vmem:[#allocation64_spill] sm:$0xff]  ;;  %v7445_v60 = vld [vmem:[#allocation53_spill] sm:$0xff] }
 0x14a   : > { %7420 = vst [vmem:[#allocation5_spill] sm:$0xff] %v6037_v42  ;;  %1648 = vst [vmem:[%s4371_s23 + $0x150] sm:$0xff] %v6037_v42  ;;  %v2541_v33 = vsel %vm2505_vm3, %v5981_v35, 0.0  ;;  %v6071_v12 = vadd.f32 %v2637_v14, %v2568_v43  ;;  %v6073_v52 = vadd.f32 %v2636_v56, %v2567_v38  ;;  %v6075_v27 = vadd.f32 %v2716_v0, %v2647_v8  ;;  %v6089_v14 = vpop.permute.xlu0 %2708  ;;  %v7434_v8 = vld [vmem:[#allocation55_spill] sm:$0xff]  ;;  %v6098_v0 = vpop.permute.xlu1 %2673  ;;  %v7436_v56 = vld [vmem:[#allocation58_spill] sm:$0xff] }
 0x14b   : > { %7423 = vst [vmem:[#allocation15_spill] sm:$0xff] %v6060_v29  ;;  %v6077_v3 = vadd.f32 %v2724_v44, %v2655_v7  ;;  %2766 = vperm.xlu0 %4159, %v1822_v5   ;;  %v2460_v25 = vadd.f32 %v7428_v16, %v2367_v40  ;;  %v6082_v10 = vpack.c.bf16 %v7430_v9, %v7429_v46  ;;  %1646 = vst [vmem:[%s4371_s23 + $0x140] sm:$0xff] %v6060_v29  ;;  %v1258_v5 = vpop.f32.mrf.mxu0  ;;  %v7438_v46 = vld [vmem:[#allocation35_spill] sm:$0xff]  ;;  %v7439_v9 = vld [vmem:[#allocation65_spill] sm:$0xff] }
 0x14c   : > { %7424 = vst [vmem:[#allocation45_spill] sm:$0xff] %v6071_v12  ;;  %7425 = vst [vmem:[#allocation80_spill] sm:$0xff] %v6073_v52  ;;  %v6087_v43 = vadd.f32 %v6025_v49, %v3985_v2  ;;  %vm2598_vm4 = vcmp.eq.s32.totalorder %v4570_v57, %v5911_v17  ;;  %v2529_v38 = vsel %vm2493_vm0, %v7411_v51, 0.0  ;;  %3721 = vmatpush3.bf16.msra.mxu1 %v7434_v8  ;;  %v2630_v44 = vsel %vm2594_vm14, %v5283_v30, 0.0  ;;  %v7441_v8 = vld [vmem:[#allocation52_spill] sm:$0xff] }
 0x14d   : > { %7426 = vst [vmem:[#allocation81_spill] sm:$0xff] %v6075_v27  ;;  %7427 = vst [vmem:[#allocation82_spill] sm:$0xff] %v6077_v3  ;;  %v2659_v40 = vadd.f32 %v2635_v20, %v2566_v55  ;;  %v2565_v7 = vadd.f32 %v2541_v33, %v5948_v15  ;;  %v2468_v2 = vadd.f32 %v7436_v56, %v2375_v36  ;;  %3722 = vmatprep.subr.bf16.mxu1 %v6082_v10  ;;  %v3988_v55 = vpop.f32.mrf.mxu0  ;;  %v7444_v45 = vld [vmem:[#allocation24_spill] sm:$0xff]  ;;  %v7459_v3 = vld [vmem:[#allocation30_spill] sm:$0xff] }
 0x14e   : > { %7431 = vst [vmem:[#allocation56_spill] sm:$0xff] %v6082_v10  ;;  %7432 = vst [vmem:[#allocation59_spill] sm:$0xff] %v6087_v43  ;;  %v6107_v16 = vadd.f32 %v6025_v49, %v1258_v5  ;;  %vm2692_vm15 = vcmp.eq.s32.totalorder %v4603_v4, %v6098_v0  ;;  %v2537_v15 = vsel %vm2501_vm8, %v7414_v19, 0.0  ;;  %vm2586_vm5 = vcmp.eq.s32.totalorder %v7415_v50, %v5203_v18  ;;  %v7461_v12 = vld [vmem:[#allocation60_spill] sm:$0xff] }
 0x14f   : > { %7433 = vst [vmem:[#allocation64_spill] sm:$0xff] %v6089_v14  ;;  %7435 = vst [vmem:[#allocation83_spill] sm:$0xff] %v6098_v0  ;;  %v2728_v36 = vsel %vm2692_vm15, %v6089_v14, 0.0  ;;  %v2634_v20 = vsel %vm2598_vm4, %v6039_v62, 0.0  ;;  %v2553_v33 = vadd.f32 %v2529_v38, %v2460_v25  ;;  %v6125_v5 = vpack.c.bf16 %v7439_v9, %v7438_v46  ;;  %v1271_v10 = vpop.f32.mrf.mxu0  ;;  %v7443_v9 = vld [vmem:[#allocation11_spill] sm:$0xff]  ;;  %v7473_v42 = vld [vmem:[#allocation20_spill] sm:$0xff] }
 0x150   : > { %1649 = vst [vmem:[%s4371_s23 + $0x158] sm:$0xff] %v6087_v43  ;;  %7437 = vst [vmem:[#allocation58_spill] sm:$0xff] %v6107_v16  ;;  %v6130_v56 = vadd.f32 %v6025_v49, %v3988_v55  ;;  %vm2691_vm2 = vcmp.eq.s32.totalorder %v4570_v57, %v6098_v0  ;;  %3723 = vmatpush3.bf16.msra.mxu1 %v7441_v8  ;;  %v2752_v25 = vadd.f32 %v2728_v36, %v2659_v40  ;;  %v7442_v55 = vld [vmem:[#allocation14_spill] sm:$0xff]  ;;  %v7472_v43 = vld [vmem:[#allocation31_spill] sm:$0xff] }
 0x151   : > { %7440 = vst [vmem:[#allocation35_spill] sm:$0xff] %v6125_v5  ;;  %1647 = vst [vmem:[%s4371_s23 + $0x148] sm:$0xff] %v6107_v16  ;;  %v2561_v38 = vadd.f32 %v2537_v15, %v2468_v2  ;;  %v2622_v46 = vsel %vm2586_vm5, %v5241_v48, 0.0  ;;  %vm2679_vm1 = vcmp.eq.s32.totalorder %v7415_v50, %v4822_v39  ;;  %vm2224_vm13 = vcmp.eq.s32.totalorder %v7443_v9, %v7442_v55  ;;  %v3989_v2 = vpop.f32.mrf.mxu0  ;;  %v7466_v0 = vld [vmem:[#allocation18_spill] sm:$0xff] }
 0x152   : > { %vm2045_vm11 = vcmp.eq.s32.totalorder %v4590_v63, %v7353_v47  ;;  %1652 = vst [vmem:[%s4371_s23 + $0x170] sm:$0xff] %v6130_v56  ;;  %v6149_v57 = vadd.f32 %v6025_v49, %v1271_v10  ;;  %3724 = vmatprep.subr.bf16.mxu1 %v6125_v5  ;;  %v2658_v40 = vadd.f32 %v2634_v20, %v2565_v7  ;;  %v2727_v15 = vsel %vm2691_vm2, %v6089_v14, 0.0  ;;  %v7462_v14 = vld [vmem:[#allocation66_spill] sm:$0xff] }
 0x153   : > { %v2646_v36 = vadd.f32 %v2622_v46, %v2553_v33  ;;  %v2654_v8 = vadd.f32 %v2630_v44, %v2561_v38  ;;  %vm2687_vm0 = vcmp.eq.s32.totalorder %v7415_v50, %v5332_v28  ;;  %vm2216_vm7 = vcmp.eq.s32.totalorder %v7443_v9, %v7444_v45  ;;  %v1274_v20 = vpop.f32.mrf.mxu0  ;;  %v7448_v46 = vld [vmem:[#allocation61_spill] sm:$0xff] }
 0x154   : > { %1650 = vst [vmem:[%s4371_s23 + $0x160] sm:$0xff] %v6149_v57  ;;  %v6160_v10 = vadd.f32 %v6025_v49, %v3989_v2  ;;  %v2715_v5 = vsel %vm2679_vm1, %v5380_v34, 0.0  ;;  %v2723_v7 = vsel %vm2687_vm0, %v7345_v1, 0.0  ;;  %3725 = vmatpush3.bf16.msra.mxu1 %v7445_v60  ;;  %v2868_v44 = vpack.c.bf16 %v2752_v25, %v2752_v25 }
 0x155   : > { %v6165_v33 = vadd.f32 %v2715_v5, %v2646_v36  ;;  %v6167_v38 = vadd.f32 %v2723_v7, %v2654_v8  ;;  %v2012_v4 = vadd.f32 %v7449_v24, %v7448_v46  ;;  %v6174_v2 = vadd.f32 %v6025_v49, %v1274_v20  ;;  %v3992_v5 = vpop.f32.mrf.mxu0  ;;  %v7450_v36 = vld [vmem:[#allocation25_spill] sm:$0xff]  ;;  %v7452_v7 = vld [vmem:[#allocation27_spill] sm:$0xff]  ;;  %v7455_v46 = vld [vmem:[#allocation12_spill] sm:$0xff] }
 0x156   : > { %1653 = vst [vmem:[%s4371_s23 + $0x178] sm:$0xff] %v6160_v10  ;;  %v2751_v27 = vadd.f32 %v2727_v15, %v2658_v40  ;;  %v2081_v60 = vsel %vm2045_vm11, %v5636_v41, 0.0  ;;  %vm2138_vm6 = vcmp.eq.s32.totalorder %v4590_v63, %v5693_v26  ;;  %vm2231_vm12 = vcmp.eq.s32.totalorder %v4590_v63, %v5764_v53  ;;  %v7453_v20 = vld [vmem:[#allocation57_spill] sm:$0xff]  ;;  %v7456_v8 = vld [vmem:[#allocation26_spill] sm:$0xff] }
 0x157   : > { %7446 = vst [vmem:[#allocation65_spill] sm:$0xff] %v6165_v33  ;;  %7447 = vst [vmem:[#allocation14_spill] sm:$0xff] %v6167_v38  ;;  %v2105_v25 = vadd.f32 %v2081_v60, %v2012_v4  ;;  %v2174_v24 = vsel %vm2138_vm6, %v5667_v59, 0.0  ;;  %v6191_v40 = vsel %vm2216_vm7, %v7450_v36, 0.0  ;;  %v6196_v15 = vadd.f32 %v6025_v49, %v3992_v5  ;;  %v1287_v5 = vpop.f32.mrf.mxu0 }
 0x158   : > { %1651 = vst [vmem:[%s4371_s23 + $0x168] sm:$0xff] %v6174_v2  ;;  %v7454_v4 = vpack.c.bf16 %v7452_v7, %v7453_v20  ;;  %v2267_v60 = vsel %vm2231_vm12, %v5802_v31, 0.0  ;;  %vm2324_vm10 = vcmp.eq.s32.totalorder %v4590_v63, %v5730_v13  ;;  %vm2132_vm8 = vcmp.eq.s32.totalorder %v7455_v46, %v4795_v21  ;;  %v7457_v20 = vld [vmem:[#allocation28_spill] sm:$0xff] }
 0x159   : > { %7451 = vst [vmem:[#allocation11_spill] sm:$0xff] %v6196_v15  ;;  %v6210_v33 = vsel %vm2224_vm13, %v7456_v8, 0.0  ;;  %vm2044_vm3 = vcmp.eq.s32.totalorder %v7415_v50, %v7353_v47  ;;  %v2198_v7 = vadd.f32 %v2174_v24, %v2105_v25  ;;  %vm2417_vm9 = vcmp.eq.s32.totalorder %v4590_v63, %v5894_v32  ;;  %1656 = vst [vmem:[%s4371_s23 + $0x190] sm:$0xff] %v6196_v15  ;;  %v3993_v58 = vpop.f32.mrf.mxu0  ;;  %v7460_v25 = vld [vmem:[#allocation16_spill] sm:$0xff] }
 0x15a   : > { %2908 = vmatmul.mubr.bf16.vlgmr.msra.gmra.mxu1 %v7454_v4  ;;  %vm2309_vm14 = vcmp.eq.s32.totalorder %v7443_v9, %v4737_v54  ;;  %vm2317_vm4 = vcmp.eq.s32.totalorder %v7443_v9, %v7457_v20  ;;  %v6223_v4 = vadd.f32 %v6025_v49, %v1287_v5  ;;  %v2867_v38 = vpack.c.bf16 %v2751_v27, %v2751_v27 }
 0x15b   : > { %2915 = vmatprep.mubr.bf16.mxu1 %v2868_v44  ;;  %v2360_v52 = vsel %vm2324_vm10, %v7459_v3, 0.0  ;;  %v2291_v44 = vadd.f32 %v2267_v60, %v2198_v7  ;;  %v2453_v24 = vsel %vm2417_vm9, %v7460_v25, 0.0  ;;  %vm2510_vm15 = vcmp.eq.s32.totalorder %v4590_v63, %v5942_v11  ;;  %v7464_v60 = vld [vmem:[#allocation21_spill] sm:$0xff] }
 0x15c   : > { %7458 = vst [vmem:[#allocation24_spill] sm:$0xff] %v6223_v4  ;;  %v2011_v23 = vadd.f32 %v7462_v14, %v7461_v12  ;;  %1654 = vst [vmem:[%s4371_s23 + $0x180] sm:$0xff] %v6223_v4  ;;  %v6234_v15 = vadd.f32 %v6025_v49, %v3993_v58  ;;  %vm2603_vm5 = vcmp.eq.s32.totalorder %v4590_v63, %v5911_v17  ;;  %v2080_v27 = vsel %vm2044_vm3, %v5636_v41, 0.0  ;;  %v1290_v12 = vpop.f32.mrf.mxu0 }
 0x15d   : > { %vm2137_vm2 = vcmp.eq.s32.totalorder %v7415_v50, %v5693_v26  ;;  %vm2410_vm1 = vcmp.eq.s32.totalorder %v7443_v9, %v7464_v60  ;;  %v2384_v14 = vadd.f32 %v2360_v52, %v2291_v44  ;;  %vm2230_vm13 = vcmp.eq.s32.totalorder %v7415_v50, %v5764_v53 }
 0x15e   : > { %7463 = vst [vmem:[#allocation61_spill] sm:$0xff] %v6234_v15  ;;  %v2104_v5 = vadd.f32 %v2080_v27, %v2011_v23  ;;  %v2173_v58 = vsel %vm2137_vm2, %v5667_v59, 0.0  ;;  %1657 = vst [vmem:[%s4371_s23 + $0x198] sm:$0xff] %v6234_v15  ;;  %v6252_v7 = vadd.f32 %v6025_v49, %v1290_v12  ;;  %v2546_v4 = vsel %vm2510_vm15, %v5981_v35, 0.0  ;;  %v3996_v52 = vpop.f32.mrf.mxu0 }
 0x15f   : > { %v2266_v61 = vsel %vm2230_vm13, %v5802_v31, 0.0  ;;  %vm2323_vm11 = vcmp.eq.s32.totalorder %v7415_v50, %v5730_v13  ;;  %v6262_v23 = vsel %vm2317_vm4, %v7466_v0, 0.0  ;;  %v2477_v44 = vadd.f32 %v2453_v24, %v2384_v14  ;;  %v7467_v24 = vld [vmem:[#allocation32_spill] sm:$0xff]  ;;  %v7468_v14 = vld [vmem:[#allocation41_spill] sm:$0xff] }
 0x160   : > { %7465 = vst [vmem:[#allocation67_spill] sm:$0xff] %v6252_v7  ;;  %v2197_v27 = vadd.f32 %v2173_v58, %v2104_v5  ;;  %vm2416_vm0 = vcmp.eq.s32.totalorder %v7415_v50, %v5894_v32  ;;  %1655 = vst [vmem:[%s4371_s23 + $0x188] sm:$0xff] %v6252_v7  ;;  %v6269_v12 = vadd.f32 %v6025_v49, %v3996_v52  ;;  %v2639_v15 = vsel %vm2603_vm5, %v6039_v62, 0.0  ;;  %v1303_v5 = vpop.f32.mrf.mxu0  ;;  %v7469_v58 = vld [vmem:[#allocation42_spill] sm:$0xff] }
 0x161   : > { %v2359_v16 = vsel %vm2323_vm11, %v7459_v3, 0.0  ;;  %vm2509_vm7 = vcmp.eq.s32.totalorder %v7415_v50, %v5942_v11  ;;  %vm2402_vm6 = vcmp.eq.s32.totalorder %v7443_v9, %v7467_v24  ;;  %vm2124_vm12 = vcmp.eq.s32.totalorder %v7455_v46, %v7468_v14 }
 0x162   : > { %2916 = vmatmul.mubr.bf16.gmra.mxu1 %v2867_v38  ;;  %v7470_v38 = vld [vmem:[#allocation70_spill] sm:$0xff]  ;;  %v2570_v7 = vadd.f32 %v2546_v4, %v2477_v44  ;;  %v2290_v63 = vadd.f32 %v2266_v61, %v2197_v27  ;;  %1660 = vst [vmem:[%s4371_s23 + $0x1b0] sm:$0xff] %v6269_v12  ;;  %v6288_v29 = vadd.f32 %v6025_v49, %v1303_v5  ;;  %v2452_v11 = vsel %vm2416_vm0, %v7460_v25, 0.0  ;;  %v3997_v13 = vpop.f32.mrf.mxu0  ;;  %v7474_v61 = vld [vmem:[#allocation17_spill] sm:$0xff] }
 0x163   : > { %v7471_v52 = vpack.c.bf16 %v7469_v58, %v7470_v38  ;;  %v2545_v3 = vsel %vm2509_vm7, %v5981_v35, 0.0  ;;  %v2091_v32 = vadd.f32 %v7473_v42, %v7472_v43  ;;  %vm2602_vm10 = vcmp.eq.s32.totalorder %v7415_v50, %v5911_v17  ;;  %v7475_v4 = vld [vmem:[#allocation37_spill] sm:$0xff]  ;;  %v7476_v5 = vld [vmem:[#allocation22_spill] sm:$0xff]  ;;  %v7477_v43 = vld [vmem:[#allocation47_spill] sm:$0xff] }
 0x164   : > { %v6294_v31 = vadd.f32 %v2639_v15, %v2570_v7  ;;  %v2383_v58 = vadd.f32 %v2359_v16, %v2290_v63  ;;  %v2099_v44 = vadd.f32 %v7475_v4, %v7474_v61  ;;  %1658 = vst [vmem:[%s4371_s23 + $0x1a0] sm:$0xff] %v6288_v29  ;;  %v6303_v27 = vadd.f32 %v6025_v49, %v3997_v13  ;;  %v7478_v16 = vld [vmem:[#allocation29_spill] sm:$0xff]  ;;  %v1306_v13 = vpop.f32.mrf.mxu0 }
 0x165   : > { %2955 = vmatprep.mubr.bf16.mxu1 %v7471_v52  ;;  %v2160_v42 = vsel %vm2124_vm12, %v7476_v5, 0.0  ;;  %v2168_v63 = vsel %vm2132_vm8, %v7477_v43, 0.0  ;;  %vm2217_vm3 = vcmp.eq.s32.totalorder %v7455_v46, %v7444_v45  ;;  %v6319_v15 = vsel %vm2309_vm14, %v7478_v16, 0.0  ;;  %v7479_v61 = vld [vmem:[#allocation33_spill] sm:$0xff]  ;;  %v7480_v5 = vld [vmem:[#allocation36_spill] sm:$0xff] }
 0x166   : > { %v2476_v7 = vadd.f32 %v2452_v11, %v2383_v58  ;;  %v2184_v38 = vadd.f32 %v2160_v42, %v2091_v32  ;;  %v2192_v14 = vadd.f32 %v2168_v63, %v2099_v44  ;;  %1661 = vst [vmem:[%s4371_s23 + $0x1b8] sm:$0xff] %v6303_v27  ;;  %v6324_v52 = vadd.f32 %v6025_v49, %v1306_v13  ;;  %v4000_v32 = vpop.f32.mrf.mxu0 }
 0x167   : > { %v2638_v21 = vsel %vm2602_vm10, %v6039_v62, 0.0  ;;  %vm2225_vm8 = vcmp.eq.s32.totalorder %v7455_v46, %v7442_v55  ;;  %v2253_v45 = vsel %vm2217_vm3, %v7450_v36, 0.0  ;;  %v6334_v4 = vsel %vm2402_vm6, %v7479_v61, 0.0 }
 0x168   : > { %v2569_v11 = vadd.f32 %v2545_v3, %v2476_v7  ;;  %v2261_v58 = vsel %vm2225_vm8, %v7456_v8, 0.0  ;;  %v2277_v44 = vadd.f32 %v2253_v45, %v2184_v38  ;;  %vm2495_vm9 = vcmp.eq.s32.totalorder %v7443_v9, %v4797_v22  ;;  %1659 = vst [vmem:[%s4371_s23 + $0x1a8] sm:$0xff] %v6324_v52  ;;  %v1319_v3 = vpop.f32.mrf.mxu0 }
 0x169   : > { %v6343_v55 = vsel %vm2410_vm1, %v7480_v5, 0.0  ;;  %v6348_v36 = vadd.f32 %v6025_v49, %v4000_v32  ;;  %v2285_v42 = vadd.f32 %v2261_v58, %v2192_v14  ;;  %vm2310_vm14 = vcmp.eq.s32.totalorder %v7455_v46, %v4737_v54 }
 0x16a   : > { %v6352_v8 = vadd.f32 %v2638_v21, %v2569_v11  ;;  %vm2318_vm4 = vcmp.eq.s32.totalorder %v7455_v46, %v7457_v20  ;;  %v2346_v43 = vsel %vm2310_vm14, %v7478_v16, 0.0  ;;  %vm2403_vm15 = vcmp.eq.s32.totalorder %v7455_v46, %v7467_v24  ;;  %v4001_v20 = vpop.f32.mrf.mxu0  ;;  %v7482_v11 = vld [vmem:[#allocation51_spill] sm:$0xff] }
 0x16b   : > { %1664 = vst [vmem:[%s4371_s23 + $0x1d0] sm:$0xff] %v6348_v36  ;;  %v6362_v63 = vadd.f32 %v6025_v49, %v1319_v3  ;;  %v2354_v13 = vsel %vm2318_vm4, %v7466_v0, 0.0  ;;  %v2370_v54 = vadd.f32 %v2346_v43, %v2277_v44  ;;  %vm2411_vm5 = vcmp.eq.s32.totalorder %v7455_v46, %v7464_v60  ;;  %v7481_v60 = vld [vmem:[#allocation49_spill] sm:$0xff] }
 0x16c   : > { %vm2503_vm2 = vcmp.eq.s32.totalorder %v7443_v9, %v7408_v6  ;;  %v2378_v16 = vadd.f32 %v2354_v13, %v2285_v42  ;;  %v2439_v7 = vsel %vm2403_vm15, %v7479_v61, 0.0  ;;  %v2447_v24 = vsel %vm2411_vm5, %v7480_v5, 0.0  ;;  %v1322_v21 = vpop.f32.mrf.mxu0 }
 0x16d   : > { %1662 = vst [vmem:[%s4371_s23 + $0x1c0] sm:$0xff] %v6362_v63  ;;  %v6374_v38 = vadd.f32 %v6025_v49, %v4001_v20  ;;  %v2463_v0 = vadd.f32 %v2439_v7, %v2370_v54  ;;  %vm2496_vm1 = vcmp.eq.s32.totalorder %v7455_v46, %v4797_v22  ;;  %vm2504_vm13 = vcmp.eq.s32.totalorder %v7455_v46, %v7408_v6 }
 0x16e   : > { %v2276_v14 = vadd.f32 %v6191_v40, %v7481_v60  ;;  %v2471_v45 = vadd.f32 %v2447_v24, %v2378_v16  ;;  %v2532_v61 = vsel %vm2496_vm1, %v7411_v51, 0.0  ;;  %v2540_v32 = vsel %vm2504_vm13, %v7414_v19, 0.0  ;;  %v4004_v40 = vpop.f32.mrf.mxu0 }
 0x16f   : > { %vm2047_vm11 = vcmp.eq.s32.totalorder %v7455_v46, %v7353_v47  ;;  %v2284_v58 = vadd.f32 %v6210_v33, %v7482_v11  ;;  %1665 = vst [vmem:[%s4371_s23 + $0x1d8] sm:$0xff] %v6374_v38  ;;  %v6391_v44 = vadd.f32 %v6025_v49, %v1322_v21  ;;  %v2556_v5 = vadd.f32 %v2532_v61, %v2463_v0 }
 0x170   : > { %vm2589_vm0 = vcmp.eq.s32.totalorder %v7455_v46, %v5203_v18  ;;  %v2564_v42 = vadd.f32 %v2540_v32, %v2471_v45  ;;  %vm2597_vm7 = vcmp.eq.s32.totalorder %v7455_v46, %v4815_v37  ;;  %vm2682_vm6 = vcmp.eq.s32.totalorder %v7455_v46, %v4822_v39  ;;  %v1335_v20 = vpop.f32.mrf.mxu0 }
 0x171   : > { %v2625_v3 = vsel %vm2589_vm0, %v5241_v48, 0.0  ;;  %v6402_v33 = vpack.c.bf16 %v6160_v10, %v6130_v56  ;;  %1663 = vst [vmem:[%s4371_s23 + $0x1c8] sm:$0xff] %v6391_v44  ;;  %v1344_v43 = vadd.f32 %v6025_v49, %v4004_v40  ;;  %v2633_v13 = vsel %vm2597_vm7, %v5283_v30, 0.0  ;;  %v7484_v40 = vld [vmem:[#allocation69_spill] sm:$0xff] }
 0x172   : > { %v2649_v54 = vadd.f32 %v2625_v3, %v2556_v5  ;;  %v2657_v16 = vadd.f32 %v2633_v13, %v2564_v42  ;;  %vm2690_vm12 = vcmp.eq.s32.totalorder %v7455_v46, %v5332_v28  ;;  %v2718_v7 = vsel %vm2682_vm6, %v5380_v34, 0.0  ;;  %v4005_v21 = vpop.f32.mrf.mxu0 }
 0x173   : > { %v2369_v24 = vadd.f32 %v6319_v15, %v2276_v14  ;;  %1668 = vst [vmem:[%s4371_s23 + $0x1f0] sm:$0xff] %v1344_v43  ;;  %v1336_v56 = vadd.f32 %v6025_v49, %v1335_v20  ;;  %v2726_v10 = vsel %vm2690_vm12, %v7345_v1, 0.0  ;;  %v2377_v60 = vadd.f32 %v6262_v23, %v2284_v58 }
 0x174   : > { %v6415_v0 = vadd.f32 %v2718_v7, %v2649_v54  ;;  %v6418_v45 = vadd.f32 %v2726_v10, %v2657_v16  ;;  %v2531_v15 = vsel %vm2495_vm9, %v7411_v51, 0.0  ;;  %v2539_v14 = vsel %vm2503_vm2, %v7414_v19, 0.0  ;;  %v1338_v22 = vpop.f32.mrf.mxu0 }
 0x175   : > { %v2462_v61 = vadd.f32 %v6334_v4, %v2369_v24  ;;  %vm2046_vm10 = vcmp.eq.s32.totalorder %v7443_v9, %v7353_v47  ;;  %1666 = vst [vmem:[%s4371_s23 + $0x1e0] sm:$0xff] %v1336_v56  ;;  %v1347_v23 = vadd.f32 %v6025_v49, %v4005_v21  ;;  %v2470_v32 = vadd.f32 %v6343_v55, %v2377_v60  ;;  %v7486_v60 = vld [vmem:[#allocation40_spill] sm:$0xff]  ;;  %v7487_v21 = vld [vmem:[#allocation79_spill] sm:$0xff] }
 0x176   : > { %vm2588_vm3 = vcmp.eq.s32.totalorder %v7443_v9, %v5203_v18  ;;  %vm2596_vm8 = vcmp.eq.s32.totalorder %v7443_v9, %v4815_v37  ;;  %v1339_v55 = vadd.f32 %v6025_v49, %v1338_v22  ;;  %vm2681_vm9 = vcmp.eq.s32.totalorder %v7443_v9, %v4822_v39  ;;  %v4008_v37 = vpop.f32.mrf.mxu0 }
 0x177   : > { %v2555_v19 = vadd.f32 %v2531_v15, %v2462_v61  ;;  %v2624_v6 = vsel %vm2588_vm3, %v5241_v48, 0.0  ;;  %v2632_v4 = vsel %vm2596_vm8, %v5283_v30, 0.0  ;;  %1669 = vst [vmem:[%s4371_s23 + $0x1f8] sm:$0xff] %v1347_v23  ;;  %v6443_v11 = vpack.c.bf16 %v1347_v23, %v1344_v43  ;;  %v7483_v48 = vld [vmem:[#allocation63_spill] sm:$0xff] }
 0x178   : > { %v2563_v58 = vadd.f32 %v2539_v14, %v2470_v32  ;;  %vm2689_vm14 = vcmp.eq.s32.totalorder %v7443_v9, %v5332_v28  ;;  %v2717_v5 = vsel %vm2681_vm9, %v5380_v34, 0.0  ;;  %v2014_v30 = vadd.f32 %v7484_v40, %v7483_v48  ;;  %1667 = vst [vmem:[%s4371_s23 + $0x1e8] sm:$0xff] %v1339_v55  ;;  %v1351_v13 = vpop.f32.mrf.mxu0  ;;  %v7488_v14 = vld [vmem:[#allocation5_spill] sm:$0xff]  ;;  %v7489_v23 = vld [vmem:[#allocation59_spill] sm:$0xff] }
 0x179   : > { %v2648_v18 = vadd.f32 %v2624_v6, %v2555_v19  ;;  %v6454_v42 = vpack.c.bf16 %v1339_v55, %v1336_v56  ;;  %v1360_v3 = vadd.f32 %v6025_v49, %v4008_v37  ;;  %3738 = vmatprep.subr.bf16.mxu1 %v6443_v11  ;;  %v2725_v39 = vsel %vm2689_vm14, %v7345_v1, 0.0  ;;  %v7485_v56 = vld [vmem:[#allocation76_spill] sm:$0xff]  ;;  %v7491_v6 = vld [vmem:[#allocation43_spill] sm:$0xff]  ;;  %v7493_v37 = vld [vmem:[#allocation62_spill] sm:$0xff] }
 0x17a   : > { %v2656_v43 = vadd.f32 %v2632_v4, %v2563_v58  ;;  %3739 = vmatpush3.bf16.msra.mxu1 %v6402_v33  ;;  %v2083_v28 = vsel %vm2047_vm11, %v5636_v41, 0.0  ;;  %vm2140_vm4 = vcmp.eq.s32.totalorder %v7455_v46, %v5693_v26  ;;  %vm2233_vm15 = vcmp.eq.s32.totalorder %v7455_v46, %v5764_v53  ;;  %v4009_v24 = vpop.f32.mrf.mxu0 }
 0x17b   : > { %v6460_v54 = vadd.f32 %v2717_v5, %v2648_v18  ;;  %1672 = vst [vmem:[%s4371_s23 + $0x210] sm:$0xff] %v1360_v3  ;;  %v1352_v1 = vadd.f32 %v6025_v49, %v1351_v13  ;;  %3740 = vmatprep.subr.bf16.mxu1 %v6454_v42  ;;  %v2107_v20 = vadd.f32 %v2083_v28, %v2014_v30  ;;  %v2176_v16 = vsel %vm2140_vm4, %v5667_v59, 0.0  ;;  %v7494_v18 = vld [vmem:[#allocation68_spill] sm:$0xff]  ;;  %v7496_v28 = vld [vmem:[#allocation15_spill] sm:$0xff] }
 0x17c   : > { %v6473_v34 = vadd.f32 %v2725_v39, %v2656_v43  ;;  %v6478_v7 = vpack.c.bf16 %v6174_v2, %v6149_v57  ;;  %v2269_v10 = vsel %vm2233_vm15, %v7485_v56, 0.0  ;;  %vm2326_vm5 = vcmp.eq.s32.totalorder %v7455_v46, %v7486_v60  ;;  %v1354_v19 = vpop.f32.mrf.mxu0 }
 0x17d   : > { %vm2419_vm2 = vcmp.eq.s32.totalorder %v7455_v46, %v7487_v21  ;;  %v6487_v61 = vpack.c.bf16 %v6374_v38, %v6348_v36  ;;  %1670 = vst [vmem:[%s4371_s23 + $0x200] sm:$0xff] %v1352_v1  ;;  %v1363_v15 = vadd.f32 %v6025_v49, %v4009_v24  ;;  %v2200_v2 = vadd.f32 %v2176_v16, %v2107_v20  ;;  %v7490_v36 = vld [vmem:[#allocation30_spill] sm:$0xff] }
 0x17e   : > { %v6495_v32 = vpack.c.bf16 %v7489_v23, %v7488_v14  ;;  %v6499_v22 = vpack.c.bf16 %v6391_v44, %v6362_v63  ;;  %3741 = vmatpush3.bf16.msra.mxu1 %v6478_v7  ;;  %v2362_v38 = vsel %vm2326_vm5, %v7490_v36, 0.0  ;;  %vm2512_vm1 = vcmp.eq.s32.totalorder %v7455_v46, %v7491_v6  ;;  %v4012_v44 = vpop.f32.mrf.mxu0 }
 0x17f   : > { %1673 = vst [vmem:[%s4371_s23 + $0x218] sm:$0xff] %v1363_v15  ;;  %v6506_v4 = vpack.c.bf16 %v1363_v15, %v1360_v3  ;;  %v1355_v55 = vadd.f32 %v6025_v49, %v1354_v19  ;;  %3742 = vmatprep.subr.bf16.mxu1 %v6487_v61  ;;  %v2293_v58 = vadd.f32 %v2269_v10, %v2200_v2  ;;  %v2455_v63 = vsel %vm2419_vm2, %v7460_v25, 0.0 }
 0x180   : > { %vm2605_vm13 = vcmp.eq.s32.totalorder %v7455_v46, %v5911_v17  ;;  %v2013_v5 = vadd.f32 %v7494_v18, %v7493_v37  ;;  %v2082_v48 = vsel %vm2046_vm10, %v5636_v41, 0.0  ;;  %vm2139_vm11 = vcmp.eq.s32.totalorder %v7443_v9, %v5693_v26  ;;  %v1367_v39 = vpop.f32.mrf.mxu0  ;;  %v7501_v37 = vld [vmem:[#allocation83_spill] sm:$0xff]  ;;  %v7502_v18 = vld [vmem:[#allocation8_spill] sm:$0xff] }
 0x181   : > { %7492 = vst [vmem:[#allocation25_spill] sm:$0xff] %v6506_v4  ;;  %1671 = vst [vmem:[%s4371_s23 + $0x208] sm:$0xff] %v1355_v55  ;;  %v6525_v40 = vpack.c.bf16 %v1355_v55, %v1352_v1  ;;  %v1376_v30 = vadd.f32 %v6025_v49, %v4012_v44  ;;  %v2386_v3 = vadd.f32 %v2362_v38, %v2293_v58  ;;  %v2175_v43 = vsel %vm2139_vm11, %v5667_v59, 0.0  ;;  %v7497_v1 = vld [vmem:[#allocation58_spill] sm:$0xff] }
 0x182   : > { %3743 = vmatpush3.bf16.msra.mxu1 %v6495_v32  ;;  %v2548_v47 = vsel %vm2512_vm1, %v5981_v35, 0.0  ;;  %v2106_v41 = vadd.f32 %v2082_v48, %v2013_v5  ;;  %vm2232_vm0 = vcmp.eq.s32.totalorder %v7443_v9, %v5764_v53  ;;  %vm2325_vm7 = vcmp.eq.s32.totalorder %v7443_v9, %v7486_v60  ;;  %v4013_v16 = vpop.f32.mrf.mxu0  ;;  %v7503_v5 = vld [vmem:[#allocation11_spill] sm:$0xff]  ;;  %v7504_v48 = vld [vmem:[#allocation61_spill] sm:$0xff] }
 0x183   : > { %7495 = vst [vmem:[#allocation27_spill] sm:$0xff] %v6525_v40  ;;  %1676 = vst [vmem:[%s4371_s23 + $0x230] sm:$0xff] %v1376_v30  ;;  %v1368_v26 = vadd.f32 %v6025_v49, %v1367_v39  ;;  %3744 = vmatprep.subr.bf16.mxu1 %v6499_v22  ;;  %v2479_v59 = vadd.f32 %v2455_v63, %v2386_v3  ;;  %v2268_v13 = vsel %vm2232_vm0, %v7485_v56, 0.0  ;;  %v2641_v53 = vsel %vm2605_vm13, %v6039_v62, 0.0  ;;  %v7505_v39 = vld [vmem:[#allocation23_spill] sm:$0xff] }
 0x184   : > { %v6544_v20 = vpack.c.bf16 %v7497_v1, %v7496_v28  ;;  %v2199_v24 = vadd.f32 %v2175_v43, %v2106_v41  ;;  %vm2418_vm6 = vcmp.eq.s32.totalorder %v7443_v9, %v7487_v21  ;;  %v6554_v10 = vpack.c.bf16 %v6303_v27, %v6269_v12  ;;  %v1370_v2 = vpop.f32.mrf.mxu0  ;;  %v7506_v41 = vld [vmem:[#allocation64_spill] sm:$0xff]  ;;  %v7508_v28 = vld [vmem:[#allocation67_spill] sm:$0xff] }
 0x185   : > { %1674 = vst [vmem:[%s4371_s23 + $0x220] sm:$0xff] %v1368_v26  ;;  %v1379_v56 = vadd.f32 %v6025_v49, %v4013_v16  ;;  %v2572_v60 = vadd.f32 %v2548_v47, %v2479_v59  ;;  %v2361_v15 = vsel %vm2325_vm7, %v7490_v36, 0.0  ;;  %vm2511_vm12 = vcmp.eq.s32.totalorder %v7443_v9, %v7491_v6 }
 0x186   : > { %3745 = vmatpush3.bf16.msra.mxu1 %v6544_v20  ;;  %v2292_v14 = vadd.f32 %v2268_v13, %v2199_v24  ;;  %v1371_v12 = vadd.f32 %v6025_v49, %v1370_v2  ;;  %v2454_v23 = vsel %vm2418_vm6, %v7460_v25, 0.0  ;;  %v4016_v19 = vpop.f32.mrf.mxu0  ;;  %vm2604_vm10 = vcmp.eq.s32.totalorder %v7443_v9, %v5911_v17  ;;  %v7500_v25 = vld [vmem:[#allocation48_spill] sm:$0xff]  ;;  %v7510_v24 = vld [vmem:[#allocation39_spill] sm:$0xff] }
 0x187   : > { %1677 = vst [vmem:[%s4371_s23 + $0x238] sm:$0xff] %v1379_v56  ;;  %v6563_v21 = vpack.c.bf16 %v1379_v56, %v1376_v30  ;;  %3746 = vmatprep.subr.bf16.mxu1 %v6554_v10  ;;  %v6567_v27 = vadd.f32 %v2641_v53, %v2572_v60  ;;  %v6574_v38 = vpack.c.bf16 %v6324_v52, %v6288_v29  ;;  %v2547_v58 = vsel %vm2511_vm12, %v5981_v35, 0.0  ;;  %v7507_v13 = vld [vmem:[#allocation24_spill] sm:$0xff]  ;;  %v7511_v56 = vld [vmem:[#allocation45_spill] sm:$0xff]  ;;  %v7512_v2 = vld [vmem:[#allocation7_spill] sm:$0xff] }
 0x188   : > { %v2385_v36 = vadd.f32 %v2361_v15, %v2292_v14  ;;  %1675 = vst [vmem:[%s4371_s23 + $0x228] sm:$0xff] %v1371_v12  ;;  %v6577_v6 = vpack.c.bf16 %v1371_v12, %v1368_v26  ;;  %v6580_v55 = vadd.f32 %v6025_v49, %v4016_v19  ;;  %v1383_v63 = vpop.f32.mrf.mxu0  ;;  %v2640_v29 = vsel %vm2604_vm10, %v6039_v62, 0.0  ;;  %v7513_v19 = vld [vmem:[#allocation44_spill] sm:$0xff] }
 0x189   : > { %7498 = vst [vmem:[#allocation57_spill] sm:$0xff] %v6563_v21  ;;  %v6587_v17 = vadd.f32 %v6025_v49, %v1383_v63  ;;  %vm2694_vm3 = vcmp.eq.s32.totalorder %v7502_v18, %v7501_v37  ;;  %v6595_v30 = vpack.c.bf16 %v7504_v48, %v7503_v5  ;;  %v6614_v1 = vpack.c.bf16 %v7508_v28, %v7507_v13  ;;  %v7517_v48 = vld [vmem:[#allocation80_spill] sm:$0xff] }
 0x18a   : > { %7499 = vst [vmem:[#allocation12_spill] sm:$0xff] %v6577_v6  ;;  %3747 = vmatpush3.bf16.msra.mxu1 %v7500_v25  ;;  %v2478_v44 = vadd.f32 %v2454_v23, %v2385_v36  ;;  %1680 = vst [vmem:[%s4371_s23 + $0x250] sm:$0xff] %v6580_v55  ;;  %v4017_v52 = vpop.f32.mrf.mxu0  ;;  %v2730_v26 = vsel %vm2694_vm3, %v7506_v41, 0.0  ;;  %vm2693_vm8 = vcmp.eq.s32.totalorder %v7512_v2, %v7501_v37 }
 0x18b   : > { %3748 = vmatprep.subr.bf16.mxu1 %v6574_v38  ;;  %1678 = vst [vmem:[%s4371_s23 + $0x240] sm:$0xff] %v6587_v17  ;;  %v6600_v3 = vadd.f32 %v6025_v49, %v4017_v52  ;;  %7509 = vst [vmem:[#allocation26_spill] sm:$0xff] %v6614_v1  ;;  %v2754_v60 = vadd.f32 %v2730_v26, %v7511_v56  ;;  %v7514_v52 = vld [vmem:[#allocation72_spill] sm:$0xff]  ;;  %vm2695_vm14 = vcmp.eq.s32.totalorder %v7415_v50, %v7501_v37 }
 0x18c   : > { %v2571_v35 = vadd.f32 %v2547_v58, %v2478_v44  ;;  %v1386_v43 = vpop.f32.mrf.mxu0  ;;  %v2729_v58 = vsel %vm2693_vm8, %v7506_v41, 0.0  ;;  %vm2698_vm3 = vcmp.eq.s32.totalorder %v7455_v46, %v7501_v37  ;;  %vm2697_vm8 = vcmp.eq.s32.totalorder %v7443_v9, %v7501_v37 }
 0x18d   : > { %1681 = vst [vmem:[%s4371_s23 + $0x258] sm:$0xff] %v6600_v3  ;;  %v6608_v47 = vadd.f32 %v6025_v49, %v1386_v43  ;;  %v2870_v36 = vpack.c.bf16 %v2754_v60, %v2754_v60  ;;  %v2753_v43 = vadd.f32 %v2729_v58, %v7517_v48  ;;  %v7518_v58 = vld [vmem:[#allocation82_spill] sm:$0xff] }
 0x18e   : > { %3749 = vmatpush3.bf16.msra.mxu1 %v7505_v39  ;;  %v6603_v62 = vadd.f32 %v2640_v29, %v2571_v35  ;;  %v4020_v59 = vpop.f32.mrf.mxu0  ;;  %v7515_v35 = vld [vmem:[#allocation71_spill] sm:$0xff] }
 0x18f   : > { %3750 = vmatprep.subr.bf16.mxu1 %v6595_v30  ;;  %1679 = vst [vmem:[%s4371_s23 + $0x248] sm:$0xff] %v6608_v47  ;;  %v6619_v16 = vadd.f32 %v6025_v49, %v4020_v59  ;;  %v7516_v5 = vpack.c.bf16 %v7514_v52, %v7515_v35 }
 0x190   : > { %v1399_v53 = vpop.f32.mrf.mxu0 }
 0x191   : > { %1684 = vst [vmem:[%s4371_s23 + $0x270] sm:$0xff] %v6619_v16  ;;  %v6626_v15 = vadd.f32 %v6025_v49, %v1399_v53  ;;  %v2869_v53 = vpack.c.bf16 %v2753_v43, %v2753_v43 }
 0x192   : > { %3751 = vmatpush3.bf16.msra.mxu1 %v7510_v24  ;;  %v4021_v14 = vpop.f32.mrf.mxu0 }
 0x193   : > { %3752 = vmatprep.subr.bf16.mxu1 %v6614_v1  ;;  %1682 = vst [vmem:[%s4371_s23 + $0x260] sm:$0xff] %v6626_v15  ;;  %v1411_v12 = vadd.f32 %v6025_v49, %v4021_v14 }
 0x194   : > { %v1402_v23 = vpop.f32.mrf.mxu0 }
 0x195   : > { %1685 = vst [vmem:[%s4371_s23 + $0x278] sm:$0xff] %v1411_v12  ;;  %v6638_v63 = vadd.f32 %v6025_v49, %v1402_v23  ;;  %v6707_v2 = vpack.c.bf16 %v1411_v12, %v6619_v16 }
 0x196   : > { %3753 = vmatpush3.bf16.msra.mxu1 %v7513_v19  ;;  %v4024_v44 = vpop.f32.mrf.mxu0 }
 0x197   : > { %1683 = vst [vmem:[%s4371_s23 + $0x268] sm:$0xff] %v6638_v63  ;;  %v6643_v29 = vadd.f32 %v6025_v49, %v4024_v44  ;;  %v7519_v44 = vld [vmem:[#allocation81_spill] sm:$0xff]  ;;  %v6720_v16 = vpack.c.bf16 %v6638_v63, %v6626_v15  ;;  %v6734_v15 = vpack.c.bf16 %v6600_v3, %v6580_v55  ;;  %v6748_v55 = vpack.c.bf16 %v6608_v47, %v6587_v17 }
 0x198   : > { %v1415_v26 = vpop.f32.mrf.mxu0  ;;  %v7520_v52 = vpack.c.bf16 %v7518_v58, %v7519_v44 }
 0x199   : > { %2956 = vmatmul.mubr.bf16.vlgmr.msra.gmra.mxu1 %v7516_v5  ;;  %1688 = vst [vmem:[%s4371_s23 + $0x290] sm:$0xff] %v6643_v29  ;;  %v6652_v59 = vadd.f32 %v6025_v49, %v1415_v26  ;;  %7522 = vst [vmem:[#allocation16_spill] sm:$0xff] %v6734_v15 }
 0x19a   : > { %2963 = vmatprep.mubr.bf16.mxu1 %v2870_v36  ;;  %v4025_v13 = vpop.f32.mrf.mxu0  ;;  %7524 = vst [vmem:[#allocation66_spill] sm:$0xff] %v6748_v55 }
 0x19b   : > { %1686 = vst [vmem:[%s4371_s23 + $0x280] sm:$0xff] %v6652_v59  ;;  %v6657_v28 = vadd.f32 %v6025_v49, %v4025_v13 }
 0x19c   : > { %v1418_v56 = vpop.f32.mrf.mxu0 }
 0x19d   : > { %1689 = vst [vmem:[%s4371_s23 + $0x298] sm:$0xff] %v6657_v28  ;;  %v6662_v60 = vadd.f32 %v6025_v49, %v1418_v56 }
 0x19e   : > { %v4028_v14 = vpop.f32.mrf.mxu0 }
 0x19f   : > { %1687 = vst [vmem:[%s4371_s23 + $0x288] sm:$0xff] %v6662_v60  ;;  %v6667_v23 = vadd.f32 %v6025_v49, %v4028_v14 }
 0x1a0   : > { %v1431_v36 = vpop.f32.mrf.mxu0 }
 0x1a1   : > { %2964 = vmatmul.mubr.bf16.gmra.mxu1 %v2869_v53  ;;  %1692 = vst [vmem:[%s4371_s23 + $0x2b0] sm:$0xff] %v6667_v23  ;;  %v6675_v35 = vadd.f32 %v6025_v49, %v1431_v36 }
 0x1a2   : > { %3003 = vmatprep.mubr.bf16.mxu1 %v7520_v52  ;;  %v4029_v5 = vpop.f32.mrf.mxu0 }
 0x1a3   : > { %1690 = vst [vmem:[%s4371_s23 + $0x2a0] sm:$0xff] %v6675_v35  ;;  %v6680_v48 = vadd.f32 %v6025_v49, %v4029_v5 }
 0x1a4   : > { %v1434_v43 = vpop.f32.mrf.mxu0 }
 0x1a5   : > { %1693 = vst [vmem:[%s4371_s23 + $0x2b8] sm:$0xff] %v6680_v48  ;;  %v6685_v26 = vadd.f32 %v6025_v49, %v1434_v43 }
 0x1a6   : > { %v4032_v13 = vpop.f32.mrf.mxu0 }
 0x1a7   : > { %1691 = vst [vmem:[%s4371_s23 + $0x2a8] sm:$0xff] %v6685_v26  ;;  %v1456_v53 = vadd.f32 %v6025_v49, %v4032_v13  ;;  %v6764_v47 = vpack.c.bf16 %v6685_v26, %v6675_v35  ;;  %v6781_v26 = vpack.c.bf16 %v6657_v28, %v6643_v29  ;;  %v6796_v29 = vld [vmem:[%s7148_s5] ss:$0 sm:$0xff] }
 0x1a8   : > { %v1447_v56 = vpop.f32.mrf.mxu0 }
 0x1a9   : > { %1696 = vst [vmem:[%s4371_s23 + $0x2d0] sm:$0xff] %v1456_v53  ;;  %v1448_v14 = vadd.f32 %v6025_v49, %v1447_v56  ;;  %7526 = vst [vmem:[#allocation18_spill] sm:$0xff] %v6764_v47 }
 0x1aa   : > { %v4033_v36 = vpop.f32.mrf.mxu0  ;;  %7527 = vst [vmem:[#allocation32_spill] sm:$0xff] %v6781_v26 }
 0x1ab   : > { %1694 = vst [vmem:[%s4371_s23 + $0x2c0] sm:$0xff] %v1448_v14  ;;  %v1459_v58 = vadd.f32 %v6025_v49, %v4033_v36 }
 0x1ac   : > { %v1450_v44 = vpop.f32.mrf.mxu0 }
 0x1ad   : > { %1697 = vst [vmem:[%s4371_s23 + $0x2d8] sm:$0xff] %v1459_v58  ;;  %v1451_v52 = vadd.f32 %v6025_v49, %v1450_v44 }
 0x1ae   : > { %v4036_v5 = vpop.f32.mrf.mxu0 }
 0x1af   : > { %1695 = vst [vmem:[%s4371_s23 + $0x2c8] sm:$0xff] %v1451_v52  ;;  %v1472_v43 = vadd.f32 %v6025_v49, %v4036_v5 }
 0x1b0   : > { %v1463_v13 = vpop.f32.mrf.mxu0 }
 0x1b1   : > { %1700 = vst [vmem:[%s4371_s23 + $0x2f0] sm:$0xff] %v1472_v43  ;;  %v1464_v57 = vadd.f32 %v6025_v49, %v1463_v13 }
 0x1b2   : > { %v4037_v56 = vpop.f32.mrf.mxu0 }
 0x1b3   : > { %1698 = vst [vmem:[%s4371_s23 + $0x2e0] sm:$0xff] %v1464_v57  ;;  %v1475_v51 = vadd.f32 %v6025_v49, %v4037_v56 }
 0x1b4   : > { %v1466_v19 = vpop.f32.mrf.mxu0 }
 0x1b5   : > { %1701 = vst [vmem:[%s4371_s23 + $0x2f8] sm:$0xff] %v1475_v51  ;;  %v6703_v36 = vpack.c.bf16 %v1475_v51, %v1472_v43  ;;  %v1467_v44 = vadd.f32 %v6025_v49, %v1466_v19 }
 0x1b6   : > { %v4040_v5 = vpop.f32.mrf.mxu0 }
 0x1b7   : > { %1699 = vst [vmem:[%s4371_s23 + $0x2e8] sm:$0xff] %v1467_v44  ;;  %v6710_v1 = vpack.c.bf16 %v1467_v44, %v1464_v57  ;;  %v1488_v13 = vadd.f32 %v6025_v49, %v4040_v5  ;;  %3766 = vmatprep.subr.bf16.mxu1 %v6703_v36  ;;  %v6722_v57 = vpack.c.bf16 %v1459_v58, %v1456_v53 }
 0x1b8   : > { %v1479_v56 = vpop.f32.mrf.mxu0  ;;  %3767 = vmatpush3.bf16.msra.mxu1 %v6707_v2  ;;  %v6736_v53 = vpack.c.bf16 %v1451_v52, %v1448_v14  ;;  %v6752_v14 = vpack.c.bf16 %v6680_v48, %v6667_v23 }
 0x1b9   : > { %1704 = vst [vmem:[%s4371_s23 + $0x310] sm:$0xff] %v1488_v13  ;;  %v1480_v51 = vadd.f32 %v6025_v49, %v1479_v56  ;;  %3768 = vmatprep.subr.bf16.mxu1 %v6710_v1  ;;  %7521 = vst [vmem:[#allocation28_spill] sm:$0xff] %v6722_v57 }
 0x1ba   : > { %v4041_v12 = vpop.f32.mrf.mxu0  ;;  %7523 = vst [vmem:[#allocation60_spill] sm:$0xff] %v6736_v53  ;;  %7525 = vst [vmem:[#allocation21_spill] sm:$0xff] %v6752_v14 }
 0x1bb   : > { %1702 = vst [vmem:[%s4371_s23 + $0x300] sm:$0xff] %v1480_v51  ;;  %v1491_v19 = vadd.f32 %v6025_v49, %v4041_v12 }
 0x1bc   : > { %v1482_v43 = vpop.f32.mrf.mxu0  ;;  %3769 = vmatpush3.bf16.msra.mxu1 %v6720_v16 }
 0x1bd   : > { %1705 = vst [vmem:[%s4371_s23 + $0x318] sm:$0xff] %v1491_v19  ;;  %v6728_v44 = vpack.c.bf16 %v1491_v19, %v1488_v13  ;;  %v1483_v5 = vadd.f32 %v6025_v49, %v1482_v43  ;;  %3770 = vmatprep.subr.bf16.mxu1 %v6722_v57 }
 0x1be   : > { %v4044_v63 = vpop.f32.mrf.mxu0 }
 0x1bf   : > { %1703 = vst [vmem:[%s4371_s23 + $0x308] sm:$0xff] %v1483_v5  ;;  %v6739_v58 = vpack.c.bf16 %v1483_v5, %v1480_v51  ;;  %v1504_v56 = vadd.f32 %v6025_v49, %v4044_v63 }
 0x1c0   : > { %v1495_v13 = vpop.f32.mrf.mxu0  ;;  %3771 = vmatpush3.bf16.msra.mxu1 %v6734_v15 }
 0x1c1   : > { %1708 = vst [vmem:[%s4371_s23 + $0x330] sm:$0xff] %v1504_v56  ;;  %v1496_v12 = vadd.f32 %v6025_v49, %v1495_v13  ;;  %3772 = vmatprep.subr.bf16.mxu1 %v6736_v53 }
 0x1c2   : > { %v4045_v3 = vpop.f32.mrf.mxu0 }
 0x1c3   : > { %1706 = vst [vmem:[%s4371_s23 + $0x320] sm:$0xff] %v1496_v12  ;;  %v1507_v52 = vadd.f32 %v6025_v49, %v4045_v3  ;;  %v6804_v3 = vpack.c.bf16 %v6662_v60, %v6652_v59 }
 0x1c4   : > { %v1498_v51 = vpop.f32.mrf.mxu0  ;;  %3773 = vmatpush3.bf16.msra.mxu1 %v6748_v55 }
 0x1c5   : > { %1709 = vst [vmem:[%s4371_s23 + $0x338] sm:$0xff] %v1507_v52  ;;  %v6758_v19 = vpack.c.bf16 %v1507_v52, %v1504_v56  ;;  %v1499_v43 = vadd.f32 %v6025_v49, %v1498_v51  ;;  %3774 = vmatprep.subr.bf16.mxu1 %v6752_v14  ;;  %7529 = vst [vmem:[#allocation41_spill] sm:$0xff] %v6804_v3 }
 0x1c6   : > { %v4048_v17 = vpop.f32.mrf.mxu0 }
 0x1c7   : > { %1707 = vst [vmem:[%s4371_s23 + $0x328] sm:$0xff] %v1499_v43  ;;  %v6767_v23 = vpack.c.bf16 %v1499_v43, %v1496_v12  ;;  %v6770_v48 = vadd.f32 %v6025_v49, %v4048_v17  ;;  %v7528_v12 = vld [vmem:[#allocation10_spill] sm:$0xff] }
 0x1c8   : > { %v1511_v5 = vpop.f32.mrf.mxu0  ;;  %3775 = vmatpush3.bf16.msra.mxu1 %v6563_v21  ;;  %vm2696_vm9 = vcmp.eq.s32.totalorder %v7528_v12, %v7501_v37 }
 0x1c9   : > { %1712 = vst [vmem:[%s4371_s23 + $0x350] sm:$0xff] %v6770_v48  ;;  %v6776_v63 = vadd.f32 %v6025_v49, %v1511_v5  ;;  %3776 = vmatprep.subr.bf16.mxu1 %v6764_v47  ;;  %v2732_v51 = vsel %vm2696_vm9, %v7506_v41, 0.0 }
 0x1ca   : > { %v4049_v35 = vpop.f32.mrf.mxu0  ;;  %v2756_v60 = vadd.f32 %v2732_v51, %v6294_v31  ;;  %v2731_v51 = vsel %vm2695_vm14, %v7506_v41, 0.0 }
 0x1cb   : > { %1710 = vst [vmem:[%s4371_s23 + $0x340] sm:$0xff] %v6776_v63  ;;  %v6786_v56 = vadd.f32 %v6025_v49, %v4049_v35 }
 0x1cc   : > { %v1514_v13 = vpop.f32.mrf.mxu0  ;;  %3777 = vmatpush3.bf16.msra.mxu1 %v6577_v6  ;;  %v2872_v31 = vpack.c.bf16 %v2756_v60, %v2756_v60 }
 0x1cd   : > { %1713 = vst [vmem:[%s4371_s23 + $0x358] sm:$0xff] %v6786_v56  ;;  %v6799_v28 = vadd.f32 %v6796_v29, %v1514_v13  ;;  %3778 = vmatprep.subr.bf16.mxu1 %v6781_v26 }
 0x1ce   : > { %v4052_v49 = vpop.f32.mrf.mxu0 }
 0x1cf   : > { %1711 = vst [vmem:[%s4371_s23 + $0x348] sm:$0xff] %v6799_v28  ;;  %v6809_v52 = vadd.f32 %v6796_v29, %v4052_v49 }
 0x1d0   : > { %v1527_v43 = vpop.f32.mrf.mxu0  ;;  %3779 = vmatpush3.bf16.msra.mxu1 %v6506_v4 }
 0x1d1   : > { %1716 = vst [vmem:[%s4371_s23 + $0x370] sm:$0xff] %v6809_v52  ;;  %v6816_v17 = vadd.f32 %v6796_v29, %v1527_v43  ;;  %3780 = vmatprep.subr.bf16.mxu1 %v6804_v3  ;;  %v7531_v3 = vld [vmem:[#allocation65_spill] sm:$0xff] }
 0x1d2   : > { %v4053_v59 = vpop.f32.mrf.mxu0 }
 0x1d3   : > { %1714 = vst [vmem:[%s4371_s23 + $0x360] sm:$0xff] %v6816_v17  ;;  %v6823_v5 = vadd.f32 %v6796_v29, %v4053_v59  ;;  %v7530_v59 = vld [vmem:[#allocation14_spill] sm:$0xff] }
 0x1d4   : > { %v1530_v35 = vpop.f32.mrf.mxu0  ;;  %3781 = vmatpush3.bf16.msra.mxu1 %v6525_v40  ;;  %v7532_v4 = vpack.c.bf16 %v7530_v59, %v7531_v3  ;;  %v6842_v40 = vpop.permute.xlu1 %2760 }
 0x1d5   : > { %1717 = vst [vmem:[%s4371_s23 + $0x378] sm:$0xff] %v6823_v5  ;;  %v6831_v13 = vadd.f32 %v6796_v29, %v1530_v35  ;;  %v2755_v35 = vadd.f32 %v2731_v51, %v6352_v8  ;;  %v7533_v51 = vpack.c.bf16 %v6418_v45, %v6415_v0  ;;  %vm2773_vm4 = vcmp.eq.s32.totalorder %v7528_v12, %v6842_v40 }
 0x1d6   : > { %v4056_v49 = vpop.f32.mrf.mxu0  ;;  %vm2772_vm2 = vcmp.eq.s32.totalorder %v7415_v50, %v6842_v40  ;;  %vm2775_vm13 = vcmp.eq.s32.totalorder %v7455_v46, %v6842_v40  ;;  %vm2774_vm7 = vcmp.eq.s32.totalorder %v7443_v9, %v6842_v40 }
 0x1d7   : > { %1715 = vst [vmem:[%s4371_s23 + $0x368] sm:$0xff] %v6831_v13  ;;  %v6837_v43 = vadd.f32 %v6796_v29, %v4056_v49  ;;  %3004 = vmatmul.mubr.bf16.vlgmr.msra.gmra.mxu1 %v7532_v4 }
 0x1d8   : > { %v1543_v26 = vpop.f32.mrf.mxu0  ;;  %3011 = vmatprep.mubr.bf16.mxu1 %v2872_v31  ;;  %v2871_v31 = vpack.c.bf16 %v2755_v35, %v2755_v35  ;;  %v6860_v59 = vpop.permute.xlu1 %2763 }
 0x1d9   : > { %1720 = vst [vmem:[%s4371_s23 + $0x390] sm:$0xff] %v6837_v43  ;;  %v6847_v60 = vadd.f32 %v6796_v29, %v1543_v26  ;;  %vm2781_vm15 = vcmp.eq.s32.totalorder %v7528_v12, %v6860_v59  ;;  %vm2780_vm1 = vcmp.eq.s32.totalorder %v7415_v50, %v6860_v59  ;;  %vm2783_vm0 = vcmp.eq.s32.totalorder %v7455_v46, %v6860_v59 }
 0x1da   : > { %v4057_v6 = vpop.f32.mrf.mxu0  ;;  %vm6877_vm5 = vmpackc.low %vm2781_vm15, %vm2773_vm4  ;;  %vm2782_vm6 = vcmp.eq.s32.totalorder %v7443_v9, %v6860_v59  ;;  %v6925_v50 = vpack.c.bf16 %v6823_v5, %v6809_v52  ;;  %v6947_v52 = vpack.c.bf16 %v6786_v56, %v6770_v48  ;;  %v2734_v48 = vsel %vm2698_vm3, %v7506_v41, 0.0  ;;  %v7544_v56 = vld [vmem:[#allocation19_spill] sm:$0xff] }
 0x1db   : > { %1718 = vst [vmem:[%s4371_s23 + $0x380] sm:$0xff] %v6847_v60  ;;  %v6853_v49 = vadd.f32 %v6796_v29, %v4057_v6  ;;  %vm6905_vm11 = vmpackc.low %vm2780_vm1, %vm2772_vm2  ;;  %vm2771_vm3 = vcmp.eq.s32.totalorder %v7502_v18, %v6842_v40 }
 0x1dc   : > { %v1546_v4 = vpop.f32.mrf.mxu0  ;;  %vm6919_vm12 = vmpackc.low %vm2783_vm0, %vm2775_vm13 }
 0x1dd   : > { %1721 = vst [vmem:[%s4371_s23 + $0x398] sm:$0xff] %v6853_v49  ;;  %v6858_v3 = vadd.f32 %v6796_v29, %v1546_v4  ;;  %vm6927_vm10 = vmpackc.low %vm2782_vm6, %vm2774_vm7 }
 0x1de   : > { %v4060_v26 = vpop.f32.mrf.mxu0 }
 0x1df   : > { %1719 = vst [vmem:[%s4371_s23 + $0x388] sm:$0xff] %v6858_v3  ;;  %v6865_v8 = vadd.f32 %v6796_v29, %v4060_v26  ;;  %3012 = vmatmul.mubr.bf16.gmra.mxu1 %v2871_v31  ;;  %v7534_v31 = vmov 0 }
 0x1e0   : > { %v1559_v6 = vpop.f32.mrf.mxu0  ;;  %3051 = vmatprep.mubr.bf16.mxu1 %v7533_v51  ;;  %v7535_v31 = vsel %vm6877_vm5, 4294967295, %v7534_v31 }
 0x1e1   : > { %1724 = vst [vmem:[%s4371_s23 + $0x3b0] sm:$0xff] %v6865_v8  ;;  %v1560_v35 = vadd.f32 %v6796_v29, %v1559_v6  ;;  %7536 = vst [vmem:[#allocation42_spill] sm:$0xff] %v7535_v31 }
 0x1e2   : > { %v4061_v4 = vpop.f32.mrf.mxu0 }
 0x1e3   : > { %1722 = vst [vmem:[%s4371_s23 + $0x3a0] sm:$0xff] %v1560_v35  ;;  %v1571_v0 = vadd.f32 %v6796_v29, %v4061_v4 }
 0x1e4   : > { %v1562_v45 = vpop.f32.mrf.mxu0 }
 0x1e5   : > { %1725 = vst [vmem:[%s4371_s23 + $0x3b8] sm:$0xff] %v1571_v0  ;;  %v1563_v26 = vadd.f32 %v6796_v29, %v1562_v45 }
 0x1e6   : > { %v4064_v51 = vpop.f32.mrf.mxu0 }
 0x1e7   : > { %1723 = vst [vmem:[%s4371_s23 + $0x3a8] sm:$0xff] %v1563_v26  ;;  %v1584_v12 = vadd.f32 %v6796_v29, %v4064_v51 }
 0x1e8   : > { %v1575_v6 = vpop.f32.mrf.mxu0 }
 0x1e9   : > { %1728 = vst [vmem:[%s4371_s23 + $0x3d0] sm:$0xff] %v1584_v12  ;;  %v1576_v47 = vadd.f32 %v6796_v29, %v1575_v6 }
 0x1ea   : > { %v4065_v21 = vpop.f32.mrf.mxu0 }
 0x1eb   : > { %1726 = vst [vmem:[%s4371_s23 + $0x3c0] sm:$0xff] %v1576_v47  ;;  %v1587_v14 = vadd.f32 %v6796_v29, %v4065_v21 }
 0x1ec   : > { %v1578_v4 = vpop.f32.mrf.mxu0 }
 0x1ed   : > { %1729 = vst [vmem:[%s4371_s23 + $0x3d8] sm:$0xff] %v1587_v14  ;;  %v1579_v55 = vadd.f32 %v6796_v29, %v1578_v4 }
 0x1ee   : > { %v4068_v53 = vpop.f32.mrf.mxu0 }
 0x1ef   : > { %1727 = vst [vmem:[%s4371_s23 + $0x3c8] sm:$0xff] %v1579_v55  ;;  %v1600_v45 = vadd.f32 %v6796_v29, %v4068_v53  ;;  %v7537_v53 = vmov 0  ;;  %v6949_v5 = vpack.c.bf16 %v1579_v55, %v1576_v47  ;;  %v6968_v55 = vpack.c.bf16 %v6853_v49, %v6837_v43  ;;  %v7546_v49 = vld [vmem:[#allocation50_spill] sm:$0xff] }
 0x1f0   : > { %v1591_v31 = vpop.f32.mrf.mxu0  ;;  %v7538_v53 = vsel %vm6905_vm11, 4294967295, %v7537_v53  ;;  %v6976_v47 = vpack.c.bf16 %v6858_v3, %v6847_v60  ;;  %v7545_v60 = vpack.c.bf16 %v6473_v34, %v6460_v54  ;;  %v7550_v34 = vld [vmem:[#allocation34_spill] sm:$0xff] }
 0x1f1   : > { %1732 = vst [vmem:[%s4371_s23 + $0x3f0] sm:$0xff] %v1600_v45  ;;  %v1592_v51 = vadd.f32 %v6796_v29, %v1591_v31  ;;  %7539 = vst [vmem:[#allocation70_spill] sm:$0xff] %v7538_v53 }
 0x1f2   : > { %v4069_v15 = vpop.f32.mrf.mxu0 }
 0x1f3   : > { %1730 = vst [vmem:[%s4371_s23 + $0x3e0] sm:$0xff] %v1592_v51  ;;  %v1603_v6 = vadd.f32 %v6796_v29, %v4069_v15 }
 0x1f4   : > { %v1594_v21 = vpop.f32.mrf.mxu0 }
 0x1f5   : > { %1733 = vst [vmem:[%s4371_s23 + $0x3f8] sm:$0xff] %v1603_v6  ;;  %v6916_v15 = vpack.c.bf16 %v1603_v6, %v1600_v45  ;;  %v1595_v31 = vadd.f32 %v6796_v29, %v1594_v21  ;;  %v6939_v29 = vpack.c.bf16 %v6831_v13, %v6816_v17  ;;  %v6941_v45 = vpack.c.bf16 %v1587_v14, %v1584_v12  ;;  %v7551_v6 = vld [vmem:[#allocation46_spill] sm:$0xff] }
 0x1f6   : > { %v6955_v17 = vpack.c.bf16 %v6799_v28, %v6776_v63  ;;  %v6958_v14 = vpack.c.bf16 %v1571_v0, %v6865_v8  ;;  %v6962_v12 = vpack.c.bf16 %v1563_v26, %v1560_v35  ;;  %v2758_v63 = vadd.f32 %v2734_v48, %v6567_v27  ;;  %v7547_v27 = vld [vmem:[#allocation78_spill] sm:$0xff]  ;;  %v7548_v35 = vld [vmem:[#allocation13_spill] sm:$0xff] }
 0x1f7   : > { %1731 = vst [vmem:[%s4371_s23 + $0x3e8] sm:$0xff] %v1595_v31  ;;  %v6932_v57 = vpack.c.bf16 %v1595_v31, %v1592_v51  ;;  %3794 = vmatprep.subr.bf16.mxu1 %v6916_v15  ;;  %v2733_v13 = vsel %vm2697_vm8, %v7506_v41, 0.0  ;;  %vm2769_vm9 = vcmp.eq.s32.totalorder %v7548_v35, %v6842_v40  ;;  %vm2777_vm14 = vcmp.eq.s32.totalorder %v7548_v35, %v6860_v59  ;;  %v7549_v0 = vld [vmem:[#allocation73_spill] sm:$0xff] }
 0x1f8   : > { %3795 = vmatpush3.bf16.msra.mxu1 %v6925_v50  ;;  %v2874_v28 = vpack.c.bf16 %v2758_v63, %v2758_v63  ;;  %v2757_v37 = vadd.f32 %v2733_v13, %v6603_v62  ;;  %vm3607_vm4 = vmpackc.low %vm2777_vm14, %vm2769_vm9  ;;  %v4281_v21 = vmov 1.0|1.0   ;;  %v7552_v31 = vld [vmem:[#allocation77_spill] sm:$0xff]  ;;  %v7554_v13 = vld [vmem:[#allocation74_spill] sm:$0xff]  ;;  %vm2779_vm8 = vcmp.eq.s32.totalorder %v7502_v18, %v6860_v59 }
 0x1f9   : > { %3796 = vmatprep.subr.bf16.mxu1 %v6932_v57  ;;  %vm3615_vm9 = vmpackc.low %vm2779_vm8, %vm2771_vm3 }
 0x1fa   : > { %v2873_v26 = vpack.c.bf16 %v2757_v37, %v2757_v37  ;;  %v7014_v37 = vpop.permute.xlu0 %2766 }
 0x1fb   : > { %vm2785_vm15 = vcmp.eq.s32.totalorder %v7548_v35, %v7014_v37  ;;  %v7571_v35 = vld [vmem:[#allocation21_spill] sm:$0xff]  ;;  %vm2790_vm8 = vcmp.eq.s32.totalorder %v7443_v9, %v7014_v37 }
 0x1fc   : > { %3797 = vmatpush3.bf16.msra.mxu1 %v6939_v29  ;;  %vm3611_vm13 = vmpackc.low %vm2785_vm15, %vm2785_vm15  ;;  %vm2787_vm15 = vcmp.eq.s32.totalorder %v7502_v18, %v7014_v37 }
 0x1fd   : > { %3798 = vmatprep.subr.bf16.mxu1 %v6941_v45 }
 0x200   : > { %3799 = vmatpush3.bf16.msra.mxu1 %v6947_v52 }
 0x201   : > { %3800 = vmatprep.subr.bf16.mxu1 %v6949_v5 }
 0x204   : > { %3801 = vmatpush3.bf16.msra.mxu1 %v6955_v17 }
 0x205   : > { %3802 = vmatprep.subr.bf16.mxu1 %v6958_v14 }
 0x208   : > { %3803 = vmatpush3.bf16.msra.mxu1 %v6758_v19 }
 0x209   : > { %3804 = vmatprep.subr.bf16.mxu1 %v6962_v12 }
 0x20c   : > { %3805 = vmatpush3.bf16.msra.mxu1 %v6767_v23 }
 0x20d   : > { %3806 = vmatprep.subr.bf16.mxu1 %v6968_v55 }
 0x210   : > { %3807 = vmatpush3.bf16.msra.mxu1 %v6728_v44 }
 0x211   : > { %3808 = vmatprep.subr.bf16.mxu1 %v6976_v47 }
 0x214   : > { %3809 = vmatpush3.bf16.msra.mxu1 %v6739_v58 }
 0x215   : > { %3822 = vmatprep.subr.bf16.mxu1 %v7544_v56 }
 0x217   : > { %3052 = vmatmul.mubr.bf16.vlgmr.msra.gmra.mxu1 %v7545_v60  ;;  %v7555_v60 = vld [vmem:[#allocation54_spill] sm:$0xff] }
 0x218   : > { %3059 = vmatprep.mubr.bf16.mxu1 %v2874_v28  ;;  %3823 = vmatpush3.bf16.msra.mxu1 %v7546_v49  ;;  %v7553_v28 = vld [vmem:[#allocation38_spill] sm:$0xff]  ;;  %v7556_v49 = vld [vmem:[#allocation75_spill] sm:$0xff] }
 0x219   : > { %3824 = vmatprep.subr.bf16.mxu1 %v7547_v27  ;;  %v7558_v27 = vld [vmem:[#allocation56_spill] sm:$0xff] }
 0x21a   : > { %v3726_v43 = vpop.f32.mrf.mxu1 }
 0x21c   : > { %v3727_v3 = vpop.f32.mrf.mxu1  ;;  %3825 = vmatpush3.bf16.msra.mxu1 %v7549_v0  ;;  %v7560_v0 = vld [vmem:[#allocation35_spill] sm:$0xff] }
 0x21d   : > { %v6993_v8 = vadd.f32 %v3727_v3, %v3726_v43  ;;  %3826 = vmatprep.subr.bf16.mxu1 %v7550_v34  ;;  %v7557_v3 = vld [vmem:[#allocation55_spill] sm:$0xff]  ;;  %v7562_v34 = vld [vmem:[#allocation53_spill] sm:$0xff] }
 0x21e   : > { %v3729_v41 = vpop.f32.mrf.mxu1 }
 0x21f   : > { %3060 = vmatmul.mubr.bf16.gmra.mxu1 %v2873_v26  ;;  %v7572_v26 = vld [vmem:[#allocation57_spill] sm:$0xff] }
 0x220   : > { %v3730_v54 = vpop.f32.mrf.mxu1  ;;  %3827 = vmatpush3.bf16.msra.mxu1 %v7551_v6  ;;  %3608 = vmatprep.mubr.msk.bf16.mxu1 %vm3607_vm4, %v4281_v21  ;;  %v7575_v6 = vld [vmem:[#allocation32_spill] sm:$0xff] }
 0x221   : > { %v7001_v51 = vadd.f32 %v3730_v54, %v3729_v41  ;;  %3828 = vmatprep.subr.bf16.mxu1 %v7552_v31  ;;  %v7559_v41 = vld [vmem:[#allocation52_spill] sm:$0xff]  ;;  %v7561_v54 = vld [vmem:[#allocation6_spill] sm:$0xff]  ;;  %v7576_v31 = vld [vmem:[#allocation25_spill] sm:$0xff] }
 0x222   : > { %v3732_v62 = vpop.f32.mrf.mxu1  ;;  %vm2768_vm2 = vcmp.eq.s32.totalorder %v7561_v54, %v6842_v40  ;;  %vm2776_vm1 = vcmp.eq.s32.totalorder %v7561_v54, %v6860_v59  ;;  %vm2784_vm7 = vcmp.eq.s32.totalorder %v7561_v54, %v7014_v37  ;;  %v2858_v54 = vld [vmem:[#allocation2 + $0x8] sm:$0xff] }
 0x223   : > { %vm3609_vm0 = vmpackc.low %vm2776_vm1, %vm2768_vm2 }
 0x224   : > { %v3733_v48 = vpop.f32.mrf.mxu1  ;;  %3829 = vmatpush3.bf16.msra.mxu1 %v7553_v28  ;;  %vm3613_vm6 = vmpackc.low %vm2784_vm7, %vm2784_vm7 }
 0x225   : > { %v7006_v63 = vadd.f32 %v3733_v48, %v3732_v62  ;;  %3830 = vmatprep.subr.bf16.mxu1 %v7554_v13  ;;  %vm3619_vm1 = vmpackc.low %vm2787_vm15, %vm2787_vm15  ;;  %v7574_v62 = vld [vmem:[#allocation12_spill] sm:$0xff]  ;;  %v7577_v48 = vld [vmem:[#allocation41_spill] sm:$0xff] }
 0x226   : > { %v3735_v56 = vpop.f32.mrf.mxu1  ;;  %v7581_v13 = vld [vmem:[#allocation9_spill] sm:$0xff] }
 0x227   : > { %v7578_v56 = vld [vmem:[#allocation27_spill] sm:$0xff] }
 0x228   : > { %v3736_v43 = vpop.f32.mrf.mxu1  ;;  %3831 = vmatpush3.bf16.msra.mxu1 %v7555_v60 }
 0x229   : > { %3832 = vmatprep.subr.bf16.mxu1 %v7556_v49 }
 0x22c   : > { %3833 = vmatpush3.bf16.msra.mxu1 %v7557_v3  ;;  %v2857_v3 = vld [vmem:[#allocation2] sm:$0xff] }
 0x22d   : > { %3834 = vmatprep.subr.bf16.mxu1 %v7558_v27 }
 0x230   : > { %3835 = vmatpush3.bf16.msra.mxu1 %v7559_v41 }
 0x231   : > { %3836 = vmatprep.subr.bf16.mxu1 %v7560_v0 }
 0x234   : > { %3837 = vmatpush3.bf16.msra.mxu1 %v7562_v34 }
 0x235   : > { %3850 = vmatprep.subr.bf16.mxu1 %v6443_v11  ;;  %v7564_v11 = vld [vmem:[#allocation7_spill] sm:$0xff] }
 0x236   : > { %vm2770_vm14 = vcmp.eq.s32.totalorder %v7564_v11, %v6842_v40  ;;  %vm2778_vm4 = vcmp.eq.s32.totalorder %v7564_v11, %v6860_v59  ;;  %v7570_v59 = vld [vmem:[#allocation66_spill] sm:$0xff] }
 0x237   : > { %3610 = vmatmul.mubr.msk.bf16.vlgmr.msra.gmra.mxu1 %vm3609_vm0, %v4281_v21  ;;  %vm3617_vm2 = vmpackc.low %vm2778_vm4, %vm2770_vm14 }
 0x238   : > { %3851 = vmatpush3.bf16.msra.mxu1 %v6402_v33  ;;  %3612 = vmatprep.mubr.msk.bf16.mxu1 %vm3611_vm13, %v4281_v21  ;;  %v7563_v33 = vld [vmem:[#allocation26_spill] sm:$0xff]  ;;  %vm2786_vm13 = vcmp.eq.s32.totalorder %v7564_v11, %v7014_v37 }
 0x239   : > { %3852 = vmatprep.subr.bf16.mxu1 %v6454_v42  ;;  %v7565_v42 = vld [vmem:[#allocation44_spill] sm:$0xff]  ;;  %vm3621_vm0 = vmpackc.low %vm2786_vm13, %vm2786_vm13 }
 0x23c   : > { %3853 = vmatpush3.bf16.msra.mxu1 %v6478_v7 }
 0x23d   : > { %3854 = vmatprep.subr.bf16.mxu1 %v6487_v61 }
 0x23f   : > { %3614 = vmatmul.mubr.msk.bf16.gmra.mxu1 %vm3613_vm6, %v4281_v21  ;;  %vm2788_vm6 = vcmp.eq.s32.totalorder %v7581_v13, %v7014_v37 }
 0x240   : > { %3855 = vmatpush3.bf16.msra.mxu1 %v6495_v32  ;;  %3616 = vmatprep.mubr.msk.bf16.mxu1 %vm3615_vm9, %v4281_v21  ;;  %vm3629_vm3 = vmpackc.low %vm2788_vm6, %vm2788_vm6 }
 0x241   : > { %3856 = vmatprep.subr.bf16.mxu1 %v6499_v22  ;;  %vm3637_vm9 = vmpackc.low %vm2790_vm8, %vm2790_vm8 }
 0x244   : > { %3857 = vmatpush3.bf16.msra.mxu1 %v6544_v20 }
 0x245   : > { %3858 = vmatprep.subr.bf16.mxu1 %v6554_v10  ;;  %v7566_v10 = vld [vmem:[#allocation28_spill] sm:$0xff] }
 0x248   : > { %3859 = vmatpush3.bf16.msra.mxu1 %v7500_v25 }
 0x249   : > { %3860 = vmatprep.subr.bf16.mxu1 %v6574_v38 }
 0x24c   : > { %3861 = vmatpush3.bf16.msra.mxu1 %v7505_v39 }
 0x24d   : > { %3862 = vmatprep.subr.bf16.mxu1 %v6595_v30  ;;  %v7567_v30 = vld [vmem:[#allocation16_spill] sm:$0xff] }
 0x250   : > { %3863 = vmatpush3.bf16.msra.mxu1 %v7510_v24  ;;  %v7569_v24 = vld [vmem:[#allocation60_spill] sm:$0xff] }
 0x251   : > { %3864 = vmatprep.subr.bf16.mxu1 %v7563_v33 }
 0x254   : > { %3865 = vmatpush3.bf16.msra.mxu1 %v7565_v42 }
 0x255   : > { %3878 = vmatprep.subr.bf16.mxu1 %v6703_v36 }
 0x257   : > { %3618 = vmatmul.mubr.msk.bf16.vlgmr.msra.gmra.mxu1 %vm3617_vm2, %v4281_v21 }
 0x258   : > { %3620 = vmatprep.mubr.msk.bf16.mxu1 %vm3619_vm1, %v4281_v21  ;;  %3879 = vmatpush3.bf16.msra.mxu1 %v6707_v2 }
 0x259   : > { %v3754_v7 = vpop.f32.mrf.mxu1  ;;  %3880 = vmatprep.subr.bf16.mxu1 %v6710_v1 }
 0x25b   : > { %v3755_v61 = vpop.f32.mrf.mxu1 }
 0x25c   : > { %v3756_v32 = vadd.f32 %v3755_v61, %v3754_v7  ;;  %3881 = vmatpush3.bf16.msra.mxu1 %v6720_v16 }
 0x25d   : > { %v3757_v22 = vpop.f32.mrf.mxu1  ;;  %3882 = vmatprep.subr.bf16.mxu1 %v7566_v10 }
 0x25e   : > { %v2958_v40 = vadd.f32 %v3756_v32, %v6993_v8 }
 0x25f   : > { %v3758_v20 = vpop.f32.mrf.mxu1  ;;  %3622 = vmatmul.mubr.msk.bf16.gmra.mxu1 %vm3621_vm0, %v4281_v21 }
 0x260   : > { %v3759_v38 = vadd.f32 %v3758_v20, %v3757_v22  ;;  %3883 = vmatpush3.bf16.msra.mxu1 %v7567_v30  ;;  %3624 = vmatprep.mubr.msk.bf16.mxu1 %vm6877_vm5, %v4281_v21 }
 0x261   : > { %v3760_v25 = vpop.f32.mrf.mxu1  ;;  %3884 = vmatprep.subr.bf16.mxu1 %v7569_v24 }
 0x262   : > { %v2961_v18 = vadd.f32 %v3759_v38, %v7001_v51  ;;  %v7573_v51 = vld [vmem:[#allocation18_spill] sm:$0xff] }
 0x263   : > { %v3761_v1 = vpop.f32.mrf.mxu1 }
 0x264   : > { %v3762_v2 = vadd.f32 %v3761_v1, %v3760_v25  ;;  %3885 = vmatpush3.bf16.msra.mxu1 %v7570_v59 }
 0x265   : > { %v3763_v36 = vpop.f32.mrf.mxu1  ;;  %3886 = vmatprep.subr.bf16.mxu1 %v7571_v35 }
 0x266   : > { %v2966_v16 = vadd.f32 %v3762_v2, %v7006_v63  ;;  %v7579_v63 = vld [vmem:[#allocation10_spill] sm:$0xff] }
 0x267   : > { %v3764_v8 = vpop.f32.mrf.mxu1  ;;  %vm2789_vm5 = vcmp.eq.s32.totalorder %v7579_v63, %v7014_v37 }
 0x268   : > { %3887 = vmatpush3.bf16.msra.mxu1 %v7572_v26  ;;  %vm3627_vm7 = vmpackc.low %vm2789_vm5, %vm2789_vm5 }
 0x269   : > { %3888 = vmatprep.subr.bf16.mxu1 %v7573_v51 }
 0x26c   : > { %3889 = vmatpush3.bf16.msra.mxu1 %v7574_v62 }
 0x26d   : > { %3890 = vmatprep.subr.bf16.mxu1 %v7575_v6 }
 0x270   : > { %3891 = vmatpush3.bf16.msra.mxu1 %v7576_v31 }
 0x271   : > { %3892 = vmatprep.subr.bf16.mxu1 %v7577_v48 }
 0x274   : > { %3893 = vmatpush3.bf16.msra.mxu1 %v7578_v56 }
 0x275   : > { %3906 = vmatprep.subr.bf16.mxu1 %v6916_v15 }
 0x277   : > { %3626 = vmatmul.mubr.msk.bf16.vlgmr.msra.gmra.mxu1 %vm6905_vm11, %v4281_v21  ;;  %vm2791_vm11 = vcmp.eq.s32.totalorder %v7455_v46, %v7014_v37 }
 0x278   : > { %3628 = vmatprep.mubr.msk.bf16.mxu1 %vm3627_vm7, %v4281_v21  ;;  %3907 = vmatpush3.bf16.msra.mxu1 %v6925_v50 }
 0x279   : > { %3908 = vmatprep.subr.bf16.mxu1 %v6932_v57 }
 0x27c   : > { %3909 = vmatpush3.bf16.msra.mxu1 %v6939_v29 }
 0x27d   : > { %3910 = vmatprep.subr.bf16.mxu1 %v6941_v45 }
 0x27f   : > { %3630 = vmatmul.mubr.msk.bf16.gmra.mxu1 %vm3629_vm3, %v4281_v21 }
 0x280   : > { %3911 = vmatpush3.bf16.msra.mxu1 %v6947_v52  ;;  %3632 = vmatprep.mubr.msk.bf16.mxu1 %vm6919_vm12, %v4281_v21  ;;  %vm3635_vm12 = vmpackc.low %vm2791_vm11, %vm2791_vm11 }
 0x281   : > { %3912 = vmatprep.subr.bf16.mxu1 %v6949_v5 }
 0x284   : > { %3913 = vmatpush3.bf16.msra.mxu1 %v6955_v17 }
 0x285   : > { %3914 = vmatprep.subr.bf16.mxu1 %v6958_v14 }
 0x288   : > { %3915 = vmatpush3.bf16.msra.mxu1 %v6758_v19 }
 0x289   : > { %3916 = vmatprep.subr.bf16.mxu1 %v6962_v12 }
 0x28c   : > { %3917 = vmatpush3.bf16.msra.mxu1 %v6767_v23 }
 0x28d   : > { %3918 = vmatprep.subr.bf16.mxu1 %v6968_v55  ;;  %v2856_v55 = vld [vmem:[#allocation2 + $0x10] sm:$0xff] }
 0x290   : > { %3919 = vmatpush3.bf16.msra.mxu1 %v6728_v44 }
 0x291   : > { %3920 = vmatprep.subr.bf16.mxu1 %v6976_v47 }
 0x294   : > { %3921 = vmatpush3.bf16.msra.mxu1 %v6739_v58 }
 0x297   : > { %v3782_v50 = vpop.f32.mrf.mxu1  ;;  %3634 = vmatmul.mubr.msk.bf16.vlgmr.msra.gmra.mxu1 %vm6927_vm10, %v4281_v21 }
 0x298   : > { %3636 = vmatprep.mubr.msk.bf16.mxu1 %vm3635_vm12, %v4281_v21 }
 0x299   : > { %v3783_v57 = vpop.f32.mrf.mxu1 }
 0x29a   : > { %v3784_v19 = vadd.f32 %v3783_v57, %v3782_v50 }
 0x29b   : > { %v3785_v23 = vpop.f32.mrf.mxu1 }
 0x29c   : > { %v3006_v44 = vadd.f32 %v3784_v19, %v2958_v40 }
 0x29d   : > { %v3786_v15 = vpop.f32.mrf.mxu1 }
 0x29e   : > { %v3787_v58 = vadd.f32 %v3786_v15, %v3785_v23 }
 0x29f   : > { %v3788_v4 = vpop.f32.mrf.mxu1  ;;  %3638 = vmatmul.mubr.msk.bf16.gmra.mxu1 %vm3637_vm9, %v4281_v21 }
 0x2a0   : > { %v3009_v46 = vadd.f32 %v3787_v58, %v2961_v18  ;;  %v3073_v58 = vld [vmem:[#allocation3 + $0x8] sm:$0xff] }
 0x2a1   : > { %v3789_v29 = vpop.f32.mrf.mxu1 }
 0x2a2   : > { %v3790_v53 = vadd.f32 %v3789_v29, %v3788_v4 }
 0x2a3   : > { %v3791_v45 = vpop.f32.mrf.mxu1 }
 0x2a4   : > { %v3014_v52 = vadd.f32 %v3790_v53, %v2966_v16 }
 0x2a5   : > { %v3792_v5 = vpop.f32.mrf.mxu1 }
 0x2d7   : > { %v3810_v17 = vpop.f32.mrf.mxu1 }
 0x2d9   : > { %v3811_v14 = vpop.f32.mrf.mxu1 }
 0x2da   : > { %v3812_v12 = vadd.f32 %v3811_v14, %v3810_v17 }
 0x2db   : > { %v3813_v47 = vpop.f32.mrf.mxu1 }
 0x2dc   : > { %v3054_v43 = vadd.f32 %v3812_v12, %v3006_v44  ;;  %v3074_v12 = vld [vmem:[#allocation3] sm:$0xff] }
 0x2dd   : > { %v3814_v9 = vpop.f32.mrf.mxu1 }
 0x2de   : > { %v3067_v60 = vadd.f32 %v3054_v43, %v2856_v55  ;;  %v3815_v49 = vadd.f32 %v3814_v9, %v3813_v47 }
 0x2df   : > { %v3816_v27 = vpop.f32.mrf.mxu1 }
 0x2e0   : > { %3070 = vst [vmem:[#allocation2 + $0x10] sm:$0xff] %v3067_v60  ;;  %v3057_v37 = vadd.f32 %v3815_v49, %v3009_v46 }
 0x2e1   : > { %v3817_v21 = vpop.f32.mrf.mxu1 }
 0x2e2   : > { %v3068_v41 = vadd.f32 %v3057_v37, %v2857_v3  ;;  %v3818_v0 = vadd.f32 %v3817_v21, %v3816_v27  ;;  %v3075_v27 = vld [vmem:[#allocation3 + $0x10] sm:$0xff] }
 0x2e3   : > { %v3819_v34 = vpop.f32.mrf.mxu1 }
 0x2e4   : > { %3071 = vst [vmem:[#allocation2] sm:$0xff] %v3068_v41  ;;  %v3062_v33 = vadd.f32 %v3818_v0, %v3014_v52 }
 0x2e5   : > { %v3820_v11 = vpop.f32.mrf.mxu1 }
 0x2e6   : > { %v3069_v42 = vadd.f32 %v3062_v33, %v2858_v54 }
 0x2e8   : > { %3072 = vst [vmem:[#allocation2 + $0x8] sm:$0xff] %v3069_v42 }
 0x2f7   : > { %v3838_v7 = vpop.f32.mrf.mxu1 }
 0x2f9   : > { %v3839_v61 = vpop.f32.mrf.mxu1 }
 0x2fa   : > { %v3840_v32 = vadd.f32 %v3839_v61, %v3838_v7 }
 0x2fb   : > { %v3841_v22 = vpop.f32.mrf.mxu1 }
 0x2fd   : > { %v3842_v40 = vpop.f32.mrf.mxu1 }
 0x2fe   : > { %v3843_v20 = vadd.f32 %v3842_v40, %v3841_v22 }
 0x2ff   : > { %v3844_v10 = vpop.f32.mrf.mxu1 }
 0x301   : > { %v3845_v38 = vpop.f32.mrf.mxu1 }
 0x302   : > { %v3846_v25 = vadd.f32 %v3845_v38, %v3844_v10 }
 0x303   : > { %v3847_v18 = vpop.f32.mrf.mxu1 }
 0x305   : > { %v3848_v30 = vpop.f32.mrf.mxu1 }
 0x317   : > { %v3866_v39 = vpop.f32.mrf.mxu1 }
 0x319   : > { %v3867_v1 = vpop.f32.mrf.mxu1 }
 0x31a   : > { %v3868_v63 = vadd.f32 %v3867_v1, %v3866_v39 }
 0x31b   : > { %v3869_v24 = vpop.f32.mrf.mxu1 }
 0x31c   : > { %v3159_v50 = vadd.f32 %v3868_v63, %v3840_v32 }
 0x31d   : > { %v3870_v2 = vpop.f32.mrf.mxu1 }
 0x31e   : > { %v3871_v57 = vadd.f32 %v3870_v2, %v3869_v24 }
 0x31f   : > { %v3872_v36 = vpop.f32.mrf.mxu1 }
 0x320   : > { %v3162_v46 = vadd.f32 %v3871_v57, %v3843_v20 }
 0x321   : > { %v3873_v16 = vpop.f32.mrf.mxu1 }
 0x322   : > { %v3874_v29 = vadd.f32 %v3873_v16, %v3872_v36 }
 0x323   : > { %v3875_v59 = vpop.f32.mrf.mxu1 }
 0x324   : > { %v3167_v47 = vadd.f32 %v3874_v29, %v3846_v25 }
 0x325   : > { %v3876_v8 = vpop.f32.mrf.mxu1 }
 0x337   : > { %v3894_v35 = vpop.f32.mrf.mxu1 }
 0x339   : > { %v3895_v26 = vpop.f32.mrf.mxu1 }
 0x33a   : > { %v3896_v28 = vadd.f32 %v3895_v26, %v3894_v35 }
 0x33b   : > { %v3897_v51 = vpop.f32.mrf.mxu1 }
 0x33c   : > { %v3207_v23 = vadd.f32 %v3896_v28, %v3159_v50 }
 0x33d   : > { %v3898_v62 = vpop.f32.mrf.mxu1 }
 0x33e   : > { %v3899_v44 = vadd.f32 %v3898_v62, %v3897_v51 }
 0x33f   : > { %v3900_v6 = vpop.f32.mrf.mxu1 }
 0x340   : > { %v3210_v52 = vadd.f32 %v3899_v44, %v3162_v46 }
 0x341   : > { %v3901_v31 = vpop.f32.mrf.mxu1 }
 0x342   : > { %v3902_v5 = vadd.f32 %v3901_v31, %v3900_v6 }
 0x343   : > { %v3903_v48 = vpop.f32.mrf.mxu1 }
 0x344   : > { %v3215_v60 = vadd.f32 %v3902_v5, %v3167_v47 }
 0x345   : > { %v3904_v56 = vpop.f32.mrf.mxu1 }
 0x357   : > { %v3922_v13 = vpop.f32.mrf.mxu1 }
 0x359   : > { %v3923_v19 = vpop.f32.mrf.mxu1 }
 0x35a   : > { %v3924_v15 = vadd.f32 %v3923_v19, %v3922_v13 }
 0x35b   : > { %v3925_v4 = vpop.f32.mrf.mxu1 }
 0x35c   : > { %v3255_v53 = vadd.f32 %v3924_v15, %v3207_v23 }
 0x35d   : > { %v3926_v45 = vpop.f32.mrf.mxu1 }
 0x35e   : > { %v3268_v17 = vadd.f32 %v3255_v53, %v3073_v58  ;;  %v3927_v14 = vadd.f32 %v3926_v45, %v3925_v4 }
 0x35f   : > { %v3928_v55 = vpop.f32.mrf.mxu1 }
 0x360   : > { %3271 = vst [vmem:[#allocation3 + $0x8] sm:$0xff] %v3268_v17  ;;  %v3258_v43 = vadd.f32 %v3927_v14, %v3210_v52 }
 0x361   : > { %v3929_v9 = vpop.f32.mrf.mxu1 }
 0x362   : > { %v3269_v49 = vadd.f32 %v3258_v43, %v3074_v12  ;;  %v3930_v3 = vadd.f32 %v3929_v9, %v3928_v55 }
 0x363   : > { %v3931_v37 = vpop.f32.mrf.mxu1 }
 0x364   : > { %3272 = vst [vmem:[#allocation3] sm:$0xff] %v3269_v49  ;;  %v3263_v21 = vadd.f32 %v3930_v3, %v3215_v60  ;;  %3277 = sbr.rel (%p3639_p8) target bundleno = 881 (0x371), region = 52 }
 0x365   : > { %v3932_v41 = vpop.f32.mrf.mxu1 }
 0x366   : > { %v3270_v0 = vadd.f32 %v3263_v21, %v3075_v27 }
 0x368   : > { %3273 = vst [vmem:[#allocation3 + $0x10] sm:$0xff] %v3270_v0 }
 0x369   : > { %v3278_v54 = vld [vmem:[#allocation2 + $0x10] sm:$0xff]  ;;  %v3279_v34 = vld [vmem:[#allocation2] sm:$0xff]  ;;  %v3280_v33 = vld [vmem:[#allocation2 + $0x8] sm:$0xff] }
 0x36a   : > { %3281 = vst [vmem:[%s4376_s26] sm:$0xff] %v3278_v54  ;;  %3282 = vst [vmem:[%s4376_s26 + $0x8] sm:$0xff] %v3279_v34  ;;  %v3284_v11 = vld [vmem:[#allocation3 + $0x8] sm:$0xff] }
 0x36b   : > { %3283 = vst [vmem:[%s4376_s26 + $0x10] sm:$0xff] %v3280_v33  ;;  %v3285_v42 = vld [vmem:[#allocation3] sm:$0xff]  ;;  %3287 = vst [vmem:[%s4381_s28] sm:$0xff] %v3284_v11 }
 0x36c   : > { %3288 = vst [vmem:[%s4381_s28 + $0x8] sm:$0xff] %v3285_v42 }
 0x36f   : > { %v3286_v7 = vld [vmem:[#allocation3 + $0x10] sm:$0xff] }
 0x370   : > { %3289 = vst [vmem:[%s4381_s28 + $0x10] sm:$0xff] %v3286_v7 }
 0x371 PF: > { %s19_s9 = sadd.s32 1, %s4268_s9   ;;  %s7582_s23 = sld [smem:[#allocation4_spill]] }
 0x372   : > { %p16_p9 = scmp.ge.s32.totalorder %s19_s9, 6   ;;  %s7583_s27 = smov %s4260_s29 }
 0x373   : > { %s7584_s28 = smov %s4264_s30  ;;  %s7585_s29 = smov %s7588_s10 }
 0x374   :  { %18 = sbr.rel (!%p16_p9) target bundleno = 3 (0x3), region = 106 }
 0x377   : > { %s7586_s30 = smov %s7582_s23 }

</bundles_post_ra>
